<compile_context>
chip_gen: v7x
topology: tpu7x:2x2x1
jax: 0.10.0
libtpu: 0.0.40
codegen_flags: <defaults>
</compile_context>

<pallas_src>
import jax
import jax.numpy as jnp
from jax.experimental import pallas as pl
from jax.experimental.pallas import tpu as pltpu


def _round_up(a, m):
    return ((a + m - 1) // m) * m


# ----------------------------- Pallas kernels --------------------------------

def _conv_relu_pool_kernel(p_ref, w_ref, b_ref, o_ref):
    """p_ref: [4, tm, K] bf16 pool-quadrant im2col patches; w_ref: [K, Cout] bf16;
    b_ref: [1, Cout] f32.  Computes relu(max_quadrant(patches @ w) + b) -> [tm, Cout]."""
    w = w_ref[...]
    m0 = jnp.dot(p_ref[0], w, preferred_element_type=jnp.float32)
    m1 = jnp.dot(p_ref[1], w, preferred_element_type=jnp.float32)
    m2 = jnp.dot(p_ref[2], w, preferred_element_type=jnp.float32)
    m3 = jnp.dot(p_ref[3], w, preferred_element_type=jnp.float32)
    m = jnp.maximum(jnp.maximum(m0, m1), jnp.maximum(m2, m3))
    o_ref[...] = jnp.maximum(m + b_ref[...], 0.0).astype(o_ref.dtype)


def _fc_fused_kernel(x_ref, w1_ref, b1_ref, w2_ref, b2_ref, o_ref, acc_ref):
    """Fused Linear(3136,1024)+ReLU+Linear(1024,10).  Grid tiles the hidden dim;
    FC2 partial products are accumulated in VMEM scratch; logits written last step."""
    j = pl.program_id(0)

    @pl.when(j == 0)
    def _():
        acc_ref[...] = jnp.zeros_like(acc_ref)

    h = jnp.dot(x_ref[...], w1_ref[...], preferred_element_type=jnp.float32)
    h = jnp.maximum(h + b1_ref[...], 0.0)
    acc_ref[...] += jnp.dot(h.astype(jnp.bfloat16), w2_ref[...],
                            preferred_element_type=jnp.float32)

    @pl.when(j == pl.num_programs(0) - 1)
    def _():
        o_ref[...] = (acc_ref[...] + b2_ref[...]).astype(o_ref.dtype)


# ------------------------------ wrappers --------------------------------------

def _pool_quadrant_patches(x_nhwc, kh, kw, pad, m_pad):
    """im2col (stride 1, symmetric pad), regrouped by 2x2-pool quadrant.
    Returns [4, m_pad, kh*kw*Cin] bf16 with rows ordered (n, h_out, w_out)."""
    N, H, W, C = x_nhwc.shape
    Ho, Wo = H // 2, W // 2
    K = kh * kw * C
    xp = jnp.pad(x_nhwc, ((0, 0), (pad, pad), (pad, pad), (0, 0)))
    taps = [xp[:, i:i + H, j:j + W, :] for i in range(kh) for j in range(kw)]
    p = jnp.stack(taps, axis=3).reshape(N, H, W, K)                     # [N,H,W,K]
    quads = jnp.stack([p[:, 0::2, 0::2], p[:, 0::2, 1::2],
                       p[:, 1::2, 0::2], p[:, 1::2, 1::2]], axis=0)     # [4,N,Ho,Wo,K]
    quads = quads.reshape(4, N * Ho * Wo, K)
    M = N * Ho * Wo
    if m_pad > M:
        quads = jnp.pad(quads, ((0, 0), (0, m_pad - M), (0, 0)))
    return quads.astype(jnp.bfloat16)


def conv_relu_pool(x_nhwc, wmat, b, *, kh, kw, pad, nm=2):
    """Conv2d(stride 1, pad) + bias + ReLU + MaxPool2d(2,2) in ONE pallas_call.
    M (pooled output rows) is split into `nm` 'parallel' blocks (v7x: 2 TCs)."""
    N, H, W, Cin = x_nhwc.shape
    K, Cout = wmat.shape
    assert K == kh * kw * Cin
    Ho, Wo = H // 2, W // 2
    M = N * Ho * Wo
    tm = _round_up(-(-M // nm), 8)          # sublane-aligned row tile
    m_pad = nm * tm
    patches = _pool_quadrant_patches(x_nhwc, kh, kw, pad, m_pad)    # [4, m_pad, K] bf16
    out = pl.pallas_call(
        _conv_relu_pool_kernel,
        out_shape=jax.ShapeDtypeStruct((m_pad, Cout), jnp.bfloat16),
        grid=(nm,),
        in_specs=[
            pl.BlockSpec((4, tm, K), lambda i: (0, i, 0)),   # quadrant patches, M-tiled
            pl.BlockSpec((K, Cout), lambda i: (0, 0)),       # conv weight (resident)
            pl.BlockSpec((1, Cout), lambda i: (0, 0)),       # bias (resident)
        ],
        out_specs=pl.BlockSpec((tm, Cout), lambda i: (i, 0)),
        compiler_params=pltpu.CompilerParams(dimension_semantics=("parallel",)),
    )(patches, wmat, b)
    return out[:M].reshape(N, Ho, Wo, Cout)


def fc_fused(x, w1, b1, w2, b2, *, tn=512):
    """logits = relu(x @ w1 + b1) @ w2 + b2 in ONE pallas_call (hidden dim tiled)."""
    M, K = x.shape
    K1, N1 = w1.shape
    N1b, N2 = w2.shape
    assert K == K1 and N1 == N1b and N1 % tn == 0
    return pl.pallas_call(
        _fc_fused_kernel,
        out_shape=jax.ShapeDtypeStruct((M, N2), jnp.float32),
        grid=(N1 // tn,),
        in_specs=[
            pl.BlockSpec((M, K), lambda j: (0, 0)),      # activations (resident)
            pl.BlockSpec((K, tn), lambda j: (0, j)),     # FC1 weight tile (bf16)
            pl.BlockSpec((1, tn), lambda j: (0, j)),     # FC1 bias tile
            pl.BlockSpec((tn, N2), lambda j: (j, 0)),    # FC2 weight tile (bf16)
            pl.BlockSpec((1, N2), lambda j: (0, 0)),     # FC2 bias (resident)
        ],
        out_specs=pl.BlockSpec((M, N2), lambda j: (0, 0)),
        scratch_shapes=[pltpu.VMEM((M, N2), jnp.float32)],
        compiler_params=pltpu.CompilerParams(dimension_semantics=("arbitrary",)),
    )(x, w1, b1, w2, b2)


# ------------------------------ parameters ------------------------------------

def init_params(key):
    """Random parameters in PyTorch nn.Module layouts."""
    ks = jax.random.split(key, 8)
    s = 0.05
    return {
        "w1": jax.random.normal(ks[0], (32, 1, 5, 5), jnp.float32) * s,    # OIHW
        "b1": jax.random.normal(ks[1], (32,), jnp.float32) * s,
        "w2": jax.random.normal(ks[2], (64, 32, 3, 3), jnp.float32) * s,   # OIHW
        "b2": jax.random.normal(ks[3], (64,), jnp.float32) * s,
        "wfc1": jax.random.normal(ks[4], (1024, 3136), jnp.float32) * s,   # [out, in(c,h,w)]
        "bfc1": jax.random.normal(ks[5], (1024,), jnp.float32) * s,
        "wfc2": jax.random.normal(ks[6], (10, 1024), jnp.float32) * s,     # [out, in]
        "bfc2": jax.random.normal(ks[7], (10,), jnp.float32) * s,
    }


def prepare_params(p):
    """One-time, outside-the-jit conversion into kernel-ready layouts:
    conv weights -> [kh*kw*Cin, Cout]; FC weights -> [in, out]; PyTorch's
    channel-first flatten (c,h,w) folded into FC1 rows; matmul weights in bf16."""
    co1, ci1, kh1, kw1 = p["w1"].shape
    co2, ci2, kh2, kw2 = p["w2"].shape
    hid, fin = p["wfc1"].shape
    hw = int(round((fin // co2) ** 0.5))                                   # 7
    w1m = jnp.transpose(p["w1"], (2, 3, 1, 0)).reshape(kh1 * kw1 * ci1, co1)
    w2m = jnp.transpose(p["w2"], (2, 3, 1, 0)).reshape(kh2 * kw2 * ci2, co2)
    wfc1 = p["wfc1"].reshape(hid, co2, hw, hw)
    wfc1 = jnp.transpose(wfc1, (2, 3, 1, 0)).reshape(hw * hw * co2, hid)   # rows: (h,w,c)
    wfc2 = p["wfc2"].T                                                     # [1024, 10]
    return {
        "w1m": w1m.astype(jnp.bfloat16),    "b1": p["b1"].reshape(1, -1),
        "w2m": w2m.astype(jnp.bfloat16),    "b2": p["b2"].reshape(1, -1),
        "wfc1m": wfc1.astype(jnp.bfloat16), "bfc1": p["bfc1"].reshape(1, -1),
        "wfc2m": wfc2.astype(jnp.bfloat16), "bfc2": p["bfc2"].reshape(1, -1),
    }


@jax.jit
def forward(params, x_nchw):
    # NCHW (PyTorch) -> NHWC; bf16 operands, f32 accumulation/bias throughout.
    x = jnp.transpose(x_nchw, (0, 2, 3, 1)).astype(jnp.bfloat16)              # [N,28,28,1]
    x = conv_relu_pool(x, params["w1m"], params["b1"], kh=5, kw=5, pad=2)     # [N,14,14,32]
    x = conv_relu_pool(x, params["w2m"], params["b2"], kh=3, kw=3, pad=1)     # [N,7,7,64]
    n = x.shape[0]
    x = x.reshape(n, -1)   # [N,3136] in (h,w,c) order; FC1 rows pre-permuted to match
    return fc_fused(x, params["wfc1m"], params["bfc1"],
                    params["wfc2m"], params["bfc2"], tn=512)


if __name__ == "__main__":
    key = jax.random.PRNGKey(0)
    pkey, xkey = jax.random.split(key)
    params = prepare_params(init_params(pkey))
    # Linear(3136 = 64*7*7) after two 2x2 pools forces 28x28 spatial input.
    x = jax.random.normal(xkey, (2, 1, 28, 28), jnp.float32)
    out = forward(params, x)
    jax.block_until_ready(out)
    assert out.shape == (2, 10) and out.dtype == jnp.float32
    print("KERNEL_OK")
</pallas_src>

<mosaic_0001>
module attributes {stable_mosaic.version = 11 : i64} {
  func.func @_conv_relu_pool_kernel(%arg0: i32, %arg1: memref<4x200x25xbf16, #tpu.memory_space<vmem>>, %arg2: memref<25x32xbf16, #tpu.memory_space<vmem>>, %arg3: memref<1x32xf32, #tpu.memory_space<vmem>>, %arg4: memref<200x32xbf16, #tpu.memory_space<vmem>>) attributes {dimension_semantics = [#tpu.dimension_semantics<parallel>], iteration_bounds = array<i64: 2>, scalar_prefetch = 0 : i64, scratch_operands = 0 : i64, tpu.core_type = #tpu.core_type<tc>, window_params = [{transform_indices = @transform_0, window_bounds = array<i64: 4, 200, 25>}, {pipeline_mode = #tpu.pipeline_mode<synchronous>, transform_indices = @transform_1, window_bounds = array<i64: 25, 32>}, {pipeline_mode = #tpu.pipeline_mode<synchronous>, transform_indices = @transform_2, window_bounds = array<i64: 1, 32>}, {transform_indices = @transform_3, window_bounds = array<i64: 200, 32>}]} {
    %c0 = arith.constant 0 : index
    %c0_0 = arith.constant 0 : index
    %0 = vector.load %arg2[%c0, %c0_0] : memref<25x32xbf16, #tpu.memory_space<vmem>>, vector<25x32xbf16>
    %c0_1 = arith.constant 0 : index
    %c0_2 = arith.constant 0 : index
    %c0_3 = arith.constant 0 : index
    %1 = vector.load %arg1[%c0_1, %c0_2, %c0_3] : memref<4x200x25xbf16, #tpu.memory_space<vmem>>, vector<1x200x25xbf16>
    %2 = vector.shape_cast %1 : vector<1x200x25xbf16> to vector<200x25xbf16>
    %cst = arith.constant dense<0.000000e+00> : vector<200x32xf32>
    %3 = tpu.matmul %2, %0, %cst {dimension_numbers = #tpu.dot_dimension_numbers<[1], [0], [0], [1], [0, 0, 1, 1], [], []>} : vector<200x25xbf16>, vector<25x32xbf16>, vector<200x32xf32> -> vector<200x32xf32>
    %c1 = arith.constant 1 : index
    %c0_4 = arith.constant 0 : index
    %c0_5 = arith.constant 0 : index
    %4 = vector.load %arg1[%c1, %c0_4, %c0_5] : memref<4x200x25xbf16, #tpu.memory_space<vmem>>, vector<1x200x25xbf16>
    %5 = vector.shape_cast %4 : vector<1x200x25xbf16> to vector<200x25xbf16>
    %cst_6 = arith.constant dense<0.000000e+00> : vector<200x32xf32>
    %6 = tpu.matmul %5, %0, %cst_6 {dimension_numbers = #tpu.dot_dimension_numbers<[1], [0], [0], [1], [0, 0, 1, 1], [], []>} : vector<200x25xbf16>, vector<25x32xbf16>, vector<200x32xf32> -> vector<200x32xf32>
    %c2 = arith.constant 2 : index
    %c0_7 = arith.constant 0 : index
    %c0_8 = arith.constant 0 : index
    %7 = vector.load %arg1[%c2, %c0_7, %c0_8] : memref<4x200x25xbf16, #tpu.memory_space<vmem>>, vector<1x200x25xbf16>
    %8 = vector.shape_cast %7 : vector<1x200x25xbf16> to vector<200x25xbf16>
    %cst_9 = arith.constant dense<0.000000e+00> : vector<200x32xf32>
    %9 = tpu.matmul %8, %0, %cst_9 {dimension_numbers = #tpu.dot_dimension_numbers<[1], [0], [0], [1], [0, 0, 1, 1], [], []>} : vector<200x25xbf16>, vector<25x32xbf16>, vector<200x32xf32> -> vector<200x32xf32>
    %c3 = arith.constant 3 : index
    %c0_10 = arith.constant 0 : index
    %c0_11 = arith.constant 0 : index
    %10 = vector.load %arg1[%c3, %c0_10, %c0_11] : memref<4x200x25xbf16, #tpu.memory_space<vmem>>, vector<1x200x25xbf16>
    %11 = vector.shape_cast %10 : vector<1x200x25xbf16> to vector<200x25xbf16>
    %cst_12 = arith.constant dense<0.000000e+00> : vector<200x32xf32>
    %12 = tpu.matmul %11, %0, %cst_12 {dimension_numbers = #tpu.dot_dimension_numbers<[1], [0], [0], [1], [0, 0, 1, 1], [], []>} : vector<200x25xbf16>, vector<25x32xbf16>, vector<200x32xf32> -> vector<200x32xf32>
    %13 = arith.maximumf %3, %6 : vector<200x32xf32>
    %14 = arith.maximumf %9, %12 : vector<200x32xf32>
    %15 = arith.maximumf %13, %14 : vector<200x32xf32>
    %c0_13 = arith.constant 0 : index
    %c0_14 = arith.constant 0 : index
    %16 = vector.load %arg3[%c0_13, %c0_14] : memref<1x32xf32, #tpu.memory_space<vmem>>, vector<1x32xf32>
    %17 = vector.broadcast %16 : vector<1x32xf32> to vector<200x32xf32>
    %18 = arith.addf %15, %17 : vector<200x32xf32>
    %cst_15 = arith.constant 0.000000e+00 : f32
    %19 = vector.broadcast %cst_15 : f32 to vector<200x32xf32>
    %20 = arith.maximumf %18, %19 : vector<200x32xf32>
    %21 = arith.truncf %20 : vector<200x32xf32> to vector<200x32xbf16>
    %c0_16 = arith.constant 0 : index
    %c0_17 = arith.constant 0 : index
    %22 = vector.load %arg4[%c0_16, %c0_17] : memref<200x32xbf16, #tpu.memory_space<vmem>>, vector<200x32xbf16>
    tpu.vector_store %arg4[%c0_16, %c0_17], %21 {strides = array<i32>} : memref<200x32xbf16, #tpu.memory_space<vmem>>, vector<200x32xbf16>,
    return
  }
  func.func @transform_0(%arg0: i32) -> (i32, i32, i32) {
    %c0_i32 = arith.constant 0 : i32
    %c0_i32_0 = arith.constant 0 : i32
    %c0_i32_1 = arith.constant 0 : i32
    return %c0_i32, %arg0, %c0_i32_0 : i32, i32, i32
  }
  func.func @transform_1(%arg0: i32) -> (i32, i32) {
    %c0_i32 = arith.constant 0 : i32
    %c0_i32_0 = arith.constant 0 : i32
    %c0_i32_1 = arith.constant 0 : i32
    return %c0_i32, %c0_i32_0 : i32, i32
  }
  func.func @transform_2(%arg0: i32) -> (i32, i32) {
    %c0_i32 = arith.constant 0 : i32
    %c0_i32_0 = arith.constant 0 : i32
    %c0_i32_1 = arith.constant 0 : i32
    return %c0_i32, %c0_i32_0 : i32, i32
  }
  func.func @transform_3(%arg0: i32) -> (i32, i32) {
    %c0_i32 = arith.constant 0 : i32
    %c0_i32_0 = arith.constant 0 : i32
    return %arg0, %c0_i32 : i32, i32
  }
}

module attributes {stable_mosaic.version = 11 : i64} {
  func.func @_conv_relu_pool_kernel(%arg0: i32, %arg1: memref<4x56x288xbf16, #tpu.memory_space<vmem>>, %arg2: memref<288x64xbf16, #tpu.memory_space<vmem>>, %arg3: memref<1x64xf32, #tpu.memory_space<vmem>>, %arg4: memref<56x64xbf16, #tpu.memory_space<vmem>>) attributes {dimension_semantics = [#tpu.dimension_semantics<parallel>], iteration_bounds = array<i64: 2>, scalar_prefetch = 0 : i64, scratch_operands = 0 : i64, tpu.core_type = #tpu.core_type<tc>, window_params = [{transform_indices = @transform_0, window_bounds = array<i64: 4, 56, 288>}, {pipeline_mode = #tpu.pipeline_mode<synchronous>, transform_indices = @transform_1, window_bounds = array<i64: 288, 64>}, {pipeline_mode = #tpu.pipeline_mode<synchronous>, transform_indices = @transform_2, window_bounds = array<i64: 1, 64>}, {transform_indices = @transform_3, window_bounds = array<i64: 56, 64>}]} {
    %c0 = arith.constant 0 : index
    %c0_0 = arith.constant 0 : index
    %0 = vector.load %arg2[%c0, %c0_0] : memref<288x64xbf16, #tpu.memory_space<vmem>>, vector<288x64xbf16>
    %c0_1 = arith.constant 0 : index
    %c0_2 = arith.constant 0 : index
    %c0_3 = arith.constant 0 : index
    %1 = vector.load %arg1[%c0_1, %c0_2, %c0_3] : memref<4x56x288xbf16, #tpu.memory_space<vmem>>, vector<1x56x288xbf16>
    %2 = vector.shape_cast %1 : vector<1x56x288xbf16> to vector<56x288xbf16>
    %cst = arith.constant dense<0.000000e+00> : vector<56x64xf32>
    %3 = tpu.matmul %2, %0, %cst {dimension_numbers = #tpu.dot_dimension_numbers<[1], [0], [0], [1], [0, 0, 1, 1], [], []>} : vector<56x288xbf16>, vector<288x64xbf16>, vector<56x64xf32> -> vector<56x64xf32>
    %c1 = arith.constant 1 : index
    %c0_4 = arith.constant 0 : index
    %c0_5 = arith.constant 0 : index
    %4 = vector.load %arg1[%c1, %c0_4, %c0_5] : memref<4x56x288xbf16, #tpu.memory_space<vmem>>, vector<1x56x288xbf16>
    %5 = vector.shape_cast %4 : vector<1x56x288xbf16> to vector<56x288xbf16>
    %cst_6 = arith.constant dense<0.000000e+00> : vector<56x64xf32>
    %6 = tpu.matmul %5, %0, %cst_6 {dimension_numbers = #tpu.dot_dimension_numbers<[1], [0], [0], [1], [0, 0, 1, 1], [], []>} : vector<56x288xbf16>, vector<288x64xbf16>, vector<56x64xf32> -> vector<56x64xf32>
    %c2 = arith.constant 2 : index
    %c0_7 = arith.constant 0 : index
    %c0_8 = arith.constant 0 : index
    %7 = vector.load %arg1[%c2, %c0_7, %c0_8] : memref<4x56x288xbf16, #tpu.memory_space<vmem>>, vector<1x56x288xbf16>
    %8 = vector.shape_cast %7 : vector<1x56x288xbf16> to vector<56x288xbf16>
    %cst_9 = arith.constant dense<0.000000e+00> : vector<56x64xf32>
    %9 = tpu.matmul %8, %0, %cst_9 {dimension_numbers = #tpu.dot_dimension_numbers<[1], [0], [0], [1], [0, 0, 1, 1], [], []>} : vector<56x288xbf16>, vector<288x64xbf16>, vector<56x64xf32> -> vector<56x64xf32>
    %c3 = arith.constant 3 : index
    %c0_10 = arith.constant 0 : index
    %c0_11 = arith.constant 0 : index
    %10 = vector.load %arg1[%c3, %c0_10, %c0_11] : memref<4x56x288xbf16, #tpu.memory_space<vmem>>, vector<1x56x288xbf16>
    %11 = vector.shape_cast %10 : vector<1x56x288xbf16> to vector<56x288xbf16>
    %cst_12 = arith.constant dense<0.000000e+00> : vector<56x64xf32>
    %12 = tpu.matmul %11, %0, %cst_12 {dimension_numbers = #tpu.dot_dimension_numbers<[1], [0], [0], [1], [0, 0, 1, 1], [], []>} : vector<56x288xbf16>, vector<288x64xbf16>, vector<56x64xf32> -> vector<56x64xf32>
    %13 = arith.maximumf %3, %6 : vector<56x64xf32>
    %14 = arith.maximumf %9, %12 : vector<56x64xf32>
    %15 = arith.maximumf %13, %14 : vector<56x64xf32>
    %c0_13 = arith.constant 0 : index
    %c0_14 = arith.constant 0 : index
    %16 = vector.load %arg3[%c0_13, %c0_14] : memref<1x64xf32, #tpu.memory_space<vmem>>, vector<1x64xf32>
    %17 = vector.broadcast %16 : vector<1x64xf32> to vector<56x64xf32>
    %18 = arith.addf %15, %17 : vector<56x64xf32>
    %cst_15 = arith.constant 0.000000e+00 : f32
    %19 = vector.broadcast %cst_15 : f32 to vector<56x64xf32>
    %20 = arith.maximumf %18, %19 : vector<56x64xf32>
    %21 = arith.truncf %20 : vector<56x64xf32> to vector<56x64xbf16>
    %c0_16 = arith.constant 0 : index
    %c0_17 = arith.constant 0 : index
    %22 = vector.load %arg4[%c0_16, %c0_17] : memref<56x64xbf16, #tpu.memory_space<vmem>>, vector<56x64xbf16>
    tpu.vector_store %arg4[%c0_16, %c0_17], %21 {strides = array<i32>} : memref<56x64xbf16, #tpu.memory_space<vmem>>, vector<56x64xbf16>,
    return
  }
  func.func @transform_0(%arg0: i32) -> (i32, i32, i32) {
    %c0_i32 = arith.constant 0 : i32
    %c0_i32_0 = arith.constant 0 : i32
    %c0_i32_1 = arith.constant 0 : i32
    return %c0_i32, %arg0, %c0_i32_0 : i32, i32, i32
  }
  func.func @transform_1(%arg0: i32) -> (i32, i32) {
    %c0_i32 = arith.constant 0 : i32
    %c0_i32_0 = arith.constant 0 : i32
    %c0_i32_1 = arith.constant 0 : i32
    return %c0_i32, %c0_i32_0 : i32, i32
  }
  func.func @transform_2(%arg0: i32) -> (i32, i32) {
    %c0_i32 = arith.constant 0 : i32
    %c0_i32_0 = arith.constant 0 : i32
    %c0_i32_1 = arith.constant 0 : i32
    return %c0_i32, %c0_i32_0 : i32, i32
  }
  func.func @transform_3(%arg0: i32) -> (i32, i32) {
    %c0_i32 = arith.constant 0 : i32
    %c0_i32_0 = arith.constant 0 : i32
    return %arg0, %c0_i32 : i32, i32
  }
}

module attributes {stable_mosaic.version = 11 : i64} {
  func.func @_fc_fused_kernel(%arg0: i32, %arg1: memref<2x3136xbf16, #tpu.memory_space<vmem>>, %arg2: memref<3136x512xbf16, #tpu.memory_space<vmem>>, %arg3: memref<1x512xf32, #tpu.memory_space<vmem>>, %arg4: memref<512x10xbf16, #tpu.memory_space<vmem>>, %arg5: memref<1x10xf32, #tpu.memory_space<vmem>>, %arg6: memref<2x10xf32, #tpu.memory_space<vmem>>, %arg7: memref<2x10xf32, #tpu.memory_space<vmem>>) attributes {dimension_semantics = [#tpu.dimension_semantics<arbitrary>], iteration_bounds = array<i64: 2>, scalar_prefetch = 0 : i64, scratch_operands = 1 : i64, tpu.core_type = #tpu.core_type<tc>, window_params = [{pipeline_mode = #tpu.pipeline_mode<synchronous>, transform_indices = @transform_0, window_bounds = array<i64: 2, 3136>}, {transform_indices = @transform_1, window_bounds = array<i64: 3136, 512>}, {transform_indices = @transform_2, window_bounds = array<i64: 1, 512>}, {transform_indices = @transform_3, window_bounds = array<i64: 512, 10>}, {pipeline_mode = #tpu.pipeline_mode<synchronous>, transform_indices = @transform_4, window_bounds = array<i64: 1, 10>}, {pipeline_mode = #tpu.pipeline_mode<synchronous>, transform_indices = @transform_5, window_bounds = array<i64: 2, 10>}]} {
    %c0_i32 = arith.constant 0 : i32
    %0 = arith.cmpi eq, %arg0, %c0_i32 : i32
    %1 = arith.extui %0 : i1 to i32
    %c0_i32_0 = arith.constant 0 : i32
    %2 = arith.cmpi ne, %1, %c0_i32_0 : i32
    scf.if %2 {
      %cst_15 = arith.constant 0.000000e+00 : f32
      %20 = vector.broadcast %cst_15 : f32 to vector<2x10xf32>
      %c0_16 = arith.constant 0 : index
      %c0_17 = arith.constant 0 : index
      %21 = vector.load %arg7[%c0_16, %c0_17] : memref<2x10xf32, #tpu.memory_space<vmem>>, vector<2x10xf32>
      tpu.vector_store %arg7[%c0_16, %c0_17], %20 {strides = array<i32>} : memref<2x10xf32, #tpu.memory_space<vmem>>, vector<2x10xf32>,
    } else {
    }
    %c0 = arith.constant 0 : index
    %c0_1 = arith.constant 0 : index
    %3 = vector.load %arg1[%c0, %c0_1] : memref<2x3136xbf16, #tpu.memory_space<vmem>>, vector<2x3136xbf16>
    %c0_2 = arith.constant 0 : index
    %c0_3 = arith.constant 0 : index
    %4 = vector.load %arg2[%c0_2, %c0_3] : memref<3136x512xbf16, #tpu.memory_space<vmem>>, vector<3136x512xbf16>
    %cst = arith.constant dense<0.000000e+00> : vector<2x512xf32>
    %5 = tpu.matmul %3, %4, %cst {dimension_numbers = #tpu.dot_dimension_numbers<[1], [0], [0], [1], [0, 0, 1, 1], [], []>} : vector<2x3136xbf16>, vector<3136x512xbf16>, vector<2x512xf32> -> vector<2x512xf32>
    %c0_4 = arith.constant 0 : index
    %c0_5 = arith.constant 0 : index
    %6 = vector.load %arg3[%c0_4, %c0_5] : memref<1x512xf32, #tpu.memory_space<vmem>>, vector<1x512xf32>
    %7 = vector.broadcast %6 : vector<1x512xf32> to vector<2x512xf32>
    %8 = arith.addf %5, %7 : vector<2x512xf32>
    %cst_6 = arith.constant 0.000000e+00 : f32
    %9 = vector.broadcast %cst_6 : f32 to vector<2x512xf32>
    %10 = arith.maximumf %8, %9 : vector<2x512xf32>
    %c0_7 = arith.constant 0 : index
    %c0_8 = arith.constant 0 : index
    %11 = vector.load %arg7[%c0_7, %c0_8] : memref<2x10xf32, #tpu.memory_space<vmem>>, vector<2x10xf32>
    %12 = arith.truncf %10 : vector<2x512xf32> to vector<2x512xbf16>
    %c0_9 = arith.constant 0 : index
    %c0_10 = arith.constant 0 : index
    %13 = vector.load %arg4[%c0_9, %c0_10] : memref<512x10xbf16, #tpu.memory_space<vmem>>, vector<512x10xbf16>
    %cst_11 = arith.constant dense<0.000000e+00> : vector<2x10xf32>
    %14 = tpu.matmul %12, %13, %cst_11 {dimension_numbers = #tpu.dot_dimension_numbers<[1], [0], [0], [1], [0, 0, 1, 1], [], []>} : vector<2x512xbf16>, vector<512x10xbf16>, vector<2x10xf32> -> vector<2x10xf32>
    %15 = arith.addf %11, %14 : vector<2x10xf32>
    %c0_12 = arith.constant 0 : index
    %c0_13 = arith.constant 0 : index
    %16 = vector.load %arg7[%c0_12, %c0_13] : memref<2x10xf32, #tpu.memory_space<vmem>>, vector<2x10xf32>
    tpu.vector_store %arg7[%c0_12, %c0_13], %15 {strides = array<i32>} : memref<2x10xf32, #tpu.memory_space<vmem>>, vector<2x10xf32>,
    %c1_i32 = arith.constant 1 : i32
    %17 = arith.cmpi eq, %arg0, %c1_i32 : i32
    %18 = arith.extui %17 : i1 to i32
    %c0_i32_14 = arith.constant 0 : i32
    %19 = arith.cmpi ne, %18, %c0_i32_14 : i32
    scf.if %19 {
      %c0_15 = arith.constant 0 : index
      %c0_16 = arith.constant 0 : index
      %20 = vector.load %arg7[%c0_15, %c0_16] : memref<2x10xf32, #tpu.memory_space<vmem>>, vector<2x10xf32>
      %c0_17 = arith.constant 0 : index
      %c0_18 = arith.constant 0 : index
      %21 = vector.load %arg5[%c0_17, %c0_18] : memref<1x10xf32, #tpu.memory_space<vmem>>, vector<1x10xf32>
      %22 = vector.broadcast %21 : vector<1x10xf32> to vector<2x10xf32>
      %23 = arith.addf %20, %22 : vector<2x10xf32>
      %c0_19 = arith.constant 0 : index
      %c0_20 = arith.constant 0 : index
      %24 = vector.load %arg6[%c0_19, %c0_20] : memref<2x10xf32, #tpu.memory_space<vmem>>, vector<2x10xf32>
      tpu.vector_store %arg6[%c0_19, %c0_20], %23 {strides = array<i32>} : memref<2x10xf32, #tpu.memory_space<vmem>>, vector<2x10xf32>,
    } else {
    }
    return
  }
  func.func @transform_0(%arg0: i32) -> (i32, i32) {
    %c0_i32 = arith.constant 0 : i32
    %c0_i32_0 = arith.constant 0 : i32
    %c0_i32_1 = arith.constant 0 : i32
    return %c0_i32, %c0_i32_0 : i32, i32
  }
  func.func @transform_1(%arg0: i32) -> (i32, i32) {
    %c0_i32 = arith.constant 0 : i32
    %c0_i32_0 = arith.constant 0 : i32
    return %c0_i32, %arg0 : i32, i32
  }
  func.func @transform_2(%arg0: i32) -> (i32, i32) {
    %c0_i32 = arith.constant 0 : i32
    %c0_i32_0 = arith.constant 0 : i32
    return %c0_i32, %arg0 : i32, i32
  }
  func.func @transform_3(%arg0: i32) -> (i32, i32) {
    %c0_i32 = arith.constant 0 : i32
    %c0_i32_0 = arith.constant 0 : i32
    return %arg0, %c0_i32 : i32, i32
  }
  func.func @transform_4(%arg0: i32) -> (i32, i32) {
    %c0_i32 = arith.constant 0 : i32
    %c0_i32_0 = arith.constant 0 : i32
    %c0_i32_1 = arith.constant 0 : i32
    return %c0_i32, %c0_i32_0 : i32, i32
  }
  func.func @transform_5(%arg0: i32) -> (i32, i32) {
    %c0_i32 = arith.constant 0 : i32
    %c0_i32_0 = arith.constant 0 : i32
    %c0_i32_1 = arith.constant 0 : i32
    return %c0_i32, %c0_i32_0 : i32, i32
  }
}

</mosaic_0001>

<bundles_post_ra>
// kernel: forward.3
= control target key start
LH: loop header
LB: loop body
LE: loop exit
PB: predicated region body
PF: predicated region fallthrough
CT: control target
= control target key end

     0   :  { %8 = vsyncpa [#allocation4], 0  ;;  %s3578_s0 = inlined_call_operand.vmem [shape: bf16[4,400,25], index: 0, kind: input, shape index: {}]   ;;  %s3579_s1 = inlined_call_operand.hbm [shape: bf16[25,32], index: 1, kind: input, shape index: {}]   ;;  %s3580_s2 = inlined_call_operand.hbm [shape: f32[1,32], index: 2, kind: input, shape index: {}]   ;;  %s3581_s3 = inlined_call_operand.vmem [shape: bf16[400,32], index: 3, kind: output, shape index: {}]  }
   0x1   :  { %9 = vsyncpa [#allocation6], 0  ;;  %s2812_s12 = smov 0   ;;  %s2814_s13 = smov 0  }
   0x2   :  { %s2816_s14 = smov 0  }
   0x3 LB: > { %s2061_s15 = sadd.s32 4294967295, %s2783_s14   ;;  %s2829_s16 = sadd.s32 1, %s2783_s14   ;;  %s2783_s14 = sphi %s2816_s14, %s3622_s14   ;;  %s2779_s13 = sphi %s2814_s13, %s3621_s13   ;;  %s2775_s12 = sphi %s2812_s12, %s3620_s12  }
   0x4   : > { %s19_s17 = ssub.s32 %s2783_s14, %s2829_s16  ;;  %s22_s18 = sadd.s32 1, %s2779_s13 }
   0x5   : > { %p20_p0 = scmp.eq.s32.totalorder %s19_s17, 0  ;;  %p29_p1 = scmp.ne.s32.totalorder %s2779_s13, %s2775_s12 }
   0x6   : > { %p30_p2 = scmp.eq.s32.totalorder %s2783_s14, 0  ;;  %p2063_p3 = scmp.ge.s32.totalorder %s2783_s14, 1 }
   0x7   : > { %s2839_s19 = scalar_select %p20_p0, %s2779_s13, %s22_s18  }
   0x8   : > { %p2841_p4 = por %p30_p2, %p29_p1  ;;  %p114_p5 = scmp.lt.s32.totalorder %s2783_s14, 3 }
   0x9   : > { %p2848_p6 = scmp.eq.s32.totalorder %s2061_s15, 0  ;;  %s2785_s23 = smov [#allocation3]  }
   0xa   : > { %s3586_s20 = scalar_select %p2841_p4, 1, 0 }
   0xb   : > { %s3587_s21 = scalar_select %p2848_p6, 1, 0 }
   0xc   : > { %p2852_p7 = pnand %p2063_p3, %p114_p5  ;;  %s126_s24 = sshll.u32 %s2785_s23, 4  ;;  %s127_s24 = int_to_ptr.vmem [resolvable:$true] %s126_s24 }
   0xd   : > { %s2786_s26 = smov [#allocation5]   ;;  %s2697_s30 = scalar_lea.hbm %s3579_s1, 256 }
   0xe   : > { %s3588_s22 = scalar_select %p2852_p7, 1, 0 }
   0xf   : > { %p2601_p8 = pneg %p2852_p7  ;;  %s140_s27 = sshll.u32 %s2786_s26, 4  ;;  %s2864_s27 = int_to_ptr.vmem [resolvable:$true] %s140_s27 }
  0x10   : > { %p2698_p10 = scmp.ne.s32.totalorder %s3579_s1, %s2697_s30  ;;  %p2704_p0 = scmp.lt.u32.totalorder %s2697_s30, %s3579_s1 }
  0x11   : > { %p2860_p9 = pnand %p2848_p6, %p2601_p8 }
  0x13   : > { %p2699_p11 = pneg %p2860_p9 }
  0x15   : > { %p2700_p12 = pnand %p2699_p11, %p2698_p10 }
  0x17   : > { %p2701_p13 = pneg %p2700_p12 }
  0x19   : > { %p2706_p1 = pnand %p2704_p0, %p2701_p13 }
  0x1b   : > { %2709 = shalt.err (!%p2706_p1)
}
  0x1c   : > { %s2710_s8 = scalar_lea.vmem %s127_s24, 256  ;;  %p2718_p8 = scmp.lt.s32.totalorder %s127_s24, %s127_s24 }
  0x1d   : > { %p2711_p2 = scmp.ne.s32.totalorder %s127_s24, %s2710_s8  ;;  %p2719_p6 = scmp.lt.s32.totalorder %s2710_s8, %s2710_s8 }
  0x1f   : > { %p2713_p3 = pnand %p2711_p2, %p2699_p11  ;;  %p2720_p7 = por %p2719_p6, %p2718_p8 }
  0x21   : > { %p2714_p5 = pneg %p2713_p3 }
  0x23   : > { %p2721_p4 = pnand %p2720_p7, %p2714_p5 }
  0x25   : > { %2724 = shalt.err (!%p2721_p4)
}
  0x26   : > { %s2787_s9 = smov 64   ;;  %s2788_s10 = smov 4  }
  0x27   : > { %2604 = dma.hbm_to_vmem [thread:$0]  (!%p2860_p9), %s3579_s1, 256, %s127_s24, [#allocation4], %s2787_s9, %s2787_s9, %s2788_s10  }
  0x28   : > { %s2725_s26 = scalar_lea.hbm %s3580_s2, 16 }
  0x29   : > { %p2726_p10 = scmp.ne.s32.totalorder %s3580_s2, %s2725_s26  ;;  %p2732_p7 = scmp.lt.u32.totalorder %s2725_s26, %s3580_s2 }
  0x2b   : > { %p2728_p4 = pnand %p2726_p10, %p2699_p11 }
  0x2d   : > { %p2729_p6 = pneg %p2728_p4 }
  0x2f   : > { %p2734_p12 = pnand %p2732_p7, %p2729_p6 }
  0x31   : > { %2737 = shalt.err (!%p2734_p12)
}
  0x32   : > { %s2738_s24 = scalar_lea.vmem %s2864_s27, 16  ;;  %s2745_s5 = scalar_lea.vmem %s2864_s27, 32 }
  0x33   : > { %p2739_p13 = scmp.ne.s32.totalorder %s2864_s27, %s2738_s24  ;;  %p2746_p2 = scmp.lt.s32.totalorder %s2864_s27, %s2864_s27 }
  0x34   : > { %p2747_p3 = scmp.lt.s32.totalorder %s2745_s5, %s2738_s24 }
  0x35   : > { %p2741_p0 = pnand %p2739_p13, %p2699_p11 }
  0x36   : > { %p2748_p5 = por %p2747_p3, %p2746_p2 }
  0x37   : > { %p2742_p1 = pneg %p2741_p0 }
  0x39   : > { %p2749_p8 = pnand %p2748_p5, %p2742_p1 }
  0x3b   : > { %2752 = shalt.err (!%p2749_p8)
}
  0x3c   : > { %2607 = dma.hbm_to_vmem [thread:$0]  (!%p2860_p9), %s3580_s2, 16, %s2864_s27, [#allocation6]  }
  0x3d   : > { %p2066_p10 = scmp.ge.s32.totalorder %s2783_s14, 2 }
  0x3e   : > { %p3590_p11 = scmp.ne.s32.totalorder (!%p2066_p10), %s3586_s20, 0 }
  0x3f   : > { %147 = sbr.rel (%p2066_p10) target bundleno = 101 (0x65), region = 24 }
  0x46   : > { %150 = sbr.rel (!%p3590_p11) target bundleno = 101 (0x65), region = 28  ;;  %s152_s8 = sand.u32 (%p3590_p11), 1, %s2779_s13  }
  0x47   : > { %s2281_s9 = smul.u32 (%p3590_p11), 100, %s2783_s14 }
  0x48   : > { %s2591_s10 = smul.u32 (%p3590_p11), 400, %s152_s8 }
  0x49   : > { %s2922_s25 = scalar_lea.vmem (%p3590_p11), %s3578_s0, %s2281_s9 }
  0x4a   : > { %v173_v0 = vld [vmem:[%s2922_s25] sm:$0xff] (%p3590_p11)   ;;  %v177_v1 = vld [vmem:[%s2922_s25 + $0x8] sm:$0xff] (%p3590_p11)   ;;  %v181_v2 = vld [vmem:[%s2922_s25 + $0x10] sm:$0xff] (%p3590_p11)   ;;  %s2927_s20 = scalar_lea.vmem (%p3590_p11), [#allocation2], %s2591_s10 }
  0x4b   : > { %174 = vst [vmem:[%s2927_s20] sm:$0xff] (%p3590_p11), %v173_v0   ;;  %178 = vst [vmem:[%s2927_s20 + $0x8] sm:$0xff] (%p3590_p11), %v177_v1   ;;  %v185_v3 = vld [vmem:[%s2922_s25 + $0x18] sm:$0xff] (%p3590_p11)   ;;  %v189_v4 = vld [vmem:[%s2922_s25 + $0x20] sm:$0xff] (%p3590_p11)  }
  0x4c   : > { %182 = vst [vmem:[%s2927_s20 + $0x10] sm:$0xff] (%p3590_p11), %v181_v2   ;;  %v193_v5 = vld [vmem:[%s2922_s25 + $0x28] sm:$0xff] (%p3590_p11)   ;;  %186 = vst [vmem:[%s2927_s20 + $0x18] sm:$0xff] (%p3590_p11), %v185_v3   ;;  %v197_v6 = vld [vmem:[%s2922_s25 + $0x30] sm:$0xff] (%p3590_p11)  }
  0x4d   : > { %190 = vst [vmem:[%s2927_s20 + $0x20] sm:$0xff] %v189_v4   ;;  %194 = vst [vmem:[%s2927_s20 + $0x28] sm:$0xff] %v193_v5   ;;  %v201_v7 = vld [vmem:[%s2922_s25 + $0x38] sm:$0xff]   ;;  %v205_v8 = vld [vmem:[%s2922_s25 + $0x40] sm:$0xff]  }
  0x4e   : > { %198 = vst [vmem:[%s2927_s20 + $0x30] sm:$0xff] %v197_v6   ;;  %202 = vst [vmem:[%s2927_s20 + $0x38] sm:$0xff] %v201_v7   ;;  %v209_v9 = vld [vmem:[%s2922_s25 + $0x48] sm:$0xff]   ;;  %v213_v10 = vld [vmem:[%s2922_s25 + $0x50] sm:$0xff]  }
  0x4f   : > { %206 = vst [vmem:[%s2927_s20 + $0x40] sm:$0xff] %v205_v8   ;;  %v217_v11 = vld [vmem:[%s2922_s25 + $0x58] sm:$0xff]   ;;  %210 = vst [vmem:[%s2927_s20 + $0x48] sm:$0xff] %v209_v9   ;;  %v221_v12 = vld [vmem:[%s2922_s25 + $0x60] sm:$0xf] }
  0x50   : > { %214 = vst [vmem:[%s2927_s20 + $0x50] sm:$0xff] %v213_v10   ;;  %218 = vst [vmem:[%s2927_s20 + $0x58] sm:$0xff] %v217_v11   ;;  %v223_v13 = vld [vmem:[%s2922_s25 + $0xc8] sm:$0xff]   ;;  %v227_v14 = vld [vmem:[%s2922_s25 + $0xd0] sm:$0xff]  }
  0x51   : > { %222 = vst [vmem:[%s2927_s20 + $0x60] sm:$0xf] %v221_v12  ;;  %224 = vst [vmem:[%s2927_s20 + $0x64] sm:$0xff] %v223_v13   ;;  %v231_v15 = vld [vmem:[%s2922_s25 + $0xd8] sm:$0xff]   ;;  %v235_v16 = vld [vmem:[%s2922_s25 + $0xe0] sm:$0xff]  }
  0x52   : > { %228 = vst [vmem:[%s2927_s20 + $0x6c] sm:$0xff] %v227_v14   ;;  %v239_v17 = vld [vmem:[%s2922_s25 + $0xe8] sm:$0xff]   ;;  %232 = vst [vmem:[%s2927_s20 + $0x74] sm:$0xff] %v231_v15   ;;  %v243_v18 = vld [vmem:[%s2922_s25 + $0xf0] sm:$0xff]  }
  0x53   : > { %236 = vst [vmem:[%s2927_s20 + $0x7c] sm:$0xff] %v235_v16   ;;  %240 = vst [vmem:[%s2927_s20 + $0x84] sm:$0xff] %v239_v17   ;;  %v247_v19 = vld [vmem:[%s2922_s25 + $0xf8] sm:$0xff]   ;;  %v251_v20 = vld [vmem:[%s2922_s25 + $0x100] sm:$0xff]  }
  0x54   : > { %244 = vst [vmem:[%s2927_s20 + $0x8c] sm:$0xff] %v243_v18   ;;  %248 = vst [vmem:[%s2927_s20 + $0x94] sm:$0xff] %v247_v19   ;;  %v255_v21 = vld [vmem:[%s2922_s25 + $0x108] sm:$0xff]   ;;  %v259_v22 = vld [vmem:[%s2922_s25 + $0x110] sm:$0xff]  }
  0x55   : > { %252 = vst [vmem:[%s2927_s20 + $0x9c] sm:$0xff] %v251_v20   ;;  %v263_v23 = vld [vmem:[%s2922_s25 + $0x118] sm:$0xff]   ;;  %256 = vst [vmem:[%s2927_s20 + $0xa4] sm:$0xff] %v255_v21   ;;  %v267_v24 = vld [vmem:[%s2922_s25 + $0x120] sm:$0xff]  }
  0x56   : > { %260 = vst [vmem:[%s2927_s20 + $0xac] sm:$0xff] %v259_v22   ;;  %264 = vst [vmem:[%s2927_s20 + $0xb4] sm:$0xff] %v263_v23   ;;  %v271_v25 = vld [vmem:[%s2922_s25 + $0x128] sm:$0xf]  ;;  %v273_v26 = vld [vmem:[%s2922_s25 + $0x190] sm:$0xff]  }
  0x57   : > { %268 = vst [vmem:[%s2927_s20 + $0xbc] sm:$0xff] %v267_v24   ;;  %272 = vst [vmem:[%s2927_s20 + $0xc4] sm:$0xf] %v271_v25  ;;  %v277_v27 = vld [vmem:[%s2922_s25 + $0x198] sm:$0xff]   ;;  %v281_v28 = vld [vmem:[%s2922_s25 + $0x1a0] sm:$0xff]  }
  0x58   : > { %274 = vst [vmem:[%s2927_s20 + $0xc8] sm:$0xff] %v273_v26   ;;  %v285_v29 = vld [vmem:[%s2922_s25 + $0x1a8] sm:$0xff]   ;;  %278 = vst [vmem:[%s2927_s20 + $0xd0] sm:$0xff] %v277_v27   ;;  %v289_v30 = vld [vmem:[%s2922_s25 + $0x1b0] sm:$0xff]  }
  0x59   : > { %282 = vst [vmem:[%s2927_s20 + $0xd8] sm:$0xff] %v281_v28   ;;  %286 = vst [vmem:[%s2927_s20 + $0xe0] sm:$0xff] %v285_v29   ;;  %v293_v31 = vld [vmem:[%s2922_s25 + $0x1b8] sm:$0xff]   ;;  %v297_v32 = vld [vmem:[%s2922_s25 + $0x1c0] sm:$0xff]  }
  0x5a   : > { %290 = vst [vmem:[%s2927_s20 + $0xe8] sm:$0xff] %v289_v30   ;;  %294 = vst [vmem:[%s2927_s20 + $0xf0] sm:$0xff] %v293_v31   ;;  %v301_v33 = vld [vmem:[%s2922_s25 + $0x1c8] sm:$0xff]   ;;  %v305_v34 = vld [vmem:[%s2922_s25 + $0x1d0] sm:$0xff]  }
  0x5b   : > { %298 = vst [vmem:[%s2927_s20 + $0xf8] sm:$0xff] %v297_v32   ;;  %v309_v35 = vld [vmem:[%s2922_s25 + $0x1d8] sm:$0xff]   ;;  %302 = vst [vmem:[%s2927_s20 + $0x100] sm:$0xff] %v301_v33   ;;  %v313_v36 = vld [vmem:[%s2922_s25 + $0x1e0] sm:$0xff]  }
  0x5c   : > { %306 = vst [vmem:[%s2927_s20 + $0x108] sm:$0xff] %v305_v34   ;;  %310 = vst [vmem:[%s2927_s20 + $0x110] sm:$0xff] %v309_v35   ;;  %v317_v37 = vld [vmem:[%s2922_s25 + $0x1e8] sm:$0xff]   ;;  %v321_v38 = vld [vmem:[%s2922_s25 + $0x1f0] sm:$0xf] }
  0x5d   : > { %314 = vst [vmem:[%s2927_s20 + $0x118] sm:$0xff] %v313_v36   ;;  %318 = vst [vmem:[%s2927_s20 + $0x120] sm:$0xff] %v317_v37   ;;  %v323_v39 = vld [vmem:[%s2922_s25 + $0x258] sm:$0xff]   ;;  %v327_v40 = vld [vmem:[%s2922_s25 + $0x260] sm:$0xff]  }
  0x5e   : > { %322 = vst [vmem:[%s2927_s20 + $0x128] sm:$0xf] %v321_v38  ;;  %v331_v41 = vld [vmem:[%s2922_s25 + $0x268] sm:$0xff]   ;;  %324 = vst [vmem:[%s2927_s20 + $0x12c] sm:$0xff] %v323_v39   ;;  %v335_v42 = vld [vmem:[%s2922_s25 + $0x270] sm:$0xff]  }
  0x5f   : > { %328 = vst [vmem:[%s2927_s20 + $0x134] sm:$0xff] %v327_v40   ;;  %332 = vst [vmem:[%s2927_s20 + $0x13c] sm:$0xff] %v331_v41   ;;  %v339_v43 = vld [vmem:[%s2922_s25 + $0x278] sm:$0xff]   ;;  %v343_v44 = vld [vmem:[%s2922_s25 + $0x280] sm:$0xff]  }
  0x60   : > { %336 = vst [vmem:[%s2927_s20 + $0x144] sm:$0xff] %v335_v42   ;;  %340 = vst [vmem:[%s2927_s20 + $0x14c] sm:$0xff] %v339_v43   ;;  %v347_v45 = vld [vmem:[%s2922_s25 + $0x288] sm:$0xff]   ;;  %v351_v46 = vld [vmem:[%s2922_s25 + $0x290] sm:$0xff]  }
  0x61   : > { %344 = vst [vmem:[%s2927_s20 + $0x154] sm:$0xff] %v343_v44   ;;  %v355_v47 = vld [vmem:[%s2922_s25 + $0x298] sm:$0xff]   ;;  %348 = vst [vmem:[%s2927_s20 + $0x15c] sm:$0xff] %v347_v45   ;;  %v359_v48 = vld [vmem:[%s2922_s25 + $0x2a0] sm:$0xff]  }
  0x62   : > { %352 = vst [vmem:[%s2927_s20 + $0x164] sm:$0xff] %v351_v46   ;;  %356 = vst [vmem:[%s2927_s20 + $0x16c] sm:$0xff] %v355_v47   ;;  %v363_v49 = vld [vmem:[%s2922_s25 + $0x2a8] sm:$0xff]   ;;  %v367_v50 = vld [vmem:[%s2922_s25 + $0x2b0] sm:$0xff]  }
  0x63   : > { %360 = vst [vmem:[%s2927_s20 + $0x174] sm:$0xff] %v359_v48   ;;  %364 = vst [vmem:[%s2927_s20 + $0x17c] sm:$0xff] %v363_v49   ;;  %v371_v51 = vld [vmem:[%s2922_s25 + $0x2b8] sm:$0xf] }
  0x64   : > { %368 = vst [vmem:[%s2927_s20 + $0x184] sm:$0xff] %v367_v50   ;;  %372 = vst [vmem:[%s2927_s20 + $0x18c] sm:$0xf] %v371_v51 }
  0x65 PF: > { %p3591_p9 = scmp.ne.s32.totalorder %s3588_s22, 0 }
  0x67   : > { %598 = sbr.rel (%p3591_p9) target bundleno = 550 (0x226), region = 69 }
  0x6e   : > { %s601_s27 = sand.u32 1, %s2775_s12   ;;  %p3592_p4 = scmp.ne.s32.totalorder %s3587_s21, 0 }
  0x6f   : > { %s2592_s18 = smul.u32 400, %s601_s27 }
  0x71   : > { %s3033_s23 = scalar_lea.vmem [#allocation2], %s2592_s18 }
  0x72   : > { %2766 = dma.done.wait (%p3592_p4), [#allocation4], 256  }
  0x73   : > { %2768 = vsyncadd (%p3592_p4), [#allocation4], 4294967040 }
  0x74   : > { %2770 = dma.done.wait (%p3592_p4), [#allocation6], 16  }
  0x75   : > { %2772 = vsyncadd (%p3592_p4), [#allocation6], 4294967280  ;;  %v2789_v52 = vmov 0.0   ;;  %vm783_vm0 = vcmask 1043456   ;;  %vm2790_vm1 = vmmov 0   ;;  %vm784_vm2 = vcmask 1044480  }
  0x76   : > { %2367 = vmatprep.subr.bf16.mxu0 %v2789_v52  ;;  %2423 = vmatprep.subr.bf16.mxu1 %v2789_v52  ;;  %v2791_v53 = vmov 65535   ;;  %v2643_v55 = vld [vmem:[#allocation3] sm:$0xff]   ;;  %v2644_v57 = vld [vmem:[#allocation3 + $0x8] sm:$0x1f]   ;;  %vm743_vm3 = vcmask 203776   ;;  %s633_s12 = smul.u32 25, %s2061_s15 }
  0x77   : > { %2371 = vmatprep.mubr.msk.bf16.mxu0 %vm2790_vm1, %v2789_v52  ;;  %2427 = vmatprep.mubr.msk.bf16.mxu1 %vm2790_vm1, %v2789_v52  ;;  %v785_v54 = vsel %vm783_vm0, 4294967295, %v2791_v53  ;;  %v2645_v59 = vld [vmem:[%s3033_s23] sm:$0xff]   ;;  %v2647_v61 = vld [vmem:[%s3033_s23 + $0x8] sm:$0xff]   ;;  %v2649_v63 = vld [vmem:[%s3033_s23 + $0x10] sm:$0xff]   ;;  %vm1951_vm4 = vcmask 257024  }
  0x78   : > { %v786_v56 = vsel %vm784_vm2, %v785_v54, 0  ;;  %2368 = vmatpush3.bf16.msra.mxu0 %v2643_v55  ;;  %2424 = vmatpush3.bf16.msra.mxu1 %v2643_v55  ;;  %v2646_v60 = vld [vmem:[%s3033_s23 + $0x64] sm:$0xff]   ;;  %v2648_v62 = vld [vmem:[%s3033_s23 + $0x6c] sm:$0xff]   ;;  %v2650_v0 = vld [vmem:[%s3033_s23 + $0x74] sm:$0xff]   ;;  %p634_p6 = scmp.lt.s32.totalorder %s633_s12, 49 }
  0x79   : > { %2369 = vmatprep.subr.bf16.mxu0 %v2789_v52  ;;  %2425 = vmatprep.subr.bf16.mxu1 %v2789_v52  ;;  %v788_v58 = vand.u32 %v2644_v57, %v786_v56  ;;  %v2651_v1 = vld [vmem:[%s3033_s23 + $0x18] sm:$0xff]   ;;  %v2653_v3 = vld [vmem:[%s3033_s23 + $0x20] sm:$0xff]   ;;  %v2655_v5 = vld [vmem:[%s3033_s23 + $0x28] sm:$0xff]  }
  0x7a   : > { %v2652_v2 = vld [vmem:[%s3033_s23 + $0x7c] sm:$0xff]   ;;  %v2654_v4 = vld [vmem:[%s3033_s23 + $0x84] sm:$0xff]   ;;  %v2656_v6 = vld [vmem:[%s3033_s23 + $0x8c] sm:$0xff]   ;;  %s3624_s12 = smov (!%p634_p6, %s633_s12), 49 }
  0x7b   : > { %v2657_v7 = vld [vmem:[%s3033_s23 + $0x30] sm:$0xff]   ;;  %v2659_v9 = vld [vmem:[%s3033_s23 + $0x38] sm:$0xff]   ;;  %v2661_v11 = vld [vmem:[%s3033_s23 + $0x40] sm:$0xff]   ;;  %s2071_s14 = sshll.u32 %s3624_s12, 2 }
  0x7c   : > { %2370 = vmatpush3.bf16.msra.mxu0 %v788_v58  ;;  %2426 = vmatpush3.bf16.msra.mxu1 %v788_v58  ;;  %v2658_v8 = vld [vmem:[%s3033_s23 + $0x94] sm:$0xff]   ;;  %v2660_v10 = vld [vmem:[%s3033_s23 + $0x9c] sm:$0xff]   ;;  %v2662_v12 = vld [vmem:[%s3033_s23 + $0xa4] sm:$0xff]   ;;  %s3424_s22 = scalar_lea.vmem %s3581_s3, %s2071_s14 }
  0x7d   : > { %2479 = vmatprep.subr.bf16.mxu0 %v2789_v52  ;;  %2535 = vmatprep.subr.bf16.mxu1 %v2789_v52  ;;  %v2663_v13 = vld [vmem:[%s3033_s23 + $0x48] sm:$0xff]   ;;  %v2665_v15 = vld [vmem:[%s3033_s23 + $0x50] sm:$0xff]   ;;  %v2667_v17 = vld [vmem:[%s3033_s23 + $0x58] sm:$0xff]  }
  0x7e   : > { %v2664_v14 = vld [vmem:[%s3033_s23 + $0xac] sm:$0xff]   ;;  %v2666_v16 = vld [vmem:[%s3033_s23 + $0xb4] sm:$0xff]   ;;  %v2668_v18 = vld [vmem:[%s3033_s23 + $0xbc] sm:$0xff]  }
  0x7f   : > { %2372 = vmatmul.mubr.msk.bf16.vlgmr.msra.gmra.mrb[0].mxu0 %vm743_vm3, %v2645_v59  ;;  %2428 = vmatmul.mubr.msk.bf16.vlgmr.msra.gmra.mrb[0].mxu1 %vm743_vm3, %v2646_v60  ;;  %v2669_v19 = vld [vmem:[%s3033_s23 + $0x60] ss:$0 sps:$4 sm:$0xff]   ;;  %v2670_v20 = vld [vmem:[%s3033_s23 + $0xc4] ss:$0 sps:$4 sm:$0xff]   ;;  %v2671_v21 = vld [vmem:[%s3033_s23 + $0xc8] sm:$0xff]  }
  0x80   : > { %2480 = vmatpush3.bf16.msra.mxu0 %v2643_v55  ;;  %2536 = vmatpush3.bf16.msra.mxu1 %v2643_v55  ;;  %v2672_v22 = vld [vmem:[%s3033_s23 + $0x12c] sm:$0xff]   ;;  %v2674_v24 = vld [vmem:[%s3033_s23 + $0x134] sm:$0xff]   ;;  %v2676_v26 = vld [vmem:[%s3033_s23 + $0x13c] sm:$0xff]  }
  0x81   : > { %2375 = vmatprep.mubr.msk.bf16.mxu0 %vm2790_vm1, %v2789_v52  ;;  %2431 = vmatprep.mubr.msk.bf16.mxu1 %vm2790_vm1, %v2789_v52  ;;  %v2673_v23 = vld [vmem:[%s3033_s23 + $0xd0] sm:$0xff]   ;;  %v2675_v25 = vld [vmem:[%s3033_s23 + $0xd8] sm:$0xff]   ;;  %v2677_v27 = vld [vmem:[%s3033_s23 + $0xe0] sm:$0xff]  }
  0x82   : > { %2481 = vmatprep.subr.bf16.mxu0 %v2789_v52  ;;  %2537 = vmatprep.subr.bf16.mxu1 %v2789_v52  ;;  %v2678_v28 = vld [vmem:[%s3033_s23 + $0x144] sm:$0xff]   ;;  %v2680_v30 = vld [vmem:[%s3033_s23 + $0x14c] sm:$0xff]   ;;  %v2682_v32 = vld [vmem:[%s3033_s23 + $0x154] sm:$0xff]  }
  0x83   : > { %v2679_v29 = vld [vmem:[%s3033_s23 + $0xe8] sm:$0xff]   ;;  %v2681_v31 = vld [vmem:[%s3033_s23 + $0xf0] sm:$0xff]   ;;  %v2683_v33 = vld [vmem:[%s3033_s23 + $0xf8] sm:$0xff]  }
  0x84   : > { %2482 = vmatpush3.bf16.msra.mxu0 %v788_v58  ;;  %2538 = vmatpush3.bf16.msra.mxu1 %v788_v58  ;;  %v2684_v34 = vld [vmem:[%s3033_s23 + $0x15c] sm:$0xff]   ;;  %v2686_v36 = vld [vmem:[%s3033_s23 + $0x164] sm:$0xff]   ;;  %v2688_v38 = vld [vmem:[%s3033_s23 + $0x16c] sm:$0xff]  }
  0x85   : > { %v2685_v35 = vld [vmem:[%s3033_s23 + $0x100] sm:$0xff]   ;;  %v2687_v37 = vld [vmem:[%s3033_s23 + $0x108] sm:$0xff]   ;;  %v2689_v39 = vld [vmem:[%s3033_s23 + $0x110] sm:$0xff]  }
  0x86   : > { %v2690_v40 = vld [vmem:[%s3033_s23 + $0x174] sm:$0xff]   ;;  %v2692_v42 = vld [vmem:[%s3033_s23 + $0x17c] sm:$0xff]   ;;  %v2694_v44 = vld [vmem:[%s3033_s23 + $0x184] sm:$0xff]  }
  0x87   : > { %2376 = vmatmul.mubr.msk.bf16.gmra.mrb[4].mxu0 %vm743_vm3, %v2647_v61  ;;  %2432 = vmatmul.mubr.msk.bf16.gmra.mrb[4].mxu1 %vm743_vm3, %v2648_v62  ;;  %v2691_v41 = vld [vmem:[%s3033_s23 + $0x118] sm:$0xff]   ;;  %v2693_v43 = vld [vmem:[%s3033_s23 + $0x120] sm:$0xff]   ;;  %v2695_v45 = vld [vmem:[%s3033_s23 + $0x128] ss:$0 sps:$4 sm:$0xff]  }
  0x88   : > { %2379 = vmatprep.mubr.msk.bf16.mxu0 %vm2790_vm1, %v2789_v52  ;;  %2435 = vmatprep.mubr.msk.bf16.mxu1 %vm2790_vm1, %v2789_v52  ;;  %v2696_v46 = vld [vmem:[%s3033_s23 + $0x18c] ss:$0 sps:$4 sm:$0xff]  }
  0x8f   : > { %2380 = vmatmul.mubr.msk.bf16.gmra.mrb[8].mxu0 %vm743_vm3, %v2649_v63  ;;  %2436 = vmatmul.mubr.msk.bf16.gmra.mrb[8].mxu1 %vm743_vm3, %v2650_v0 }
  0x90   : > { %2383 = vmatprep.mubr.msk.bf16.mxu0 %vm2790_vm1, %v2789_v52  ;;  %2439 = vmatprep.mubr.msk.bf16.mxu1 %vm2790_vm1, %v2789_v52 }
  0x97   : > { %2384 = vmatmul.mubr.msk.bf16.gmra.mrb[12].mxu0 %vm743_vm3, %v2651_v1  ;;  %2440 = vmatmul.mubr.msk.bf16.gmra.mrb[12].mxu1 %vm743_vm3, %v2652_v2 }
  0x98   : > { %2387 = vmatprep.mubr.msk.bf16.mxu0 %vm2790_vm1, %v2789_v52  ;;  %2443 = vmatprep.mubr.msk.bf16.mxu1 %vm2790_vm1, %v2789_v52 }
  0x9f   : > { %2388 = vmatmul.mubr.msk.bf16.gmra.mrb[16].mxu0 %vm743_vm3, %v2653_v3  ;;  %2444 = vmatmul.mubr.msk.bf16.gmra.mrb[16].mxu1 %vm743_vm3, %v2654_v4 }
  0xa0   : > { %2391 = vmatprep.mubr.msk.bf16.mxu0 %vm2790_vm1, %v2789_v52  ;;  %2447 = vmatprep.mubr.msk.bf16.mxu1 %vm2790_vm1, %v2789_v52 }
  0xa7   : > { %2392 = vmatmul.mubr.msk.bf16.gmra.mrb[20].mxu0 %vm743_vm3, %v2655_v5  ;;  %2448 = vmatmul.mubr.msk.bf16.gmra.mrb[20].mxu1 %vm743_vm3, %v2656_v6 }
  0xa8   : > { %2395 = vmatprep.mubr.msk.bf16.mxu0 %vm2790_vm1, %v2789_v52  ;;  %2451 = vmatprep.mubr.msk.bf16.mxu1 %vm2790_vm1, %v2789_v52 }
  0xaf   : > { %2396 = vmatmul.mubr.msk.bf16.gmra.mrb[24].mxu0 %vm743_vm3, %v2657_v7  ;;  %2452 = vmatmul.mubr.msk.bf16.gmra.mrb[24].mxu1 %vm743_vm3, %v2658_v8 }
  0xb0   : > { %2399 = vmatprep.mubr.msk.bf16.mxu0 %vm2790_vm1, %v2789_v52  ;;  %2455 = vmatprep.mubr.msk.bf16.mxu1 %vm2790_vm1, %v2789_v52 }
  0xb7   : > { %2400 = vmatmul.mubr.msk.bf16.gmra.mrb[28].mxu0 %vm743_vm3, %v2659_v9  ;;  %2456 = vmatmul.mubr.msk.bf16.gmra.mrb[28].mxu1 %vm743_vm3, %v2660_v10 }
  0xb8   : > { %2403 = vmatprep.mubr.msk.bf16.mxu0 %vm2790_vm1, %v2789_v52  ;;  %2459 = vmatprep.mubr.msk.bf16.mxu1 %vm2790_vm1, %v2789_v52 }
  0xbf   : > { %2404 = vmatmul.mubr.msk.bf16.gmra.mrb[32].mxu0 %vm743_vm3, %v2661_v11  ;;  %2460 = vmatmul.mubr.msk.bf16.gmra.mrb[32].mxu1 %vm743_vm3, %v2662_v12 }
  0xc0   : > { %2407 = vmatprep.mubr.msk.bf16.mxu0 %vm2790_vm1, %v2789_v52  ;;  %2463 = vmatprep.mubr.msk.bf16.mxu1 %vm2790_vm1, %v2789_v52 }
  0xc7   : > { %2408 = vmatmul.mubr.msk.bf16.gmra.mrb[36].mxu0 %vm743_vm3, %v2663_v13  ;;  %2464 = vmatmul.mubr.msk.bf16.gmra.mrb[36].mxu1 %vm743_vm3, %v2664_v14 }
  0xc8   : > { %2411 = vmatprep.mubr.msk.bf16.mxu0 %vm2790_vm1, %v2789_v52  ;;  %2467 = vmatprep.mubr.msk.bf16.mxu1 %vm2790_vm1, %v2789_v52 }
  0xcf   : > { %2412 = vmatmul.mubr.msk.bf16.gmra.mrb[40].mxu0 %vm743_vm3, %v2665_v15  ;;  %2468 = vmatmul.mubr.msk.bf16.gmra.mrb[40].mxu1 %vm743_vm3, %v2666_v16 }
  0xd0   : > { %2415 = vmatprep.mubr.msk.bf16.mxu0 %vm2790_vm1, %v2789_v52  ;;  %2471 = vmatprep.mubr.msk.bf16.mxu1 %vm2790_vm1, %v2789_v52 }
  0xd7   : > { %2416 = vmatmul.mubr.msk.bf16.gmra.mrb[44].mxu0 %vm743_vm3, %v2667_v17  ;;  %2472 = vmatmul.mubr.msk.bf16.gmra.mrb[44].mxu1 %vm743_vm3, %v2668_v18 }
  0xd8   : > { %2419 = vmatprep.mubr.msk.bf16.mxu0 %vm2790_vm1, %v2789_v52  ;;  %2475 = vmatprep.mubr.msk.bf16.mxu1 %vm2790_vm1, %v2789_v52 }
  0xdf   : > { %2420 = vmatmul.mubr.msk.bf16.gmra.mrb[48].mxu0 %vm743_vm3, %v2669_v19  ;;  %2476 = vmatmul.mubr.msk.bf16.gmra.mrb[48].mxu1 %vm743_vm3, %v2670_v20 }
  0xe0   : > { %2483 = vmatprep.mubr.msk.bf16.mxu0 %vm2790_vm1, %v2789_v52  ;;  %2539 = vmatprep.mubr.msk.bf16.mxu1 %vm2790_vm1, %v2789_v52 }
  0xe7   : > { %2484 = vmatmul.mubr.msk.bf16.vlgmr.msra.gmra.mrb[52].mxu0 %vm743_vm3, %v2671_v21  ;;  %2540 = vmatmul.mubr.msk.bf16.vlgmr.msra.gmra.mrb[52].mxu1 %vm743_vm3, %v2672_v22 }
  0xe8   : > { %2487 = vmatprep.mubr.msk.bf16.mxu0 %vm2790_vm1, %v2789_v52  ;;  %2543 = vmatprep.mubr.msk.bf16.mxu1 %vm2790_vm1, %v2789_v52 }
  0xef   : > { %2488 = vmatmul.mubr.msk.bf16.gmra.mrb[56].mxu0 %vm743_vm3, %v2673_v23  ;;  %2544 = vmatmul.mubr.msk.bf16.gmra.mrb[56].mxu1 %vm743_vm3, %v2674_v24 }
  0xf0   : > { %2491 = vmatprep.mubr.msk.bf16.mxu0 %vm2790_vm1, %v2789_v52  ;;  %2547 = vmatprep.mubr.msk.bf16.mxu1 %vm2790_vm1, %v2789_v52 }
  0xf7   : > { %2492 = vmatmul.mubr.msk.bf16.gmra.mrb[60].mxu0 %vm743_vm3, %v2675_v25  ;;  %2548 = vmatmul.mubr.msk.bf16.gmra.mrb[60].mxu1 %vm743_vm3, %v2676_v26 }
  0xf8   : > { %2495 = vmatprep.mubr.msk.bf16.mxu0 %vm2790_vm1, %v2789_v52  ;;  %2551 = vmatprep.mubr.msk.bf16.mxu1 %vm2790_vm1, %v2789_v52 }
  0xff   : > { %2496 = vmatmul.mubr.msk.bf16.gmra.mrb[64].mxu0 %vm743_vm3, %v2677_v27  ;;  %2552 = vmatmul.mubr.msk.bf16.gmra.mrb[64].mxu1 %vm743_vm3, %v2678_v28 }
 0x100   : > { %2499 = vmatprep.mubr.msk.bf16.mxu0 %vm2790_vm1, %v2789_v52  ;;  %2555 = vmatprep.mubr.msk.bf16.mxu1 %vm2790_vm1, %v2789_v52 }
 0x107   : > { %2500 = vmatmul.mubr.msk.bf16.gmra.mrb[68].mxu0 %vm743_vm3, %v2679_v29  ;;  %2556 = vmatmul.mubr.msk.bf16.gmra.mrb[68].mxu1 %vm743_vm3, %v2680_v30 }
 0x108   : > { %2503 = vmatprep.mubr.msk.bf16.mxu0 %vm2790_vm1, %v2789_v52  ;;  %2559 = vmatprep.mubr.msk.bf16.mxu1 %vm2790_vm1, %v2789_v52 }
 0x10f   : > { %2504 = vmatmul.mubr.msk.bf16.gmra.mrb[72].mxu0 %vm743_vm3, %v2681_v31  ;;  %2560 = vmatmul.mubr.msk.bf16.gmra.mrb[72].mxu1 %vm743_vm3, %v2682_v32 }
 0x110   : > { %2507 = vmatprep.mubr.msk.bf16.mxu0 %vm2790_vm1, %v2789_v52  ;;  %2563 = vmatprep.mubr.msk.bf16.mxu1 %vm2790_vm1, %v2789_v52 }
 0x117   : > { %2508 = vmatmul.mubr.msk.bf16.gmra.mrb[76].mxu0 %vm743_vm3, %v2683_v33  ;;  %2564 = vmatmul.mubr.msk.bf16.gmra.mrb[76].mxu1 %vm743_vm3, %v2684_v34 }
 0x118   : > { %2511 = vmatprep.mubr.msk.bf16.mxu0 %vm2790_vm1, %v2789_v52  ;;  %2567 = vmatprep.mubr.msk.bf16.mxu1 %vm2790_vm1, %v2789_v52 }
 0x11f   : > { %2512 = vmatmul.mubr.msk.bf16.gmra.mrb[80].mxu0 %vm743_vm3, %v2685_v35  ;;  %2568 = vmatmul.mubr.msk.bf16.gmra.mrb[80].mxu1 %vm743_vm3, %v2686_v36 }
 0x120   : > { %2515 = vmatprep.mubr.msk.bf16.mxu0 %vm2790_vm1, %v2789_v52  ;;  %2571 = vmatprep.mubr.msk.bf16.mxu1 %vm2790_vm1, %v2789_v52 }
 0x127   : > { %2516 = vmatmul.mubr.msk.bf16.gmra.mrb[84].mxu0 %vm743_vm3, %v2687_v37  ;;  %2572 = vmatmul.mubr.msk.bf16.gmra.mrb[84].mxu1 %vm743_vm3, %v2688_v38 }
 0x128   : > { %2519 = vmatprep.mubr.msk.bf16.mxu0 %vm2790_vm1, %v2789_v52  ;;  %2575 = vmatprep.mubr.msk.bf16.mxu1 %vm2790_vm1, %v2789_v52 }
 0x12f   : > { %2520 = vmatmul.mubr.msk.bf16.gmra.mrb[88].mxu0 %vm743_vm3, %v2689_v39  ;;  %2576 = vmatmul.mubr.msk.bf16.gmra.mrb[88].mxu1 %vm743_vm3, %v2690_v40 }
 0x130   : > { %2523 = vmatprep.mubr.msk.bf16.mxu0 %vm2790_vm1, %v2789_v52  ;;  %2579 = vmatprep.mubr.msk.bf16.mxu1 %vm2790_vm1, %v2789_v52 }
 0x137   : > { %2524 = vmatmul.mubr.msk.bf16.gmra.mrb[92].mxu0 %vm743_vm3, %v2691_v41  ;;  %2580 = vmatmul.mubr.msk.bf16.gmra.mrb[92].mxu1 %vm743_vm3, %v2692_v42 }
 0x138   : > { %2527 = vmatprep.mubr.msk.bf16.mxu0 %vm2790_vm1, %v2789_v52  ;;  %2583 = vmatprep.mubr.msk.bf16.mxu1 %vm2790_vm1, %v2789_v52 }
 0x13f   : > { %2528 = vmatmul.mubr.msk.bf16.gmra.mrb[96].mxu0 %vm743_vm3, %v2693_v43  ;;  %2584 = vmatmul.mubr.msk.bf16.gmra.mrb[96].mxu1 %vm743_vm3, %v2694_v44 }
 0x140   : > { %2531 = vmatprep.mubr.msk.bf16.mxu0 %vm2790_vm1, %v2789_v52  ;;  %2587 = vmatprep.mubr.msk.bf16.mxu1 %vm2790_vm1, %v2789_v52  ;;  %v3411_v52 = vld [vmem:[#allocation5] ss:$0 sm:$0xff] }
 0x147   : > { %2532 = vmatmul.mubr.msk.bf16.gmra.mrb[100].mxu0 %vm743_vm3, %v2695_v45  ;;  %2588 = vmatmul.mubr.msk.bf16.gmra.mrb[100].mxu1 %vm743_vm3, %v2696_v46 }
 0x152   : > { %v3259_v47 = vpop.f32.mrb[0].mxu0  ;;  %v3261_v48 = vpop.f32.mrb[0].mxu1 }
 0x153   : > { %v2373_v50 = vpop.f32.mrb[1].mxu0  ;;  %v2429_v51 = vpop.f32.mrb[1].mxu1 }
 0x154   : > { %v3265_v53 = vpop.f32.mrb[2].mxu0  ;;  %v3267_v54 = vpop.f32.mrb[2].mxu1 }
 0x155   : > { %v2374_v55 = vpop.f32.mrb[3].mxu0  ;;  %v2430_v56 = vpop.f32.mrb[3].mxu1 }
 0x15a   : > { %v3271_v57 = vpop.f32.mrb[4].mxu0  ;;  %v3273_v58 = vpop.f32.mrb[4].mxu1 }
 0x15b   : > { %v2377_v60 = vpop.f32.mrb[5].mxu0  ;;  %v2433_v61 = vpop.f32.mrb[5].mxu1 }
 0x15c   : > { %v3277_v62 = vpop.f32.mrb[6].mxu0  ;;  %v3279_v63 = vpop.f32.mrb[6].mxu1 }
 0x15d   : > { %v2378_v1 = vpop.f32.mrb[7].mxu0  ;;  %v2434_v2 = vpop.f32.mrb[7].mxu1 }
 0x162   : > { %v3283_v3 = vpop.f32.mrb[8].mxu0  ;;  %v3285_v4 = vpop.f32.mrb[8].mxu1 }
 0x163   : > { %v2381_v6 = vpop.f32.mrb[9].mxu0  ;;  %v2437_v7 = vpop.f32.mrb[9].mxu1 }
 0x164   : > { %v3289_v8 = vpop.f32.mrb[10].mxu0  ;;  %v3291_v9 = vpop.f32.mrb[10].mxu1 }
 0x165   : > { %v2382_v11 = vpop.f32.mrb[11].mxu0  ;;  %v2438_v12 = vpop.f32.mrb[11].mxu1 }
 0x16a   : > { %v3295_v13 = vpop.f32.mrb[12].mxu0  ;;  %v3297_v14 = vpop.f32.mrb[12].mxu1 }
 0x16b   : > { %v2385_v16 = vpop.f32.mrb[13].mxu0  ;;  %v2441_v17 = vpop.f32.mrb[13].mxu1 }
 0x16c   : > { %v3301_v18 = vpop.f32.mrb[14].mxu0  ;;  %v3303_v19 = vpop.f32.mrb[14].mxu1 }
 0x16d   : > { %v2386_v21 = vpop.f32.mrb[15].mxu0  ;;  %v2442_v22 = vpop.f32.mrb[15].mxu1 }
 0x172   : > { %v3307_v23 = vpop.f32.mrb[16].mxu0  ;;  %v3309_v24 = vpop.f32.mrb[16].mxu1 }
 0x173   : > { %v2389_v26 = vpop.f32.mrb[17].mxu0  ;;  %v2445_v27 = vpop.f32.mrb[17].mxu1 }
 0x174   : > { %v3313_v28 = vpop.f32.mrb[18].mxu0  ;;  %v3315_v29 = vpop.f32.mrb[18].mxu1 }
 0x175   : > { %v2390_v31 = vpop.f32.mrb[19].mxu0  ;;  %v2446_v32 = vpop.f32.mrb[19].mxu1 }
 0x17a   : > { %v3319_v33 = vpop.f32.mrb[20].mxu0  ;;  %v3321_v34 = vpop.f32.mrb[20].mxu1 }
 0x17b   : > { %v2393_v36 = vpop.f32.mrb[21].mxu0  ;;  %v2449_v37 = vpop.f32.mrb[21].mxu1 }
 0x17c   : > { %v3325_v38 = vpop.f32.mrb[22].mxu0  ;;  %v3327_v39 = vpop.f32.mrb[22].mxu1 }
 0x17d   : > { %v2394_v41 = vpop.f32.mrb[23].mxu0  ;;  %v2450_v42 = vpop.f32.mrb[23].mxu1 }
 0x182   : > { %v3331_v43 = vpop.f32.mrb[24].mxu0  ;;  %v3333_v44 = vpop.f32.mrb[24].mxu1 }
 0x183   : > { %v2397_v46 = vpop.f32.mrb[25].mxu0  ;;  %v2453_v50 = vpop.f32.mrb[25].mxu1 }
 0x184   : > { %v3337_v51 = vpop.f32.mrb[26].mxu0  ;;  %v3339_v55 = vpop.f32.mrb[26].mxu1 }
 0x185   : > { %v2398_v60 = vpop.f32.mrb[27].mxu0  ;;  %v2454_v61 = vpop.f32.mrb[27].mxu1 }
 0x18a   : > { %v3343_v1 = vpop.f32.mrb[28].mxu0  ;;  %v3345_v2 = vpop.f32.mrb[28].mxu1 }
 0x18b   : > { %v2401_v7 = vpop.f32.mrb[29].mxu0  ;;  %v2457_v11 = vpop.f32.mrb[29].mxu1 }
 0x18c   : > { %v3349_v12 = vpop.f32.mrb[30].mxu0  ;;  %v3351_v16 = vpop.f32.mrb[30].mxu1 }
 0x18d   : > { %v2402_v21 = vpop.f32.mrb[31].mxu0  ;;  %v2458_v22 = vpop.f32.mrb[31].mxu1 }
 0x192   : > { %v3355_v26 = vpop.f32.mrb[32].mxu0  ;;  %v3357_v27 = vpop.f32.mrb[32].mxu1 }
 0x193   : > { %v2405_v32 = vpop.f32.mrb[33].mxu0  ;;  %v2461_v36 = vpop.f32.mrb[33].mxu1 }
 0x194   : > { %v3361_v37 = vpop.f32.mrb[34].mxu0  ;;  %v3363_v41 = vpop.f32.mrb[34].mxu1 }
 0x195   : > { %v2406_v46 = vpop.f32.mrb[35].mxu0  ;;  %v2462_v50 = vpop.f32.mrb[35].mxu1 }
 0x19a   : > { %v3367_v60 = vpop.f32.mrb[36].mxu0  ;;  %v3369_v61 = vpop.f32.mrb[36].mxu1 }
 0x19b   : > { %v2409_v11 = vpop.f32.mrb[37].mxu0  ;;  %v2465_v21 = vpop.f32.mrb[37].mxu1 }
 0x19c   : > { %v3373_v22 = vpop.f32.mrb[38].mxu0  ;;  %v3375_v32 = vpop.f32.mrb[38].mxu1 }
 0x19d   : > { %v2410_v31 = vpop.f32.mrb[39].mxu0  ;;  %v2466_v42 = vpop.f32.mrb[39].mxu1 }
 0x1a2   : > { %v3379_v46 = vpop.f32.mrb[40].mxu0  ;;  %v3381_v50 = vpop.f32.mrb[40].mxu1 }
 0x1a3   : > { %v2413_v6 = vpop.f32.mrb[41].mxu0  ;;  %v2469_v7 = vpop.f32.mrb[41].mxu1 }
 0x1a4   : > { %v3385_v11 = vpop.f32.mrb[42].mxu0  ;;  %v3387_v21 = vpop.f32.mrb[42].mxu1 }
 0x1a5   : > { %v2414_v45 = vpop.f32.mrb[43].mxu0  ;;  %v2470_v36 = vpop.f32.mrb[43].mxu1 }
 0x1aa   : > { %v3391_v31 = vpop.f32.mrb[44].mxu0  ;;  %v3393_v42 = vpop.f32.mrb[44].mxu1 }
 0x1ab   : > { %v2417_v17 = vpop.f32.mrb[45].mxu0  ;;  %v2473_v6 = vpop.f32.mrb[45].mxu1 }
 0x1ac   : > { %v3397_v7 = vpop.f32.mrb[46].mxu0  ;;  %v3399_v35 = vpop.f32.mrb[46].mxu1 }
 0x1ad   : > { %3593 = vst [vmem:[#allocation9_spill] sm:$0xff] %v3399_v35  ;;  %v2418_v56 = vpop.f32.mrb[47].mxu0  ;;  %v2474_v45 = vpop.f32.mrb[47].mxu1 }
 0x1b2   : > { %v3403_v36 = vpop.f32.mrb[48].mxu0  ;;  %v3405_v25 = vpop.f32.mrb[48].mxu1 }
 0x1b3   : > { %v2421_v15 = vpop.f32.mrb[49].mxu0  ;;  %v2477_v40 = vpop.f32.mrb[49].mxu1 }
 0x1b4   : > { %v923_v17 = vpop.f32.mrb[50].mxu0  ;;  %v1187_v6 = vpop.f32.mrb[50].mxu1  ;;  %v3594_v15 = vmax.f32 %v3259_v47, %v3261_v48 }
 0x1b5   : > { %v2422_v10 = vpop.f32.mrb[51].mxu0  ;;  %v2478_v5 = vpop.f32.mrb[51].mxu1 }
 0x1b6   : > { %v3595_v10 = vmax.f32 %v3265_v53, %v3267_v54 }
 0x1ba   : > { %v1352_v0 = vpop.f32.mrb[52].mxu0  ;;  %v1616_v30 = vpop.f32.mrb[52].mxu1 }
 0x1bb   : > { %v1743_v56 = vmax.f32 %v1352_v0, %v1616_v30  ;;  %v2485_v45 = vpop.f32.mrb[53].mxu0  ;;  %v2541_v59 = vpop.f32.mrb[53].mxu1 }
 0x1bc   : > { %v1355_v49 = vpop.f32.mrb[54].mxu0  ;;  %v1619_v35 = vpop.f32.mrb[54].mxu1 }
 0x1bd   : > { %v1768_v40 = vmax.f32 %v3594_v15, %v1743_v56  ;;  %v1744_v20 = vmax.f32 %v1355_v49, %v1619_v35  ;;  %v2486_v17 = vpop.f32.mrb[55].mxu0  ;;  %v2542_v6 = vpop.f32.mrb[55].mxu1 }
 0x1bf   : > { %v1800_v5 = vadd.f32 %v3411_v52, %v1768_v40  ;;  %v1769_v0 = vmax.f32 %v3595_v10, %v1744_v20  ;;  %v3596_v40 = vmax.f32 %v3271_v57, %v3273_v58 }
 0x1c1   : > { %v1825_v30 = vmax.f32 %v1800_v5, 0.0  ;;  %v1801_v59 = vadd.f32 %v3411_v52, %v1769_v0 }
 0x1c2   : > { %v1360_v47 = vpop.f32.mrb[56].mxu0  ;;  %v1624_v48 = vpop.f32.mrb[56].mxu1 }
 0x1c3   : > { %v2282_v49 = vpack.c.bf16 %v1825_v30, %v1825_v30  ;;  %v1826_v35 = vmax.f32 %v1801_v59, 0.0  ;;  %v1745_v56 = vmax.f32 %v1360_v47, %v1624_v48  ;;  %v2489_v45 = vpop.f32.mrb[57].mxu0  ;;  %v2545_v15 = vpop.f32.mrb[57].mxu1  ;;  %v3597_v30 = vmax.f32 %v3277_v62, %v3279_v63 }
 0x1c4   : > { %v1363_v53 = vpop.f32.mrb[58].mxu0  ;;  %v1627_v54 = vpop.f32.mrb[58].mxu1  ;;  %v3598_v62 = vmax.f32 %v3283_v3, %v3285_v4 }
 0x1c5   : > { %1952 = vst.msk [vmem:[%s3424_s22] sm:$0xf] %vm1951_vm4, %v2282_v49  ;;  %v2283_v20 = vpack.c.bf16 %v1826_v35, %v1826_v35  ;;  %v1770_v17 = vmax.f32 %v3596_v40, %v1745_v56  ;;  %v1746_v6 = vmax.f32 %v1363_v53, %v1627_v54  ;;  %v2490_v5 = vpop.f32.mrb[59].mxu0  ;;  %v2546_v10 = vpop.f32.mrb[59].mxu1 }
 0x1c6   : > { %v3599_v10 = vmax.f32 %v3289_v8, %v3291_v9  ;;  %v3600_v8 = vmax.f32 %v3295_v13, %v3297_v14 }
 0x1c7   : > { %1953 = vst.msk [vmem:[%s3424_s22 + $0x4] sm:$0xf] %vm1951_vm4, %v2283_v20  ;;  %v1802_v0 = vadd.f32 %v3411_v52, %v1770_v17  ;;  %v1771_v59 = vmax.f32 %v3597_v30, %v1746_v6 }
 0x1c9   : > { %v1827_v47 = vmax.f32 %v1802_v0, 0.0  ;;  %v1803_v48 = vadd.f32 %v3411_v52, %v1771_v59 }
 0x1ca   : > { %v1368_v49 = vpop.f32.mrb[60].mxu0  ;;  %v1632_v35 = vpop.f32.mrb[60].mxu1 }
 0x1cb   : > { %v2284_v57 = vpack.c.bf16 %v1827_v47, %v1827_v47  ;;  %v1828_v58 = vmax.f32 %v1803_v48, 0.0  ;;  %v1747_v56 = vmax.f32 %v1368_v49, %v1632_v35  ;;  %v2493_v45 = vpop.f32.mrb[61].mxu0  ;;  %v2549_v15 = vpop.f32.mrb[61].mxu1 }
 0x1cc   : > { %v1371_v53 = vpop.f32.mrb[62].mxu0  ;;  %v1635_v54 = vpop.f32.mrb[62].mxu1 }
 0x1cd   : > { %1954 = vst.msk [vmem:[%s3424_s22 + $0x8] sm:$0xf] %vm1951_vm4, %v2284_v57  ;;  %v2285_v20 = vpack.c.bf16 %v1828_v58, %v1828_v58  ;;  %v1772_v63 = vmax.f32 %v3598_v62, %v1747_v56  ;;  %v1748_v40 = vmax.f32 %v1371_v53, %v1635_v54  ;;  %v2494_v17 = vpop.f32.mrb[63].mxu0  ;;  %v2550_v6 = vpop.f32.mrb[63].mxu1  ;;  %v3601_v62 = vmax.f32 %v3301_v18, %v3303_v19 }
 0x1ce   : > { %v3602_v18 = vmax.f32 %v3307_v23, %v3309_v24 }
 0x1cf   : > { %1955 = vst.msk [vmem:[%s3424_s22 + $0xc] sm:$0xf] %vm1951_vm4, %v2285_v20  ;;  %v1804_v5 = vadd.f32 %v3411_v52, %v1772_v63  ;;  %v1773_v0 = vmax.f32 %v3599_v10, %v1748_v40 }
 0x1d1   : > { %v1829_v30 = vmax.f32 %v1804_v5, 0.0  ;;  %v1805_v59 = vadd.f32 %v3411_v52, %v1773_v0 }
 0x1d2   : > { %v1376_v47 = vpop.f32.mrb[64].mxu0  ;;  %v1640_v48 = vpop.f32.mrb[64].mxu1 }
 0x1d3   : > { %v2286_v3 = vpack.c.bf16 %v1829_v30, %v1829_v30  ;;  %v1830_v4 = vmax.f32 %v1805_v59, 0.0  ;;  %v1749_v49 = vmax.f32 %v1376_v47, %v1640_v48  ;;  %v2497_v35 = vpop.f32.mrb[65].mxu0  ;;  %v2553_v57 = vpop.f32.mrb[65].mxu1 }
 0x1d4   : > { %v1379_v58 = vpop.f32.mrb[66].mxu0  ;;  %v1643_v56 = vpop.f32.mrb[66].mxu1  ;;  %v3603_v57 = vmax.f32 %v3313_v28, %v3315_v29  ;;  %v3604_v28 = vmax.f32 %v3319_v33, %v3321_v34 }
 0x1d5   : > { %1956 = vst.msk [vmem:[%s3424_s22 + $0x10] sm:$0xf] %vm1951_vm4, %v2286_v3  ;;  %v2287_v45 = vpack.c.bf16 %v1830_v4, %v1830_v4  ;;  %v1774_v9 = vmax.f32 %v3600_v8, %v1749_v49  ;;  %v1750_v15 = vmax.f32 %v1379_v58, %v1643_v56  ;;  %v2498_v53 = vpop.f32.mrb[67].mxu0  ;;  %v2554_v54 = vpop.f32.mrb[67].mxu1 }
 0x1d7   : > { %1957 = vst.msk [vmem:[%s3424_s22 + $0x14] sm:$0xf] %vm1951_vm4, %v2287_v45  ;;  %v1806_v20 = vadd.f32 %v3411_v52, %v1774_v9  ;;  %v1775_v63 = vmax.f32 %v3601_v62, %v1750_v15 }
 0x1d9   : > { %v1831_v40 = vmax.f32 %v1806_v20, 0.0  ;;  %v1807_v17 = vadd.f32 %v3411_v52, %v1775_v63 }
 0x1da   : > { %v1384_v6 = vpop.f32.mrb[68].mxu0  ;;  %v1648_v5 = vpop.f32.mrb[68].mxu1 }
 0x1db   : > { %v2288_v13 = vpack.c.bf16 %v1831_v40, %v1831_v40  ;;  %v1832_v14 = vmax.f32 %v1807_v17, 0.0  ;;  %v1751_v10 = vmax.f32 %v1384_v6, %v1648_v5  ;;  %v2501_v0 = vpop.f32.mrb[69].mxu0  ;;  %v2557_v30 = vpop.f32.mrb[69].mxu1 }
 0x1dc   : > { %v1387_v59 = vpop.f32.mrb[70].mxu0  ;;  %v1651_v47 = vpop.f32.mrb[70].mxu1 }
 0x1dd   : > { %1958 = vst.msk [vmem:[%s3424_s22 + $0x18] sm:$0xf] %vm1951_vm4, %v2288_v13  ;;  %v2289_v48 = vpack.c.bf16 %v1832_v14, %v1832_v14  ;;  %v1776_v19 = vmax.f32 %v3602_v18, %v1751_v10  ;;  %v1752_v3 = vmax.f32 %v1387_v59, %v1651_v47  ;;  %v2502_v4 = vpop.f32.mrb[71].mxu0  ;;  %v2558_v49 = vpop.f32.mrb[71].mxu1  ;;  %v3605_v13 = vmax.f32 %v3325_v38, %v3327_v39 }
 0x1de   : > { %v3606_v38 = vmax.f32 %v3331_v43, %v3333_v44 }
 0x1df   : > { %1959 = vst.msk [vmem:[%s3424_s22 + $0x1c] sm:$0xf] %vm1951_vm4, %v2289_v48  ;;  %v1808_v35 = vadd.f32 %v3411_v52, %v1776_v19  ;;  %v1777_v58 = vmax.f32 %v3603_v57, %v1752_v3 }
 0x1e1   : > { %v1833_v56 = vmax.f32 %v1808_v35, 0.0  ;;  %v1809_v45 = vadd.f32 %v3411_v52, %v1777_v58 }
 0x1e2   : > { %v1392_v8 = vpop.f32.mrb[72].mxu0  ;;  %v1656_v9 = vpop.f32.mrb[72].mxu1 }
 0x1e3   : > { %v2290_v23 = vpack.c.bf16 %v1833_v56, %v1833_v56  ;;  %v1834_v24 = vmax.f32 %v1809_v45, 0.0  ;;  %v1753_v15 = vmax.f32 %v1392_v8, %v1656_v9  ;;  %v2505_v53 = vpop.f32.mrb[73].mxu0  ;;  %v2561_v54 = vpop.f32.mrb[73].mxu1  ;;  %v3607_v56 = vmax.f32 %v3337_v51, %v3339_v55 }
 0x1e4   : > { %v1395_v20 = vpop.f32.mrb[74].mxu0  ;;  %v1659_v62 = vpop.f32.mrb[74].mxu1  ;;  %v3608_v51 = vmax.f32 %v3343_v1, %v3345_v2 }
 0x1e5   : > { %1960 = vst.msk [vmem:[%s3424_s22 + $0x20] sm:$0xf] %vm1951_vm4, %v2290_v23  ;;  %v2291_v63 = vpack.c.bf16 %v1834_v24, %v1834_v24  ;;  %v1778_v29 = vmax.f32 %v3604_v28, %v1753_v15  ;;  %v1754_v40 = vmax.f32 %v1395_v20, %v1659_v62  ;;  %v2506_v17 = vpop.f32.mrb[75].mxu0  ;;  %v2562_v6 = vpop.f32.mrb[75].mxu1 }
 0x1e6   : > { %v3609_v6 = vmax.f32 %v3349_v12, %v3351_v16  ;;  %v3610_v12 = vmax.f32 %v3355_v26, %v3357_v27 }
 0x1e7   : > { %1961 = vst.msk [vmem:[%s3424_s22 + $0x24] sm:$0xf] %vm1951_vm4, %v2291_v63  ;;  %v1810_v5 = vadd.f32 %v3411_v52, %v1778_v29  ;;  %v1779_v14 = vmax.f32 %v3605_v13, %v1754_v40 }
 0x1e9   : > { %v1835_v10 = vmax.f32 %v1810_v5, 0.0  ;;  %v1811_v0 = vadd.f32 %v3411_v52, %v1779_v14 }
 0x1ea   : > { %v1400_v30 = vpop.f32.mrb[76].mxu0  ;;  %v1664_v59 = vpop.f32.mrb[76].mxu1 }
 0x1eb   : > { %v2292_v33 = vpack.c.bf16 %v1835_v10, %v1835_v10  ;;  %v1836_v34 = vmax.f32 %v1811_v0, 0.0  ;;  %v1755_v47 = vmax.f32 %v1400_v30, %v1664_v59  ;;  %v2509_v48 = vpop.f32.mrb[77].mxu0  ;;  %v2565_v18 = vpop.f32.mrb[77].mxu1 }
 0x1ec   : > { %v1403_v19 = vpop.f32.mrb[78].mxu0  ;;  %v1667_v3 = vpop.f32.mrb[78].mxu1 }
 0x1ed   : > { %1962 = vst.msk [vmem:[%s3424_s22 + $0x28] sm:$0xf] %vm1951_vm4, %v2292_v33  ;;  %v2293_v4 = vpack.c.bf16 %v1836_v34, %v1836_v34  ;;  %v1780_v39 = vmax.f32 %v3606_v38, %v1755_v47  ;;  %v1756_v49 = vmax.f32 %v1403_v19, %v1667_v3  ;;  %v2510_v35 = vpop.f32.mrb[79].mxu0  ;;  %v2566_v57 = vpop.f32.mrb[79].mxu1  ;;  %v3611_v38 = vmax.f32 %v3361_v37, %v3363_v41 }
 0x1ee   : > { %v3612_v37 = vmax.f32 %v3367_v60, %v3369_v61 }
 0x1ef   : > { %1963 = vst.msk [vmem:[%s3424_s22 + $0x2c] sm:$0xf] %vm1951_vm4, %v2293_v4  ;;  %v1812_v58 = vadd.f32 %v3411_v52, %v1780_v39  ;;  %v1781_v45 = vmax.f32 %v3607_v56, %v1756_v49 }
 0x1f1   : > { %v1837_v8 = vmax.f32 %v1812_v58, 0.0  ;;  %v1813_v9 = vadd.f32 %v3411_v52, %v1781_v45 }
 0x1f2   : > { %v1408_v23 = vpop.f32.mrb[80].mxu0  ;;  %v1672_v24 = vpop.f32.mrb[80].mxu1 }
 0x1f3   : > { %v2294_v43 = vpack.c.bf16 %v1837_v8, %v1837_v8  ;;  %v1838_v44 = vmax.f32 %v1813_v9, 0.0  ;;  %v1757_v15 = vmax.f32 %v1408_v23, %v1672_v24  ;;  %v2513_v53 = vpop.f32.mrb[81].mxu0  ;;  %v2569_v54 = vpop.f32.mrb[81].mxu1 }
 0x1f4   : > { %v1411_v20 = vpop.f32.mrb[82].mxu0  ;;  %v1675_v62 = vpop.f32.mrb[82].mxu1  ;;  %v3613_v54 = vmax.f32 %v3373_v22, %v3375_v32  ;;  %v3614_v22 = vmax.f32 %v3379_v46, %v3381_v50 }
 0x1f5   : > { %1964 = vst.msk [vmem:[%s3424_s22 + $0x30] sm:$0xf] %vm1951_vm4, %v2294_v43  ;;  %v2295_v63 = vpack.c.bf16 %v1838_v44, %v1838_v44  ;;  %v1782_v55 = vmax.f32 %v3608_v51, %v1757_v15  ;;  %v1758_v28 = vmax.f32 %v1411_v20, %v1675_v62  ;;  %v2514_v29 = vpop.f32.mrb[83].mxu0  ;;  %v2570_v40 = vpop.f32.mrb[83].mxu1 }
 0x1f7   : > { %1965 = vst.msk [vmem:[%s3424_s22 + $0x34] sm:$0xf] %vm1951_vm4, %v2295_v63  ;;  %v1814_v17 = vadd.f32 %v3411_v52, %v1782_v55  ;;  %v1783_v5 = vmax.f32 %v3609_v6, %v1758_v28 }
 0x1f9   : > { %v1839_v13 = vmax.f32 %v1814_v17, 0.0  ;;  %v1815_v14 = vadd.f32 %v3411_v52, %v1783_v5 }
 0x1fa   : > { %v1416_v10 = vpop.f32.mrb[84].mxu0  ;;  %v1680_v0 = vpop.f32.mrb[84].mxu1 }
 0x1fb   : > { %v2296_v1 = vpack.c.bf16 %v1839_v13, %v1839_v13  ;;  %v1840_v2 = vmax.f32 %v1815_v14, 0.0  ;;  %v1759_v30 = vmax.f32 %v1416_v10, %v1680_v0  ;;  %v2517_v59 = vpop.f32.mrb[85].mxu0  ;;  %v2573_v33 = vpop.f32.mrb[85].mxu1 }
 0x1fc   : > { %v1419_v34 = vpop.f32.mrb[86].mxu0  ;;  %v1683_v47 = vpop.f32.mrb[86].mxu1 }
 0x1fd   : > { %1966 = vst.msk [vmem:[%s3424_s22 + $0x38] sm:$0xf] %vm1951_vm4, %v2296_v1  ;;  %v2297_v48 = vpack.c.bf16 %v1840_v2, %v1840_v2  ;;  %v1784_v16 = vmax.f32 %v3610_v12, %v1759_v30  ;;  %v1760_v18 = vmax.f32 %v1419_v34, %v1683_v47  ;;  %v2518_v19 = vpop.f32.mrb[87].mxu0  ;;  %v2574_v3 = vpop.f32.mrb[87].mxu1  ;;  %v3615_v1 = vmax.f32 %v3385_v11, %v3387_v21 }
 0x1fe   : > { %v3616_v11 = vmax.f32 %v3391_v31, %v3393_v42 }
 0x1ff   : > { %1967 = vst.msk [vmem:[%s3424_s22 + $0x3c] sm:$0xf] %vm1951_vm4, %v2297_v48  ;;  %v1816_v4 = vadd.f32 %v3411_v52, %v1784_v16  ;;  %v1785_v39 = vmax.f32 %v3611_v38, %v1760_v18 }
 0x201   : > { %v1841_v49 = vmax.f32 %v1816_v4, 0.0  ;;  %v1817_v35 = vadd.f32 %v3411_v52, %v1785_v39 }
 0x202   : > { %v1424_v57 = vpop.f32.mrb[88].mxu0  ;;  %v1688_v58 = vpop.f32.mrb[88].mxu1 }
 0x203   : > { %v2298_v26 = vpack.c.bf16 %v1841_v49, %v1841_v49  ;;  %v1842_v27 = vmax.f32 %v1817_v35, 0.0  ;;  %v1761_v56 = vmax.f32 %v1424_v57, %v1688_v58  ;;  %v2521_v45 = vpop.f32.mrb[89].mxu0  ;;  %v2577_v8 = vpop.f32.mrb[89].mxu1  ;;  %v3617_v49 = vld [vmem:[#allocation9_spill] sm:$0xff] }
 0x204   : > { %v1427_v9 = vpop.f32.mrb[90].mxu0  ;;  %v1691_v23 = vpop.f32.mrb[90].mxu1  ;;  %v3618_v35 = vmax.f32 %v3397_v7, %v3617_v49  ;;  %v3619_v7 = vmax.f32 %v3403_v36, %v3405_v25 }
 0x205   : > { %1968 = vst.msk [vmem:[%s3424_s22 + $0x40] sm:$0xf] %vm1951_vm4, %v2298_v26  ;;  %v2299_v24 = vpack.c.bf16 %v1842_v27, %v1842_v27  ;;  %v1786_v41 = vmax.f32 %v3612_v37, %v1761_v56  ;;  %v1762_v43 = vmax.f32 %v1427_v9, %v1691_v23  ;;  %v2522_v44 = vpop.f32.mrb[91].mxu0  ;;  %v2578_v15 = vpop.f32.mrb[91].mxu1 }
 0x207   : > { %1969 = vst.msk [vmem:[%s3424_s22 + $0x44] sm:$0xf] %vm1951_vm4, %v2299_v24  ;;  %v1818_v53 = vadd.f32 %v3411_v52, %v1786_v41  ;;  %v1787_v20 = vmax.f32 %v3613_v54, %v1762_v43 }
 0x209   : > { %v1843_v62 = vmax.f32 %v1818_v53, 0.0  ;;  %v1819_v63 = vadd.f32 %v3411_v52, %v1787_v20 }
 0x20a   : > { %v1432_v51 = vpop.f32.mrb[92].mxu0  ;;  %v1696_v55 = vpop.f32.mrb[92].mxu1 }
 0x20b   : > { %v2300_v60 = vpack.c.bf16 %v1843_v62, %v1843_v62  ;;  %v1844_v61 = vmax.f32 %v1819_v63, 0.0  ;;  %v1763_v28 = vmax.f32 %v1432_v51, %v1696_v55  ;;  %v2525_v29 = vpop.f32.mrb[93].mxu0  ;;  %v2581_v40 = vpop.f32.mrb[93].mxu1 }
 0x20c   : > { %v1435_v17 = vpop.f32.mrb[94].mxu0  ;;  %v1699_v6 = vpop.f32.mrb[94].mxu1 }
 0x20d   : > { %1970 = vst.msk [vmem:[%s3424_s22 + $0x48] sm:$0xf] %vm1951_vm4, %v2300_v60  ;;  %v2301_v5 = vpack.c.bf16 %v1844_v61, %v1844_v61  ;;  %v1788_v32 = vmax.f32 %v3614_v22, %v1763_v28  ;;  %v1764_v13 = vmax.f32 %v1435_v17, %v1699_v6  ;;  %v2526_v14 = vpop.f32.mrb[95].mxu0  ;;  %v2582_v10 = vpop.f32.mrb[95].mxu1 }
 0x20f   : > { %1971 = vst.msk [vmem:[%s3424_s22 + $0x4c] sm:$0xf] %vm1951_vm4, %v2301_v5  ;;  %v1820_v0 = vadd.f32 %v3411_v52, %v1788_v32  ;;  %v1789_v2 = vmax.f32 %v3615_v1, %v1764_v13 }
 0x211   : > { %v1845_v30 = vmax.f32 %v1820_v0, 0.0  ;;  %v1821_v59 = vadd.f32 %v3411_v52, %v1789_v2 }
 0x212   : > { %v1440_v33 = vpop.f32.mrb[96].mxu0  ;;  %v1704_v34 = vpop.f32.mrb[96].mxu1 }
 0x213   : > { %v2302_v46 = vpack.c.bf16 %v1845_v30, %v1845_v30  ;;  %v1846_v50 = vmax.f32 %v1821_v59, 0.0  ;;  %v1765_v47 = vmax.f32 %v1440_v33, %v1704_v34  ;;  %v2529_v48 = vpop.f32.mrb[97].mxu0  ;;  %v2585_v12 = vpop.f32.mrb[97].mxu1 }
 0x214   : > { %v1443_v16 = vpop.f32.mrb[98].mxu0  ;;  %v1707_v18 = vpop.f32.mrb[98].mxu1 }
 0x215   : > { %1972 = vst.msk [vmem:[%s3424_s22 + $0x50] sm:$0xf] %vm1951_vm4, %v2302_v46  ;;  %v2303_v19 = vpack.c.bf16 %v1846_v50, %v1846_v50  ;;  %v1790_v21 = vmax.f32 %v3616_v11, %v1765_v47  ;;  %v1766_v3 = vmax.f32 %v1443_v16, %v1707_v18  ;;  %v2530_v4 = vpop.f32.mrb[99].mxu0  ;;  %v2586_v38 = vpop.f32.mrb[99].mxu1 }
 0x217   : > { %1973 = vst.msk [vmem:[%s3424_s22 + $0x54] sm:$0xf] %vm1951_vm4, %v2303_v19  ;;  %v1822_v39 = vadd.f32 %v3411_v52, %v1790_v21  ;;  %v1791_v57 = vmax.f32 %v3618_v35, %v1766_v3 }
 0x219   : > { %v1847_v58 = vmax.f32 %v1822_v39, 0.0  ;;  %v1823_v26 = vadd.f32 %v3411_v52, %v1791_v57 }
 0x21a   : > { %v1448_v27 = vpop.f32.mrb[100].mxu0  ;;  %v1712_v56 = vpop.f32.mrb[100].mxu1 }
 0x21b   : > { %v2304_v31 = vpack.c.bf16 %v1847_v58, %v1847_v58  ;;  %v1848_v42 = vmax.f32 %v1823_v26, 0.0  ;;  %v1767_v45 = vmax.f32 %v1448_v27, %v1712_v56  ;;  %v2533_v8 = vpop.f32.mrb[101].mxu0  ;;  %v2589_v9 = vpop.f32.mrb[101].mxu1 }
 0x21c   : > { %v1451_v23 = vpop.f32.mrb[102].mxu0  ;;  %v1715_v24 = vpop.f32.mrb[102].mxu1 }
 0x21d   : > { %1974 = vst.msk [vmem:[%s3424_s22 + $0x58] sm:$0xf] %vm1951_vm4, %v2304_v31  ;;  %v2305_v37 = vpack.c.bf16 %v1848_v42, %v1848_v42  ;;  %v1792_v41 = vmax.f32 %v3619_v7, %v1767_v45  ;;  %v2534_v43 = vpop.f32.mrb[103].mxu0  ;;  %v2590_v44 = vpop.f32.mrb[103].mxu1 }
 0x21f   : > { %1975 = vst.msk [vmem:[%s3424_s22 + $0x5c] sm:$0xf] %vm1951_vm4, %v2305_v37  ;;  %v1824_v15 = vadd.f32 %v3411_v52, %v1792_v41 }
 0x221   : > { %v1849_v53 = vmax.f32 %v1824_v15, 0.0 }
 0x223   : > { %v2306_v54 = vpack.c.bf16 %v1849_v53, %v1849_v53 }
 0x225   : > { %1976 = vst.msk [vmem:[%s3424_s22 + $0x60] sm:$0xf] %vm1951_vm4, %v2306_v54 }
 0x226 PF: > { %p12_p7 = scmp.ge.s32.totalorder %s2829_s16, 4   ;;  %s3620_s12 = smov %s2779_s13 }
 0x227   : > { %s3621_s13 = smov %s2839_s19  ;;  %s3622_s14 = smov %s2829_s16 }
 0x228   :  { %14 = sbr.rel (!%p12_p7) target bundleno = 3 (0x3), region = 120 }
 0x22f   :  { %1999 = vsyncpa [#allocation4], 1 }
 0x230   :  { %2001 = vsyncpa [#allocation4 + $0x1], 1 }
 0x231   :  { %2002 = vsyncpa [#allocation6], 1 }

// kernel: forward.4
= control target key start
LH: loop header
LB: loop body
LE: loop exit
PB: predicated region body
PF: predicated region fallthrough
CT: control target
= control target key end

     0   :  { %s2029_s12 = smov 0   ;;  %s2031_s13 = smov 0   ;;  %s2532_s0 = inlined_call_operand.vmem [shape: bf16[4,112,288], index: 0, kind: input, shape index: {}]   ;;  %s2533_s1 = inlined_call_operand.vmem [shape: bf16[288,64], index: 1, kind: input, shape index: {}]   ;;  %s2534_s2 = inlined_call_operand.vmem [shape: f32[1,64], index: 2, kind: input, shape index: {}]   ;;  %s2535_s3 = inlined_call_operand.vmem [shape: bf16[112,64], index: 3, kind: output, shape index: {}]  }
   0x1   :  { %s2033_s14 = smov 0  }
   0x2 LB: > { %s1443_s15 = sadd.s32 4294967295, %s2007_s14   ;;  %s2046_s16 = sadd.s32 1, %s2007_s14   ;;  %s2007_s14 = sphi %s2033_s14, %s2538_s14   ;;  %s2003_s13 = sphi %s2031_s13, %s2537_s13   ;;  %s1999_s12 = sphi %s2029_s12, %s2536_s12  }
   0x3   : > { %s17_s17 = ssub.s32 %s2007_s14, %s2046_s16  ;;  %s20_s18 = sadd.s32 1, %s2003_s13 }
   0x4   : > { %p18_p0 = scmp.eq.s32.totalorder %s17_s17, 0  ;;  %p27_p1 = scmp.ne.s32.totalorder %s2003_s13, %s1999_s12 }
   0x5   : > { %p28_p2 = scmp.eq.s32.totalorder %s2007_s14, 0  ;;  %p1446_p4 = scmp.ge.s32.totalorder %s2007_s14, 2 }
   0x6   : > { %s2055_s19 = scalar_select %p18_p0, %s2003_s13, %s20_s18  }
   0x7   : > { %p29_p3 = por %p28_p2, %p27_p1  ;;  %127 = sbr.rel (%p1446_p4) target bundleno = 52 (0x34), region = 24 }
   0xe   : > { %130 = sbr.rel (!%p29_p3) target bundleno = 52 (0x34), region = 28  ;;  %s132_s20 = sand.u32 (%p29_p3), 1, %s2003_s13  }
   0xf   : > { %s1879_s21 = smul.u32 (%p29_p3), 336, %s132_s20 }
  0x10   : > { %s1882_s22 = smul.u32 (%p29_p3), 84, %s2007_s14 }
  0x11   : > { %s2068_s26 = scalar_lea.vmem (%p29_p3), [#allocation2], %s1879_s21 }
  0x12   : > { %s2063_s25 = scalar_lea.vmem (%p29_p3), %s2532_s0, %s1882_s22 }
  0x13   : > { %v153_v0 = vld [vmem:[%s2063_s25] sm:$0xff] (%p29_p3)  ;;  %v155_v1 = vld [vmem:[%s2063_s25 + $0xc] sm:$0xff] (%p29_p3)  ;;  %v157_v2 = vld [vmem:[%s2063_s25 + $0x18] sm:$0xff] (%p29_p3) }
  0x14   : > { %154 = vst [vmem:[%s2068_s26] sm:$0xff] (%p29_p3), %v153_v0  ;;  %156 = vst [vmem:[%s2068_s26 + $0xc] sm:$0xff] (%p29_p3), %v155_v1  ;;  %v159_v3 = vld [vmem:[%s2063_s25 + $0x24] sm:$0xff] (%p29_p3)  ;;  %v161_v4 = vld [vmem:[%s2063_s25 + $0x30] sm:$0xff] (%p29_p3) }
  0x15   : > { %158 = vst [vmem:[%s2068_s26 + $0x18] sm:$0xff] %v157_v2  ;;  %v163_v5 = vld [vmem:[%s2063_s25 + $0x3c] sm:$0xff]  ;;  %160 = vst [vmem:[%s2068_s26 + $0x24] sm:$0xff] %v159_v3  ;;  %v165_v6 = vld [vmem:[%s2063_s25 + $0x48] sm:$0xff] }
  0x16   : > { %162 = vst [vmem:[%s2068_s26 + $0x30] sm:$0xff] %v161_v4  ;;  %164 = vst [vmem:[%s2068_s26 + $0x3c] sm:$0xff] %v163_v5  ;;  %v167_v7 = vld [vmem:[%s2063_s25 + $0xa8] sm:$0xff]  ;;  %v169_v8 = vld [vmem:[%s2063_s25 + $0xb4] sm:$0xff] }
  0x17   : > { %166 = vst [vmem:[%s2068_s26 + $0x48] sm:$0xff] %v165_v6  ;;  %168 = vst [vmem:[%s2068_s26 + $0x54] sm:$0xff] %v167_v7  ;;  %v171_v9 = vld [vmem:[%s2063_s25 + $0xc0] sm:$0xff]  ;;  %v173_v10 = vld [vmem:[%s2063_s25 + $0xcc] sm:$0xff] }
  0x18   : > { %170 = vst [vmem:[%s2068_s26 + $0x60] sm:$0xff] %v169_v8  ;;  %v175_v11 = vld [vmem:[%s2063_s25 + $0xd8] sm:$0xff]  ;;  %172 = vst [vmem:[%s2068_s26 + $0x6c] sm:$0xff] %v171_v9  ;;  %v177_v12 = vld [vmem:[%s2063_s25 + $0xe4] sm:$0xff] }
  0x19   : > { %174 = vst [vmem:[%s2068_s26 + $0x78] sm:$0xff] %v173_v10  ;;  %176 = vst [vmem:[%s2068_s26 + $0x84] sm:$0xff] %v175_v11  ;;  %v179_v13 = vld [vmem:[%s2063_s25 + $0xf0] sm:$0xff]  ;;  %v183_v15 = vld [vmem:[%s2063_s25 + $0x15c] sm:$0xff] }
  0x1a   : > { %v181_v14 = vld [vmem:[%s2063_s25 + $0x150] sm:$0xff]  ;;  %178 = vst [vmem:[%s2068_s26 + $0x90] sm:$0xff] %v177_v12  ;;  %180 = vst [vmem:[%s2068_s26 + $0x9c] sm:$0xff] %v179_v13  ;;  %v185_v16 = vld [vmem:[%s2063_s25 + $0x168] sm:$0xff] }
  0x1b   : > { %182 = vst [vmem:[%s2068_s26 + $0xa8] sm:$0xff] %v181_v14  ;;  %v187_v17 = vld [vmem:[%s2063_s25 + $0x174] sm:$0xff]  ;;  %184 = vst [vmem:[%s2068_s26 + $0xb4] sm:$0xff] %v183_v15  ;;  %v189_v18 = vld [vmem:[%s2063_s25 + $0x180] sm:$0xff] }
  0x1c   : > { %186 = vst [vmem:[%s2068_s26 + $0xc0] sm:$0xff] %v185_v16  ;;  %188 = vst [vmem:[%s2068_s26 + $0xcc] sm:$0xff] %v187_v17  ;;  %v191_v19 = vld [vmem:[%s2063_s25 + $0x18c] sm:$0xff]  ;;  %v193_v20 = vld [vmem:[%s2063_s25 + $0x198] sm:$0xff] }
  0x1d   : > { %190 = vst [vmem:[%s2068_s26 + $0xd8] sm:$0xff] %v189_v18  ;;  %192 = vst [vmem:[%s2068_s26 + $0xe4] sm:$0xff] %v191_v19  ;;  %v195_v21 = vld [vmem:[%s2063_s25 + $0x1f8] sm:$0xff]  ;;  %v197_v22 = vld [vmem:[%s2063_s25 + $0x204] sm:$0xff] }
  0x1e   : > { %194 = vst [vmem:[%s2068_s26 + $0xf0] sm:$0xff] %v193_v20  ;;  %v199_v23 = vld [vmem:[%s2063_s25 + $0x210] sm:$0xff]  ;;  %196 = vst [vmem:[%s2068_s26 + $0xfc] sm:$0xff] %v195_v21  ;;  %v201_v24 = vld [vmem:[%s2063_s25 + $0x21c] sm:$0xff] }
  0x1f   : > { %198 = vst [vmem:[%s2068_s26 + $0x108] sm:$0xff] %v197_v22  ;;  %200 = vst [vmem:[%s2068_s26 + $0x114] sm:$0xff] %v199_v23  ;;  %v203_v25 = vld [vmem:[%s2063_s25 + $0x228] sm:$0xff]  ;;  %v205_v26 = vld [vmem:[%s2063_s25 + $0x234] sm:$0xff] }
  0x20   : > { %202 = vst [vmem:[%s2068_s26 + $0x120] sm:$0xff] %v201_v24  ;;  %204 = vst [vmem:[%s2068_s26 + $0x12c] sm:$0xff] %v203_v25  ;;  %v207_v27 = vld [vmem:[%s2063_s25 + $0x240] sm:$0xff]  ;;  %v1448_v28 = vld [vmem:[%s2063_s25 + $0x8] sm:$0xf] }
  0x21   : > { %206 = vst [vmem:[%s2068_s26 + $0x138] sm:$0xff] %v205_v26  ;;  %v1450_v29 = vld [vmem:[%s2063_s25 + $0x14] sm:$0xf]  ;;  %208 = vst [vmem:[%s2068_s26 + $0x144] sm:$0xff] %v207_v27  ;;  %v1452_v30 = vld [vmem:[%s2063_s25 + $0x20] sm:$0xf] }
  0x22   : > { %1449 = vst [vmem:[%s2068_s26 + $0x8] sm:$0xf] %v1448_v28  ;;  %1451 = vst [vmem:[%s2068_s26 + $0x14] sm:$0xf] %v1450_v29  ;;  %v1454_v31 = vld [vmem:[%s2063_s25 + $0x2c] sm:$0xf] }
  0x23   : > { %v1456_v32 = vld [vmem:[%s2063_s25 + $0x38] sm:$0xf]  ;;  %1453 = vst [vmem:[%s2068_s26 + $0x20] sm:$0xf] %v1452_v30  ;;  %1455 = vst [vmem:[%s2068_s26 + $0x2c] sm:$0xf] %v1454_v31 }
  0x24   : > { %1457 = vst [vmem:[%s2068_s26 + $0x38] sm:$0xf] %v1456_v32  ;;  %v1458_v33 = vld [vmem:[%s2063_s25 + $0x44] sm:$0xf]  ;;  %v1460_v34 = vld [vmem:[%s2063_s25 + $0x50] sm:$0xf] }
  0x25   : > { %v1462_v35 = vld [vmem:[%s2063_s25 + $0xb0] sm:$0xf]  ;;  %1459 = vst [vmem:[%s2068_s26 + $0x44] sm:$0xf] %v1458_v33  ;;  %1461 = vst [vmem:[%s2068_s26 + $0x50] sm:$0xf] %v1460_v34 }
  0x26   : > { %1463 = vst [vmem:[%s2068_s26 + $0x5c] sm:$0xf] %v1462_v35  ;;  %v1464_v36 = vld [vmem:[%s2063_s25 + $0xbc] sm:$0xf]  ;;  %v1466_v37 = vld [vmem:[%s2063_s25 + $0xc8] sm:$0xf] }
  0x27   : > { %v1468_v38 = vld [vmem:[%s2063_s25 + $0xd4] sm:$0xf]  ;;  %1465 = vst [vmem:[%s2068_s26 + $0x68] sm:$0xf] %v1464_v36  ;;  %1467 = vst [vmem:[%s2068_s26 + $0x74] sm:$0xf] %v1466_v37 }
  0x28   : > { %1469 = vst [vmem:[%s2068_s26 + $0x80] sm:$0xf] %v1468_v38  ;;  %v1470_v39 = vld [vmem:[%s2063_s25 + $0xe0] sm:$0xf]  ;;  %v1472_v40 = vld [vmem:[%s2063_s25 + $0xec] sm:$0xf] }
  0x29   : > { %v1474_v41 = vld [vmem:[%s2063_s25 + $0xf8] sm:$0xf]  ;;  %1471 = vst [vmem:[%s2068_s26 + $0x8c] sm:$0xf] %v1470_v39  ;;  %1473 = vst [vmem:[%s2068_s26 + $0x98] sm:$0xf] %v1472_v40 }
  0x2a   : > { %1475 = vst [vmem:[%s2068_s26 + $0xa4] sm:$0xf] %v1474_v41  ;;  %v1476_v42 = vld [vmem:[%s2063_s25 + $0x158] sm:$0xf]  ;;  %v1478_v43 = vld [vmem:[%s2063_s25 + $0x164] sm:$0xf] }
  0x2b   : > { %v1480_v44 = vld [vmem:[%s2063_s25 + $0x170] sm:$0xf]  ;;  %1477 = vst [vmem:[%s2068_s26 + $0xb0] sm:$0xf] %v1476_v42  ;;  %1479 = vst [vmem:[%s2068_s26 + $0xbc] sm:$0xf] %v1478_v43 }
  0x2c   : > { %1481 = vst [vmem:[%s2068_s26 + $0xc8] sm:$0xf] %v1480_v44  ;;  %v1482_v45 = vld [vmem:[%s2063_s25 + $0x17c] sm:$0xf]  ;;  %v1484_v46 = vld [vmem:[%s2063_s25 + $0x188] sm:$0xf] }
  0x2d   : > { %v1486_v47 = vld [vmem:[%s2063_s25 + $0x194] sm:$0xf]  ;;  %1483 = vst [vmem:[%s2068_s26 + $0xd4] sm:$0xf] %v1482_v45  ;;  %1485 = vst [vmem:[%s2068_s26 + $0xe0] sm:$0xf] %v1484_v46 }
  0x2e   : > { %1487 = vst [vmem:[%s2068_s26 + $0xec] sm:$0xf] %v1486_v47  ;;  %v1488_v48 = vld [vmem:[%s2063_s25 + $0x1a0] sm:$0xf]  ;;  %v1492_v50 = vld [vmem:[%s2063_s25 + $0x20c] sm:$0xf] }
  0x2f   : > { %v1490_v49 = vld [vmem:[%s2063_s25 + $0x200] sm:$0xf]  ;;  %1489 = vst [vmem:[%s2068_s26 + $0xf8] sm:$0xf] %v1488_v48  ;;  %1493 = vst [vmem:[%s2068_s26 + $0x110] sm:$0xf] %v1492_v50 }
  0x30   : > { %1491 = vst [vmem:[%s2068_s26 + $0x104] sm:$0xf] %v1490_v49  ;;  %v1494_v51 = vld [vmem:[%s2063_s25 + $0x218] sm:$0xf]  ;;  %v1496_v52 = vld [vmem:[%s2063_s25 + $0x224] sm:$0xf] }
  0x31   : > { %v1498_v53 = vld [vmem:[%s2063_s25 + $0x230] sm:$0xf]  ;;  %1495 = vst [vmem:[%s2068_s26 + $0x11c] sm:$0xf] %v1494_v51  ;;  %1497 = vst [vmem:[%s2068_s26 + $0x128] sm:$0xf] %v1496_v52 }
  0x32   : > { %1499 = vst [vmem:[%s2068_s26 + $0x134] sm:$0xf] %v1498_v53  ;;  %v1500_v54 = vld [vmem:[%s2063_s25 + $0x23c] sm:$0xf]  ;;  %v1502_v55 = vld [vmem:[%s2063_s25 + $0x248] sm:$0xf] }
  0x33   : > { %1501 = vst [vmem:[%s2068_s26 + $0x140] sm:$0xf] %v1500_v54  ;;  %1503 = vst [vmem:[%s2068_s26 + $0x14c] sm:$0xf] %v1502_v55 }
  0x34 PF: > { %p1504_p5 = scmp.ge.s32.totalorder %s2007_s14, 1  ;;  %p276_p6 = scmp.lt.s32.totalorder %s2007_s14, 3 }
  0x36   : > { %p277_p7 = pnand %p1504_p5, %p276_p6 }
  0x37   : > { %v2184_v56 = vld [vmem:[%s2533_s1 + $0x40] sm:$0xff] (!%p277_p7)   ;;  %v2196_v58 = vld [vmem:[%s2533_s1 + $0x48] sm:$0xff] (!%p277_p7)   ;;  %v2210_v60 = vld [vmem:[%s2533_s1 + $0x50] sm:$0xff] (!%p277_p7)   ;;  %s283_s17 = sand.u32 (!%p277_p7), 1, %s1999_s12   ;;  %vm527_vm0 = vcmask (!%p277_p7), 261120   ;;  %s307_s23 = smul.u32 (!%p277_p7), 7, %s1443_s15 }
  0x38   : > { %280 = sbr.rel (%p277_p7) target bundleno = 405 (0x195), region = 54  ;;  %v2189_v57 = vld [vmem:[%s2533_s1] sm:$0xff] (!%p277_p7)   ;;  %1647 = vmatprep.subr.bf16.mxu0 (!%p277_p7), %v2184_v56  ;;  %1693 = vmatprep.subr.bf16.mxu1 (!%p277_p7), %v2184_v56  ;;  %v2203_v59 = vld [vmem:[%s2533_s1 + $0x8] sm:$0xff] (!%p277_p7)   ;;  %v2217_v61 = vld [vmem:[%s2533_s1 + $0x10] sm:$0xff] (!%p277_p7)   ;;  %vm1369_vm1 = vcmask (!%p277_p7), 519168  }
  0x39   : > { %1648 = vmatpush3.bf16.msra.mxu0 (!%p277_p7), %v2189_v57  ;;  %1694 = vmatpush3.bf16.msra.mxu1 (!%p277_p7), %v2189_v57  ;;  %v2225_v62 = vld [vmem:[%s2533_s1 + $0x58] sm:$0xff] (!%p277_p7)   ;;  %s1881_s21 = smul.u32 (!%p277_p7), 336, %s283_s17  ;;  %v2239_v0 = vld [vmem:[%s2533_s1 + $0x60] sm:$0xff] (!%p277_p7)   ;;  %v2253_v2 = vld [vmem:[%s2533_s1 + $0x68] sm:$0xff] (!%p277_p7)   ;;  %p308_p8 = scmp.lt.s32.totalorder (!%p277_p7), %s307_s23, 13 }
  0x3a   : > { %1649 = vmatprep.subr.bf16.mxu0 (!%p277_p7), %v2196_v58  ;;  %1695 = vmatprep.subr.bf16.mxu1 (!%p277_p7), %v2196_v58  ;;  %v2232_v63 = vld [vmem:[%s2533_s1 + $0x18] sm:$0xff] (!%p277_p7)   ;;  %v2246_v1 = vld [vmem:[%s2533_s1 + $0x20] sm:$0xff] (!%p277_p7)   ;;  %v2264_v5 = vld [vmem:[%s2533_s1 + $0x28] sm:$0xff] (!%p277_p7)  }
  0x3b   : > { %s2255_s29 = scalar_lea.vmem (!%p277_p7), [#allocation2], %s1881_s21  ;;  %v2271_v6 = vld [vmem:[%s2533_s1 + $0x70] sm:$0xff] (!%p277_p7)   ;;  %v2285_v8 = vld [vmem:[%s2533_s1 + $0x78] sm:$0xff] (!%p277_p7)   ;;  %v2299_v10 = vld [vmem:[%s2533_s1 + $0x80] sm:$0xff] (!%p277_p7)  }
  0x3c   : > { %v1925_v3 = vld [vmem:[%s2255_s29 + $0x4] ss:$12 sps:$4 sm:$0xff] (!%p277_p7)   ;;  %v2292_v9 = vld [vmem:[%s2533_s1 + $0x38] sm:$0xff] (!%p277_p7)   ;;  %v1926_v12 = vld [vmem:[%s2255_s29 + $0x54] ss:$12 sps:$4 sm:$0xff] (!%p277_p7)  }
  0x3d   : > { %1650 = vmatpush3.bf16.msra.mxu0 (!%p277_p7), %v2203_v59  ;;  %1696 = vmatpush3.bf16.msra.mxu1 (!%p277_p7), %v2203_v59  ;;  %v1928_v4 = vld [vmem:[%s2255_s29 + $0x58] ss:$12 sps:$4 sm:$0xff] (!%p277_p7)   ;;  %v1923_v11 = vld [vmem:[%s2255_s29] ss:$12 sps:$4 sm:$0xff] (!%p277_p7)   ;;  %v1930_v13 = vld [vmem:[%s2255_s29 + $0x1c] ss:$12 sps:$4 sm:$0xff] (!%p277_p7)  }
  0x3e   : > { %1651 = vmatprep.subr.bf16.mxu0 (!%p277_p7), %v2210_v60  ;;  %1697 = vmatprep.subr.bf16.mxu1 (!%p277_p7), %v2210_v60  ;;  %v2278_v7 = vld [vmem:[%s2533_s1 + $0x30] sm:$0xff] (!%p277_p7)   ;;  %v2312_v15 = vld [vmem:[%s2533_s1 + $0x88] sm:$0xff] (!%p277_p7)  }
  0x3f   : > { %572 = vmatprep.mubr.bf16.mxu0 %v1925_v3  ;;  %782 = vmatprep.mubr.bf16.mxu1 %v1928_v4  ;;  %v1932_v14 = vld [vmem:[%s2255_s29 + $0x70] ss:$12 sps:$4 sm:$0xff]   ;;  %v1934_v16 = vld [vmem:[%s2255_s29 + $0x18] ss:$12 sps:$4 sm:$0xff]   ;;  %v1936_v18 = vld [vmem:[%s2255_s29 + $0x34] ss:$12 sps:$4 sm:$0xff]  }
  0x40   : > { %v1935_v17 = vld [vmem:[%s2255_s29 + $0x6c] ss:$12 sps:$4 sm:$0xff]   ;;  %v1938_v19 = vld [vmem:[%s2255_s29 + $0x88] ss:$12 sps:$4 sm:$0xff]   ;;  %v1552_v21 = vld [vmem:[%s2255_s29 + $0x9c] sm:$0xff]  ;;  %s2540_s23 = smov (!%p308_p8, %s307_s23), 13 }
  0x41   : > { %1652 = vmatpush3.bf16.msra.mxu0 %v2217_v61  ;;  %1698 = vmatpush3.bf16.msra.mxu1 %v2217_v61  ;;  %v362_v20 = vld [vmem:[%s2255_s29 + $0x48] sm:$0xff]  ;;  %v1940_v22 = vld [vmem:[%s2255_s29 + $0x30] ss:$12 sps:$4 sm:$0xff]   ;;  %v1564_v25 = vcombine.high %v1552_v21, %v1552_v21  ;;  %v1563_v27 = vcombine.low %v1552_v21, %v1552_v21  ;;  %v1952_v32 = vld [vmem:[%s2255_s29 + $0x38] ss:$12 sps:$4 sm:$0xff]   ;;  %s1505_s12 = sshll.u32 %s2540_s23, 2 }
  0x42   : > { %1653 = vmatprep.subr.bf16.mxu0 %v2225_v62  ;;  %1699 = vmatprep.subr.bf16.mxu1 %v2225_v62  ;;  %v1942_v23 = vld [vmem:[%s2255_s29 + $0x84] ss:$12 sps:$4 sm:$0xff]   ;;  %v1516_v24 = vcombine.high %v362_v20, %v362_v20  ;;  %v1515_v26 = vcombine.low %v362_v20, %v362_v20  ;;  %v1947_v28 = vld [vmem:[%s2255_s29 + $0x8] ss:$12 sps:$4 sm:$0xff]   ;;  %v1950_v29 = vld [vmem:[%s2255_s29 + $0xac] ss:$12 sps:$4 sm:$0xff]   ;;  %s2494_s26 = scalar_lea.vmem %s2535_s3, %s1505_s12 }
  0x43   : > { %v1948_v30 = vld [vmem:[%s2255_s29 + $0xa8] ss:$12 sps:$4 sm:$0xff]   ;;  %v1951_v31 = vld [vmem:[%s2255_s29 + $0x20] ss:$12 sps:$4 sm:$0xff]   ;;  %v1953_v33 = vld [vmem:[%s2255_s29 + $0xc4] ss:$12 sps:$4 sm:$0xff]  }
  0x44   : > { %v1955_v34 = vld [vmem:[%s2255_s29 + $0x50] ss:$0 sps:$4 sm:$0xff]   ;;  %v1956_v35 = vld [vmem:[%s2255_s29 + $0xc0] ss:$12 sps:$4 sm:$0xff]   ;;  %v1957_v36 = vld [vmem:[%s2255_s29 + $0x5c] ss:$12 sps:$4 sm:$0xff]  }
  0x45   : > { %1654 = vmatpush3.bf16.msra.mxu0 %v2232_v63  ;;  %1700 = vmatpush3.bf16.msra.mxu1 %v2232_v63  ;;  %v1958_v37 = vld [vmem:[%s2255_s29 + $0xdc] ss:$12 sps:$4 sm:$0xff]   ;;  %v1960_v38 = vld [vmem:[%s2255_s29 + $0x74] ss:$12 sps:$4 sm:$0xff]   ;;  %v1961_v39 = vld [vmem:[%s2255_s29 + $0xd8] ss:$12 sps:$4 sm:$0xff]  }
  0x46   : > { %1655 = vmatprep.subr.bf16.mxu0 %v2239_v0  ;;  %1701 = vmatprep.subr.bf16.mxu1 %v2239_v0  ;;  %v1582_v40 = vld [vmem:[%s2255_s29 + $0xf0] sm:$0xff]  ;;  %v1962_v41 = vld [vmem:[%s2255_s29 + $0x8c] ss:$12 sps:$4 sm:$0xff]   ;;  %v1964_v43 = vld [vmem:[%s2255_s29 + $0xa4] ss:$0 sps:$4 sm:$0xff]  }
  0x47   : > { %v1594_v42 = vcombine.high %v1582_v40, %v1582_v40  ;;  %v1593_v44 = vcombine.low %v1582_v40, %v1582_v40  ;;  %v1966_v45 = vld [vmem:[%s2255_s29 + $0xb0] ss:$12 sps:$4 sm:$0xff]   ;;  %v1969_v46 = vld [vmem:[%s2255_s29 + $0x100] ss:$12 sps:$4 sm:$0xff]   ;;  %v1970_v48 = vld [vmem:[%s2255_s29 + $0xc8] ss:$12 sps:$4 sm:$0xff]  }
  0x48   : > { %v1967_v47 = vld [vmem:[%s2255_s29 + $0xfc] ss:$12 sps:$4 sm:$0xff]   ;;  %v1971_v49 = vld [vmem:[%s2255_s29 + $0xe0] ss:$12 sps:$4 sm:$0xff]   ;;  %v1972_v50 = vld [vmem:[%s2255_s29 + $0x118] ss:$12 sps:$4 sm:$0xff]  }
  0x49   : > { %1656 = vmatpush3.bf16.msra.mxu0 %v2246_v1  ;;  %1702 = vmatpush3.bf16.msra.mxu1 %v2246_v1  ;;  %v1974_v51 = vld [vmem:[%s2255_s29 + $0xf8] ss:$0 sps:$4 sm:$0xff]   ;;  %v1975_v52 = vld [vmem:[%s2255_s29 + $0x114] ss:$12 sps:$4 sm:$0xff]   ;;  %v1976_v53 = vld [vmem:[%s2255_s29 + $0x130] ss:$12 sps:$4 sm:$0xff]  }
  0x4a   : > { %1657 = vmatprep.subr.bf16.mxu0 %v2253_v2  ;;  %1703 = vmatprep.subr.bf16.mxu1 %v2253_v2  ;;  %v1978_v54 = vld [vmem:[%s2255_s29 + $0x104] ss:$12 sps:$4 sm:$0xff]  }
  0x4b   : > { %v1612_v55 = vld [vmem:[%s2255_s29 + $0x144] sm:$0xff] }
  0x4d   : > { %1658 = vmatpush3.bf16.msra.mxu0 %v2264_v5  ;;  %1704 = vmatpush3.bf16.msra.mxu1 %v2264_v5 }
  0x4e   : > { %1659 = vmatprep.subr.bf16.mxu0 %v2271_v6  ;;  %1705 = vmatprep.subr.bf16.mxu1 %v2271_v6 }
  0x51   : > { %1660 = vmatpush3.bf16.msra.mxu0 %v2278_v7  ;;  %1706 = vmatpush3.bf16.msra.mxu1 %v2278_v7 }
  0x52   : > { %1661 = vmatprep.subr.bf16.mxu0 %v2285_v8  ;;  %1707 = vmatprep.subr.bf16.mxu1 %v2285_v8 }
  0x55   : > { %1662 = vmatpush3.bf16.msra.mxu0 %v2292_v9  ;;  %1708 = vmatpush3.bf16.msra.mxu1 %v2292_v9 }
  0x56   : > { %1831 = vmatprep.subr.bf16.mxu0 %v2299_v10  ;;  %1739 = vmatprep.subr.bf16.mxu1 %v2184_v56 }
  0x58   : > { %573 = vmatmul.mubr.bf16.vlgmr.msra.gmra.mrb[0].mxu0 %v1923_v11  ;;  %783 = vmatmul.mubr.bf16.vlgmr.msra.gmra.mrb[0].mxu1 %v1926_v12 }
  0x59   : > { %1832 = vmatpush3.bf16.msra.mxu0 %v2299_v10  ;;  %1740 = vmatpush3.bf16.msra.mxu1 %v2189_v57 }
  0x5a   : > { %1741 = vmatprep.subr.bf16.mxu1 %v2196_v58  ;;  %580 = vmatprep.mubr.bf16.mxu0 %v1930_v13 }
  0x5b   : > { %790 = vmatprep.mubr.bf16.mxu1 %v1932_v14  ;;  %1833 = vmatprep.subr.bf16.mxu0 %v2312_v15 }
  0x5d   : > { %1742 = vmatpush3.bf16.msra.mxu1 %v2203_v59  ;;  %1834 = vmatpush3.bf16.msra.mxu0 %v2312_v15 }
  0x5e   : > { %1743 = vmatprep.subr.bf16.mxu1 %v2210_v60  ;;  %1843 = vmatprep.subr.bf16.mxu0 %v2299_v10 }
  0x60   : > { %581 = vmatmul.mubr.bf16.gmra.mrb[4].mxu0 %v1934_v16  ;;  %791 = vmatmul.mubr.bf16.gmra.mrb[4].mxu1 %v1935_v17 }
  0x61   : > { %1744 = vmatpush3.bf16.msra.mxu1 %v2217_v61  ;;  %588 = vmatprep.mubr.bf16.mxu0 %v1936_v18 }
  0x62   : > { %1745 = vmatprep.subr.bf16.mxu1 %v2225_v62  ;;  %798 = vmatprep.mubr.bf16.mxu1 %v1938_v19 }
  0x65   : > { %1746 = vmatpush3.bf16.msra.mxu1 %v2232_v63 }
  0x66   : > { %1747 = vmatprep.subr.bf16.mxu1 %v2239_v0 }
  0x68   : > { %589 = vmatmul.mubr.bf16.gmra.mrb[8].mxu0 %v1940_v22  ;;  %799 = vmatmul.mubr.bf16.gmra.mrb[8].mxu1 %v1942_v23 }
  0x69   : > { %1748 = vmatpush3.bf16.msra.mxu1 %v2246_v1  ;;  %596 = vmatprep.mubr.bf16.mxu0 %v1516_v24 }
  0x6a   : > { %1749 = vmatprep.subr.bf16.mxu1 %v2253_v2  ;;  %806 = vmatprep.mubr.bf16.mxu1 %v1564_v25 }
  0x6d   : > { %1750 = vmatpush3.bf16.msra.mxu1 %v2264_v5 }
  0x6e   : > { %1751 = vmatprep.subr.bf16.mxu1 %v2271_v6 }
  0x70   : > { %597 = vmatmul.mubr.bf16.gmra.mrb[12].mxu0 %v1515_v26  ;;  %807 = vmatmul.mubr.bf16.gmra.mrb[12].mxu1 %v1563_v27 }
  0x71   : > { %1752 = vmatpush3.bf16.msra.mxu1 %v2278_v7  ;;  %1835 = vmatprep.mubr.msk.bf16.mxu0 %vm527_vm0, %v1947_v28 }
  0x72   : > { %1753 = vmatprep.subr.bf16.mxu1 %v2285_v8  ;;  %992 = vmatprep.mubr.bf16.mxu1 %v1950_v29 }
  0x75   : > { %1754 = vmatpush3.bf16.msra.mxu1 %v2292_v9 }
  0x76   : > { %1785 = vmatprep.subr.bf16.mxu1 %v2184_v56  ;;  %v1979_v56 = vld [vmem:[%s2255_s29 + $0x12c] ss:$12 sps:$4 sm:$0xff]  }
  0x78   : > { %1836 = vmatmul.mubr.msk.bf16.vlgmr.msra.gmra.mrb[16].mxu0 %vm527_vm0, %v1951_v31  ;;  %993 = vmatmul.mubr.bf16.vlgmr.msra.gmra.mrb[16].mxu1 %v1948_v30 }
  0x79   : > { %1844 = vmatpush3.bf16.msra.mxu0 %v2299_v10  ;;  %1786 = vmatpush3.bf16.msra.mxu1 %v2189_v57  ;;  %v1980_v57 = vld [vmem:[%s2255_s29 + $0x11c] ss:$12 sps:$4 sm:$0xff]  }
  0x7a   : > { %1787 = vmatprep.subr.bf16.mxu1 %v2196_v58  ;;  %1839 = vmatprep.mubr.msk.bf16.mxu0 %vm527_vm0, %v1952_v32  ;;  %v1624_v58 = vcombine.high %v1612_v55, %v1612_v55 }
  0x7b   : > { %1000 = vmatprep.mubr.bf16.mxu1 %v1953_v33  ;;  %1845 = vmatprep.subr.bf16.mxu0 %v2312_v15 }
  0x7d   : > { %1788 = vmatpush3.bf16.msra.mxu1 %v2203_v59  ;;  %1846 = vmatpush3.bf16.msra.mxu0 %v2312_v15  ;;  %v1982_v59 = vld [vmem:[%s2255_s29 + $0x134] ss:$12 sps:$4 sm:$0xff]  }
  0x7e   : > { %1789 = vmatprep.subr.bf16.mxu1 %v2210_v60  ;;  %1855 = vmatprep.subr.bf16.mxu0 %v2299_v10  ;;  %v1623_v60 = vcombine.low %v1612_v55, %v1612_v55 }
  0x80   : > { %1840 = vmatmul.mubr.msk.bf16.gmra.mrb[20].mxu0 %vm527_vm0, %v1955_v34  ;;  %1001 = vmatmul.mubr.bf16.gmra.mrb[20].mxu1 %v1956_v35 }
  0x81   : > { %1790 = vmatpush3.bf16.msra.mxu1 %v2217_v61  ;;  %1847 = vmatprep.mubr.msk.bf16.mxu0 %vm527_vm0, %v1957_v36  ;;  %v1984_v61 = vld [vmem:[%s2255_s29 + $0x14c] ss:$0 sps:$4 sm:$0xff]  }
  0x82   : > { %1791 = vmatprep.subr.bf16.mxu1 %v2225_v62  ;;  %1008 = vmatprep.mubr.bf16.mxu1 %v1958_v37 }
  0x85   : > { %1792 = vmatpush3.bf16.msra.mxu1 %v2232_v63 }
  0x86   : > { %1793 = vmatprep.subr.bf16.mxu1 %v2239_v0 }
  0x88   : > { %1848 = vmatmul.mubr.msk.bf16.vlgmr.msra.gmra.mrb[24].mxu0 %vm527_vm0, %v1960_v38  ;;  %1009 = vmatmul.mubr.bf16.gmra.mrb[24].mxu1 %v1961_v39 }
  0x89   : > { %1856 = vmatpush3.bf16.msra.mxu0 %v2299_v10  ;;  %1794 = vmatpush3.bf16.msra.mxu1 %v2246_v1 }
  0x8a   : > { %1795 = vmatprep.subr.bf16.mxu1 %v2253_v2  ;;  %1851 = vmatprep.mubr.msk.bf16.mxu0 %vm527_vm0, %v1962_v41 }
  0x8b   : > { %1016 = vmatprep.mubr.bf16.mxu1 %v1594_v42  ;;  %1857 = vmatprep.subr.bf16.mxu0 %v2312_v15 }
  0x8d   : > { %1796 = vmatpush3.bf16.msra.mxu1 %v2264_v5  ;;  %1858 = vmatpush3.bf16.msra.mxu0 %v2312_v15 }
  0x8e   : > { %1797 = vmatprep.subr.bf16.mxu1 %v2271_v6  ;;  %1867 = vmatprep.subr.bf16.mxu0 %v2299_v10 }
  0x90   : > { %1852 = vmatmul.mubr.msk.bf16.gmra.mrb[28].mxu0 %vm527_vm0, %v1964_v43  ;;  %1017 = vmatmul.mubr.bf16.gmra.mrb[28].mxu1 %v1593_v44 }
  0x91   : > { %1798 = vmatpush3.bf16.msra.mxu1 %v2278_v7  ;;  %1859 = vmatprep.mubr.msk.bf16.mxu0 %vm527_vm0, %v1966_v45 }
  0x92   : > { %1799 = vmatprep.subr.bf16.mxu1 %v2285_v8  ;;  %1202 = vmatprep.mubr.bf16.mxu1 %v1969_v46 }
  0x95   : > { %1800 = vmatpush3.bf16.msra.mxu1 %v2292_v9 }
  0x98   : > { %1860 = vmatmul.mubr.msk.bf16.vlgmr.msra.gmra.mrb[32].mxu0 %vm527_vm0, %v1970_v48  ;;  %1203 = vmatmul.mubr.bf16.vlgmr.msra.gmra.mrb[32].mxu1 %v1967_v47 }
  0x99   : > { %1868 = vmatpush3.bf16.msra.mxu0 %v2299_v10  ;;  %1863 = vmatprep.mubr.msk.bf16.mxu0 %vm527_vm0, %v1971_v49 }
  0x9a   : > { %1210 = vmatprep.mubr.bf16.mxu1 %v1972_v50  ;;  %1869 = vmatprep.subr.bf16.mxu0 %v2312_v15 }
  0x9d   : > { %1870 = vmatpush3.bf16.msra.mxu0 %v2312_v15 }
  0xa0   : > { %1864 = vmatmul.mubr.msk.bf16.gmra.mrb[36].mxu0 %vm527_vm0, %v1974_v51  ;;  %1211 = vmatmul.mubr.bf16.gmra.mrb[36].mxu1 %v1975_v52 }
  0xa1   : > { %1218 = vmatprep.mubr.bf16.mxu1 %v1976_v53  ;;  %1871 = vmatprep.mubr.msk.bf16.mxu0 %vm527_vm0, %v1978_v54 }
  0xa8   : > { %1219 = vmatmul.mubr.bf16.gmra.mrb[40].mxu1 %v1979_v56  ;;  %1872 = vmatmul.mubr.msk.bf16.vlgmr.msra.gmra.mrb[40].mxu0 %vm527_vm0, %v1980_v57 }
  0xa9   : > { %1226 = vmatprep.mubr.bf16.mxu1 %v1624_v58  ;;  %1875 = vmatprep.mubr.msk.bf16.mxu0 %vm527_vm0, %v1982_v59 }
  0xb0   : > { %1227 = vmatmul.mubr.bf16.gmra.mrb[44].mxu1 %v1623_v60  ;;  %1876 = vmatmul.mubr.msk.bf16.gmra.mrb[44].mxu0 %vm527_vm0, %v1984_v61 }
 0x12b   : > { %v1663_v62 = vpop.f32.mrb[0].mxu0  ;;  %v1709_v63 = vpop.f32.mrb[0].mxu1 }
 0x12c   : > { %v1664_v0 = vpop.f32.mrb[1].mxu0  ;;  %v1710_v1 = vpop.f32.mrb[1].mxu1 }
 0x12d   : > { %v1665_v2 = vadd.f32 %v1664_v0, %v1663_v62  ;;  %v2414_v3 = vadd.f32 %v1710_v1, %v1709_v63  ;;  %v1666_v4 = vpop.f32.mrb[2].mxu0  ;;  %v1712_v5 = vpop.f32.mrb[2].mxu1 }
 0x12e   : > { %v1667_v6 = vpop.f32.mrb[3].mxu0  ;;  %v1713_v7 = vpop.f32.mrb[3].mxu1 }
 0x12f   : > { %v1668_v8 = vadd.f32 %v1667_v6, %v1666_v4  ;;  %v2416_v9 = vadd.f32 %v1713_v7, %v1712_v5 }
 0x133   : > { %v1669_v10 = vpop.f32.mrb[4].mxu0  ;;  %v1715_v11 = vpop.f32.mrb[4].mxu1 }
 0x134   : > { %v1670_v12 = vpop.f32.mrb[5].mxu0  ;;  %v1716_v13 = vpop.f32.mrb[5].mxu1 }
 0x135   : > { %v1671_v14 = vadd.f32 %v1670_v12, %v1669_v10  ;;  %v1717_v15 = vadd.f32 %v1716_v13, %v1715_v11  ;;  %v1672_v16 = vpop.f32.mrb[6].mxu0  ;;  %v1718_v17 = vpop.f32.mrb[6].mxu1 }
 0x136   : > { %v1673_v18 = vpop.f32.mrb[7].mxu0  ;;  %v1719_v19 = vpop.f32.mrb[7].mxu1 }
 0x137   : > { %v1674_v20 = vadd.f32 %v1673_v18, %v1672_v16  ;;  %v1720_v21 = vadd.f32 %v1719_v19, %v1718_v17 }
 0x13b   : > { %v1675_v22 = vpop.f32.mrb[8].mxu0  ;;  %v1721_v23 = vpop.f32.mrb[8].mxu1 }
 0x13c   : > { %v1676_v24 = vpop.f32.mrb[9].mxu0  ;;  %v1722_v25 = vpop.f32.mrb[9].mxu1 }
 0x13d   : > { %v1677_v26 = vadd.f32 %v1676_v24, %v1675_v22  ;;  %v2418_v27 = vadd.f32 %v1722_v25, %v1721_v23  ;;  %v1678_v28 = vpop.f32.mrb[10].mxu0  ;;  %v1724_v29 = vpop.f32.mrb[10].mxu1 }
 0x13e   : > { %v1679_v30 = vpop.f32.mrb[11].mxu0  ;;  %v1725_v31 = vpop.f32.mrb[11].mxu1 }
 0x13f   : > { %v1680_v32 = vadd.f32 %v1679_v30, %v1678_v28  ;;  %v2420_v33 = vadd.f32 %v1725_v31, %v1724_v29 }
 0x143   : > { %v1681_v34 = vpop.f32.mrb[12].mxu0  ;;  %v1727_v35 = vpop.f32.mrb[12].mxu1 }
 0x144   : > { %v1682_v36 = vpop.f32.mrb[13].mxu0  ;;  %v1728_v37 = vpop.f32.mrb[13].mxu1 }
 0x145   : > { %v1683_v38 = vadd.f32 %v1682_v36, %v1681_v34  ;;  %v1729_v39 = vadd.f32 %v1728_v37, %v1727_v35  ;;  %v1684_v40 = vpop.f32.mrb[14].mxu0  ;;  %v1730_v41 = vpop.f32.mrb[14].mxu1 }
 0x146   : > { %v1685_v42 = vpop.f32.mrb[15].mxu0  ;;  %v1731_v43 = vpop.f32.mrb[15].mxu1 }
 0x14b   : > { %v1837_v44 = vpop.f32.mrb[16].mxu0  ;;  %v1755_v45 = vpop.f32.mrb[16].mxu1 }
 0x14c   : > { %v2422_v46 = vadd.f32 %v1837_v44, %v1671_v14  ;;  %v638_v47 = vpop.f32.mrb[17].mxu0  ;;  %v1756_v48 = vpop.f32.mrb[17].mxu1 }
 0x14d   : > { %v2424_v49 = vadd.f32 %v1665_v2, %v638_v47  ;;  %v1757_v50 = vadd.f32 %v1756_v48, %v1755_v45  ;;  %v1838_v51 = vpop.f32.mrb[18].mxu0  ;;  %v1758_v52 = vpop.f32.mrb[18].mxu1 }
 0x14e   : > { %v2426_v53 = vadd.f32 %v1838_v51, %v1674_v20  ;;  %v641_v54 = vpop.f32.mrb[19].mxu0  ;;  %v1759_v55 = vpop.f32.mrb[19].mxu1 }
 0x14f   : > { %v2428_v56 = vadd.f32 %v1668_v8, %v641_v54  ;;  %v1760_v57 = vadd.f32 %v1759_v55, %v1758_v52 }
 0x153   : > { %v1841_v58 = vpop.f32.mrb[20].mxu0  ;;  %v1761_v59 = vpop.f32.mrb[20].mxu1 }
 0x154   : > { %v2430_v60 = vadd.f32 %v1841_v58, %v1683_v38  ;;  %v654_v61 = vpop.f32.mrb[21].mxu0  ;;  %v1762_v62 = vpop.f32.mrb[21].mxu1 }
 0x155   : > { %v2432_v63 = vadd.f32 %v1677_v26, %v654_v61  ;;  %v1763_v0 = vadd.f32 %v1762_v62, %v1761_v59  ;;  %v1842_v1 = vpop.f32.mrb[22].mxu0  ;;  %v1764_v2 = vpop.f32.mrb[22].mxu1 }
 0x156   : > { %v657_v4 = vpop.f32.mrb[23].mxu0  ;;  %v1765_v5 = vpop.f32.mrb[23].mxu1 }
 0x157   : > { %v2434_v6 = vadd.f32 %v1680_v32, %v657_v4  ;;  %v1766_v7 = vadd.f32 %v1765_v5, %v1764_v2 }
 0x15b   : > { %v1849_v10 = vpop.f32.mrb[24].mxu0  ;;  %v1767_v8 = vpop.f32.mrb[24].mxu1 }
 0x15c   : > { %v2436_v11 = vadd.f32 %v1849_v10, %v1717_v15  ;;  %v848_v12 = vpop.f32.mrb[25].mxu0  ;;  %v1768_v13 = vpop.f32.mrb[25].mxu1 }
 0x15d   : > { %v2439_v14 = vadd.f32 %v2414_v3, %v848_v12  ;;  %v1769_v16 = vadd.f32 %v1768_v13, %v1767_v8  ;;  %v1850_v17 = vpop.f32.mrb[26].mxu0  ;;  %v1770_v18 = vpop.f32.mrb[26].mxu1 }
 0x15e   : > { %v1300_v19 = vmax.f32 %v2422_v46, %v2436_v11  ;;  %v2443_v20 = vadd.f32 %v1850_v17, %v1720_v21  ;;  %v851_v22 = vpop.f32.mrb[27].mxu0  ;;  %v1771_v23 = vpop.f32.mrb[27].mxu1 }
 0x15f   : > { %v1298_v24 = vmax.f32 %v2424_v49, %v2439_v14  ;;  %v2448_v15 = vadd.f32 %v2416_v9, %v851_v22  ;;  %v1772_v25 = vadd.f32 %v1771_v23, %v1770_v18 }
 0x160   : > { %v1301_v3 = vmax.f32 %v2426_v53, %v2443_v20 }
 0x161   : > { %v1299_v26 = vmax.f32 %v2428_v56, %v2448_v15 }
 0x163   : > { %v1853_v28 = vpop.f32.mrb[28].mxu0  ;;  %v1773_v29 = vpop.f32.mrb[28].mxu1 }
 0x164   : > { %v2454_v30 = vadd.f32 %v1853_v28, %v1729_v39  ;;  %v864_v21 = vpop.f32.mrb[29].mxu0  ;;  %v1774_v31 = vpop.f32.mrb[29].mxu1 }
 0x165   : > { %v2457_v32 = vadd.f32 %v2418_v27, %v864_v21  ;;  %v1775_v34 = vadd.f32 %v1774_v31, %v1773_v29  ;;  %v1854_v35 = vpop.f32.mrb[30].mxu0  ;;  %v1776_v9 = vpop.f32.mrb[30].mxu1 }
 0x166   : > { %v1304_v36 = vmax.f32 %v2430_v60, %v2454_v30  ;;  %v867_v37 = vpop.f32.mrb[31].mxu0  ;;  %v1777_v38 = vpop.f32.mrb[31].mxu1 }
 0x167   : > { %v1302_v40 = vmax.f32 %v2432_v63, %v2457_v32  ;;  %v2464_v41 = vadd.f32 %v2420_v33, %v867_v37 }
 0x169   : > { %v1303_v39 = vmax.f32 %v2434_v6, %v2464_v41 }
 0x16b   : > { %v1861_v42 = vpop.f32.mrb[32].mxu0  ;;  %v1801_v27 = vpop.f32.mrb[32].mxu1 }
 0x16c   : > { %v1067_v43 = vadd.f32 %v1861_v42, %v1763_v0  ;;  %v1058_v44 = vpop.f32.mrb[33].mxu0  ;;  %v1802_v45 = vpop.f32.mrb[33].mxu1 }
 0x16d   : > { %v1059_v47 = vadd.f32 %v1757_v50, %v1058_v44  ;;  %v1803_v48 = vadd.f32 %v1802_v45, %v1801_v27  ;;  %v1862_v51 = vpop.f32.mrb[34].mxu0  ;;  %v1804_v52 = vpop.f32.mrb[34].mxu1 }
 0x16e   : > { %v1070_v54 = vadd.f32 %v1862_v51, %v1766_v7  ;;  %v1061_v55 = vpop.f32.mrb[35].mxu0  ;;  %v1805_v58 = vpop.f32.mrb[35].mxu1 }
 0x16f   : > { %v1062_v59 = vadd.f32 %v1760_v57, %v1061_v55  ;;  %v1806_v61 = vadd.f32 %v1805_v58, %v1804_v52 }
 0x173   : > { %v1865_v33 = vpop.f32.mrb[36].mxu0  ;;  %v1807_v62 = vpop.f32.mrb[36].mxu1 }
 0x174   : > { %v2468_v1 = vadd.f32 %v1865_v33, %v1775_v34  ;;  %v1074_v2 = vpop.f32.mrb[37].mxu0  ;;  %v1808_v4 = vpop.f32.mrb[37].mxu1 }
 0x175   : > { %v2470_v5 = vadd.f32 %v1769_v16, %v1074_v2  ;;  %v1809_v0 = vadd.f32 %v1808_v4, %v1807_v62  ;;  %v1866_v10 = vpop.f32.mrb[38].mxu0  ;;  %v1810_v50 = vpop.f32.mrb[38].mxu1 }
 0x176   : > { %v1077_v8 = vpop.f32.mrb[39].mxu0  ;;  %v1811_v12 = vpop.f32.mrb[39].mxu1 }
 0x177   : > { %v2474_v7 = vadd.f32 %v1772_v25, %v1077_v8  ;;  %v1812_v13 = vadd.f32 %v1811_v12, %v1810_v50  ;;  %v1630_v25 = vld [vmem:[%s2534_s2] ss:$0 sm:$0xff] }
 0x17b   : > { %v1813_v57 = vpop.f32.mrb[40].mxu1  ;;  %v1873_v17 = vpop.f32.mrb[40].mxu0 }
 0x17c   : > { %v1277_v18 = vadd.f32 %v1873_v17, %v1809_v0  ;;  %v1814_v22 = vpop.f32.mrb[41].mxu1  ;;  %v1268_v23 = vpop.f32.mrb[41].mxu0 }
 0x17d   : > { %v1815_v28 = vadd.f32 %v1814_v22, %v1813_v57  ;;  %v1269_v29 = vadd.f32 %v1803_v48, %v1268_v23  ;;  %v1816_v16 = vpop.f32.mrb[42].mxu1  ;;  %v1874_v21 = vpop.f32.mrb[42].mxu0 }
 0x17e   : > { %v1307_v31 = vmax.f32 %v1067_v43, %v1277_v18  ;;  %v1280_v34 = vadd.f32 %v1874_v21, %v1812_v13  ;;  %v1817_v35 = vpop.f32.mrb[43].mxu1  ;;  %v1271_v9 = vpop.f32.mrb[43].mxu0 }
 0x17f   : > { %v1305_v37 = vmax.f32 %v1059_v47, %v1269_v29  ;;  %v1818_v38 = vadd.f32 %v1817_v35, %v1816_v16  ;;  %v1272_v42 = vadd.f32 %v1806_v61, %v1271_v9 }
 0x180   : > { %v1314_v27 = vmax.f32 %v1300_v19, %v1307_v31  ;;  %v1308_v44 = vmax.f32 %v1070_v54, %v1280_v34 }
 0x181   : > { %v1312_v45 = vmax.f32 %v1298_v24, %v1305_v37  ;;  %v1306_v43 = vmax.f32 %v1062_v59, %v1272_v42 }
 0x182   : > { %v1328_v48 = vadd.f32 %v1630_v25, %v1314_v27  ;;  %v1315_v51 = vmax.f32 %v1301_v3, %v1308_v44 }
 0x183   : > { %v1326_v52 = vadd.f32 %v1630_v25, %v1312_v45  ;;  %v1313_v47 = vmax.f32 %v1299_v26, %v1306_v43  ;;  %v1819_v55 = vpop.f32.mrb[44].mxu1  ;;  %v1877_v46 = vpop.f32.mrb[44].mxu0 }
 0x184   : > { %v1335_v11 = vmax.f32 %v1328_v48, 0.0  ;;  %v1329_v19 = vadd.f32 %v1630_v25, %v1315_v51  ;;  %v1820_v54 = vpop.f32.mrb[45].mxu1  ;;  %v1284_v49 = vpop.f32.mrb[45].mxu0 }
 0x185   : > { %v1333_v53 = vmax.f32 %v1326_v52, 0.0  ;;  %v1327_v14 = vadd.f32 %v1630_v25, %v1313_v47  ;;  %v1821_v20 = vadd.f32 %v1820_v54, %v1819_v55  ;;  %v1285_v24 = vadd.f32 %v1815_v28, %v1284_v49  ;;  %v1822_v56 = vpop.f32.mrb[46].mxu1  ;;  %v1878_v15 = vpop.f32.mrb[46].mxu0 }
 0x186   : > { %v1642_v3 = vpack.c.bf16 %v1335_v11, %v1335_v11  ;;  %v1336_v26 = vmax.f32 %v1329_v19, 0.0  ;;  %v1823_v58 = vpop.f32.mrb[47].mxu1  ;;  %v1287_v59 = vpop.f32.mrb[47].mxu0 }
 0x187   : > { %v1640_v61 = vpack.c.bf16 %v1333_v53, %v1333_v53  ;;  %v1334_v33 = vmax.f32 %v1327_v14, 0.0  ;;  %v1293_v62 = vadd.f32 %v1877_v46, %v1821_v20  ;;  %v1309_v2 = vmax.f32 %v2470_v5, %v1285_v24 }
 0x188   : > { %1372 = vst.msk [vmem:[%s2494_s26 + $0x8] sm:$0xf] %vm1369_vm1, %v1642_v3  ;;  %v1643_v4 = vpack.c.bf16 %v1336_v26, %v1336_v26  ;;  %v1288_v0 = vadd.f32 %v1818_v38, %v1287_v59 }
 0x189   : > { %1370 = vst.msk [vmem:[%s2494_s26] sm:$0xf] %vm1369_vm1, %v1640_v61  ;;  %v1641_v10 = vpack.c.bf16 %v1334_v33, %v1334_v33  ;;  %v1311_v50 = vmax.f32 %v2468_v1, %v1293_v62  ;;  %v1316_v8 = vmax.f32 %v1302_v40, %v1309_v2 }
 0x18a   : > { %1373 = vst.msk [vmem:[%s2494_s26 + $0xc] sm:$0xf] %vm1369_vm1, %v1643_v4  ;;  %v1310_v5 = vmax.f32 %v2474_v7, %v1288_v0 }
 0x18b   : > { %1371 = vst.msk [vmem:[%s2494_s26 + $0x4] sm:$0xf] %vm1369_vm1, %v1641_v10  ;;  %v1318_v12 = vmax.f32 %v1304_v36, %v1311_v50  ;;  %v1330_v13 = vadd.f32 %v1630_v25, %v1316_v8 }
 0x18c   : > { %v1317_v1 = vmax.f32 %v1303_v39, %v1310_v5 }
 0x18d   : > { %v1332_v57 = vadd.f32 %v1630_v25, %v1318_v12  ;;  %v1337_v63 = vmax.f32 %v1330_v13, 0.0 }
 0x18e   : > { %v1331_v32 = vadd.f32 %v1630_v25, %v1317_v1 }
 0x18f   : > { %v1339_v40 = vmax.f32 %v1332_v57, 0.0  ;;  %v1644_v17 = vpack.c.bf16 %v1337_v63, %v1337_v63 }
 0x190   : > { %v1338_v18 = vmax.f32 %v1331_v32, 0.0 }
 0x191   : > { %v1646_v22 = vpack.c.bf16 %v1339_v40, %v1339_v40  ;;  %1374 = vst.msk [vmem:[%s2494_s26 + $0x10] sm:$0xf] %vm1369_vm1, %v1644_v17 }
 0x192   : > { %v1645_v7 = vpack.c.bf16 %v1338_v18, %v1338_v18 }
 0x193   : > { %1376 = vst.msk [vmem:[%s2494_s26 + $0x18] sm:$0xf] %vm1369_vm1, %v1646_v22 }
 0x194   : > { %1375 = vst.msk [vmem:[%s2494_s26 + $0x14] sm:$0xf] %vm1369_vm1, %v1645_v7 }
 0x195 PF: > { %p10_p9 = scmp.ge.s32.totalorder %s2046_s16, 4   ;;  %s2536_s12 = smov %s2003_s13 }
 0x196   : > { %s2537_s13 = smov %s2055_s19  ;;  %s2538_s14 = smov %s2046_s16 }
 0x197   :  { %12 = sbr.rel (!%p10_p9) target bundleno = 2 (0x2), region = 102 }

// kernel: forward.5
= control target key start
LH: loop header
LB: loop body
LE: loop exit
PB: predicated region body
PF: predicated region fallthrough
CT: control target
= control target key end

     0   :  { %10 = vsyncpa [#allocation5], 0  ;;  %s10587_s18 = smov 0   ;;  %s10589_s19 = smov 0   ;;  %s13215_s0 = inlined_call_operand.vmem [shape: bf16[2,3136], index: 0, kind: input, shape index: {}]   ;;  %s13216_s1 = inlined_call_operand.vmem [shape: bf16[3136,1024], index: 1, kind: input, shape index: {}]   ;;  %s13217_s2 = inlined_call_operand.vmem [shape: f32[1,1024], index: 2, kind: input, shape index: {}]   ;;  %s13218_s3 = inlined_call_operand.vmem [shape: bf16[1024,10], index: 3, kind: input, shape index: {}]   ;;  %s13219_s4 = inlined_call_operand.vmem [shape: f32[1,10], index: 4, kind: input, shape index: {}]   ;;  %s13220_s5 = inlined_call_operand.hbm [shape: f32[2,10], index: 5, kind: output, shape index: {}]  }
   0x1   :  { %s10591_s20 = smov 0  }
   0x2 LB: > { %s10603_s21 = sadd.s32 4294967295, %s10551_s20   ;;  %s10606_s22 = sadd.s32 1, %s10551_s20   ;;  %s10551_s20 = sphi %s10591_s20, %s13223_s20   ;;  %s10547_s19 = sphi %s10589_s19, %s13222_s19   ;;  %s10543_s18 = sphi %s10587_s18, %s13221_s18  }
   0x3   : > { %s41_s23 = ssub.s32 %s10551_s20, %s10606_s22  ;;  %s44_s24 = sadd.s32 1, %s10547_s19 }
   0x4   : > { %p42_p0 = scmp.eq.s32.totalorder %s41_s23, 0  ;;  %p51_p1 = scmp.ne.s32.totalorder %s10547_s19, %s10543_s18 }
   0x5   : > { %p52_p2 = scmp.eq.s32.totalorder %s10551_s20, 0  ;;  %p8272_p4 = scmp.ge.s32.totalorder %s10551_s20, 2 }
   0x6   : > { %s10615_s25 = scalar_select %p42_p0, %s10547_s19, %s44_s24  }
   0x7   : > { %p53_p3 = por %p52_p2, %p51_p1  ;;  %177 = sbr.rel (%p8272_p4) target bundleno = 410 (0x19a), region = 24 }
   0xe   : > { %180 = sbr.rel (!%p53_p3) target bundleno = 410 (0x19a), region = 28  ;;  %s182_s26 = sand.u32 (%p53_p3), 1, %s10547_s19  }
   0xf   : > { %s9105_s27 = sshll.u32 (%p53_p3), %s10551_s20, 4  ;;  %s9250_s28 = smul.u32 (%p53_p3), 6272, %s182_s26 }
  0x10   : > { %s10623_s6 = scalar_lea.vmem (%p53_p3), %s13216_s1, %s9105_s27 }
  0x11   : > { %v200_v0 = vld [vmem:[%s10623_s6] sm:$0xff] (%p53_p3)  ;;  %v202_v1 = vld [vmem:[%s10623_s6 + $0x8] sm:$0xff] (%p53_p3)  ;;  %s10631_s7 = scalar_lea.vmem (%p53_p3), [#allocation3], %s9250_s28 }
  0x12   : > { %v204_v2 = vld [vmem:[%s10623_s6 + $0x20] sm:$0xff] (%p53_p3)  ;;  %v206_v3 = vld [vmem:[%s10623_s6 + $0x28] sm:$0xff] (%p53_p3)  ;;  %201 = vst [vmem:[%s10631_s7] sm:$0xff] (%p53_p3), %v200_v0  ;;  %203 = vst [vmem:[%s10631_s7 + $0x8] sm:$0xff] (%p53_p3), %v202_v1 }
  0x13   : > { %v208_v4 = vld [vmem:[%s10623_s6 + $0x40] sm:$0xff] (%p53_p3)  ;;  %v210_v5 = vld [vmem:[%s10623_s6 + $0x48] sm:$0xff] (%p53_p3)  ;;  %205 = vst [vmem:[%s10631_s7 + $0x10] sm:$0xff] (%p53_p3), %v204_v2  ;;  %207 = vst [vmem:[%s10631_s7 + $0x18] sm:$0xff] (%p53_p3), %v206_v3 }
  0x14   : > { %209 = vst [vmem:[%s10631_s7 + $0x20] sm:$0xff] (%p53_p3), %v208_v4  ;;  %211 = vst [vmem:[%s10631_s7 + $0x28] sm:$0xff] (%p53_p3), %v210_v5  ;;  %v212_v6 = vld [vmem:[%s10623_s6 + $0x60] sm:$0xff] (%p53_p3)  ;;  %v214_v7 = vld [vmem:[%s10623_s6 + $0x68] sm:$0xff] (%p53_p3) }
  0x15   : > { %v216_v8 = vld [vmem:[%s10623_s6 + $0x80] sm:$0xff]  ;;  %213 = vst [vmem:[%s10631_s7 + $0x30] sm:$0xff] %v212_v6  ;;  %215 = vst [vmem:[%s10631_s7 + $0x38] sm:$0xff] %v214_v7  ;;  %v218_v9 = vld [vmem:[%s10623_s6 + $0x88] sm:$0xff] }
  0x16   : > { %217 = vst [vmem:[%s10631_s7 + $0x40] sm:$0xff] %v216_v8  ;;  %v220_v10 = vld [vmem:[%s10623_s6 + $0xa0] sm:$0xff]  ;;  %v222_v11 = vld [vmem:[%s10623_s6 + $0xa8] sm:$0xff]  ;;  %219 = vst [vmem:[%s10631_s7 + $0x48] sm:$0xff] %v218_v9 }
  0x17   : > { %221 = vst [vmem:[%s10631_s7 + $0x50] sm:$0xff] %v220_v10  ;;  %223 = vst [vmem:[%s10631_s7 + $0x58] sm:$0xff] %v222_v11  ;;  %v224_v12 = vld [vmem:[%s10623_s6 + $0xc0] sm:$0xff]  ;;  %v226_v13 = vld [vmem:[%s10623_s6 + $0xc8] sm:$0xff] }
  0x18   : > { %v228_v14 = vld [vmem:[%s10623_s6 + $0xe0] sm:$0xff]  ;;  %225 = vst [vmem:[%s10631_s7 + $0x60] sm:$0xff] %v224_v12  ;;  %227 = vst [vmem:[%s10631_s7 + $0x68] sm:$0xff] %v226_v13  ;;  %v230_v15 = vld [vmem:[%s10623_s6 + $0xe8] sm:$0xff] }
  0x19   : > { %229 = vst [vmem:[%s10631_s7 + $0x70] sm:$0xff] %v228_v14  ;;  %v232_v16 = vld [vmem:[%s10623_s6 + $0x100] sm:$0xff]  ;;  %v234_v17 = vld [vmem:[%s10623_s6 + $0x108] sm:$0xff]  ;;  %231 = vst [vmem:[%s10631_s7 + $0x78] sm:$0xff] %v230_v15 }
  0x1a   : > { %233 = vst [vmem:[%s10631_s7 + $0x80] sm:$0xff] %v232_v16  ;;  %235 = vst [vmem:[%s10631_s7 + $0x88] sm:$0xff] %v234_v17  ;;  %v236_v18 = vld [vmem:[%s10623_s6 + $0x120] sm:$0xff]  ;;  %v238_v19 = vld [vmem:[%s10623_s6 + $0x128] sm:$0xff] }
  0x1b   : > { %v240_v20 = vld [vmem:[%s10623_s6 + $0x140] sm:$0xff]  ;;  %237 = vst [vmem:[%s10631_s7 + $0x90] sm:$0xff] %v236_v18  ;;  %239 = vst [vmem:[%s10631_s7 + $0x98] sm:$0xff] %v238_v19  ;;  %v242_v21 = vld [vmem:[%s10623_s6 + $0x148] sm:$0xff] }
  0x1c   : > { %241 = vst [vmem:[%s10631_s7 + $0xa0] sm:$0xff] %v240_v20  ;;  %v244_v22 = vld [vmem:[%s10623_s6 + $0x160] sm:$0xff]  ;;  %v246_v23 = vld [vmem:[%s10623_s6 + $0x168] sm:$0xff]  ;;  %243 = vst [vmem:[%s10631_s7 + $0xa8] sm:$0xff] %v242_v21 }
  0x1d   : > { %245 = vst [vmem:[%s10631_s7 + $0xb0] sm:$0xff] %v244_v22  ;;  %247 = vst [vmem:[%s10631_s7 + $0xb8] sm:$0xff] %v246_v23  ;;  %v248_v24 = vld [vmem:[%s10623_s6 + $0x180] sm:$0xff]  ;;  %v250_v25 = vld [vmem:[%s10623_s6 + $0x188] sm:$0xff] }
  0x1e   : > { %v252_v26 = vld [vmem:[%s10623_s6 + $0x1a0] sm:$0xff]  ;;  %249 = vst [vmem:[%s10631_s7 + $0xc0] sm:$0xff] %v248_v24  ;;  %251 = vst [vmem:[%s10631_s7 + $0xc8] sm:$0xff] %v250_v25  ;;  %v254_v27 = vld [vmem:[%s10623_s6 + $0x1a8] sm:$0xff] }
  0x1f   : > { %253 = vst [vmem:[%s10631_s7 + $0xd0] sm:$0xff] %v252_v26  ;;  %v256_v28 = vld [vmem:[%s10623_s6 + $0x1c0] sm:$0xff]  ;;  %v258_v29 = vld [vmem:[%s10623_s6 + $0x1c8] sm:$0xff]  ;;  %255 = vst [vmem:[%s10631_s7 + $0xd8] sm:$0xff] %v254_v27 }
  0x20   : > { %257 = vst [vmem:[%s10631_s7 + $0xe0] sm:$0xff] %v256_v28  ;;  %259 = vst [vmem:[%s10631_s7 + $0xe8] sm:$0xff] %v258_v29  ;;  %v260_v30 = vld [vmem:[%s10623_s6 + $0x1e0] sm:$0xff]  ;;  %v262_v31 = vld [vmem:[%s10623_s6 + $0x1e8] sm:$0xff] }
  0x21   : > { %v264_v32 = vld [vmem:[%s10623_s6 + $0x200] sm:$0xff]  ;;  %261 = vst [vmem:[%s10631_s7 + $0xf0] sm:$0xff] %v260_v30  ;;  %263 = vst [vmem:[%s10631_s7 + $0xf8] sm:$0xff] %v262_v31  ;;  %v266_v33 = vld [vmem:[%s10623_s6 + $0x208] sm:$0xff] }
  0x22   : > { %265 = vst [vmem:[%s10631_s7 + $0x100] sm:$0xff] %v264_v32  ;;  %v268_v34 = vld [vmem:[%s10623_s6 + $0x220] sm:$0xff]  ;;  %v270_v35 = vld [vmem:[%s10623_s6 + $0x228] sm:$0xff]  ;;  %267 = vst [vmem:[%s10631_s7 + $0x108] sm:$0xff] %v266_v33 }
  0x23   : > { %269 = vst [vmem:[%s10631_s7 + $0x110] sm:$0xff] %v268_v34  ;;  %271 = vst [vmem:[%s10631_s7 + $0x118] sm:$0xff] %v270_v35  ;;  %v272_v36 = vld [vmem:[%s10623_s6 + $0x240] sm:$0xff]  ;;  %v274_v37 = vld [vmem:[%s10623_s6 + $0x248] sm:$0xff] }
  0x24   : > { %v276_v38 = vld [vmem:[%s10623_s6 + $0x260] sm:$0xff]  ;;  %273 = vst [vmem:[%s10631_s7 + $0x120] sm:$0xff] %v272_v36  ;;  %275 = vst [vmem:[%s10631_s7 + $0x128] sm:$0xff] %v274_v37  ;;  %v278_v39 = vld [vmem:[%s10623_s6 + $0x268] sm:$0xff] }
  0x25   : > { %277 = vst [vmem:[%s10631_s7 + $0x130] sm:$0xff] %v276_v38  ;;  %v280_v40 = vld [vmem:[%s10623_s6 + $0x280] sm:$0xff]  ;;  %v282_v41 = vld [vmem:[%s10623_s6 + $0x288] sm:$0xff]  ;;  %279 = vst [vmem:[%s10631_s7 + $0x138] sm:$0xff] %v278_v39 }
  0x26   : > { %281 = vst [vmem:[%s10631_s7 + $0x140] sm:$0xff] %v280_v40  ;;  %283 = vst [vmem:[%s10631_s7 + $0x148] sm:$0xff] %v282_v41  ;;  %v284_v42 = vld [vmem:[%s10623_s6 + $0x2a0] sm:$0xff]  ;;  %v286_v43 = vld [vmem:[%s10623_s6 + $0x2a8] sm:$0xff] }
  0x27   : > { %v288_v44 = vld [vmem:[%s10623_s6 + $0x2c0] sm:$0xff]  ;;  %285 = vst [vmem:[%s10631_s7 + $0x150] sm:$0xff] %v284_v42  ;;  %287 = vst [vmem:[%s10631_s7 + $0x158] sm:$0xff] %v286_v43  ;;  %v290_v45 = vld [vmem:[%s10623_s6 + $0x2c8] sm:$0xff] }
  0x28   : > { %289 = vst [vmem:[%s10631_s7 + $0x160] sm:$0xff] %v288_v44  ;;  %v292_v46 = vld [vmem:[%s10623_s6 + $0x2e0] sm:$0xff]  ;;  %v294_v47 = vld [vmem:[%s10623_s6 + $0x2e8] sm:$0xff]  ;;  %291 = vst [vmem:[%s10631_s7 + $0x168] sm:$0xff] %v290_v45 }
  0x29   : > { %293 = vst [vmem:[%s10631_s7 + $0x170] sm:$0xff] %v292_v46  ;;  %295 = vst [vmem:[%s10631_s7 + $0x178] sm:$0xff] %v294_v47  ;;  %v296_v48 = vld [vmem:[%s10623_s6 + $0x300] sm:$0xff]  ;;  %v298_v49 = vld [vmem:[%s10623_s6 + $0x308] sm:$0xff] }
  0x2a   : > { %v300_v50 = vld [vmem:[%s10623_s6 + $0x320] sm:$0xff]  ;;  %297 = vst [vmem:[%s10631_s7 + $0x180] sm:$0xff] %v296_v48  ;;  %299 = vst [vmem:[%s10631_s7 + $0x188] sm:$0xff] %v298_v49  ;;  %v302_v51 = vld [vmem:[%s10623_s6 + $0x328] sm:$0xff] }
  0x2b   : > { %301 = vst [vmem:[%s10631_s7 + $0x190] sm:$0xff] %v300_v50  ;;  %v304_v52 = vld [vmem:[%s10623_s6 + $0x340] sm:$0xff]  ;;  %v306_v53 = vld [vmem:[%s10623_s6 + $0x348] sm:$0xff]  ;;  %303 = vst [vmem:[%s10631_s7 + $0x198] sm:$0xff] %v302_v51 }
  0x2c   : > { %305 = vst [vmem:[%s10631_s7 + $0x1a0] sm:$0xff] %v304_v52  ;;  %307 = vst [vmem:[%s10631_s7 + $0x1a8] sm:$0xff] %v306_v53  ;;  %v308_v54 = vld [vmem:[%s10623_s6 + $0x360] sm:$0xff]  ;;  %v310_v55 = vld [vmem:[%s10623_s6 + $0x368] sm:$0xff] }
  0x2d   : > { %v312_v56 = vld [vmem:[%s10623_s6 + $0x380] sm:$0xff]  ;;  %309 = vst [vmem:[%s10631_s7 + $0x1b0] sm:$0xff] %v308_v54  ;;  %311 = vst [vmem:[%s10631_s7 + $0x1b8] sm:$0xff] %v310_v55  ;;  %v314_v57 = vld [vmem:[%s10623_s6 + $0x388] sm:$0xff] }
  0x2e   : > { %313 = vst [vmem:[%s10631_s7 + $0x1c0] sm:$0xff] %v312_v56  ;;  %v316_v58 = vld [vmem:[%s10623_s6 + $0x3a0] sm:$0xff]  ;;  %v318_v59 = vld [vmem:[%s10623_s6 + $0x3a8] sm:$0xff]  ;;  %315 = vst [vmem:[%s10631_s7 + $0x1c8] sm:$0xff] %v314_v57 }
  0x2f   : > { %317 = vst [vmem:[%s10631_s7 + $0x1d0] sm:$0xff] %v316_v58  ;;  %319 = vst [vmem:[%s10631_s7 + $0x1d8] sm:$0xff] %v318_v59  ;;  %v320_v60 = vld [vmem:[%s10623_s6 + $0x3c0] sm:$0xff]  ;;  %v322_v61 = vld [vmem:[%s10623_s6 + $0x3c8] sm:$0xff] }
  0x30   : > { %v324_v62 = vld [vmem:[%s10623_s6 + $0x3e0] sm:$0xff]  ;;  %321 = vst [vmem:[%s10631_s7 + $0x1e0] sm:$0xff] %v320_v60  ;;  %323 = vst [vmem:[%s10631_s7 + $0x1e8] sm:$0xff] %v322_v61  ;;  %v326_v63 = vld [vmem:[%s10623_s6 + $0x3e8] sm:$0xff] }
  0x31   : > { %325 = vst [vmem:[%s10631_s7 + $0x1f0] sm:$0xff] %v324_v62  ;;  %v328_v0 = vld [vmem:[%s10623_s6 + $0x400] sm:$0xff]  ;;  %v330_v1 = vld [vmem:[%s10623_s6 + $0x408] sm:$0xff]  ;;  %327 = vst [vmem:[%s10631_s7 + $0x1f8] sm:$0xff] %v326_v63 }
  0x32   : > { %329 = vst [vmem:[%s10631_s7 + $0x200] sm:$0xff] %v328_v0  ;;  %331 = vst [vmem:[%s10631_s7 + $0x208] sm:$0xff] %v330_v1  ;;  %v332_v2 = vld [vmem:[%s10623_s6 + $0x420] sm:$0xff]  ;;  %v334_v3 = vld [vmem:[%s10623_s6 + $0x428] sm:$0xff] }
  0x33   : > { %v336_v4 = vld [vmem:[%s10623_s6 + $0x440] sm:$0xff]  ;;  %333 = vst [vmem:[%s10631_s7 + $0x210] sm:$0xff] %v332_v2  ;;  %335 = vst [vmem:[%s10631_s7 + $0x218] sm:$0xff] %v334_v3  ;;  %v338_v5 = vld [vmem:[%s10623_s6 + $0x448] sm:$0xff] }
  0x34   : > { %337 = vst [vmem:[%s10631_s7 + $0x220] sm:$0xff] %v336_v4  ;;  %v340_v6 = vld [vmem:[%s10623_s6 + $0x460] sm:$0xff]  ;;  %v342_v7 = vld [vmem:[%s10623_s6 + $0x468] sm:$0xff]  ;;  %339 = vst [vmem:[%s10631_s7 + $0x228] sm:$0xff] %v338_v5 }
  0x35   : > { %341 = vst [vmem:[%s10631_s7 + $0x230] sm:$0xff] %v340_v6  ;;  %343 = vst [vmem:[%s10631_s7 + $0x238] sm:$0xff] %v342_v7  ;;  %v344_v8 = vld [vmem:[%s10623_s6 + $0x480] sm:$0xff]  ;;  %v346_v9 = vld [vmem:[%s10623_s6 + $0x488] sm:$0xff] }
  0x36   : > { %v348_v10 = vld [vmem:[%s10623_s6 + $0x4a0] sm:$0xff]  ;;  %345 = vst [vmem:[%s10631_s7 + $0x240] sm:$0xff] %v344_v8  ;;  %347 = vst [vmem:[%s10631_s7 + $0x248] sm:$0xff] %v346_v9  ;;  %v350_v11 = vld [vmem:[%s10623_s6 + $0x4a8] sm:$0xff] }
  0x37   : > { %349 = vst [vmem:[%s10631_s7 + $0x250] sm:$0xff] %v348_v10  ;;  %v352_v12 = vld [vmem:[%s10623_s6 + $0x4c0] sm:$0xff]  ;;  %v354_v13 = vld [vmem:[%s10623_s6 + $0x4c8] sm:$0xff]  ;;  %351 = vst [vmem:[%s10631_s7 + $0x258] sm:$0xff] %v350_v11 }
  0x38   : > { %353 = vst [vmem:[%s10631_s7 + $0x260] sm:$0xff] %v352_v12  ;;  %355 = vst [vmem:[%s10631_s7 + $0x268] sm:$0xff] %v354_v13  ;;  %v356_v14 = vld [vmem:[%s10623_s6 + $0x4e0] sm:$0xff]  ;;  %v358_v15 = vld [vmem:[%s10623_s6 + $0x4e8] sm:$0xff] }
  0x39   : > { %v360_v16 = vld [vmem:[%s10623_s6 + $0x500] sm:$0xff]  ;;  %357 = vst [vmem:[%s10631_s7 + $0x270] sm:$0xff] %v356_v14  ;;  %359 = vst [vmem:[%s10631_s7 + $0x278] sm:$0xff] %v358_v15  ;;  %v362_v17 = vld [vmem:[%s10623_s6 + $0x508] sm:$0xff] }
  0x3a   : > { %361 = vst [vmem:[%s10631_s7 + $0x280] sm:$0xff] %v360_v16  ;;  %v364_v18 = vld [vmem:[%s10623_s6 + $0x520] sm:$0xff]  ;;  %v366_v19 = vld [vmem:[%s10623_s6 + $0x528] sm:$0xff]  ;;  %363 = vst [vmem:[%s10631_s7 + $0x288] sm:$0xff] %v362_v17 }
  0x3b   : > { %365 = vst [vmem:[%s10631_s7 + $0x290] sm:$0xff] %v364_v18  ;;  %367 = vst [vmem:[%s10631_s7 + $0x298] sm:$0xff] %v366_v19  ;;  %v368_v20 = vld [vmem:[%s10623_s6 + $0x540] sm:$0xff]  ;;  %v370_v21 = vld [vmem:[%s10623_s6 + $0x548] sm:$0xff] }
  0x3c   : > { %v372_v22 = vld [vmem:[%s10623_s6 + $0x560] sm:$0xff]  ;;  %369 = vst [vmem:[%s10631_s7 + $0x2a0] sm:$0xff] %v368_v20  ;;  %371 = vst [vmem:[%s10631_s7 + $0x2a8] sm:$0xff] %v370_v21  ;;  %v374_v23 = vld [vmem:[%s10623_s6 + $0x568] sm:$0xff] }
  0x3d   : > { %373 = vst [vmem:[%s10631_s7 + $0x2b0] sm:$0xff] %v372_v22  ;;  %v376_v24 = vld [vmem:[%s10623_s6 + $0x580] sm:$0xff]  ;;  %v378_v25 = vld [vmem:[%s10623_s6 + $0x588] sm:$0xff]  ;;  %375 = vst [vmem:[%s10631_s7 + $0x2b8] sm:$0xff] %v374_v23 }
  0x3e   : > { %377 = vst [vmem:[%s10631_s7 + $0x2c0] sm:$0xff] %v376_v24  ;;  %379 = vst [vmem:[%s10631_s7 + $0x2c8] sm:$0xff] %v378_v25  ;;  %v380_v26 = vld [vmem:[%s10623_s6 + $0x5a0] sm:$0xff]  ;;  %v382_v27 = vld [vmem:[%s10623_s6 + $0x5a8] sm:$0xff] }
  0x3f   : > { %v384_v28 = vld [vmem:[%s10623_s6 + $0x5c0] sm:$0xff]  ;;  %381 = vst [vmem:[%s10631_s7 + $0x2d0] sm:$0xff] %v380_v26  ;;  %383 = vst [vmem:[%s10631_s7 + $0x2d8] sm:$0xff] %v382_v27  ;;  %v386_v29 = vld [vmem:[%s10623_s6 + $0x5c8] sm:$0xff] }
  0x40   : > { %385 = vst [vmem:[%s10631_s7 + $0x2e0] sm:$0xff] %v384_v28  ;;  %v388_v30 = vld [vmem:[%s10623_s6 + $0x5e0] sm:$0xff]  ;;  %v390_v31 = vld [vmem:[%s10623_s6 + $0x5e8] sm:$0xff]  ;;  %387 = vst [vmem:[%s10631_s7 + $0x2e8] sm:$0xff] %v386_v29 }
  0x41   : > { %389 = vst [vmem:[%s10631_s7 + $0x2f0] sm:$0xff] %v388_v30  ;;  %391 = vst [vmem:[%s10631_s7 + $0x2f8] sm:$0xff] %v390_v31  ;;  %v392_v32 = vld [vmem:[%s10623_s6 + $0x600] sm:$0xff]  ;;  %v394_v33 = vld [vmem:[%s10623_s6 + $0x608] sm:$0xff] }
  0x42   : > { %v396_v34 = vld [vmem:[%s10623_s6 + $0x620] sm:$0xff]  ;;  %393 = vst [vmem:[%s10631_s7 + $0x300] sm:$0xff] %v392_v32  ;;  %395 = vst [vmem:[%s10631_s7 + $0x308] sm:$0xff] %v394_v33  ;;  %v398_v35 = vld [vmem:[%s10623_s6 + $0x628] sm:$0xff] }
  0x43   : > { %397 = vst [vmem:[%s10631_s7 + $0x310] sm:$0xff] %v396_v34  ;;  %v400_v36 = vld [vmem:[%s10623_s6 + $0x640] sm:$0xff]  ;;  %v402_v37 = vld [vmem:[%s10623_s6 + $0x648] sm:$0xff]  ;;  %399 = vst [vmem:[%s10631_s7 + $0x318] sm:$0xff] %v398_v35 }
  0x44   : > { %401 = vst [vmem:[%s10631_s7 + $0x320] sm:$0xff] %v400_v36  ;;  %403 = vst [vmem:[%s10631_s7 + $0x328] sm:$0xff] %v402_v37  ;;  %v404_v38 = vld [vmem:[%s10623_s6 + $0x660] sm:$0xff]  ;;  %v406_v39 = vld [vmem:[%s10623_s6 + $0x668] sm:$0xff] }
  0x45   : > { %v408_v40 = vld [vmem:[%s10623_s6 + $0x680] sm:$0xff]  ;;  %405 = vst [vmem:[%s10631_s7 + $0x330] sm:$0xff] %v404_v38  ;;  %407 = vst [vmem:[%s10631_s7 + $0x338] sm:$0xff] %v406_v39  ;;  %v410_v41 = vld [vmem:[%s10623_s6 + $0x688] sm:$0xff] }
  0x46   : > { %409 = vst [vmem:[%s10631_s7 + $0x340] sm:$0xff] %v408_v40  ;;  %v412_v42 = vld [vmem:[%s10623_s6 + $0x6a0] sm:$0xff]  ;;  %v414_v43 = vld [vmem:[%s10623_s6 + $0x6a8] sm:$0xff]  ;;  %411 = vst [vmem:[%s10631_s7 + $0x348] sm:$0xff] %v410_v41 }
  0x47   : > { %413 = vst [vmem:[%s10631_s7 + $0x350] sm:$0xff] %v412_v42  ;;  %415 = vst [vmem:[%s10631_s7 + $0x358] sm:$0xff] %v414_v43  ;;  %v416_v44 = vld [vmem:[%s10623_s6 + $0x6c0] sm:$0xff]  ;;  %v418_v45 = vld [vmem:[%s10623_s6 + $0x6c8] sm:$0xff] }
  0x48   : > { %v420_v46 = vld [vmem:[%s10623_s6 + $0x6e0] sm:$0xff]  ;;  %417 = vst [vmem:[%s10631_s7 + $0x360] sm:$0xff] %v416_v44  ;;  %419 = vst [vmem:[%s10631_s7 + $0x368] sm:$0xff] %v418_v45  ;;  %v422_v47 = vld [vmem:[%s10623_s6 + $0x6e8] sm:$0xff] }
  0x49   : > { %421 = vst [vmem:[%s10631_s7 + $0x370] sm:$0xff] %v420_v46  ;;  %v424_v48 = vld [vmem:[%s10623_s6 + $0x700] sm:$0xff]  ;;  %v426_v49 = vld [vmem:[%s10623_s6 + $0x708] sm:$0xff]  ;;  %423 = vst [vmem:[%s10631_s7 + $0x378] sm:$0xff] %v422_v47 }
  0x4a   : > { %425 = vst [vmem:[%s10631_s7 + $0x380] sm:$0xff] %v424_v48  ;;  %427 = vst [vmem:[%s10631_s7 + $0x388] sm:$0xff] %v426_v49  ;;  %v428_v50 = vld [vmem:[%s10623_s6 + $0x720] sm:$0xff]  ;;  %v430_v51 = vld [vmem:[%s10623_s6 + $0x728] sm:$0xff] }
  0x4b   : > { %v432_v52 = vld [vmem:[%s10623_s6 + $0x740] sm:$0xff]  ;;  %429 = vst [vmem:[%s10631_s7 + $0x390] sm:$0xff] %v428_v50  ;;  %431 = vst [vmem:[%s10631_s7 + $0x398] sm:$0xff] %v430_v51  ;;  %v434_v53 = vld [vmem:[%s10623_s6 + $0x748] sm:$0xff] }
  0x4c   : > { %433 = vst [vmem:[%s10631_s7 + $0x3a0] sm:$0xff] %v432_v52  ;;  %v436_v54 = vld [vmem:[%s10623_s6 + $0x760] sm:$0xff]  ;;  %v438_v55 = vld [vmem:[%s10623_s6 + $0x768] sm:$0xff]  ;;  %435 = vst [vmem:[%s10631_s7 + $0x3a8] sm:$0xff] %v434_v53 }
  0x4d   : > { %437 = vst [vmem:[%s10631_s7 + $0x3b0] sm:$0xff] %v436_v54  ;;  %439 = vst [vmem:[%s10631_s7 + $0x3b8] sm:$0xff] %v438_v55  ;;  %v440_v56 = vld [vmem:[%s10623_s6 + $0x780] sm:$0xff]  ;;  %v442_v57 = vld [vmem:[%s10623_s6 + $0x788] sm:$0xff] }
  0x4e   : > { %v444_v58 = vld [vmem:[%s10623_s6 + $0x7a0] sm:$0xff]  ;;  %441 = vst [vmem:[%s10631_s7 + $0x3c0] sm:$0xff] %v440_v56  ;;  %443 = vst [vmem:[%s10631_s7 + $0x3c8] sm:$0xff] %v442_v57  ;;  %v446_v59 = vld [vmem:[%s10623_s6 + $0x7a8] sm:$0xff] }
  0x4f   : > { %445 = vst [vmem:[%s10631_s7 + $0x3d0] sm:$0xff] %v444_v58  ;;  %v448_v60 = vld [vmem:[%s10623_s6 + $0x7c0] sm:$0xff]  ;;  %v450_v61 = vld [vmem:[%s10623_s6 + $0x7c8] sm:$0xff]  ;;  %447 = vst [vmem:[%s10631_s7 + $0x3d8] sm:$0xff] %v446_v59 }
  0x50   : > { %449 = vst [vmem:[%s10631_s7 + $0x3e0] sm:$0xff] %v448_v60  ;;  %451 = vst [vmem:[%s10631_s7 + $0x3e8] sm:$0xff] %v450_v61  ;;  %v452_v62 = vld [vmem:[%s10623_s6 + $0x7e0] sm:$0xff]  ;;  %v454_v63 = vld [vmem:[%s10623_s6 + $0x7e8] sm:$0xff] }
  0x51   : > { %v456_v0 = vld [vmem:[%s10623_s6 + $0x800] sm:$0xff]  ;;  %453 = vst [vmem:[%s10631_s7 + $0x3f0] sm:$0xff] %v452_v62  ;;  %455 = vst [vmem:[%s10631_s7 + $0x3f8] sm:$0xff] %v454_v63  ;;  %v458_v1 = vld [vmem:[%s10623_s6 + $0x808] sm:$0xff] }
  0x52   : > { %457 = vst [vmem:[%s10631_s7 + $0x400] sm:$0xff] %v456_v0  ;;  %v460_v2 = vld [vmem:[%s10623_s6 + $0x820] sm:$0xff]  ;;  %v462_v3 = vld [vmem:[%s10623_s6 + $0x828] sm:$0xff]  ;;  %459 = vst [vmem:[%s10631_s7 + $0x408] sm:$0xff] %v458_v1 }
  0x53   : > { %461 = vst [vmem:[%s10631_s7 + $0x410] sm:$0xff] %v460_v2  ;;  %463 = vst [vmem:[%s10631_s7 + $0x418] sm:$0xff] %v462_v3  ;;  %v464_v4 = vld [vmem:[%s10623_s6 + $0x840] sm:$0xff]  ;;  %v466_v5 = vld [vmem:[%s10623_s6 + $0x848] sm:$0xff] }
  0x54   : > { %v468_v6 = vld [vmem:[%s10623_s6 + $0x860] sm:$0xff]  ;;  %465 = vst [vmem:[%s10631_s7 + $0x420] sm:$0xff] %v464_v4  ;;  %467 = vst [vmem:[%s10631_s7 + $0x428] sm:$0xff] %v466_v5  ;;  %v470_v7 = vld [vmem:[%s10623_s6 + $0x868] sm:$0xff] }
  0x55   : > { %469 = vst [vmem:[%s10631_s7 + $0x430] sm:$0xff] %v468_v6  ;;  %v472_v8 = vld [vmem:[%s10623_s6 + $0x880] sm:$0xff]  ;;  %v474_v9 = vld [vmem:[%s10623_s6 + $0x888] sm:$0xff]  ;;  %471 = vst [vmem:[%s10631_s7 + $0x438] sm:$0xff] %v470_v7 }
  0x56   : > { %473 = vst [vmem:[%s10631_s7 + $0x440] sm:$0xff] %v472_v8  ;;  %475 = vst [vmem:[%s10631_s7 + $0x448] sm:$0xff] %v474_v9  ;;  %v476_v10 = vld [vmem:[%s10623_s6 + $0x8a0] sm:$0xff]  ;;  %v478_v11 = vld [vmem:[%s10623_s6 + $0x8a8] sm:$0xff] }
  0x57   : > { %v480_v12 = vld [vmem:[%s10623_s6 + $0x8c0] sm:$0xff]  ;;  %477 = vst [vmem:[%s10631_s7 + $0x450] sm:$0xff] %v476_v10  ;;  %479 = vst [vmem:[%s10631_s7 + $0x458] sm:$0xff] %v478_v11  ;;  %v482_v13 = vld [vmem:[%s10623_s6 + $0x8c8] sm:$0xff] }
  0x58   : > { %481 = vst [vmem:[%s10631_s7 + $0x460] sm:$0xff] %v480_v12  ;;  %v484_v14 = vld [vmem:[%s10623_s6 + $0x8e0] sm:$0xff]  ;;  %v486_v15 = vld [vmem:[%s10623_s6 + $0x8e8] sm:$0xff]  ;;  %483 = vst [vmem:[%s10631_s7 + $0x468] sm:$0xff] %v482_v13 }
  0x59   : > { %485 = vst [vmem:[%s10631_s7 + $0x470] sm:$0xff] %v484_v14  ;;  %487 = vst [vmem:[%s10631_s7 + $0x478] sm:$0xff] %v486_v15  ;;  %v488_v16 = vld [vmem:[%s10623_s6 + $0x900] sm:$0xff]  ;;  %v490_v17 = vld [vmem:[%s10623_s6 + $0x908] sm:$0xff] }
  0x5a   : > { %v492_v18 = vld [vmem:[%s10623_s6 + $0x920] sm:$0xff]  ;;  %489 = vst [vmem:[%s10631_s7 + $0x480] sm:$0xff] %v488_v16  ;;  %491 = vst [vmem:[%s10631_s7 + $0x488] sm:$0xff] %v490_v17  ;;  %v494_v19 = vld [vmem:[%s10623_s6 + $0x928] sm:$0xff] }
  0x5b   : > { %493 = vst [vmem:[%s10631_s7 + $0x490] sm:$0xff] %v492_v18  ;;  %v496_v20 = vld [vmem:[%s10623_s6 + $0x940] sm:$0xff]  ;;  %v498_v21 = vld [vmem:[%s10623_s6 + $0x948] sm:$0xff]  ;;  %495 = vst [vmem:[%s10631_s7 + $0x498] sm:$0xff] %v494_v19 }
  0x5c   : > { %497 = vst [vmem:[%s10631_s7 + $0x4a0] sm:$0xff] %v496_v20  ;;  %499 = vst [vmem:[%s10631_s7 + $0x4a8] sm:$0xff] %v498_v21  ;;  %v500_v22 = vld [vmem:[%s10623_s6 + $0x960] sm:$0xff]  ;;  %v502_v23 = vld [vmem:[%s10623_s6 + $0x968] sm:$0xff] }
  0x5d   : > { %v504_v24 = vld [vmem:[%s10623_s6 + $0x980] sm:$0xff]  ;;  %501 = vst [vmem:[%s10631_s7 + $0x4b0] sm:$0xff] %v500_v22  ;;  %503 = vst [vmem:[%s10631_s7 + $0x4b8] sm:$0xff] %v502_v23  ;;  %v506_v25 = vld [vmem:[%s10623_s6 + $0x988] sm:$0xff] }
  0x5e   : > { %505 = vst [vmem:[%s10631_s7 + $0x4c0] sm:$0xff] %v504_v24  ;;  %v508_v26 = vld [vmem:[%s10623_s6 + $0x9a0] sm:$0xff]  ;;  %v510_v27 = vld [vmem:[%s10623_s6 + $0x9a8] sm:$0xff]  ;;  %507 = vst [vmem:[%s10631_s7 + $0x4c8] sm:$0xff] %v506_v25 }
  0x5f   : > { %509 = vst [vmem:[%s10631_s7 + $0x4d0] sm:$0xff] %v508_v26  ;;  %511 = vst [vmem:[%s10631_s7 + $0x4d8] sm:$0xff] %v510_v27  ;;  %v512_v28 = vld [vmem:[%s10623_s6 + $0x9c0] sm:$0xff]  ;;  %v514_v29 = vld [vmem:[%s10623_s6 + $0x9c8] sm:$0xff] }
  0x60   : > { %v516_v30 = vld [vmem:[%s10623_s6 + $0x9e0] sm:$0xff]  ;;  %513 = vst [vmem:[%s10631_s7 + $0x4e0] sm:$0xff] %v512_v28  ;;  %515 = vst [vmem:[%s10631_s7 + $0x4e8] sm:$0xff] %v514_v29  ;;  %v518_v31 = vld [vmem:[%s10623_s6 + $0x9e8] sm:$0xff] }
  0x61   : > { %517 = vst [vmem:[%s10631_s7 + $0x4f0] sm:$0xff] %v516_v30  ;;  %v520_v32 = vld [vmem:[%s10623_s6 + $0xa00] sm:$0xff]  ;;  %v522_v33 = vld [vmem:[%s10623_s6 + $0xa08] sm:$0xff]  ;;  %519 = vst [vmem:[%s10631_s7 + $0x4f8] sm:$0xff] %v518_v31 }
  0x62   : > { %521 = vst [vmem:[%s10631_s7 + $0x500] sm:$0xff] %v520_v32  ;;  %523 = vst [vmem:[%s10631_s7 + $0x508] sm:$0xff] %v522_v33  ;;  %v524_v34 = vld [vmem:[%s10623_s6 + $0xa20] sm:$0xff]  ;;  %v526_v35 = vld [vmem:[%s10623_s6 + $0xa28] sm:$0xff] }
  0x63   : > { %v528_v36 = vld [vmem:[%s10623_s6 + $0xa40] sm:$0xff]  ;;  %525 = vst [vmem:[%s10631_s7 + $0x510] sm:$0xff] %v524_v34  ;;  %527 = vst [vmem:[%s10631_s7 + $0x518] sm:$0xff] %v526_v35  ;;  %v530_v37 = vld [vmem:[%s10623_s6 + $0xa48] sm:$0xff] }
  0x64   : > { %529 = vst [vmem:[%s10631_s7 + $0x520] sm:$0xff] %v528_v36  ;;  %v532_v38 = vld [vmem:[%s10623_s6 + $0xa60] sm:$0xff]  ;;  %v534_v39 = vld [vmem:[%s10623_s6 + $0xa68] sm:$0xff]  ;;  %531 = vst [vmem:[%s10631_s7 + $0x528] sm:$0xff] %v530_v37 }
  0x65   : > { %533 = vst [vmem:[%s10631_s7 + $0x530] sm:$0xff] %v532_v38  ;;  %535 = vst [vmem:[%s10631_s7 + $0x538] sm:$0xff] %v534_v39  ;;  %v536_v40 = vld [vmem:[%s10623_s6 + $0xa80] sm:$0xff]  ;;  %v538_v41 = vld [vmem:[%s10623_s6 + $0xa88] sm:$0xff] }
  0x66   : > { %v540_v42 = vld [vmem:[%s10623_s6 + $0xaa0] sm:$0xff]  ;;  %537 = vst [vmem:[%s10631_s7 + $0x540] sm:$0xff] %v536_v40  ;;  %539 = vst [vmem:[%s10631_s7 + $0x548] sm:$0xff] %v538_v41  ;;  %v542_v43 = vld [vmem:[%s10623_s6 + $0xaa8] sm:$0xff] }
  0x67   : > { %541 = vst [vmem:[%s10631_s7 + $0x550] sm:$0xff] %v540_v42  ;;  %v544_v44 = vld [vmem:[%s10623_s6 + $0xac0] sm:$0xff]  ;;  %v546_v45 = vld [vmem:[%s10623_s6 + $0xac8] sm:$0xff]  ;;  %543 = vst [vmem:[%s10631_s7 + $0x558] sm:$0xff] %v542_v43 }
  0x68   : > { %545 = vst [vmem:[%s10631_s7 + $0x560] sm:$0xff] %v544_v44  ;;  %547 = vst [vmem:[%s10631_s7 + $0x568] sm:$0xff] %v546_v45  ;;  %v548_v46 = vld [vmem:[%s10623_s6 + $0xae0] sm:$0xff]  ;;  %v550_v47 = vld [vmem:[%s10623_s6 + $0xae8] sm:$0xff] }
  0x69   : > { %v552_v48 = vld [vmem:[%s10623_s6 + $0xb00] sm:$0xff]  ;;  %549 = vst [vmem:[%s10631_s7 + $0x570] sm:$0xff] %v548_v46  ;;  %551 = vst [vmem:[%s10631_s7 + $0x578] sm:$0xff] %v550_v47  ;;  %v554_v49 = vld [vmem:[%s10623_s6 + $0xb08] sm:$0xff] }
  0x6a   : > { %553 = vst [vmem:[%s10631_s7 + $0x580] sm:$0xff] %v552_v48  ;;  %v556_v50 = vld [vmem:[%s10623_s6 + $0xb20] sm:$0xff]  ;;  %v558_v51 = vld [vmem:[%s10623_s6 + $0xb28] sm:$0xff]  ;;  %555 = vst [vmem:[%s10631_s7 + $0x588] sm:$0xff] %v554_v49 }
  0x6b   : > { %557 = vst [vmem:[%s10631_s7 + $0x590] sm:$0xff] %v556_v50  ;;  %559 = vst [vmem:[%s10631_s7 + $0x598] sm:$0xff] %v558_v51  ;;  %v560_v52 = vld [vmem:[%s10623_s6 + $0xb40] sm:$0xff]  ;;  %v562_v53 = vld [vmem:[%s10623_s6 + $0xb48] sm:$0xff] }
  0x6c   : > { %v564_v54 = vld [vmem:[%s10623_s6 + $0xb60] sm:$0xff]  ;;  %561 = vst [vmem:[%s10631_s7 + $0x5a0] sm:$0xff] %v560_v52  ;;  %563 = vst [vmem:[%s10631_s7 + $0x5a8] sm:$0xff] %v562_v53  ;;  %v566_v55 = vld [vmem:[%s10623_s6 + $0xb68] sm:$0xff] }
  0x6d   : > { %565 = vst [vmem:[%s10631_s7 + $0x5b0] sm:$0xff] %v564_v54  ;;  %v568_v56 = vld [vmem:[%s10623_s6 + $0xb80] sm:$0xff]  ;;  %v570_v57 = vld [vmem:[%s10623_s6 + $0xb88] sm:$0xff]  ;;  %567 = vst [vmem:[%s10631_s7 + $0x5b8] sm:$0xff] %v566_v55 }
  0x6e   : > { %569 = vst [vmem:[%s10631_s7 + $0x5c0] sm:$0xff] %v568_v56  ;;  %571 = vst [vmem:[%s10631_s7 + $0x5c8] sm:$0xff] %v570_v57  ;;  %v572_v58 = vld [vmem:[%s10623_s6 + $0xba0] sm:$0xff]  ;;  %v574_v59 = vld [vmem:[%s10623_s6 + $0xba8] sm:$0xff] }
  0x6f   : > { %v576_v60 = vld [vmem:[%s10623_s6 + $0xbc0] sm:$0xff]  ;;  %573 = vst [vmem:[%s10631_s7 + $0x5d0] sm:$0xff] %v572_v58  ;;  %575 = vst [vmem:[%s10631_s7 + $0x5d8] sm:$0xff] %v574_v59  ;;  %v578_v61 = vld [vmem:[%s10623_s6 + $0xbc8] sm:$0xff] }
  0x70   : > { %577 = vst [vmem:[%s10631_s7 + $0x5e0] sm:$0xff] %v576_v60  ;;  %v580_v62 = vld [vmem:[%s10623_s6 + $0xbe0] sm:$0xff]  ;;  %v582_v63 = vld [vmem:[%s10623_s6 + $0xbe8] sm:$0xff]  ;;  %579 = vst [vmem:[%s10631_s7 + $0x5e8] sm:$0xff] %v578_v61 }
  0x71   : > { %581 = vst [vmem:[%s10631_s7 + $0x5f0] sm:$0xff] %v580_v62  ;;  %583 = vst [vmem:[%s10631_s7 + $0x5f8] sm:$0xff] %v582_v63  ;;  %v584_v0 = vld [vmem:[%s10623_s6 + $0xc00] sm:$0xff]  ;;  %v586_v1 = vld [vmem:[%s10623_s6 + $0xc08] sm:$0xff] }
  0x72   : > { %v588_v2 = vld [vmem:[%s10623_s6 + $0xc20] sm:$0xff]  ;;  %585 = vst [vmem:[%s10631_s7 + $0x600] sm:$0xff] %v584_v0  ;;  %587 = vst [vmem:[%s10631_s7 + $0x608] sm:$0xff] %v586_v1  ;;  %v590_v3 = vld [vmem:[%s10623_s6 + $0xc28] sm:$0xff] }
  0x73   : > { %589 = vst [vmem:[%s10631_s7 + $0x610] sm:$0xff] %v588_v2  ;;  %v592_v4 = vld [vmem:[%s10623_s6 + $0xc40] sm:$0xff]  ;;  %v594_v5 = vld [vmem:[%s10623_s6 + $0xc48] sm:$0xff]  ;;  %591 = vst [vmem:[%s10631_s7 + $0x618] sm:$0xff] %v590_v3 }
  0x74   : > { %593 = vst [vmem:[%s10631_s7 + $0x620] sm:$0xff] %v592_v4  ;;  %595 = vst [vmem:[%s10631_s7 + $0x628] sm:$0xff] %v594_v5  ;;  %v596_v6 = vld [vmem:[%s10623_s6 + $0xc60] sm:$0xff]  ;;  %v598_v7 = vld [vmem:[%s10623_s6 + $0xc68] sm:$0xff] }
  0x75   : > { %v600_v8 = vld [vmem:[%s10623_s6 + $0xc80] sm:$0xff]  ;;  %597 = vst [vmem:[%s10631_s7 + $0x630] sm:$0xff] %v596_v6  ;;  %599 = vst [vmem:[%s10631_s7 + $0x638] sm:$0xff] %v598_v7  ;;  %v602_v9 = vld [vmem:[%s10623_s6 + $0xc88] sm:$0xff] }
  0x76   : > { %601 = vst [vmem:[%s10631_s7 + $0x640] sm:$0xff] %v600_v8  ;;  %v604_v10 = vld [vmem:[%s10623_s6 + $0xca0] sm:$0xff]  ;;  %v606_v11 = vld [vmem:[%s10623_s6 + $0xca8] sm:$0xff]  ;;  %603 = vst [vmem:[%s10631_s7 + $0x648] sm:$0xff] %v602_v9 }
  0x77   : > { %605 = vst [vmem:[%s10631_s7 + $0x650] sm:$0xff] %v604_v10  ;;  %607 = vst [vmem:[%s10631_s7 + $0x658] sm:$0xff] %v606_v11  ;;  %v608_v12 = vld [vmem:[%s10623_s6 + $0xcc0] sm:$0xff]  ;;  %v610_v13 = vld [vmem:[%s10623_s6 + $0xcc8] sm:$0xff] }
  0x78   : > { %v612_v14 = vld [vmem:[%s10623_s6 + $0xce0] sm:$0xff]  ;;  %609 = vst [vmem:[%s10631_s7 + $0x660] sm:$0xff] %v608_v12  ;;  %611 = vst [vmem:[%s10631_s7 + $0x668] sm:$0xff] %v610_v13  ;;  %v614_v15 = vld [vmem:[%s10623_s6 + $0xce8] sm:$0xff] }
  0x79   : > { %613 = vst [vmem:[%s10631_s7 + $0x670] sm:$0xff] %v612_v14  ;;  %v616_v16 = vld [vmem:[%s10623_s6 + $0xd00] sm:$0xff]  ;;  %v618_v17 = vld [vmem:[%s10623_s6 + $0xd08] sm:$0xff]  ;;  %615 = vst [vmem:[%s10631_s7 + $0x678] sm:$0xff] %v614_v15 }
  0x7a   : > { %617 = vst [vmem:[%s10631_s7 + $0x680] sm:$0xff] %v616_v16  ;;  %619 = vst [vmem:[%s10631_s7 + $0x688] sm:$0xff] %v618_v17  ;;  %v620_v18 = vld [vmem:[%s10623_s6 + $0xd20] sm:$0xff]  ;;  %v622_v19 = vld [vmem:[%s10623_s6 + $0xd28] sm:$0xff] }
  0x7b   : > { %v624_v20 = vld [vmem:[%s10623_s6 + $0xd40] sm:$0xff]  ;;  %621 = vst [vmem:[%s10631_s7 + $0x690] sm:$0xff] %v620_v18  ;;  %623 = vst [vmem:[%s10631_s7 + $0x698] sm:$0xff] %v622_v19  ;;  %v626_v21 = vld [vmem:[%s10623_s6 + $0xd48] sm:$0xff] }
  0x7c   : > { %625 = vst [vmem:[%s10631_s7 + $0x6a0] sm:$0xff] %v624_v20  ;;  %v628_v22 = vld [vmem:[%s10623_s6 + $0xd60] sm:$0xff]  ;;  %v630_v23 = vld [vmem:[%s10623_s6 + $0xd68] sm:$0xff]  ;;  %627 = vst [vmem:[%s10631_s7 + $0x6a8] sm:$0xff] %v626_v21 }
  0x7d   : > { %629 = vst [vmem:[%s10631_s7 + $0x6b0] sm:$0xff] %v628_v22  ;;  %631 = vst [vmem:[%s10631_s7 + $0x6b8] sm:$0xff] %v630_v23  ;;  %v632_v24 = vld [vmem:[%s10623_s6 + $0xd80] sm:$0xff]  ;;  %v634_v25 = vld [vmem:[%s10623_s6 + $0xd88] sm:$0xff] }
  0x7e   : > { %v636_v26 = vld [vmem:[%s10623_s6 + $0xda0] sm:$0xff]  ;;  %633 = vst [vmem:[%s10631_s7 + $0x6c0] sm:$0xff] %v632_v24  ;;  %635 = vst [vmem:[%s10631_s7 + $0x6c8] sm:$0xff] %v634_v25  ;;  %v638_v27 = vld [vmem:[%s10623_s6 + $0xda8] sm:$0xff] }
  0x7f   : > { %637 = vst [vmem:[%s10631_s7 + $0x6d0] sm:$0xff] %v636_v26  ;;  %v640_v28 = vld [vmem:[%s10623_s6 + $0xdc0] sm:$0xff]  ;;  %v642_v29 = vld [vmem:[%s10623_s6 + $0xdc8] sm:$0xff]  ;;  %639 = vst [vmem:[%s10631_s7 + $0x6d8] sm:$0xff] %v638_v27 }
  0x80   : > { %641 = vst [vmem:[%s10631_s7 + $0x6e0] sm:$0xff] %v640_v28  ;;  %643 = vst [vmem:[%s10631_s7 + $0x6e8] sm:$0xff] %v642_v29  ;;  %v644_v30 = vld [vmem:[%s10623_s6 + $0xde0] sm:$0xff]  ;;  %v646_v31 = vld [vmem:[%s10623_s6 + $0xde8] sm:$0xff] }
  0x81   : > { %v648_v32 = vld [vmem:[%s10623_s6 + $0xe00] sm:$0xff]  ;;  %645 = vst [vmem:[%s10631_s7 + $0x6f0] sm:$0xff] %v644_v30  ;;  %647 = vst [vmem:[%s10631_s7 + $0x6f8] sm:$0xff] %v646_v31  ;;  %v650_v33 = vld [vmem:[%s10623_s6 + $0xe08] sm:$0xff] }
  0x82   : > { %649 = vst [vmem:[%s10631_s7 + $0x700] sm:$0xff] %v648_v32  ;;  %v652_v34 = vld [vmem:[%s10623_s6 + $0xe20] sm:$0xff]  ;;  %v654_v35 = vld [vmem:[%s10623_s6 + $0xe28] sm:$0xff]  ;;  %651 = vst [vmem:[%s10631_s7 + $0x708] sm:$0xff] %v650_v33 }
  0x83   : > { %653 = vst [vmem:[%s10631_s7 + $0x710] sm:$0xff] %v652_v34  ;;  %655 = vst [vmem:[%s10631_s7 + $0x718] sm:$0xff] %v654_v35  ;;  %v656_v36 = vld [vmem:[%s10623_s6 + $0xe40] sm:$0xff]  ;;  %v658_v37 = vld [vmem:[%s10623_s6 + $0xe48] sm:$0xff] }
  0x84   : > { %v660_v38 = vld [vmem:[%s10623_s6 + $0xe60] sm:$0xff]  ;;  %657 = vst [vmem:[%s10631_s7 + $0x720] sm:$0xff] %v656_v36  ;;  %659 = vst [vmem:[%s10631_s7 + $0x728] sm:$0xff] %v658_v37  ;;  %v662_v39 = vld [vmem:[%s10623_s6 + $0xe68] sm:$0xff] }
  0x85   : > { %661 = vst [vmem:[%s10631_s7 + $0x730] sm:$0xff] %v660_v38  ;;  %v664_v40 = vld [vmem:[%s10623_s6 + $0xe80] sm:$0xff]  ;;  %v666_v41 = vld [vmem:[%s10623_s6 + $0xe88] sm:$0xff]  ;;  %663 = vst [vmem:[%s10631_s7 + $0x738] sm:$0xff] %v662_v39 }
  0x86   : > { %665 = vst [vmem:[%s10631_s7 + $0x740] sm:$0xff] %v664_v40  ;;  %667 = vst [vmem:[%s10631_s7 + $0x748] sm:$0xff] %v666_v41  ;;  %v668_v42 = vld [vmem:[%s10623_s6 + $0xea0] sm:$0xff]  ;;  %v670_v43 = vld [vmem:[%s10623_s6 + $0xea8] sm:$0xff] }
  0x87   : > { %v672_v44 = vld [vmem:[%s10623_s6 + $0xec0] sm:$0xff]  ;;  %669 = vst [vmem:[%s10631_s7 + $0x750] sm:$0xff] %v668_v42  ;;  %671 = vst [vmem:[%s10631_s7 + $0x758] sm:$0xff] %v670_v43  ;;  %v674_v45 = vld [vmem:[%s10623_s6 + $0xec8] sm:$0xff] }
  0x88   : > { %673 = vst [vmem:[%s10631_s7 + $0x760] sm:$0xff] %v672_v44  ;;  %v676_v46 = vld [vmem:[%s10623_s6 + $0xee0] sm:$0xff]  ;;  %v678_v47 = vld [vmem:[%s10623_s6 + $0xee8] sm:$0xff]  ;;  %675 = vst [vmem:[%s10631_s7 + $0x768] sm:$0xff] %v674_v45 }
  0x89   : > { %677 = vst [vmem:[%s10631_s7 + $0x770] sm:$0xff] %v676_v46  ;;  %679 = vst [vmem:[%s10631_s7 + $0x778] sm:$0xff] %v678_v47  ;;  %v680_v48 = vld [vmem:[%s10623_s6 + $0xf00] sm:$0xff]  ;;  %v682_v49 = vld [vmem:[%s10623_s6 + $0xf08] sm:$0xff] }
  0x8a   : > { %v684_v50 = vld [vmem:[%s10623_s6 + $0xf20] sm:$0xff]  ;;  %681 = vst [vmem:[%s10631_s7 + $0x780] sm:$0xff] %v680_v48  ;;  %683 = vst [vmem:[%s10631_s7 + $0x788] sm:$0xff] %v682_v49  ;;  %v686_v51 = vld [vmem:[%s10623_s6 + $0xf28] sm:$0xff] }
  0x8b   : > { %685 = vst [vmem:[%s10631_s7 + $0x790] sm:$0xff] %v684_v50  ;;  %v688_v52 = vld [vmem:[%s10623_s6 + $0xf40] sm:$0xff]  ;;  %v690_v53 = vld [vmem:[%s10623_s6 + $0xf48] sm:$0xff]  ;;  %687 = vst [vmem:[%s10631_s7 + $0x798] sm:$0xff] %v686_v51 }
  0x8c   : > { %689 = vst [vmem:[%s10631_s7 + $0x7a0] sm:$0xff] %v688_v52  ;;  %691 = vst [vmem:[%s10631_s7 + $0x7a8] sm:$0xff] %v690_v53  ;;  %v692_v54 = vld [vmem:[%s10623_s6 + $0xf60] sm:$0xff]  ;;  %v694_v55 = vld [vmem:[%s10623_s6 + $0xf68] sm:$0xff] }
  0x8d   : > { %v696_v56 = vld [vmem:[%s10623_s6 + $0xf80] sm:$0xff]  ;;  %693 = vst [vmem:[%s10631_s7 + $0x7b0] sm:$0xff] %v692_v54  ;;  %695 = vst [vmem:[%s10631_s7 + $0x7b8] sm:$0xff] %v694_v55  ;;  %v698_v57 = vld [vmem:[%s10623_s6 + $0xf88] sm:$0xff] }
  0x8e   : > { %697 = vst [vmem:[%s10631_s7 + $0x7c0] sm:$0xff] %v696_v56  ;;  %v700_v58 = vld [vmem:[%s10623_s6 + $0xfa0] sm:$0xff]  ;;  %v702_v59 = vld [vmem:[%s10623_s6 + $0xfa8] sm:$0xff]  ;;  %699 = vst [vmem:[%s10631_s7 + $0x7c8] sm:$0xff] %v698_v57 }
  0x8f   : > { %701 = vst [vmem:[%s10631_s7 + $0x7d0] sm:$0xff] %v700_v58  ;;  %703 = vst [vmem:[%s10631_s7 + $0x7d8] sm:$0xff] %v702_v59  ;;  %v704_v60 = vld [vmem:[%s10623_s6 + $0xfc0] sm:$0xff]  ;;  %v706_v61 = vld [vmem:[%s10623_s6 + $0xfc8] sm:$0xff] }
  0x90   : > { %v708_v62 = vld [vmem:[%s10623_s6 + $0xfe0] sm:$0xff]  ;;  %705 = vst [vmem:[%s10631_s7 + $0x7e0] sm:$0xff] %v704_v60  ;;  %707 = vst [vmem:[%s10631_s7 + $0x7e8] sm:$0xff] %v706_v61  ;;  %v710_v63 = vld [vmem:[%s10623_s6 + $0xfe8] sm:$0xff] }
  0x91   : > { %709 = vst [vmem:[%s10631_s7 + $0x7f0] sm:$0xff] %v708_v62  ;;  %v712_v0 = vld [vmem:[%s10623_s6 + $0x1000] sm:$0xff]  ;;  %v714_v1 = vld [vmem:[%s10623_s6 + $0x1008] sm:$0xff]  ;;  %711 = vst [vmem:[%s10631_s7 + $0x7f8] sm:$0xff] %v710_v63 }
  0x92   : > { %713 = vst [vmem:[%s10631_s7 + $0x800] sm:$0xff] %v712_v0  ;;  %715 = vst [vmem:[%s10631_s7 + $0x808] sm:$0xff] %v714_v1  ;;  %v716_v2 = vld [vmem:[%s10623_s6 + $0x1020] sm:$0xff]  ;;  %v718_v3 = vld [vmem:[%s10623_s6 + $0x1028] sm:$0xff] }
  0x93   : > { %v720_v4 = vld [vmem:[%s10623_s6 + $0x1040] sm:$0xff]  ;;  %717 = vst [vmem:[%s10631_s7 + $0x810] sm:$0xff] %v716_v2  ;;  %719 = vst [vmem:[%s10631_s7 + $0x818] sm:$0xff] %v718_v3  ;;  %v722_v5 = vld [vmem:[%s10623_s6 + $0x1048] sm:$0xff] }
  0x94   : > { %721 = vst [vmem:[%s10631_s7 + $0x820] sm:$0xff] %v720_v4  ;;  %v724_v6 = vld [vmem:[%s10623_s6 + $0x1060] sm:$0xff]  ;;  %v726_v7 = vld [vmem:[%s10623_s6 + $0x1068] sm:$0xff]  ;;  %723 = vst [vmem:[%s10631_s7 + $0x828] sm:$0xff] %v722_v5 }
  0x95   : > { %725 = vst [vmem:[%s10631_s7 + $0x830] sm:$0xff] %v724_v6  ;;  %727 = vst [vmem:[%s10631_s7 + $0x838] sm:$0xff] %v726_v7  ;;  %v728_v8 = vld [vmem:[%s10623_s6 + $0x1080] sm:$0xff]  ;;  %v730_v9 = vld [vmem:[%s10623_s6 + $0x1088] sm:$0xff] }
  0x96   : > { %v732_v10 = vld [vmem:[%s10623_s6 + $0x10a0] sm:$0xff]  ;;  %729 = vst [vmem:[%s10631_s7 + $0x840] sm:$0xff] %v728_v8  ;;  %731 = vst [vmem:[%s10631_s7 + $0x848] sm:$0xff] %v730_v9  ;;  %v734_v11 = vld [vmem:[%s10623_s6 + $0x10a8] sm:$0xff] }
  0x97   : > { %733 = vst [vmem:[%s10631_s7 + $0x850] sm:$0xff] %v732_v10  ;;  %v736_v12 = vld [vmem:[%s10623_s6 + $0x10c0] sm:$0xff]  ;;  %v738_v13 = vld [vmem:[%s10623_s6 + $0x10c8] sm:$0xff]  ;;  %735 = vst [vmem:[%s10631_s7 + $0x858] sm:$0xff] %v734_v11 }
  0x98   : > { %737 = vst [vmem:[%s10631_s7 + $0x860] sm:$0xff] %v736_v12  ;;  %739 = vst [vmem:[%s10631_s7 + $0x868] sm:$0xff] %v738_v13  ;;  %v740_v14 = vld [vmem:[%s10623_s6 + $0x10e0] sm:$0xff]  ;;  %v742_v15 = vld [vmem:[%s10623_s6 + $0x10e8] sm:$0xff] }
  0x99   : > { %v744_v16 = vld [vmem:[%s10623_s6 + $0x1100] sm:$0xff]  ;;  %741 = vst [vmem:[%s10631_s7 + $0x870] sm:$0xff] %v740_v14  ;;  %743 = vst [vmem:[%s10631_s7 + $0x878] sm:$0xff] %v742_v15  ;;  %v746_v17 = vld [vmem:[%s10623_s6 + $0x1108] sm:$0xff] }
  0x9a   : > { %745 = vst [vmem:[%s10631_s7 + $0x880] sm:$0xff] %v744_v16  ;;  %v748_v18 = vld [vmem:[%s10623_s6 + $0x1120] sm:$0xff]  ;;  %v750_v19 = vld [vmem:[%s10623_s6 + $0x1128] sm:$0xff]  ;;  %747 = vst [vmem:[%s10631_s7 + $0x888] sm:$0xff] %v746_v17 }
  0x9b   : > { %749 = vst [vmem:[%s10631_s7 + $0x890] sm:$0xff] %v748_v18  ;;  %751 = vst [vmem:[%s10631_s7 + $0x898] sm:$0xff] %v750_v19  ;;  %v752_v20 = vld [vmem:[%s10623_s6 + $0x1140] sm:$0xff]  ;;  %v754_v21 = vld [vmem:[%s10623_s6 + $0x1148] sm:$0xff] }
  0x9c   : > { %v756_v22 = vld [vmem:[%s10623_s6 + $0x1160] sm:$0xff]  ;;  %753 = vst [vmem:[%s10631_s7 + $0x8a0] sm:$0xff] %v752_v20  ;;  %755 = vst [vmem:[%s10631_s7 + $0x8a8] sm:$0xff] %v754_v21  ;;  %v758_v23 = vld [vmem:[%s10623_s6 + $0x1168] sm:$0xff] }
  0x9d   : > { %757 = vst [vmem:[%s10631_s7 + $0x8b0] sm:$0xff] %v756_v22  ;;  %v760_v24 = vld [vmem:[%s10623_s6 + $0x1180] sm:$0xff]  ;;  %v762_v25 = vld [vmem:[%s10623_s6 + $0x1188] sm:$0xff]  ;;  %759 = vst [vmem:[%s10631_s7 + $0x8b8] sm:$0xff] %v758_v23 }
  0x9e   : > { %761 = vst [vmem:[%s10631_s7 + $0x8c0] sm:$0xff] %v760_v24  ;;  %763 = vst [vmem:[%s10631_s7 + $0x8c8] sm:$0xff] %v762_v25  ;;  %v764_v26 = vld [vmem:[%s10623_s6 + $0x11a0] sm:$0xff]  ;;  %v766_v27 = vld [vmem:[%s10623_s6 + $0x11a8] sm:$0xff] }
  0x9f   : > { %v768_v28 = vld [vmem:[%s10623_s6 + $0x11c0] sm:$0xff]  ;;  %765 = vst [vmem:[%s10631_s7 + $0x8d0] sm:$0xff] %v764_v26  ;;  %767 = vst [vmem:[%s10631_s7 + $0x8d8] sm:$0xff] %v766_v27  ;;  %v770_v29 = vld [vmem:[%s10623_s6 + $0x11c8] sm:$0xff] }
  0xa0   : > { %769 = vst [vmem:[%s10631_s7 + $0x8e0] sm:$0xff] %v768_v28  ;;  %v772_v30 = vld [vmem:[%s10623_s6 + $0x11e0] sm:$0xff]  ;;  %v774_v31 = vld [vmem:[%s10623_s6 + $0x11e8] sm:$0xff]  ;;  %771 = vst [vmem:[%s10631_s7 + $0x8e8] sm:$0xff] %v770_v29 }
  0xa1   : > { %773 = vst [vmem:[%s10631_s7 + $0x8f0] sm:$0xff] %v772_v30  ;;  %775 = vst [vmem:[%s10631_s7 + $0x8f8] sm:$0xff] %v774_v31  ;;  %v776_v32 = vld [vmem:[%s10623_s6 + $0x1200] sm:$0xff]  ;;  %v778_v33 = vld [vmem:[%s10623_s6 + $0x1208] sm:$0xff] }
  0xa2   : > { %v780_v34 = vld [vmem:[%s10623_s6 + $0x1220] sm:$0xff]  ;;  %777 = vst [vmem:[%s10631_s7 + $0x900] sm:$0xff] %v776_v32  ;;  %779 = vst [vmem:[%s10631_s7 + $0x908] sm:$0xff] %v778_v33  ;;  %v782_v35 = vld [vmem:[%s10623_s6 + $0x1228] sm:$0xff] }
  0xa3   : > { %781 = vst [vmem:[%s10631_s7 + $0x910] sm:$0xff] %v780_v34  ;;  %v784_v36 = vld [vmem:[%s10623_s6 + $0x1240] sm:$0xff]  ;;  %v786_v37 = vld [vmem:[%s10623_s6 + $0x1248] sm:$0xff]  ;;  %783 = vst [vmem:[%s10631_s7 + $0x918] sm:$0xff] %v782_v35 }
  0xa4   : > { %785 = vst [vmem:[%s10631_s7 + $0x920] sm:$0xff] %v784_v36  ;;  %787 = vst [vmem:[%s10631_s7 + $0x928] sm:$0xff] %v786_v37  ;;  %v788_v38 = vld [vmem:[%s10623_s6 + $0x1260] sm:$0xff]  ;;  %v790_v39 = vld [vmem:[%s10623_s6 + $0x1268] sm:$0xff] }
  0xa5   : > { %v792_v40 = vld [vmem:[%s10623_s6 + $0x1280] sm:$0xff]  ;;  %789 = vst [vmem:[%s10631_s7 + $0x930] sm:$0xff] %v788_v38  ;;  %791 = vst [vmem:[%s10631_s7 + $0x938] sm:$0xff] %v790_v39  ;;  %v794_v41 = vld [vmem:[%s10623_s6 + $0x1288] sm:$0xff] }
  0xa6   : > { %793 = vst [vmem:[%s10631_s7 + $0x940] sm:$0xff] %v792_v40  ;;  %v796_v42 = vld [vmem:[%s10623_s6 + $0x12a0] sm:$0xff]  ;;  %v798_v43 = vld [vmem:[%s10623_s6 + $0x12a8] sm:$0xff]  ;;  %795 = vst [vmem:[%s10631_s7 + $0x948] sm:$0xff] %v794_v41 }
  0xa7   : > { %797 = vst [vmem:[%s10631_s7 + $0x950] sm:$0xff] %v796_v42  ;;  %799 = vst [vmem:[%s10631_s7 + $0x958] sm:$0xff] %v798_v43  ;;  %v800_v44 = vld [vmem:[%s10623_s6 + $0x12c0] sm:$0xff]  ;;  %v802_v45 = vld [vmem:[%s10623_s6 + $0x12c8] sm:$0xff] }
  0xa8   : > { %v804_v46 = vld [vmem:[%s10623_s6 + $0x12e0] sm:$0xff]  ;;  %801 = vst [vmem:[%s10631_s7 + $0x960] sm:$0xff] %v800_v44  ;;  %803 = vst [vmem:[%s10631_s7 + $0x968] sm:$0xff] %v802_v45  ;;  %v806_v47 = vld [vmem:[%s10623_s6 + $0x12e8] sm:$0xff] }
  0xa9   : > { %805 = vst [vmem:[%s10631_s7 + $0x970] sm:$0xff] %v804_v46  ;;  %v808_v48 = vld [vmem:[%s10623_s6 + $0x1300] sm:$0xff]  ;;  %v810_v49 = vld [vmem:[%s10623_s6 + $0x1308] sm:$0xff]  ;;  %807 = vst [vmem:[%s10631_s7 + $0x978] sm:$0xff] %v806_v47 }
  0xaa   : > { %809 = vst [vmem:[%s10631_s7 + $0x980] sm:$0xff] %v808_v48  ;;  %811 = vst [vmem:[%s10631_s7 + $0x988] sm:$0xff] %v810_v49  ;;  %v812_v50 = vld [vmem:[%s10623_s6 + $0x1320] sm:$0xff]  ;;  %v814_v51 = vld [vmem:[%s10623_s6 + $0x1328] sm:$0xff] }
  0xab   : > { %v816_v52 = vld [vmem:[%s10623_s6 + $0x1340] sm:$0xff]  ;;  %813 = vst [vmem:[%s10631_s7 + $0x990] sm:$0xff] %v812_v50  ;;  %815 = vst [vmem:[%s10631_s7 + $0x998] sm:$0xff] %v814_v51  ;;  %v818_v53 = vld [vmem:[%s10623_s6 + $0x1348] sm:$0xff] }
  0xac   : > { %817 = vst [vmem:[%s10631_s7 + $0x9a0] sm:$0xff] %v816_v52  ;;  %v820_v54 = vld [vmem:[%s10623_s6 + $0x1360] sm:$0xff]  ;;  %v822_v55 = vld [vmem:[%s10623_s6 + $0x1368] sm:$0xff]  ;;  %819 = vst [vmem:[%s10631_s7 + $0x9a8] sm:$0xff] %v818_v53 }
  0xad   : > { %821 = vst [vmem:[%s10631_s7 + $0x9b0] sm:$0xff] %v820_v54  ;;  %823 = vst [vmem:[%s10631_s7 + $0x9b8] sm:$0xff] %v822_v55  ;;  %v824_v56 = vld [vmem:[%s10623_s6 + $0x1380] sm:$0xff]  ;;  %v826_v57 = vld [vmem:[%s10623_s6 + $0x1388] sm:$0xff] }
  0xae   : > { %v828_v58 = vld [vmem:[%s10623_s6 + $0x13a0] sm:$0xff]  ;;  %825 = vst [vmem:[%s10631_s7 + $0x9c0] sm:$0xff] %v824_v56  ;;  %827 = vst [vmem:[%s10631_s7 + $0x9c8] sm:$0xff] %v826_v57  ;;  %v830_v59 = vld [vmem:[%s10623_s6 + $0x13a8] sm:$0xff] }
  0xaf   : > { %829 = vst [vmem:[%s10631_s7 + $0x9d0] sm:$0xff] %v828_v58  ;;  %v832_v60 = vld [vmem:[%s10623_s6 + $0x13c0] sm:$0xff]  ;;  %v834_v61 = vld [vmem:[%s10623_s6 + $0x13c8] sm:$0xff]  ;;  %831 = vst [vmem:[%s10631_s7 + $0x9d8] sm:$0xff] %v830_v59 }
  0xb0   : > { %833 = vst [vmem:[%s10631_s7 + $0x9e0] sm:$0xff] %v832_v60  ;;  %835 = vst [vmem:[%s10631_s7 + $0x9e8] sm:$0xff] %v834_v61  ;;  %v836_v62 = vld [vmem:[%s10623_s6 + $0x13e0] sm:$0xff]  ;;  %v838_v63 = vld [vmem:[%s10623_s6 + $0x13e8] sm:$0xff] }
  0xb1   : > { %v840_v0 = vld [vmem:[%s10623_s6 + $0x1400] sm:$0xff]  ;;  %837 = vst [vmem:[%s10631_s7 + $0x9f0] sm:$0xff] %v836_v62  ;;  %839 = vst [vmem:[%s10631_s7 + $0x9f8] sm:$0xff] %v838_v63  ;;  %v842_v1 = vld [vmem:[%s10623_s6 + $0x1408] sm:$0xff] }
  0xb2   : > { %841 = vst [vmem:[%s10631_s7 + $0xa00] sm:$0xff] %v840_v0  ;;  %v844_v2 = vld [vmem:[%s10623_s6 + $0x1420] sm:$0xff]  ;;  %v846_v3 = vld [vmem:[%s10623_s6 + $0x1428] sm:$0xff]  ;;  %843 = vst [vmem:[%s10631_s7 + $0xa08] sm:$0xff] %v842_v1 }
  0xb3   : > { %845 = vst [vmem:[%s10631_s7 + $0xa10] sm:$0xff] %v844_v2  ;;  %847 = vst [vmem:[%s10631_s7 + $0xa18] sm:$0xff] %v846_v3  ;;  %v848_v4 = vld [vmem:[%s10623_s6 + $0x1440] sm:$0xff]  ;;  %v850_v5 = vld [vmem:[%s10623_s6 + $0x1448] sm:$0xff] }
  0xb4   : > { %v852_v6 = vld [vmem:[%s10623_s6 + $0x1460] sm:$0xff]  ;;  %849 = vst [vmem:[%s10631_s7 + $0xa20] sm:$0xff] %v848_v4  ;;  %851 = vst [vmem:[%s10631_s7 + $0xa28] sm:$0xff] %v850_v5  ;;  %v854_v7 = vld [vmem:[%s10623_s6 + $0x1468] sm:$0xff] }
  0xb5   : > { %853 = vst [vmem:[%s10631_s7 + $0xa30] sm:$0xff] %v852_v6  ;;  %v856_v8 = vld [vmem:[%s10623_s6 + $0x1480] sm:$0xff]  ;;  %v858_v9 = vld [vmem:[%s10623_s6 + $0x1488] sm:$0xff]  ;;  %855 = vst [vmem:[%s10631_s7 + $0xa38] sm:$0xff] %v854_v7 }
  0xb6   : > { %857 = vst [vmem:[%s10631_s7 + $0xa40] sm:$0xff] %v856_v8  ;;  %859 = vst [vmem:[%s10631_s7 + $0xa48] sm:$0xff] %v858_v9  ;;  %v860_v10 = vld [vmem:[%s10623_s6 + $0x14a0] sm:$0xff]  ;;  %v862_v11 = vld [vmem:[%s10623_s6 + $0x14a8] sm:$0xff] }
  0xb7   : > { %v864_v12 = vld [vmem:[%s10623_s6 + $0x14c0] sm:$0xff]  ;;  %861 = vst [vmem:[%s10631_s7 + $0xa50] sm:$0xff] %v860_v10  ;;  %863 = vst [vmem:[%s10631_s7 + $0xa58] sm:$0xff] %v862_v11  ;;  %v866_v13 = vld [vmem:[%s10623_s6 + $0x14c8] sm:$0xff] }
  0xb8   : > { %865 = vst [vmem:[%s10631_s7 + $0xa60] sm:$0xff] %v864_v12  ;;  %v868_v14 = vld [vmem:[%s10623_s6 + $0x14e0] sm:$0xff]  ;;  %v870_v15 = vld [vmem:[%s10623_s6 + $0x14e8] sm:$0xff]  ;;  %867 = vst [vmem:[%s10631_s7 + $0xa68] sm:$0xff] %v866_v13 }
  0xb9   : > { %869 = vst [vmem:[%s10631_s7 + $0xa70] sm:$0xff] %v868_v14  ;;  %871 = vst [vmem:[%s10631_s7 + $0xa78] sm:$0xff] %v870_v15  ;;  %v872_v16 = vld [vmem:[%s10623_s6 + $0x1500] sm:$0xff]  ;;  %v874_v17 = vld [vmem:[%s10623_s6 + $0x1508] sm:$0xff] }
  0xba   : > { %v876_v18 = vld [vmem:[%s10623_s6 + $0x1520] sm:$0xff]  ;;  %873 = vst [vmem:[%s10631_s7 + $0xa80] sm:$0xff] %v872_v16  ;;  %875 = vst [vmem:[%s10631_s7 + $0xa88] sm:$0xff] %v874_v17  ;;  %v878_v19 = vld [vmem:[%s10623_s6 + $0x1528] sm:$0xff] }
  0xbb   : > { %877 = vst [vmem:[%s10631_s7 + $0xa90] sm:$0xff] %v876_v18  ;;  %v880_v20 = vld [vmem:[%s10623_s6 + $0x1540] sm:$0xff]  ;;  %v882_v21 = vld [vmem:[%s10623_s6 + $0x1548] sm:$0xff]  ;;  %879 = vst [vmem:[%s10631_s7 + $0xa98] sm:$0xff] %v878_v19 }
  0xbc   : > { %881 = vst [vmem:[%s10631_s7 + $0xaa0] sm:$0xff] %v880_v20  ;;  %883 = vst [vmem:[%s10631_s7 + $0xaa8] sm:$0xff] %v882_v21  ;;  %v884_v22 = vld [vmem:[%s10623_s6 + $0x1560] sm:$0xff]  ;;  %v886_v23 = vld [vmem:[%s10623_s6 + $0x1568] sm:$0xff] }
  0xbd   : > { %v888_v24 = vld [vmem:[%s10623_s6 + $0x1580] sm:$0xff]  ;;  %885 = vst [vmem:[%s10631_s7 + $0xab0] sm:$0xff] %v884_v22  ;;  %887 = vst [vmem:[%s10631_s7 + $0xab8] sm:$0xff] %v886_v23  ;;  %v890_v25 = vld [vmem:[%s10623_s6 + $0x1588] sm:$0xff] }
  0xbe   : > { %889 = vst [vmem:[%s10631_s7 + $0xac0] sm:$0xff] %v888_v24  ;;  %v892_v26 = vld [vmem:[%s10623_s6 + $0x15a0] sm:$0xff]  ;;  %v894_v27 = vld [vmem:[%s10623_s6 + $0x15a8] sm:$0xff]  ;;  %891 = vst [vmem:[%s10631_s7 + $0xac8] sm:$0xff] %v890_v25 }
  0xbf   : > { %893 = vst [vmem:[%s10631_s7 + $0xad0] sm:$0xff] %v892_v26  ;;  %895 = vst [vmem:[%s10631_s7 + $0xad8] sm:$0xff] %v894_v27  ;;  %v896_v28 = vld [vmem:[%s10623_s6 + $0x15c0] sm:$0xff]  ;;  %v898_v29 = vld [vmem:[%s10623_s6 + $0x15c8] sm:$0xff] }
  0xc0   : > { %v900_v30 = vld [vmem:[%s10623_s6 + $0x15e0] sm:$0xff]  ;;  %897 = vst [vmem:[%s10631_s7 + $0xae0] sm:$0xff] %v896_v28  ;;  %899 = vst [vmem:[%s10631_s7 + $0xae8] sm:$0xff] %v898_v29  ;;  %v902_v31 = vld [vmem:[%s10623_s6 + $0x15e8] sm:$0xff] }
  0xc1   : > { %901 = vst [vmem:[%s10631_s7 + $0xaf0] sm:$0xff] %v900_v30  ;;  %v904_v32 = vld [vmem:[%s10623_s6 + $0x1600] sm:$0xff]  ;;  %v906_v33 = vld [vmem:[%s10623_s6 + $0x1608] sm:$0xff]  ;;  %903 = vst [vmem:[%s10631_s7 + $0xaf8] sm:$0xff] %v902_v31 }
  0xc2   : > { %905 = vst [vmem:[%s10631_s7 + $0xb00] sm:$0xff] %v904_v32  ;;  %907 = vst [vmem:[%s10631_s7 + $0xb08] sm:$0xff] %v906_v33  ;;  %v908_v34 = vld [vmem:[%s10623_s6 + $0x1620] sm:$0xff]  ;;  %v910_v35 = vld [vmem:[%s10623_s6 + $0x1628] sm:$0xff] }
  0xc3   : > { %v912_v36 = vld [vmem:[%s10623_s6 + $0x1640] sm:$0xff]  ;;  %909 = vst [vmem:[%s10631_s7 + $0xb10] sm:$0xff] %v908_v34  ;;  %911 = vst [vmem:[%s10631_s7 + $0xb18] sm:$0xff] %v910_v35  ;;  %v914_v37 = vld [vmem:[%s10623_s6 + $0x1648] sm:$0xff] }
  0xc4   : > { %913 = vst [vmem:[%s10631_s7 + $0xb20] sm:$0xff] %v912_v36  ;;  %v916_v38 = vld [vmem:[%s10623_s6 + $0x1660] sm:$0xff]  ;;  %v918_v39 = vld [vmem:[%s10623_s6 + $0x1668] sm:$0xff]  ;;  %915 = vst [vmem:[%s10631_s7 + $0xb28] sm:$0xff] %v914_v37 }
  0xc5   : > { %917 = vst [vmem:[%s10631_s7 + $0xb30] sm:$0xff] %v916_v38  ;;  %919 = vst [vmem:[%s10631_s7 + $0xb38] sm:$0xff] %v918_v39  ;;  %v920_v40 = vld [vmem:[%s10623_s6 + $0x1680] sm:$0xff]  ;;  %v922_v41 = vld [vmem:[%s10623_s6 + $0x1688] sm:$0xff] }
  0xc6   : > { %v924_v42 = vld [vmem:[%s10623_s6 + $0x16a0] sm:$0xff]  ;;  %921 = vst [vmem:[%s10631_s7 + $0xb40] sm:$0xff] %v920_v40  ;;  %923 = vst [vmem:[%s10631_s7 + $0xb48] sm:$0xff] %v922_v41  ;;  %v926_v43 = vld [vmem:[%s10623_s6 + $0x16a8] sm:$0xff] }
  0xc7   : > { %925 = vst [vmem:[%s10631_s7 + $0xb50] sm:$0xff] %v924_v42  ;;  %v928_v44 = vld [vmem:[%s10623_s6 + $0x16c0] sm:$0xff]  ;;  %v930_v45 = vld [vmem:[%s10623_s6 + $0x16c8] sm:$0xff]  ;;  %927 = vst [vmem:[%s10631_s7 + $0xb58] sm:$0xff] %v926_v43 }
  0xc8   : > { %929 = vst [vmem:[%s10631_s7 + $0xb60] sm:$0xff] %v928_v44  ;;  %931 = vst [vmem:[%s10631_s7 + $0xb68] sm:$0xff] %v930_v45  ;;  %v932_v46 = vld [vmem:[%s10623_s6 + $0x16e0] sm:$0xff]  ;;  %v934_v47 = vld [vmem:[%s10623_s6 + $0x16e8] sm:$0xff] }
  0xc9   : > { %v936_v48 = vld [vmem:[%s10623_s6 + $0x1700] sm:$0xff]  ;;  %933 = vst [vmem:[%s10631_s7 + $0xb70] sm:$0xff] %v932_v46  ;;  %935 = vst [vmem:[%s10631_s7 + $0xb78] sm:$0xff] %v934_v47  ;;  %v938_v49 = vld [vmem:[%s10623_s6 + $0x1708] sm:$0xff] }
  0xca   : > { %937 = vst [vmem:[%s10631_s7 + $0xb80] sm:$0xff] %v936_v48  ;;  %v940_v50 = vld [vmem:[%s10623_s6 + $0x1720] sm:$0xff]  ;;  %v942_v51 = vld [vmem:[%s10623_s6 + $0x1728] sm:$0xff]  ;;  %939 = vst [vmem:[%s10631_s7 + $0xb88] sm:$0xff] %v938_v49 }
  0xcb   : > { %941 = vst [vmem:[%s10631_s7 + $0xb90] sm:$0xff] %v940_v50  ;;  %943 = vst [vmem:[%s10631_s7 + $0xb98] sm:$0xff] %v942_v51  ;;  %v944_v52 = vld [vmem:[%s10623_s6 + $0x1740] sm:$0xff]  ;;  %v946_v53 = vld [vmem:[%s10623_s6 + $0x1748] sm:$0xff] }
  0xcc   : > { %v948_v54 = vld [vmem:[%s10623_s6 + $0x1760] sm:$0xff]  ;;  %945 = vst [vmem:[%s10631_s7 + $0xba0] sm:$0xff] %v944_v52  ;;  %947 = vst [vmem:[%s10631_s7 + $0xba8] sm:$0xff] %v946_v53  ;;  %v950_v55 = vld [vmem:[%s10623_s6 + $0x1768] sm:$0xff] }
  0xcd   : > { %949 = vst [vmem:[%s10631_s7 + $0xbb0] sm:$0xff] %v948_v54  ;;  %v952_v56 = vld [vmem:[%s10623_s6 + $0x1780] sm:$0xff]  ;;  %v954_v57 = vld [vmem:[%s10623_s6 + $0x1788] sm:$0xff]  ;;  %951 = vst [vmem:[%s10631_s7 + $0xbb8] sm:$0xff] %v950_v55 }
  0xce   : > { %953 = vst [vmem:[%s10631_s7 + $0xbc0] sm:$0xff] %v952_v56  ;;  %955 = vst [vmem:[%s10631_s7 + $0xbc8] sm:$0xff] %v954_v57  ;;  %v956_v58 = vld [vmem:[%s10623_s6 + $0x17a0] sm:$0xff]  ;;  %v958_v59 = vld [vmem:[%s10623_s6 + $0x17a8] sm:$0xff] }
  0xcf   : > { %v960_v60 = vld [vmem:[%s10623_s6 + $0x17c0] sm:$0xff]  ;;  %957 = vst [vmem:[%s10631_s7 + $0xbd0] sm:$0xff] %v956_v58  ;;  %959 = vst [vmem:[%s10631_s7 + $0xbd8] sm:$0xff] %v958_v59  ;;  %v962_v61 = vld [vmem:[%s10623_s6 + $0x17c8] sm:$0xff] }
  0xd0   : > { %961 = vst [vmem:[%s10631_s7 + $0xbe0] sm:$0xff] %v960_v60  ;;  %v964_v62 = vld [vmem:[%s10623_s6 + $0x17e0] sm:$0xff]  ;;  %v966_v63 = vld [vmem:[%s10623_s6 + $0x17e8] sm:$0xff]  ;;  %963 = vst [vmem:[%s10631_s7 + $0xbe8] sm:$0xff] %v962_v61 }
  0xd1   : > { %965 = vst [vmem:[%s10631_s7 + $0xbf0] sm:$0xff] %v964_v62  ;;  %967 = vst [vmem:[%s10631_s7 + $0xbf8] sm:$0xff] %v966_v63  ;;  %v968_v0 = vld [vmem:[%s10623_s6 + $0x1800] sm:$0xff]  ;;  %v970_v1 = vld [vmem:[%s10623_s6 + $0x1808] sm:$0xff] }
  0xd2   : > { %v972_v2 = vld [vmem:[%s10623_s6 + $0x1820] sm:$0xff]  ;;  %969 = vst [vmem:[%s10631_s7 + $0xc00] sm:$0xff] %v968_v0  ;;  %971 = vst [vmem:[%s10631_s7 + $0xc08] sm:$0xff] %v970_v1  ;;  %v974_v3 = vld [vmem:[%s10623_s6 + $0x1828] sm:$0xff] }
  0xd3   : > { %973 = vst [vmem:[%s10631_s7 + $0xc10] sm:$0xff] %v972_v2  ;;  %v976_v4 = vld [vmem:[%s10623_s6 + $0x1840] sm:$0xff]  ;;  %v978_v5 = vld [vmem:[%s10623_s6 + $0x1848] sm:$0xff]  ;;  %975 = vst [vmem:[%s10631_s7 + $0xc18] sm:$0xff] %v974_v3 }
  0xd4   : > { %977 = vst [vmem:[%s10631_s7 + $0xc20] sm:$0xff] %v976_v4  ;;  %979 = vst [vmem:[%s10631_s7 + $0xc28] sm:$0xff] %v978_v5  ;;  %v980_v6 = vld [vmem:[%s10623_s6 + $0x1860] sm:$0xff]  ;;  %v982_v7 = vld [vmem:[%s10623_s6 + $0x1868] sm:$0xff] }
  0xd5   : > { %v984_v8 = vld [vmem:[%s10623_s6 + $0x1880] sm:$0xff]  ;;  %981 = vst [vmem:[%s10631_s7 + $0xc30] sm:$0xff] %v980_v6  ;;  %983 = vst [vmem:[%s10631_s7 + $0xc38] sm:$0xff] %v982_v7  ;;  %v986_v9 = vld [vmem:[%s10623_s6 + $0x1888] sm:$0xff] }
  0xd6   : > { %985 = vst [vmem:[%s10631_s7 + $0xc40] sm:$0xff] %v984_v8  ;;  %v988_v10 = vld [vmem:[%s10623_s6 + $0x18a0] sm:$0xff]  ;;  %v990_v11 = vld [vmem:[%s10623_s6 + $0x18a8] sm:$0xff]  ;;  %987 = vst [vmem:[%s10631_s7 + $0xc48] sm:$0xff] %v986_v9 }
  0xd7   : > { %989 = vst [vmem:[%s10631_s7 + $0xc50] sm:$0xff] %v988_v10  ;;  %991 = vst [vmem:[%s10631_s7 + $0xc58] sm:$0xff] %v990_v11  ;;  %v992_v12 = vld [vmem:[%s10623_s6 + $0x18c0] sm:$0xff]  ;;  %v994_v13 = vld [vmem:[%s10623_s6 + $0x18c8] sm:$0xff] }
  0xd8   : > { %v996_v14 = vld [vmem:[%s10623_s6 + $0x18e0] sm:$0xff]  ;;  %993 = vst [vmem:[%s10631_s7 + $0xc60] sm:$0xff] %v992_v12  ;;  %995 = vst [vmem:[%s10631_s7 + $0xc68] sm:$0xff] %v994_v13  ;;  %v998_v15 = vld [vmem:[%s10623_s6 + $0x18e8] sm:$0xff] }
  0xd9   : > { %997 = vst [vmem:[%s10631_s7 + $0xc70] sm:$0xff] %v996_v14  ;;  %v1000_v16 = vld [vmem:[%s10623_s6 + $0x1900] sm:$0xff]  ;;  %v1002_v17 = vld [vmem:[%s10623_s6 + $0x1908] sm:$0xff]  ;;  %999 = vst [vmem:[%s10631_s7 + $0xc78] sm:$0xff] %v998_v15 }
  0xda   : > { %1001 = vst [vmem:[%s10631_s7 + $0xc80] sm:$0xff] %v1000_v16  ;;  %1003 = vst [vmem:[%s10631_s7 + $0xc88] sm:$0xff] %v1002_v17  ;;  %v1004_v18 = vld [vmem:[%s10623_s6 + $0x1920] sm:$0xff]  ;;  %v1006_v19 = vld [vmem:[%s10623_s6 + $0x1928] sm:$0xff] }
  0xdb   : > { %v1008_v20 = vld [vmem:[%s10623_s6 + $0x1940] sm:$0xff]  ;;  %1005 = vst [vmem:[%s10631_s7 + $0xc90] sm:$0xff] %v1004_v18  ;;  %1007 = vst [vmem:[%s10631_s7 + $0xc98] sm:$0xff] %v1006_v19  ;;  %v1010_v21 = vld [vmem:[%s10623_s6 + $0x1948] sm:$0xff] }
  0xdc   : > { %1009 = vst [vmem:[%s10631_s7 + $0xca0] sm:$0xff] %v1008_v20  ;;  %v1012_v22 = vld [vmem:[%s10623_s6 + $0x1960] sm:$0xff]  ;;  %v1014_v23 = vld [vmem:[%s10623_s6 + $0x1968] sm:$0xff]  ;;  %1011 = vst [vmem:[%s10631_s7 + $0xca8] sm:$0xff] %v1010_v21 }
  0xdd   : > { %1013 = vst [vmem:[%s10631_s7 + $0xcb0] sm:$0xff] %v1012_v22  ;;  %1015 = vst [vmem:[%s10631_s7 + $0xcb8] sm:$0xff] %v1014_v23  ;;  %v1016_v24 = vld [vmem:[%s10623_s6 + $0x1980] sm:$0xff]  ;;  %v1018_v25 = vld [vmem:[%s10623_s6 + $0x1988] sm:$0xff] }
  0xde   : > { %v1020_v26 = vld [vmem:[%s10623_s6 + $0x19a0] sm:$0xff]  ;;  %1017 = vst [vmem:[%s10631_s7 + $0xcc0] sm:$0xff] %v1016_v24  ;;  %1019 = vst [vmem:[%s10631_s7 + $0xcc8] sm:$0xff] %v1018_v25  ;;  %v1022_v27 = vld [vmem:[%s10623_s6 + $0x19a8] sm:$0xff] }
  0xdf   : > { %1021 = vst [vmem:[%s10631_s7 + $0xcd0] sm:$0xff] %v1020_v26  ;;  %v1024_v28 = vld [vmem:[%s10623_s6 + $0x19c0] sm:$0xff]  ;;  %v1026_v29 = vld [vmem:[%s10623_s6 + $0x19c8] sm:$0xff]  ;;  %1023 = vst [vmem:[%s10631_s7 + $0xcd8] sm:$0xff] %v1022_v27 }
  0xe0   : > { %1025 = vst [vmem:[%s10631_s7 + $0xce0] sm:$0xff] %v1024_v28  ;;  %1027 = vst [vmem:[%s10631_s7 + $0xce8] sm:$0xff] %v1026_v29  ;;  %v1028_v30 = vld [vmem:[%s10623_s6 + $0x19e0] sm:$0xff]  ;;  %v1030_v31 = vld [vmem:[%s10623_s6 + $0x19e8] sm:$0xff] }
  0xe1   : > { %v1032_v32 = vld [vmem:[%s10623_s6 + $0x1a00] sm:$0xff]  ;;  %1029 = vst [vmem:[%s10631_s7 + $0xcf0] sm:$0xff] %v1028_v30  ;;  %1031 = vst [vmem:[%s10631_s7 + $0xcf8] sm:$0xff] %v1030_v31  ;;  %v1034_v33 = vld [vmem:[%s10623_s6 + $0x1a08] sm:$0xff] }
  0xe2   : > { %1033 = vst [vmem:[%s10631_s7 + $0xd00] sm:$0xff] %v1032_v32  ;;  %v1036_v34 = vld [vmem:[%s10623_s6 + $0x1a20] sm:$0xff]  ;;  %v1038_v35 = vld [vmem:[%s10623_s6 + $0x1a28] sm:$0xff]  ;;  %1035 = vst [vmem:[%s10631_s7 + $0xd08] sm:$0xff] %v1034_v33 }
  0xe3   : > { %1037 = vst [vmem:[%s10631_s7 + $0xd10] sm:$0xff] %v1036_v34  ;;  %1039 = vst [vmem:[%s10631_s7 + $0xd18] sm:$0xff] %v1038_v35  ;;  %v1040_v36 = vld [vmem:[%s10623_s6 + $0x1a40] sm:$0xff]  ;;  %v1042_v37 = vld [vmem:[%s10623_s6 + $0x1a48] sm:$0xff] }
  0xe4   : > { %v1044_v38 = vld [vmem:[%s10623_s6 + $0x1a60] sm:$0xff]  ;;  %1041 = vst [vmem:[%s10631_s7 + $0xd20] sm:$0xff] %v1040_v36  ;;  %1043 = vst [vmem:[%s10631_s7 + $0xd28] sm:$0xff] %v1042_v37  ;;  %v1046_v39 = vld [vmem:[%s10623_s6 + $0x1a68] sm:$0xff] }
  0xe5   : > { %1045 = vst [vmem:[%s10631_s7 + $0xd30] sm:$0xff] %v1044_v38  ;;  %v1048_v40 = vld [vmem:[%s10623_s6 + $0x1a80] sm:$0xff]  ;;  %v1050_v41 = vld [vmem:[%s10623_s6 + $0x1a88] sm:$0xff]  ;;  %1047 = vst [vmem:[%s10631_s7 + $0xd38] sm:$0xff] %v1046_v39 }
  0xe6   : > { %1049 = vst [vmem:[%s10631_s7 + $0xd40] sm:$0xff] %v1048_v40  ;;  %1051 = vst [vmem:[%s10631_s7 + $0xd48] sm:$0xff] %v1050_v41  ;;  %v1052_v42 = vld [vmem:[%s10623_s6 + $0x1aa0] sm:$0xff]  ;;  %v1054_v43 = vld [vmem:[%s10623_s6 + $0x1aa8] sm:$0xff] }
  0xe7   : > { %v1056_v44 = vld [vmem:[%s10623_s6 + $0x1ac0] sm:$0xff]  ;;  %1053 = vst [vmem:[%s10631_s7 + $0xd50] sm:$0xff] %v1052_v42  ;;  %1055 = vst [vmem:[%s10631_s7 + $0xd58] sm:$0xff] %v1054_v43  ;;  %v1058_v45 = vld [vmem:[%s10623_s6 + $0x1ac8] sm:$0xff] }
  0xe8   : > { %1057 = vst [vmem:[%s10631_s7 + $0xd60] sm:$0xff] %v1056_v44  ;;  %v1060_v46 = vld [vmem:[%s10623_s6 + $0x1ae0] sm:$0xff]  ;;  %v1062_v47 = vld [vmem:[%s10623_s6 + $0x1ae8] sm:$0xff]  ;;  %1059 = vst [vmem:[%s10631_s7 + $0xd68] sm:$0xff] %v1058_v45 }
  0xe9   : > { %1061 = vst [vmem:[%s10631_s7 + $0xd70] sm:$0xff] %v1060_v46  ;;  %1063 = vst [vmem:[%s10631_s7 + $0xd78] sm:$0xff] %v1062_v47  ;;  %v1064_v48 = vld [vmem:[%s10623_s6 + $0x1b00] sm:$0xff]  ;;  %v1066_v49 = vld [vmem:[%s10623_s6 + $0x1b08] sm:$0xff] }
  0xea   : > { %v1068_v50 = vld [vmem:[%s10623_s6 + $0x1b20] sm:$0xff]  ;;  %1065 = vst [vmem:[%s10631_s7 + $0xd80] sm:$0xff] %v1064_v48  ;;  %1067 = vst [vmem:[%s10631_s7 + $0xd88] sm:$0xff] %v1066_v49  ;;  %v1070_v51 = vld [vmem:[%s10623_s6 + $0x1b28] sm:$0xff] }
  0xeb   : > { %1069 = vst [vmem:[%s10631_s7 + $0xd90] sm:$0xff] %v1068_v50  ;;  %v1072_v52 = vld [vmem:[%s10623_s6 + $0x1b40] sm:$0xff]  ;;  %v1074_v53 = vld [vmem:[%s10623_s6 + $0x1b48] sm:$0xff]  ;;  %1071 = vst [vmem:[%s10631_s7 + $0xd98] sm:$0xff] %v1070_v51 }
  0xec   : > { %1073 = vst [vmem:[%s10631_s7 + $0xda0] sm:$0xff] %v1072_v52  ;;  %1075 = vst [vmem:[%s10631_s7 + $0xda8] sm:$0xff] %v1074_v53  ;;  %v1076_v54 = vld [vmem:[%s10623_s6 + $0x1b60] sm:$0xff]  ;;  %v1078_v55 = vld [vmem:[%s10623_s6 + $0x1b68] sm:$0xff] }
  0xed   : > { %v1080_v56 = vld [vmem:[%s10623_s6 + $0x1b80] sm:$0xff]  ;;  %1077 = vst [vmem:[%s10631_s7 + $0xdb0] sm:$0xff] %v1076_v54  ;;  %1079 = vst [vmem:[%s10631_s7 + $0xdb8] sm:$0xff] %v1078_v55  ;;  %v1082_v57 = vld [vmem:[%s10623_s6 + $0x1b88] sm:$0xff] }
  0xee   : > { %1081 = vst [vmem:[%s10631_s7 + $0xdc0] sm:$0xff] %v1080_v56  ;;  %v1084_v58 = vld [vmem:[%s10623_s6 + $0x1ba0] sm:$0xff]  ;;  %v1086_v59 = vld [vmem:[%s10623_s6 + $0x1ba8] sm:$0xff]  ;;  %1083 = vst [vmem:[%s10631_s7 + $0xdc8] sm:$0xff] %v1082_v57 }
  0xef   : > { %1085 = vst [vmem:[%s10631_s7 + $0xdd0] sm:$0xff] %v1084_v58  ;;  %1087 = vst [vmem:[%s10631_s7 + $0xdd8] sm:$0xff] %v1086_v59  ;;  %v1088_v60 = vld [vmem:[%s10623_s6 + $0x1bc0] sm:$0xff]  ;;  %v1090_v61 = vld [vmem:[%s10623_s6 + $0x1bc8] sm:$0xff] }
  0xf0   : > { %v1092_v62 = vld [vmem:[%s10623_s6 + $0x1be0] sm:$0xff]  ;;  %1089 = vst [vmem:[%s10631_s7 + $0xde0] sm:$0xff] %v1088_v60  ;;  %1091 = vst [vmem:[%s10631_s7 + $0xde8] sm:$0xff] %v1090_v61  ;;  %v1094_v63 = vld [vmem:[%s10623_s6 + $0x1be8] sm:$0xff] }
  0xf1   : > { %1093 = vst [vmem:[%s10631_s7 + $0xdf0] sm:$0xff] %v1092_v62  ;;  %v1096_v0 = vld [vmem:[%s10623_s6 + $0x1c00] sm:$0xff]  ;;  %v1098_v1 = vld [vmem:[%s10623_s6 + $0x1c08] sm:$0xff]  ;;  %1095 = vst [vmem:[%s10631_s7 + $0xdf8] sm:$0xff] %v1094_v63 }
  0xf2   : > { %1097 = vst [vmem:[%s10631_s7 + $0xe00] sm:$0xff] %v1096_v0  ;;  %1099 = vst [vmem:[%s10631_s7 + $0xe08] sm:$0xff] %v1098_v1  ;;  %v1100_v2 = vld [vmem:[%s10623_s6 + $0x1c20] sm:$0xff]  ;;  %v1102_v3 = vld [vmem:[%s10623_s6 + $0x1c28] sm:$0xff] }
  0xf3   : > { %v1104_v4 = vld [vmem:[%s10623_s6 + $0x1c40] sm:$0xff]  ;;  %1101 = vst [vmem:[%s10631_s7 + $0xe10] sm:$0xff] %v1100_v2  ;;  %1103 = vst [vmem:[%s10631_s7 + $0xe18] sm:$0xff] %v1102_v3  ;;  %v1106_v5 = vld [vmem:[%s10623_s6 + $0x1c48] sm:$0xff] }
  0xf4   : > { %1105 = vst [vmem:[%s10631_s7 + $0xe20] sm:$0xff] %v1104_v4  ;;  %v1108_v6 = vld [vmem:[%s10623_s6 + $0x1c60] sm:$0xff]  ;;  %v1110_v7 = vld [vmem:[%s10623_s6 + $0x1c68] sm:$0xff]  ;;  %1107 = vst [vmem:[%s10631_s7 + $0xe28] sm:$0xff] %v1106_v5 }
  0xf5   : > { %1109 = vst [vmem:[%s10631_s7 + $0xe30] sm:$0xff] %v1108_v6  ;;  %1111 = vst [vmem:[%s10631_s7 + $0xe38] sm:$0xff] %v1110_v7  ;;  %v1112_v8 = vld [vmem:[%s10623_s6 + $0x1c80] sm:$0xff]  ;;  %v1114_v9 = vld [vmem:[%s10623_s6 + $0x1c88] sm:$0xff] }
  0xf6   : > { %v1116_v10 = vld [vmem:[%s10623_s6 + $0x1ca0] sm:$0xff]  ;;  %1113 = vst [vmem:[%s10631_s7 + $0xe40] sm:$0xff] %v1112_v8  ;;  %1115 = vst [vmem:[%s10631_s7 + $0xe48] sm:$0xff] %v1114_v9  ;;  %v1118_v11 = vld [vmem:[%s10623_s6 + $0x1ca8] sm:$0xff] }
  0xf7   : > { %1117 = vst [vmem:[%s10631_s7 + $0xe50] sm:$0xff] %v1116_v10  ;;  %v1120_v12 = vld [vmem:[%s10623_s6 + $0x1cc0] sm:$0xff]  ;;  %v1122_v13 = vld [vmem:[%s10623_s6 + $0x1cc8] sm:$0xff]  ;;  %1119 = vst [vmem:[%s10631_s7 + $0xe58] sm:$0xff] %v1118_v11 }
  0xf8   : > { %1121 = vst [vmem:[%s10631_s7 + $0xe60] sm:$0xff] %v1120_v12  ;;  %1123 = vst [vmem:[%s10631_s7 + $0xe68] sm:$0xff] %v1122_v13  ;;  %v1124_v14 = vld [vmem:[%s10623_s6 + $0x1ce0] sm:$0xff]  ;;  %v1126_v15 = vld [vmem:[%s10623_s6 + $0x1ce8] sm:$0xff] }
  0xf9   : > { %v1128_v16 = vld [vmem:[%s10623_s6 + $0x1d00] sm:$0xff]  ;;  %1125 = vst [vmem:[%s10631_s7 + $0xe70] sm:$0xff] %v1124_v14  ;;  %1127 = vst [vmem:[%s10631_s7 + $0xe78] sm:$0xff] %v1126_v15  ;;  %v1130_v17 = vld [vmem:[%s10623_s6 + $0x1d08] sm:$0xff] }
  0xfa   : > { %1129 = vst [vmem:[%s10631_s7 + $0xe80] sm:$0xff] %v1128_v16  ;;  %v1132_v18 = vld [vmem:[%s10623_s6 + $0x1d20] sm:$0xff]  ;;  %v1134_v19 = vld [vmem:[%s10623_s6 + $0x1d28] sm:$0xff]  ;;  %1131 = vst [vmem:[%s10631_s7 + $0xe88] sm:$0xff] %v1130_v17 }
  0xfb   : > { %1133 = vst [vmem:[%s10631_s7 + $0xe90] sm:$0xff] %v1132_v18  ;;  %1135 = vst [vmem:[%s10631_s7 + $0xe98] sm:$0xff] %v1134_v19  ;;  %v1136_v20 = vld [vmem:[%s10623_s6 + $0x1d40] sm:$0xff]  ;;  %v1138_v21 = vld [vmem:[%s10623_s6 + $0x1d48] sm:$0xff] }
  0xfc   : > { %v1140_v22 = vld [vmem:[%s10623_s6 + $0x1d60] sm:$0xff]  ;;  %1137 = vst [vmem:[%s10631_s7 + $0xea0] sm:$0xff] %v1136_v20  ;;  %1139 = vst [vmem:[%s10631_s7 + $0xea8] sm:$0xff] %v1138_v21  ;;  %v1142_v23 = vld [vmem:[%s10623_s6 + $0x1d68] sm:$0xff] }
  0xfd   : > { %1141 = vst [vmem:[%s10631_s7 + $0xeb0] sm:$0xff] %v1140_v22  ;;  %v1144_v24 = vld [vmem:[%s10623_s6 + $0x1d80] sm:$0xff]  ;;  %v1146_v25 = vld [vmem:[%s10623_s6 + $0x1d88] sm:$0xff]  ;;  %1143 = vst [vmem:[%s10631_s7 + $0xeb8] sm:$0xff] %v1142_v23 }
  0xfe   : > { %1145 = vst [vmem:[%s10631_s7 + $0xec0] sm:$0xff] %v1144_v24  ;;  %1147 = vst [vmem:[%s10631_s7 + $0xec8] sm:$0xff] %v1146_v25  ;;  %v1148_v26 = vld [vmem:[%s10623_s6 + $0x1da0] sm:$0xff]  ;;  %v1150_v27 = vld [vmem:[%s10623_s6 + $0x1da8] sm:$0xff] }
  0xff   : > { %v1152_v28 = vld [vmem:[%s10623_s6 + $0x1dc0] sm:$0xff]  ;;  %1149 = vst [vmem:[%s10631_s7 + $0xed0] sm:$0xff] %v1148_v26  ;;  %1151 = vst [vmem:[%s10631_s7 + $0xed8] sm:$0xff] %v1150_v27  ;;  %v1154_v29 = vld [vmem:[%s10623_s6 + $0x1dc8] sm:$0xff] }
 0x100   : > { %1153 = vst [vmem:[%s10631_s7 + $0xee0] sm:$0xff] %v1152_v28  ;;  %v1156_v30 = vld [vmem:[%s10623_s6 + $0x1de0] sm:$0xff]  ;;  %v1158_v31 = vld [vmem:[%s10623_s6 + $0x1de8] sm:$0xff]  ;;  %1155 = vst [vmem:[%s10631_s7 + $0xee8] sm:$0xff] %v1154_v29 }
 0x101   : > { %1157 = vst [vmem:[%s10631_s7 + $0xef0] sm:$0xff] %v1156_v30  ;;  %1159 = vst [vmem:[%s10631_s7 + $0xef8] sm:$0xff] %v1158_v31  ;;  %v1160_v32 = vld [vmem:[%s10623_s6 + $0x1e00] sm:$0xff]  ;;  %v1162_v33 = vld [vmem:[%s10623_s6 + $0x1e08] sm:$0xff] }
 0x102   : > { %v1164_v34 = vld [vmem:[%s10623_s6 + $0x1e20] sm:$0xff]  ;;  %1161 = vst [vmem:[%s10631_s7 + $0xf00] sm:$0xff] %v1160_v32  ;;  %1163 = vst [vmem:[%s10631_s7 + $0xf08] sm:$0xff] %v1162_v33  ;;  %v1166_v35 = vld [vmem:[%s10623_s6 + $0x1e28] sm:$0xff] }
 0x103   : > { %1165 = vst [vmem:[%s10631_s7 + $0xf10] sm:$0xff] %v1164_v34  ;;  %v1168_v36 = vld [vmem:[%s10623_s6 + $0x1e40] sm:$0xff]  ;;  %v1170_v37 = vld [vmem:[%s10623_s6 + $0x1e48] sm:$0xff]  ;;  %1167 = vst [vmem:[%s10631_s7 + $0xf18] sm:$0xff] %v1166_v35 }
 0x104   : > { %1169 = vst [vmem:[%s10631_s7 + $0xf20] sm:$0xff] %v1168_v36  ;;  %1171 = vst [vmem:[%s10631_s7 + $0xf28] sm:$0xff] %v1170_v37  ;;  %v1172_v38 = vld [vmem:[%s10623_s6 + $0x1e60] sm:$0xff]  ;;  %v1174_v39 = vld [vmem:[%s10623_s6 + $0x1e68] sm:$0xff] }
 0x105   : > { %v1176_v40 = vld [vmem:[%s10623_s6 + $0x1e80] sm:$0xff]  ;;  %1173 = vst [vmem:[%s10631_s7 + $0xf30] sm:$0xff] %v1172_v38  ;;  %1175 = vst [vmem:[%s10631_s7 + $0xf38] sm:$0xff] %v1174_v39  ;;  %v1178_v41 = vld [vmem:[%s10623_s6 + $0x1e88] sm:$0xff] }
 0x106   : > { %1177 = vst [vmem:[%s10631_s7 + $0xf40] sm:$0xff] %v1176_v40  ;;  %v1180_v42 = vld [vmem:[%s10623_s6 + $0x1ea0] sm:$0xff]  ;;  %v1182_v43 = vld [vmem:[%s10623_s6 + $0x1ea8] sm:$0xff]  ;;  %1179 = vst [vmem:[%s10631_s7 + $0xf48] sm:$0xff] %v1178_v41 }
 0x107   : > { %1181 = vst [vmem:[%s10631_s7 + $0xf50] sm:$0xff] %v1180_v42  ;;  %1183 = vst [vmem:[%s10631_s7 + $0xf58] sm:$0xff] %v1182_v43  ;;  %v1184_v44 = vld [vmem:[%s10623_s6 + $0x1ec0] sm:$0xff]  ;;  %v1186_v45 = vld [vmem:[%s10623_s6 + $0x1ec8] sm:$0xff] }
 0x108   : > { %v1188_v46 = vld [vmem:[%s10623_s6 + $0x1ee0] sm:$0xff]  ;;  %1185 = vst [vmem:[%s10631_s7 + $0xf60] sm:$0xff] %v1184_v44  ;;  %1187 = vst [vmem:[%s10631_s7 + $0xf68] sm:$0xff] %v1186_v45  ;;  %v1190_v47 = vld [vmem:[%s10623_s6 + $0x1ee8] sm:$0xff] }
 0x109   : > { %1189 = vst [vmem:[%s10631_s7 + $0xf70] sm:$0xff] %v1188_v46  ;;  %v1192_v48 = vld [vmem:[%s10623_s6 + $0x1f00] sm:$0xff]  ;;  %v1194_v49 = vld [vmem:[%s10623_s6 + $0x1f08] sm:$0xff]  ;;  %1191 = vst [vmem:[%s10631_s7 + $0xf78] sm:$0xff] %v1190_v47 }
 0x10a   : > { %1193 = vst [vmem:[%s10631_s7 + $0xf80] sm:$0xff] %v1192_v48  ;;  %1195 = vst [vmem:[%s10631_s7 + $0xf88] sm:$0xff] %v1194_v49  ;;  %v1196_v50 = vld [vmem:[%s10623_s6 + $0x1f20] sm:$0xff]  ;;  %v1198_v51 = vld [vmem:[%s10623_s6 + $0x1f28] sm:$0xff] }
 0x10b   : > { %v1200_v52 = vld [vmem:[%s10623_s6 + $0x1f40] sm:$0xff]  ;;  %1197 = vst [vmem:[%s10631_s7 + $0xf90] sm:$0xff] %v1196_v50  ;;  %1199 = vst [vmem:[%s10631_s7 + $0xf98] sm:$0xff] %v1198_v51  ;;  %v1202_v53 = vld [vmem:[%s10623_s6 + $0x1f48] sm:$0xff] }
 0x10c   : > { %1201 = vst [vmem:[%s10631_s7 + $0xfa0] sm:$0xff] %v1200_v52  ;;  %v1204_v54 = vld [vmem:[%s10623_s6 + $0x1f60] sm:$0xff]  ;;  %v1206_v55 = vld [vmem:[%s10623_s6 + $0x1f68] sm:$0xff]  ;;  %1203 = vst [vmem:[%s10631_s7 + $0xfa8] sm:$0xff] %v1202_v53 }
 0x10d   : > { %1205 = vst [vmem:[%s10631_s7 + $0xfb0] sm:$0xff] %v1204_v54  ;;  %1207 = vst [vmem:[%s10631_s7 + $0xfb8] sm:$0xff] %v1206_v55  ;;  %v1208_v56 = vld [vmem:[%s10623_s6 + $0x1f80] sm:$0xff]  ;;  %v1210_v57 = vld [vmem:[%s10623_s6 + $0x1f88] sm:$0xff] }
 0x10e   : > { %v1212_v58 = vld [vmem:[%s10623_s6 + $0x1fa0] sm:$0xff]  ;;  %1209 = vst [vmem:[%s10631_s7 + $0xfc0] sm:$0xff] %v1208_v56  ;;  %1211 = vst [vmem:[%s10631_s7 + $0xfc8] sm:$0xff] %v1210_v57  ;;  %v1214_v59 = vld [vmem:[%s10623_s6 + $0x1fa8] sm:$0xff] }
 0x10f   : > { %1213 = vst [vmem:[%s10631_s7 + $0xfd0] sm:$0xff] %v1212_v58  ;;  %v1216_v60 = vld [vmem:[%s10623_s6 + $0x1fc0] sm:$0xff]  ;;  %v1218_v61 = vld [vmem:[%s10623_s6 + $0x1fc8] sm:$0xff]  ;;  %1215 = vst [vmem:[%s10631_s7 + $0xfd8] sm:$0xff] %v1214_v59 }
 0x110   : > { %1217 = vst [vmem:[%s10631_s7 + $0xfe0] sm:$0xff] %v1216_v60  ;;  %1219 = vst [vmem:[%s10631_s7 + $0xfe8] sm:$0xff] %v1218_v61  ;;  %v1220_v62 = vld [vmem:[%s10623_s6 + $0x1fe0] sm:$0xff]  ;;  %v1222_v63 = vld [vmem:[%s10623_s6 + $0x1fe8] sm:$0xff] }
 0x111   : > { %v1224_v0 = vld [vmem:[%s10623_s6 + $0x2000] sm:$0xff]  ;;  %1221 = vst [vmem:[%s10631_s7 + $0xff0] sm:$0xff] %v1220_v62  ;;  %1223 = vst [vmem:[%s10631_s7 + $0xff8] sm:$0xff] %v1222_v63  ;;  %v1226_v1 = vld [vmem:[%s10623_s6 + $0x2008] sm:$0xff] }
 0x112   : > { %1225 = vst [vmem:[%s10631_s7 + $0x1000] sm:$0xff] %v1224_v0  ;;  %v1228_v2 = vld [vmem:[%s10623_s6 + $0x2020] sm:$0xff]  ;;  %v1230_v3 = vld [vmem:[%s10623_s6 + $0x2028] sm:$0xff]  ;;  %1227 = vst [vmem:[%s10631_s7 + $0x1008] sm:$0xff] %v1226_v1 }
 0x113   : > { %1229 = vst [vmem:[%s10631_s7 + $0x1010] sm:$0xff] %v1228_v2  ;;  %1231 = vst [vmem:[%s10631_s7 + $0x1018] sm:$0xff] %v1230_v3  ;;  %v1232_v4 = vld [vmem:[%s10623_s6 + $0x2040] sm:$0xff]  ;;  %v1234_v5 = vld [vmem:[%s10623_s6 + $0x2048] sm:$0xff] }
 0x114   : > { %v1236_v6 = vld [vmem:[%s10623_s6 + $0x2060] sm:$0xff]  ;;  %1233 = vst [vmem:[%s10631_s7 + $0x1020] sm:$0xff] %v1232_v4  ;;  %1235 = vst [vmem:[%s10631_s7 + $0x1028] sm:$0xff] %v1234_v5  ;;  %v1238_v7 = vld [vmem:[%s10623_s6 + $0x2068] sm:$0xff] }
 0x115   : > { %1237 = vst [vmem:[%s10631_s7 + $0x1030] sm:$0xff] %v1236_v6  ;;  %v1240_v8 = vld [vmem:[%s10623_s6 + $0x2080] sm:$0xff]  ;;  %v1242_v9 = vld [vmem:[%s10623_s6 + $0x2088] sm:$0xff]  ;;  %1239 = vst [vmem:[%s10631_s7 + $0x1038] sm:$0xff] %v1238_v7 }
 0x116   : > { %1241 = vst [vmem:[%s10631_s7 + $0x1040] sm:$0xff] %v1240_v8  ;;  %1243 = vst [vmem:[%s10631_s7 + $0x1048] sm:$0xff] %v1242_v9  ;;  %v1244_v10 = vld [vmem:[%s10623_s6 + $0x20a0] sm:$0xff]  ;;  %v1246_v11 = vld [vmem:[%s10623_s6 + $0x20a8] sm:$0xff] }
 0x117   : > { %v1248_v12 = vld [vmem:[%s10623_s6 + $0x20c0] sm:$0xff]  ;;  %1245 = vst [vmem:[%s10631_s7 + $0x1050] sm:$0xff] %v1244_v10  ;;  %1247 = vst [vmem:[%s10631_s7 + $0x1058] sm:$0xff] %v1246_v11  ;;  %v1250_v13 = vld [vmem:[%s10623_s6 + $0x20c8] sm:$0xff] }
 0x118   : > { %1249 = vst [vmem:[%s10631_s7 + $0x1060] sm:$0xff] %v1248_v12  ;;  %v1252_v14 = vld [vmem:[%s10623_s6 + $0x20e0] sm:$0xff]  ;;  %v1254_v15 = vld [vmem:[%s10623_s6 + $0x20e8] sm:$0xff]  ;;  %1251 = vst [vmem:[%s10631_s7 + $0x1068] sm:$0xff] %v1250_v13 }
 0x119   : > { %1253 = vst [vmem:[%s10631_s7 + $0x1070] sm:$0xff] %v1252_v14  ;;  %1255 = vst [vmem:[%s10631_s7 + $0x1078] sm:$0xff] %v1254_v15  ;;  %v1256_v16 = vld [vmem:[%s10623_s6 + $0x2100] sm:$0xff]  ;;  %v1258_v17 = vld [vmem:[%s10623_s6 + $0x2108] sm:$0xff] }
 0x11a   : > { %v1260_v18 = vld [vmem:[%s10623_s6 + $0x2120] sm:$0xff]  ;;  %1257 = vst [vmem:[%s10631_s7 + $0x1080] sm:$0xff] %v1256_v16  ;;  %1259 = vst [vmem:[%s10631_s7 + $0x1088] sm:$0xff] %v1258_v17  ;;  %v1262_v19 = vld [vmem:[%s10623_s6 + $0x2128] sm:$0xff] }
 0x11b   : > { %1261 = vst [vmem:[%s10631_s7 + $0x1090] sm:$0xff] %v1260_v18  ;;  %v1264_v20 = vld [vmem:[%s10623_s6 + $0x2140] sm:$0xff]  ;;  %v1266_v21 = vld [vmem:[%s10623_s6 + $0x2148] sm:$0xff]  ;;  %1263 = vst [vmem:[%s10631_s7 + $0x1098] sm:$0xff] %v1262_v19 }
 0x11c   : > { %1265 = vst [vmem:[%s10631_s7 + $0x10a0] sm:$0xff] %v1264_v20  ;;  %1267 = vst [vmem:[%s10631_s7 + $0x10a8] sm:$0xff] %v1266_v21  ;;  %v1268_v22 = vld [vmem:[%s10623_s6 + $0x2160] sm:$0xff]  ;;  %v1270_v23 = vld [vmem:[%s10623_s6 + $0x2168] sm:$0xff] }
 0x11d   : > { %v1272_v24 = vld [vmem:[%s10623_s6 + $0x2180] sm:$0xff]  ;;  %1269 = vst [vmem:[%s10631_s7 + $0x10b0] sm:$0xff] %v1268_v22  ;;  %1271 = vst [vmem:[%s10631_s7 + $0x10b8] sm:$0xff] %v1270_v23  ;;  %v1274_v25 = vld [vmem:[%s10623_s6 + $0x2188] sm:$0xff] }
 0x11e   : > { %1273 = vst [vmem:[%s10631_s7 + $0x10c0] sm:$0xff] %v1272_v24  ;;  %v1276_v26 = vld [vmem:[%s10623_s6 + $0x21a0] sm:$0xff]  ;;  %v1278_v27 = vld [vmem:[%s10623_s6 + $0x21a8] sm:$0xff]  ;;  %1275 = vst [vmem:[%s10631_s7 + $0x10c8] sm:$0xff] %v1274_v25 }
 0x11f   : > { %1277 = vst [vmem:[%s10631_s7 + $0x10d0] sm:$0xff] %v1276_v26  ;;  %1279 = vst [vmem:[%s10631_s7 + $0x10d8] sm:$0xff] %v1278_v27  ;;  %v1280_v28 = vld [vmem:[%s10623_s6 + $0x21c0] sm:$0xff]  ;;  %v1282_v29 = vld [vmem:[%s10623_s6 + $0x21c8] sm:$0xff] }
 0x120   : > { %v1284_v30 = vld [vmem:[%s10623_s6 + $0x21e0] sm:$0xff]  ;;  %1281 = vst [vmem:[%s10631_s7 + $0x10e0] sm:$0xff] %v1280_v28  ;;  %1283 = vst [vmem:[%s10631_s7 + $0x10e8] sm:$0xff] %v1282_v29  ;;  %v1286_v31 = vld [vmem:[%s10623_s6 + $0x21e8] sm:$0xff] }
 0x121   : > { %1285 = vst [vmem:[%s10631_s7 + $0x10f0] sm:$0xff] %v1284_v30  ;;  %v1288_v32 = vld [vmem:[%s10623_s6 + $0x2200] sm:$0xff]  ;;  %v1290_v33 = vld [vmem:[%s10623_s6 + $0x2208] sm:$0xff]  ;;  %1287 = vst [vmem:[%s10631_s7 + $0x10f8] sm:$0xff] %v1286_v31 }
 0x122   : > { %1289 = vst [vmem:[%s10631_s7 + $0x1100] sm:$0xff] %v1288_v32  ;;  %1291 = vst [vmem:[%s10631_s7 + $0x1108] sm:$0xff] %v1290_v33  ;;  %v1292_v34 = vld [vmem:[%s10623_s6 + $0x2220] sm:$0xff]  ;;  %v1294_v35 = vld [vmem:[%s10623_s6 + $0x2228] sm:$0xff] }
 0x123   : > { %v1296_v36 = vld [vmem:[%s10623_s6 + $0x2240] sm:$0xff]  ;;  %1293 = vst [vmem:[%s10631_s7 + $0x1110] sm:$0xff] %v1292_v34  ;;  %1295 = vst [vmem:[%s10631_s7 + $0x1118] sm:$0xff] %v1294_v35  ;;  %v1298_v37 = vld [vmem:[%s10623_s6 + $0x2248] sm:$0xff] }
 0x124   : > { %1297 = vst [vmem:[%s10631_s7 + $0x1120] sm:$0xff] %v1296_v36  ;;  %v1300_v38 = vld [vmem:[%s10623_s6 + $0x2260] sm:$0xff]  ;;  %v1302_v39 = vld [vmem:[%s10623_s6 + $0x2268] sm:$0xff]  ;;  %1299 = vst [vmem:[%s10631_s7 + $0x1128] sm:$0xff] %v1298_v37 }
 0x125   : > { %1301 = vst [vmem:[%s10631_s7 + $0x1130] sm:$0xff] %v1300_v38  ;;  %1303 = vst [vmem:[%s10631_s7 + $0x1138] sm:$0xff] %v1302_v39  ;;  %v1304_v40 = vld [vmem:[%s10623_s6 + $0x2280] sm:$0xff]  ;;  %v1306_v41 = vld [vmem:[%s10623_s6 + $0x2288] sm:$0xff] }
 0x126   : > { %v1308_v42 = vld [vmem:[%s10623_s6 + $0x22a0] sm:$0xff]  ;;  %1305 = vst [vmem:[%s10631_s7 + $0x1140] sm:$0xff] %v1304_v40  ;;  %1307 = vst [vmem:[%s10631_s7 + $0x1148] sm:$0xff] %v1306_v41  ;;  %v1310_v43 = vld [vmem:[%s10623_s6 + $0x22a8] sm:$0xff] }
 0x127   : > { %1309 = vst [vmem:[%s10631_s7 + $0x1150] sm:$0xff] %v1308_v42  ;;  %v1312_v44 = vld [vmem:[%s10623_s6 + $0x22c0] sm:$0xff]  ;;  %v1314_v45 = vld [vmem:[%s10623_s6 + $0x22c8] sm:$0xff]  ;;  %1311 = vst [vmem:[%s10631_s7 + $0x1158] sm:$0xff] %v1310_v43 }
 0x128   : > { %1313 = vst [vmem:[%s10631_s7 + $0x1160] sm:$0xff] %v1312_v44  ;;  %1315 = vst [vmem:[%s10631_s7 + $0x1168] sm:$0xff] %v1314_v45  ;;  %v1316_v46 = vld [vmem:[%s10623_s6 + $0x22e0] sm:$0xff]  ;;  %v1318_v47 = vld [vmem:[%s10623_s6 + $0x22e8] sm:$0xff] }
 0x129   : > { %v1320_v48 = vld [vmem:[%s10623_s6 + $0x2300] sm:$0xff]  ;;  %1317 = vst [vmem:[%s10631_s7 + $0x1170] sm:$0xff] %v1316_v46  ;;  %1319 = vst [vmem:[%s10631_s7 + $0x1178] sm:$0xff] %v1318_v47  ;;  %v1322_v49 = vld [vmem:[%s10623_s6 + $0x2308] sm:$0xff] }
 0x12a   : > { %1321 = vst [vmem:[%s10631_s7 + $0x1180] sm:$0xff] %v1320_v48  ;;  %v1324_v50 = vld [vmem:[%s10623_s6 + $0x2320] sm:$0xff]  ;;  %v1326_v51 = vld [vmem:[%s10623_s6 + $0x2328] sm:$0xff]  ;;  %1323 = vst [vmem:[%s10631_s7 + $0x1188] sm:$0xff] %v1322_v49 }
 0x12b   : > { %1325 = vst [vmem:[%s10631_s7 + $0x1190] sm:$0xff] %v1324_v50  ;;  %1327 = vst [vmem:[%s10631_s7 + $0x1198] sm:$0xff] %v1326_v51  ;;  %v1328_v52 = vld [vmem:[%s10623_s6 + $0x2340] sm:$0xff]  ;;  %v1330_v53 = vld [vmem:[%s10623_s6 + $0x2348] sm:$0xff] }
 0x12c   : > { %v1332_v54 = vld [vmem:[%s10623_s6 + $0x2360] sm:$0xff]  ;;  %1329 = vst [vmem:[%s10631_s7 + $0x11a0] sm:$0xff] %v1328_v52  ;;  %1331 = vst [vmem:[%s10631_s7 + $0x11a8] sm:$0xff] %v1330_v53  ;;  %v1334_v55 = vld [vmem:[%s10623_s6 + $0x2368] sm:$0xff] }
 0x12d   : > { %1333 = vst [vmem:[%s10631_s7 + $0x11b0] sm:$0xff] %v1332_v54  ;;  %v1336_v56 = vld [vmem:[%s10623_s6 + $0x2380] sm:$0xff]  ;;  %v1338_v57 = vld [vmem:[%s10623_s6 + $0x2388] sm:$0xff]  ;;  %1335 = vst [vmem:[%s10631_s7 + $0x11b8] sm:$0xff] %v1334_v55 }
 0x12e   : > { %1337 = vst [vmem:[%s10631_s7 + $0x11c0] sm:$0xff] %v1336_v56  ;;  %1339 = vst [vmem:[%s10631_s7 + $0x11c8] sm:$0xff] %v1338_v57  ;;  %v1340_v58 = vld [vmem:[%s10623_s6 + $0x23a0] sm:$0xff]  ;;  %v1342_v59 = vld [vmem:[%s10623_s6 + $0x23a8] sm:$0xff] }
 0x12f   : > { %v1344_v60 = vld [vmem:[%s10623_s6 + $0x23c0] sm:$0xff]  ;;  %1341 = vst [vmem:[%s10631_s7 + $0x11d0] sm:$0xff] %v1340_v58  ;;  %1343 = vst [vmem:[%s10631_s7 + $0x11d8] sm:$0xff] %v1342_v59  ;;  %v1346_v61 = vld [vmem:[%s10623_s6 + $0x23c8] sm:$0xff] }
 0x130   : > { %1345 = vst [vmem:[%s10631_s7 + $0x11e0] sm:$0xff] %v1344_v60  ;;  %v1348_v62 = vld [vmem:[%s10623_s6 + $0x23e0] sm:$0xff]  ;;  %v1350_v63 = vld [vmem:[%s10623_s6 + $0x23e8] sm:$0xff]  ;;  %1347 = vst [vmem:[%s10631_s7 + $0x11e8] sm:$0xff] %v1346_v61 }
 0x131   : > { %1349 = vst [vmem:[%s10631_s7 + $0x11f0] sm:$0xff] %v1348_v62  ;;  %1351 = vst [vmem:[%s10631_s7 + $0x11f8] sm:$0xff] %v1350_v63  ;;  %v1352_v0 = vld [vmem:[%s10623_s6 + $0x2400] sm:$0xff]  ;;  %v1354_v1 = vld [vmem:[%s10623_s6 + $0x2408] sm:$0xff] }
 0x132   : > { %v1356_v2 = vld [vmem:[%s10623_s6 + $0x2420] sm:$0xff]  ;;  %1353 = vst [vmem:[%s10631_s7 + $0x1200] sm:$0xff] %v1352_v0  ;;  %1355 = vst [vmem:[%s10631_s7 + $0x1208] sm:$0xff] %v1354_v1  ;;  %v1358_v3 = vld [vmem:[%s10623_s6 + $0x2428] sm:$0xff] }
 0x133   : > { %1357 = vst [vmem:[%s10631_s7 + $0x1210] sm:$0xff] %v1356_v2  ;;  %v1360_v4 = vld [vmem:[%s10623_s6 + $0x2440] sm:$0xff]  ;;  %v1362_v5 = vld [vmem:[%s10623_s6 + $0x2448] sm:$0xff]  ;;  %1359 = vst [vmem:[%s10631_s7 + $0x1218] sm:$0xff] %v1358_v3 }
 0x134   : > { %1361 = vst [vmem:[%s10631_s7 + $0x1220] sm:$0xff] %v1360_v4  ;;  %1363 = vst [vmem:[%s10631_s7 + $0x1228] sm:$0xff] %v1362_v5  ;;  %v1364_v6 = vld [vmem:[%s10623_s6 + $0x2460] sm:$0xff]  ;;  %v1366_v7 = vld [vmem:[%s10623_s6 + $0x2468] sm:$0xff] }
 0x135   : > { %v1368_v8 = vld [vmem:[%s10623_s6 + $0x2480] sm:$0xff]  ;;  %1365 = vst [vmem:[%s10631_s7 + $0x1230] sm:$0xff] %v1364_v6  ;;  %1367 = vst [vmem:[%s10631_s7 + $0x1238] sm:$0xff] %v1366_v7  ;;  %v1370_v9 = vld [vmem:[%s10623_s6 + $0x2488] sm:$0xff] }
 0x136   : > { %1369 = vst [vmem:[%s10631_s7 + $0x1240] sm:$0xff] %v1368_v8  ;;  %v1372_v10 = vld [vmem:[%s10623_s6 + $0x24a0] sm:$0xff]  ;;  %v1374_v11 = vld [vmem:[%s10623_s6 + $0x24a8] sm:$0xff]  ;;  %1371 = vst [vmem:[%s10631_s7 + $0x1248] sm:$0xff] %v1370_v9 }
 0x137   : > { %1373 = vst [vmem:[%s10631_s7 + $0x1250] sm:$0xff] %v1372_v10  ;;  %1375 = vst [vmem:[%s10631_s7 + $0x1258] sm:$0xff] %v1374_v11  ;;  %v1376_v12 = vld [vmem:[%s10623_s6 + $0x24c0] sm:$0xff]  ;;  %v1378_v13 = vld [vmem:[%s10623_s6 + $0x24c8] sm:$0xff] }
 0x138   : > { %v1380_v14 = vld [vmem:[%s10623_s6 + $0x24e0] sm:$0xff]  ;;  %1377 = vst [vmem:[%s10631_s7 + $0x1260] sm:$0xff] %v1376_v12  ;;  %1379 = vst [vmem:[%s10631_s7 + $0x1268] sm:$0xff] %v1378_v13  ;;  %v1382_v15 = vld [vmem:[%s10623_s6 + $0x24e8] sm:$0xff] }
 0x139   : > { %1381 = vst [vmem:[%s10631_s7 + $0x1270] sm:$0xff] %v1380_v14  ;;  %v1384_v16 = vld [vmem:[%s10623_s6 + $0x2500] sm:$0xff]  ;;  %v1386_v17 = vld [vmem:[%s10623_s6 + $0x2508] sm:$0xff]  ;;  %1383 = vst [vmem:[%s10631_s7 + $0x1278] sm:$0xff] %v1382_v15 }
 0x13a   : > { %1385 = vst [vmem:[%s10631_s7 + $0x1280] sm:$0xff] %v1384_v16  ;;  %1387 = vst [vmem:[%s10631_s7 + $0x1288] sm:$0xff] %v1386_v17  ;;  %v1388_v18 = vld [vmem:[%s10623_s6 + $0x2520] sm:$0xff]  ;;  %v1390_v19 = vld [vmem:[%s10623_s6 + $0x2528] sm:$0xff] }
 0x13b   : > { %v1392_v20 = vld [vmem:[%s10623_s6 + $0x2540] sm:$0xff]  ;;  %1389 = vst [vmem:[%s10631_s7 + $0x1290] sm:$0xff] %v1388_v18  ;;  %1391 = vst [vmem:[%s10631_s7 + $0x1298] sm:$0xff] %v1390_v19  ;;  %v1394_v21 = vld [vmem:[%s10623_s6 + $0x2548] sm:$0xff] }
 0x13c   : > { %1393 = vst [vmem:[%s10631_s7 + $0x12a0] sm:$0xff] %v1392_v20  ;;  %v1396_v22 = vld [vmem:[%s10623_s6 + $0x2560] sm:$0xff]  ;;  %v1398_v23 = vld [vmem:[%s10623_s6 + $0x2568] sm:$0xff]  ;;  %1395 = vst [vmem:[%s10631_s7 + $0x12a8] sm:$0xff] %v1394_v21 }
 0x13d   : > { %1397 = vst [vmem:[%s10631_s7 + $0x12b0] sm:$0xff] %v1396_v22  ;;  %1399 = vst [vmem:[%s10631_s7 + $0x12b8] sm:$0xff] %v1398_v23  ;;  %v1400_v24 = vld [vmem:[%s10623_s6 + $0x2580] sm:$0xff]  ;;  %v1402_v25 = vld [vmem:[%s10623_s6 + $0x2588] sm:$0xff] }
 0x13e   : > { %v1404_v26 = vld [vmem:[%s10623_s6 + $0x25a0] sm:$0xff]  ;;  %1401 = vst [vmem:[%s10631_s7 + $0x12c0] sm:$0xff] %v1400_v24  ;;  %1403 = vst [vmem:[%s10631_s7 + $0x12c8] sm:$0xff] %v1402_v25  ;;  %v1406_v27 = vld [vmem:[%s10623_s6 + $0x25a8] sm:$0xff] }
 0x13f   : > { %1405 = vst [vmem:[%s10631_s7 + $0x12d0] sm:$0xff] %v1404_v26  ;;  %v1408_v28 = vld [vmem:[%s10623_s6 + $0x25c0] sm:$0xff]  ;;  %v1410_v29 = vld [vmem:[%s10623_s6 + $0x25c8] sm:$0xff]  ;;  %1407 = vst [vmem:[%s10631_s7 + $0x12d8] sm:$0xff] %v1406_v27 }
 0x140   : > { %1409 = vst [vmem:[%s10631_s7 + $0x12e0] sm:$0xff] %v1408_v28  ;;  %1411 = vst [vmem:[%s10631_s7 + $0x12e8] sm:$0xff] %v1410_v29  ;;  %v1412_v30 = vld [vmem:[%s10623_s6 + $0x25e0] sm:$0xff]  ;;  %v1414_v31 = vld [vmem:[%s10623_s6 + $0x25e8] sm:$0xff] }
 0x141   : > { %v1416_v32 = vld [vmem:[%s10623_s6 + $0x2600] sm:$0xff]  ;;  %1413 = vst [vmem:[%s10631_s7 + $0x12f0] sm:$0xff] %v1412_v30  ;;  %1415 = vst [vmem:[%s10631_s7 + $0x12f8] sm:$0xff] %v1414_v31  ;;  %v1418_v33 = vld [vmem:[%s10623_s6 + $0x2608] sm:$0xff] }
 0x142   : > { %1417 = vst [vmem:[%s10631_s7 + $0x1300] sm:$0xff] %v1416_v32  ;;  %v1420_v34 = vld [vmem:[%s10623_s6 + $0x2620] sm:$0xff]  ;;  %v1422_v35 = vld [vmem:[%s10623_s6 + $0x2628] sm:$0xff]  ;;  %1419 = vst [vmem:[%s10631_s7 + $0x1308] sm:$0xff] %v1418_v33 }
 0x143   : > { %1421 = vst [vmem:[%s10631_s7 + $0x1310] sm:$0xff] %v1420_v34  ;;  %1423 = vst [vmem:[%s10631_s7 + $0x1318] sm:$0xff] %v1422_v35  ;;  %v1424_v36 = vld [vmem:[%s10623_s6 + $0x2640] sm:$0xff]  ;;  %v1426_v37 = vld [vmem:[%s10623_s6 + $0x2648] sm:$0xff] }
 0x144   : > { %v1428_v38 = vld [vmem:[%s10623_s6 + $0x2660] sm:$0xff]  ;;  %1425 = vst [vmem:[%s10631_s7 + $0x1320] sm:$0xff] %v1424_v36  ;;  %1427 = vst [vmem:[%s10631_s7 + $0x1328] sm:$0xff] %v1426_v37  ;;  %v1430_v39 = vld [vmem:[%s10623_s6 + $0x2668] sm:$0xff] }
 0x145   : > { %1429 = vst [vmem:[%s10631_s7 + $0x1330] sm:$0xff] %v1428_v38  ;;  %v1432_v40 = vld [vmem:[%s10623_s6 + $0x2680] sm:$0xff]  ;;  %v1434_v41 = vld [vmem:[%s10623_s6 + $0x2688] sm:$0xff]  ;;  %1431 = vst [vmem:[%s10631_s7 + $0x1338] sm:$0xff] %v1430_v39 }
 0x146   : > { %1433 = vst [vmem:[%s10631_s7 + $0x1340] sm:$0xff] %v1432_v40  ;;  %1435 = vst [vmem:[%s10631_s7 + $0x1348] sm:$0xff] %v1434_v41  ;;  %v1436_v42 = vld [vmem:[%s10623_s6 + $0x26a0] sm:$0xff]  ;;  %v1438_v43 = vld [vmem:[%s10623_s6 + $0x26a8] sm:$0xff] }
 0x147   : > { %v1440_v44 = vld [vmem:[%s10623_s6 + $0x26c0] sm:$0xff]  ;;  %1437 = vst [vmem:[%s10631_s7 + $0x1350] sm:$0xff] %v1436_v42  ;;  %1439 = vst [vmem:[%s10631_s7 + $0x1358] sm:$0xff] %v1438_v43  ;;  %v1442_v45 = vld [vmem:[%s10623_s6 + $0x26c8] sm:$0xff] }
 0x148   : > { %1441 = vst [vmem:[%s10631_s7 + $0x1360] sm:$0xff] %v1440_v44  ;;  %v1444_v46 = vld [vmem:[%s10623_s6 + $0x26e0] sm:$0xff]  ;;  %v1446_v47 = vld [vmem:[%s10623_s6 + $0x26e8] sm:$0xff]  ;;  %1443 = vst [vmem:[%s10631_s7 + $0x1368] sm:$0xff] %v1442_v45 }
 0x149   : > { %1445 = vst [vmem:[%s10631_s7 + $0x1370] sm:$0xff] %v1444_v46  ;;  %1447 = vst [vmem:[%s10631_s7 + $0x1378] sm:$0xff] %v1446_v47  ;;  %v1448_v48 = vld [vmem:[%s10623_s6 + $0x2700] sm:$0xff]  ;;  %v1450_v49 = vld [vmem:[%s10623_s6 + $0x2708] sm:$0xff] }
 0x14a   : > { %v1452_v50 = vld [vmem:[%s10623_s6 + $0x2720] sm:$0xff]  ;;  %1449 = vst [vmem:[%s10631_s7 + $0x1380] sm:$0xff] %v1448_v48  ;;  %1451 = vst [vmem:[%s10631_s7 + $0x1388] sm:$0xff] %v1450_v49  ;;  %v1454_v51 = vld [vmem:[%s10623_s6 + $0x2728] sm:$0xff] }
 0x14b   : > { %1453 = vst [vmem:[%s10631_s7 + $0x1390] sm:$0xff] %v1452_v50  ;;  %v1456_v52 = vld [vmem:[%s10623_s6 + $0x2740] sm:$0xff]  ;;  %v1458_v53 = vld [vmem:[%s10623_s6 + $0x2748] sm:$0xff]  ;;  %1455 = vst [vmem:[%s10631_s7 + $0x1398] sm:$0xff] %v1454_v51 }
 0x14c   : > { %1457 = vst [vmem:[%s10631_s7 + $0x13a0] sm:$0xff] %v1456_v52  ;;  %1459 = vst [vmem:[%s10631_s7 + $0x13a8] sm:$0xff] %v1458_v53  ;;  %v1460_v54 = vld [vmem:[%s10623_s6 + $0x2760] sm:$0xff]  ;;  %v1462_v55 = vld [vmem:[%s10623_s6 + $0x2768] sm:$0xff] }
 0x14d   : > { %v1464_v56 = vld [vmem:[%s10623_s6 + $0x2780] sm:$0xff]  ;;  %1461 = vst [vmem:[%s10631_s7 + $0x13b0] sm:$0xff] %v1460_v54  ;;  %1463 = vst [vmem:[%s10631_s7 + $0x13b8] sm:$0xff] %v1462_v55  ;;  %v1466_v57 = vld [vmem:[%s10623_s6 + $0x2788] sm:$0xff] }
 0x14e   : > { %1465 = vst [vmem:[%s10631_s7 + $0x13c0] sm:$0xff] %v1464_v56  ;;  %v1468_v58 = vld [vmem:[%s10623_s6 + $0x27a0] sm:$0xff]  ;;  %v1470_v59 = vld [vmem:[%s10623_s6 + $0x27a8] sm:$0xff]  ;;  %1467 = vst [vmem:[%s10631_s7 + $0x13c8] sm:$0xff] %v1466_v57 }
 0x14f   : > { %1469 = vst [vmem:[%s10631_s7 + $0x13d0] sm:$0xff] %v1468_v58  ;;  %1471 = vst [vmem:[%s10631_s7 + $0x13d8] sm:$0xff] %v1470_v59  ;;  %v1472_v60 = vld [vmem:[%s10623_s6 + $0x27c0] sm:$0xff]  ;;  %v1474_v61 = vld [vmem:[%s10623_s6 + $0x27c8] sm:$0xff] }
 0x150   : > { %v1476_v62 = vld [vmem:[%s10623_s6 + $0x27e0] sm:$0xff]  ;;  %1473 = vst [vmem:[%s10631_s7 + $0x13e0] sm:$0xff] %v1472_v60  ;;  %1475 = vst [vmem:[%s10631_s7 + $0x13e8] sm:$0xff] %v1474_v61  ;;  %v1478_v63 = vld [vmem:[%s10623_s6 + $0x27e8] sm:$0xff] }
 0x151   : > { %1477 = vst [vmem:[%s10631_s7 + $0x13f0] sm:$0xff] %v1476_v62  ;;  %v1480_v0 = vld [vmem:[%s10623_s6 + $0x2800] sm:$0xff]  ;;  %v1482_v1 = vld [vmem:[%s10623_s6 + $0x2808] sm:$0xff]  ;;  %1479 = vst [vmem:[%s10631_s7 + $0x13f8] sm:$0xff] %v1478_v63 }
 0x152   : > { %1481 = vst [vmem:[%s10631_s7 + $0x1400] sm:$0xff] %v1480_v0  ;;  %1483 = vst [vmem:[%s10631_s7 + $0x1408] sm:$0xff] %v1482_v1  ;;  %v1484_v2 = vld [vmem:[%s10623_s6 + $0x2820] sm:$0xff]  ;;  %v1486_v3 = vld [vmem:[%s10623_s6 + $0x2828] sm:$0xff] }
 0x153   : > { %v1488_v4 = vld [vmem:[%s10623_s6 + $0x2840] sm:$0xff]  ;;  %1485 = vst [vmem:[%s10631_s7 + $0x1410] sm:$0xff] %v1484_v2  ;;  %1487 = vst [vmem:[%s10631_s7 + $0x1418] sm:$0xff] %v1486_v3  ;;  %v1490_v5 = vld [vmem:[%s10623_s6 + $0x2848] sm:$0xff] }
 0x154   : > { %1489 = vst [vmem:[%s10631_s7 + $0x1420] sm:$0xff] %v1488_v4  ;;  %v1492_v6 = vld [vmem:[%s10623_s6 + $0x2860] sm:$0xff]  ;;  %v1494_v7 = vld [vmem:[%s10623_s6 + $0x2868] sm:$0xff]  ;;  %1491 = vst [vmem:[%s10631_s7 + $0x1428] sm:$0xff] %v1490_v5 }
 0x155   : > { %1493 = vst [vmem:[%s10631_s7 + $0x1430] sm:$0xff] %v1492_v6  ;;  %1495 = vst [vmem:[%s10631_s7 + $0x1438] sm:$0xff] %v1494_v7  ;;  %v1496_v8 = vld [vmem:[%s10623_s6 + $0x2880] sm:$0xff]  ;;  %v1498_v9 = vld [vmem:[%s10623_s6 + $0x2888] sm:$0xff] }
 0x156   : > { %v1500_v10 = vld [vmem:[%s10623_s6 + $0x28a0] sm:$0xff]  ;;  %1497 = vst [vmem:[%s10631_s7 + $0x1440] sm:$0xff] %v1496_v8  ;;  %1499 = vst [vmem:[%s10631_s7 + $0x1448] sm:$0xff] %v1498_v9  ;;  %v1502_v11 = vld [vmem:[%s10623_s6 + $0x28a8] sm:$0xff] }
 0x157   : > { %1501 = vst [vmem:[%s10631_s7 + $0x1450] sm:$0xff] %v1500_v10  ;;  %v1504_v12 = vld [vmem:[%s10623_s6 + $0x28c0] sm:$0xff]  ;;  %v1506_v13 = vld [vmem:[%s10623_s6 + $0x28c8] sm:$0xff]  ;;  %1503 = vst [vmem:[%s10631_s7 + $0x1458] sm:$0xff] %v1502_v11 }
 0x158   : > { %1505 = vst [vmem:[%s10631_s7 + $0x1460] sm:$0xff] %v1504_v12  ;;  %1507 = vst [vmem:[%s10631_s7 + $0x1468] sm:$0xff] %v1506_v13  ;;  %v1508_v14 = vld [vmem:[%s10623_s6 + $0x28e0] sm:$0xff]  ;;  %v1510_v15 = vld [vmem:[%s10623_s6 + $0x28e8] sm:$0xff] }
 0x159   : > { %v1512_v16 = vld [vmem:[%s10623_s6 + $0x2900] sm:$0xff]  ;;  %1509 = vst [vmem:[%s10631_s7 + $0x1470] sm:$0xff] %v1508_v14  ;;  %1511 = vst [vmem:[%s10631_s7 + $0x1478] sm:$0xff] %v1510_v15  ;;  %v1514_v17 = vld [vmem:[%s10623_s6 + $0x2908] sm:$0xff] }
 0x15a   : > { %1513 = vst [vmem:[%s10631_s7 + $0x1480] sm:$0xff] %v1512_v16  ;;  %v1516_v18 = vld [vmem:[%s10623_s6 + $0x2920] sm:$0xff]  ;;  %v1518_v19 = vld [vmem:[%s10623_s6 + $0x2928] sm:$0xff]  ;;  %1515 = vst [vmem:[%s10631_s7 + $0x1488] sm:$0xff] %v1514_v17 }
 0x15b   : > { %1517 = vst [vmem:[%s10631_s7 + $0x1490] sm:$0xff] %v1516_v18  ;;  %1519 = vst [vmem:[%s10631_s7 + $0x1498] sm:$0xff] %v1518_v19  ;;  %v1520_v20 = vld [vmem:[%s10623_s6 + $0x2940] sm:$0xff]  ;;  %v1522_v21 = vld [vmem:[%s10623_s6 + $0x2948] sm:$0xff] }
 0x15c   : > { %v1524_v22 = vld [vmem:[%s10623_s6 + $0x2960] sm:$0xff]  ;;  %1521 = vst [vmem:[%s10631_s7 + $0x14a0] sm:$0xff] %v1520_v20  ;;  %1523 = vst [vmem:[%s10631_s7 + $0x14a8] sm:$0xff] %v1522_v21  ;;  %v1526_v23 = vld [vmem:[%s10623_s6 + $0x2968] sm:$0xff] }
 0x15d   : > { %1525 = vst [vmem:[%s10631_s7 + $0x14b0] sm:$0xff] %v1524_v22  ;;  %v1528_v24 = vld [vmem:[%s10623_s6 + $0x2980] sm:$0xff]  ;;  %v1530_v25 = vld [vmem:[%s10623_s6 + $0x2988] sm:$0xff]  ;;  %1527 = vst [vmem:[%s10631_s7 + $0x14b8] sm:$0xff] %v1526_v23 }
 0x15e   : > { %1529 = vst [vmem:[%s10631_s7 + $0x14c0] sm:$0xff] %v1528_v24  ;;  %1531 = vst [vmem:[%s10631_s7 + $0x14c8] sm:$0xff] %v1530_v25  ;;  %v1532_v26 = vld [vmem:[%s10623_s6 + $0x29a0] sm:$0xff]  ;;  %v1534_v27 = vld [vmem:[%s10623_s6 + $0x29a8] sm:$0xff] }
 0x15f   : > { %v1536_v28 = vld [vmem:[%s10623_s6 + $0x29c0] sm:$0xff]  ;;  %1533 = vst [vmem:[%s10631_s7 + $0x14d0] sm:$0xff] %v1532_v26  ;;  %1535 = vst [vmem:[%s10631_s7 + $0x14d8] sm:$0xff] %v1534_v27  ;;  %v1538_v29 = vld [vmem:[%s10623_s6 + $0x29c8] sm:$0xff] }
 0x160   : > { %1537 = vst [vmem:[%s10631_s7 + $0x14e0] sm:$0xff] %v1536_v28  ;;  %v1540_v30 = vld [vmem:[%s10623_s6 + $0x29e0] sm:$0xff]  ;;  %v1542_v31 = vld [vmem:[%s10623_s6 + $0x29e8] sm:$0xff]  ;;  %1539 = vst [vmem:[%s10631_s7 + $0x14e8] sm:$0xff] %v1538_v29 }
 0x161   : > { %1541 = vst [vmem:[%s10631_s7 + $0x14f0] sm:$0xff] %v1540_v30  ;;  %1543 = vst [vmem:[%s10631_s7 + $0x14f8] sm:$0xff] %v1542_v31  ;;  %v1544_v32 = vld [vmem:[%s10623_s6 + $0x2a00] sm:$0xff]  ;;  %v1546_v33 = vld [vmem:[%s10623_s6 + $0x2a08] sm:$0xff] }
 0x162   : > { %v1548_v34 = vld [vmem:[%s10623_s6 + $0x2a20] sm:$0xff]  ;;  %1545 = vst [vmem:[%s10631_s7 + $0x1500] sm:$0xff] %v1544_v32  ;;  %1547 = vst [vmem:[%s10631_s7 + $0x1508] sm:$0xff] %v1546_v33  ;;  %v1550_v35 = vld [vmem:[%s10623_s6 + $0x2a28] sm:$0xff] }
 0x163   : > { %1549 = vst [vmem:[%s10631_s7 + $0x1510] sm:$0xff] %v1548_v34  ;;  %v1552_v36 = vld [vmem:[%s10623_s6 + $0x2a40] sm:$0xff]  ;;  %v1554_v37 = vld [vmem:[%s10623_s6 + $0x2a48] sm:$0xff]  ;;  %1551 = vst [vmem:[%s10631_s7 + $0x1518] sm:$0xff] %v1550_v35 }
 0x164   : > { %1553 = vst [vmem:[%s10631_s7 + $0x1520] sm:$0xff] %v1552_v36  ;;  %1555 = vst [vmem:[%s10631_s7 + $0x1528] sm:$0xff] %v1554_v37  ;;  %v1556_v38 = vld [vmem:[%s10623_s6 + $0x2a60] sm:$0xff]  ;;  %v1558_v39 = vld [vmem:[%s10623_s6 + $0x2a68] sm:$0xff] }
 0x165   : > { %v1560_v40 = vld [vmem:[%s10623_s6 + $0x2a80] sm:$0xff]  ;;  %1557 = vst [vmem:[%s10631_s7 + $0x1530] sm:$0xff] %v1556_v38  ;;  %1559 = vst [vmem:[%s10631_s7 + $0x1538] sm:$0xff] %v1558_v39  ;;  %v1562_v41 = vld [vmem:[%s10623_s6 + $0x2a88] sm:$0xff] }
 0x166   : > { %1561 = vst [vmem:[%s10631_s7 + $0x1540] sm:$0xff] %v1560_v40  ;;  %v1564_v42 = vld [vmem:[%s10623_s6 + $0x2aa0] sm:$0xff]  ;;  %v1566_v43 = vld [vmem:[%s10623_s6 + $0x2aa8] sm:$0xff]  ;;  %1563 = vst [vmem:[%s10631_s7 + $0x1548] sm:$0xff] %v1562_v41 }
 0x167   : > { %1565 = vst [vmem:[%s10631_s7 + $0x1550] sm:$0xff] %v1564_v42  ;;  %1567 = vst [vmem:[%s10631_s7 + $0x1558] sm:$0xff] %v1566_v43  ;;  %v1568_v44 = vld [vmem:[%s10623_s6 + $0x2ac0] sm:$0xff]  ;;  %v1570_v45 = vld [vmem:[%s10623_s6 + $0x2ac8] sm:$0xff] }
 0x168   : > { %v1572_v46 = vld [vmem:[%s10623_s6 + $0x2ae0] sm:$0xff]  ;;  %1569 = vst [vmem:[%s10631_s7 + $0x1560] sm:$0xff] %v1568_v44  ;;  %1571 = vst [vmem:[%s10631_s7 + $0x1568] sm:$0xff] %v1570_v45  ;;  %v1574_v47 = vld [vmem:[%s10623_s6 + $0x2ae8] sm:$0xff] }
 0x169   : > { %1573 = vst [vmem:[%s10631_s7 + $0x1570] sm:$0xff] %v1572_v46  ;;  %v1576_v48 = vld [vmem:[%s10623_s6 + $0x2b00] sm:$0xff]  ;;  %v1578_v49 = vld [vmem:[%s10623_s6 + $0x2b08] sm:$0xff]  ;;  %1575 = vst [vmem:[%s10631_s7 + $0x1578] sm:$0xff] %v1574_v47 }
 0x16a   : > { %1577 = vst [vmem:[%s10631_s7 + $0x1580] sm:$0xff] %v1576_v48  ;;  %1579 = vst [vmem:[%s10631_s7 + $0x1588] sm:$0xff] %v1578_v49  ;;  %v1580_v50 = vld [vmem:[%s10623_s6 + $0x2b20] sm:$0xff]  ;;  %v1582_v51 = vld [vmem:[%s10623_s6 + $0x2b28] sm:$0xff] }
 0x16b   : > { %v1584_v52 = vld [vmem:[%s10623_s6 + $0x2b40] sm:$0xff]  ;;  %1581 = vst [vmem:[%s10631_s7 + $0x1590] sm:$0xff] %v1580_v50  ;;  %1583 = vst [vmem:[%s10631_s7 + $0x1598] sm:$0xff] %v1582_v51  ;;  %v1586_v53 = vld [vmem:[%s10623_s6 + $0x2b48] sm:$0xff] }
 0x16c   : > { %1585 = vst [vmem:[%s10631_s7 + $0x15a0] sm:$0xff] %v1584_v52  ;;  %v1588_v54 = vld [vmem:[%s10623_s6 + $0x2b60] sm:$0xff]  ;;  %v1590_v55 = vld [vmem:[%s10623_s6 + $0x2b68] sm:$0xff]  ;;  %1587 = vst [vmem:[%s10631_s7 + $0x15a8] sm:$0xff] %v1586_v53 }
 0x16d   : > { %1589 = vst [vmem:[%s10631_s7 + $0x15b0] sm:$0xff] %v1588_v54  ;;  %1591 = vst [vmem:[%s10631_s7 + $0x15b8] sm:$0xff] %v1590_v55  ;;  %v1592_v56 = vld [vmem:[%s10623_s6 + $0x2b80] sm:$0xff]  ;;  %v1594_v57 = vld [vmem:[%s10623_s6 + $0x2b88] sm:$0xff] }
 0x16e   : > { %v1596_v58 = vld [vmem:[%s10623_s6 + $0x2ba0] sm:$0xff]  ;;  %1593 = vst [vmem:[%s10631_s7 + $0x15c0] sm:$0xff] %v1592_v56  ;;  %1595 = vst [vmem:[%s10631_s7 + $0x15c8] sm:$0xff] %v1594_v57  ;;  %v1598_v59 = vld [vmem:[%s10623_s6 + $0x2ba8] sm:$0xff] }
 0x16f   : > { %1597 = vst [vmem:[%s10631_s7 + $0x15d0] sm:$0xff] %v1596_v58  ;;  %v1600_v60 = vld [vmem:[%s10623_s6 + $0x2bc0] sm:$0xff]  ;;  %v1602_v61 = vld [vmem:[%s10623_s6 + $0x2bc8] sm:$0xff]  ;;  %1599 = vst [vmem:[%s10631_s7 + $0x15d8] sm:$0xff] %v1598_v59 }
 0x170   : > { %1601 = vst [vmem:[%s10631_s7 + $0x15e0] sm:$0xff] %v1600_v60  ;;  %1603 = vst [vmem:[%s10631_s7 + $0x15e8] sm:$0xff] %v1602_v61  ;;  %v1604_v62 = vld [vmem:[%s10623_s6 + $0x2be0] sm:$0xff]  ;;  %v1606_v63 = vld [vmem:[%s10623_s6 + $0x2be8] sm:$0xff] }
 0x171   : > { %v1608_v0 = vld [vmem:[%s10623_s6 + $0x2c00] sm:$0xff]  ;;  %1605 = vst [vmem:[%s10631_s7 + $0x15f0] sm:$0xff] %v1604_v62  ;;  %1607 = vst [vmem:[%s10631_s7 + $0x15f8] sm:$0xff] %v1606_v63  ;;  %v1610_v1 = vld [vmem:[%s10623_s6 + $0x2c08] sm:$0xff] }
 0x172   : > { %1609 = vst [vmem:[%s10631_s7 + $0x1600] sm:$0xff] %v1608_v0  ;;  %v1612_v2 = vld [vmem:[%s10623_s6 + $0x2c20] sm:$0xff]  ;;  %v1614_v3 = vld [vmem:[%s10623_s6 + $0x2c28] sm:$0xff]  ;;  %1611 = vst [vmem:[%s10631_s7 + $0x1608] sm:$0xff] %v1610_v1 }
 0x173   : > { %1613 = vst [vmem:[%s10631_s7 + $0x1610] sm:$0xff] %v1612_v2  ;;  %1615 = vst [vmem:[%s10631_s7 + $0x1618] sm:$0xff] %v1614_v3  ;;  %v1616_v4 = vld [vmem:[%s10623_s6 + $0x2c40] sm:$0xff]  ;;  %v1618_v5 = vld [vmem:[%s10623_s6 + $0x2c48] sm:$0xff] }
 0x174   : > { %v1620_v6 = vld [vmem:[%s10623_s6 + $0x2c60] sm:$0xff]  ;;  %1617 = vst [vmem:[%s10631_s7 + $0x1620] sm:$0xff] %v1616_v4  ;;  %1619 = vst [vmem:[%s10631_s7 + $0x1628] sm:$0xff] %v1618_v5  ;;  %v1622_v7 = vld [vmem:[%s10623_s6 + $0x2c68] sm:$0xff] }
 0x175   : > { %1621 = vst [vmem:[%s10631_s7 + $0x1630] sm:$0xff] %v1620_v6  ;;  %v1624_v8 = vld [vmem:[%s10623_s6 + $0x2c80] sm:$0xff]  ;;  %v1626_v9 = vld [vmem:[%s10623_s6 + $0x2c88] sm:$0xff]  ;;  %1623 = vst [vmem:[%s10631_s7 + $0x1638] sm:$0xff] %v1622_v7 }
 0x176   : > { %1625 = vst [vmem:[%s10631_s7 + $0x1640] sm:$0xff] %v1624_v8  ;;  %1627 = vst [vmem:[%s10631_s7 + $0x1648] sm:$0xff] %v1626_v9  ;;  %v1628_v10 = vld [vmem:[%s10623_s6 + $0x2ca0] sm:$0xff]  ;;  %v1630_v11 = vld [vmem:[%s10623_s6 + $0x2ca8] sm:$0xff] }
 0x177   : > { %v1632_v12 = vld [vmem:[%s10623_s6 + $0x2cc0] sm:$0xff]  ;;  %1629 = vst [vmem:[%s10631_s7 + $0x1650] sm:$0xff] %v1628_v10  ;;  %1631 = vst [vmem:[%s10631_s7 + $0x1658] sm:$0xff] %v1630_v11  ;;  %v1634_v13 = vld [vmem:[%s10623_s6 + $0x2cc8] sm:$0xff] }
 0x178   : > { %1633 = vst [vmem:[%s10631_s7 + $0x1660] sm:$0xff] %v1632_v12  ;;  %v1636_v14 = vld [vmem:[%s10623_s6 + $0x2ce0] sm:$0xff]  ;;  %v1638_v15 = vld [vmem:[%s10623_s6 + $0x2ce8] sm:$0xff]  ;;  %1635 = vst [vmem:[%s10631_s7 + $0x1668] sm:$0xff] %v1634_v13 }
 0x179   : > { %1637 = vst [vmem:[%s10631_s7 + $0x1670] sm:$0xff] %v1636_v14  ;;  %1639 = vst [vmem:[%s10631_s7 + $0x1678] sm:$0xff] %v1638_v15  ;;  %v1640_v16 = vld [vmem:[%s10623_s6 + $0x2d00] sm:$0xff]  ;;  %v1642_v17 = vld [vmem:[%s10623_s6 + $0x2d08] sm:$0xff] }
 0x17a   : > { %v1644_v18 = vld [vmem:[%s10623_s6 + $0x2d20] sm:$0xff]  ;;  %1641 = vst [vmem:[%s10631_s7 + $0x1680] sm:$0xff] %v1640_v16  ;;  %1643 = vst [vmem:[%s10631_s7 + $0x1688] sm:$0xff] %v1642_v17  ;;  %v1646_v19 = vld [vmem:[%s10623_s6 + $0x2d28] sm:$0xff] }
 0x17b   : > { %1645 = vst [vmem:[%s10631_s7 + $0x1690] sm:$0xff] %v1644_v18  ;;  %v1648_v20 = vld [vmem:[%s10623_s6 + $0x2d40] sm:$0xff]  ;;  %v1650_v21 = vld [vmem:[%s10623_s6 + $0x2d48] sm:$0xff]  ;;  %1647 = vst [vmem:[%s10631_s7 + $0x1698] sm:$0xff] %v1646_v19 }
 0x17c   : > { %1649 = vst [vmem:[%s10631_s7 + $0x16a0] sm:$0xff] %v1648_v20  ;;  %1651 = vst [vmem:[%s10631_s7 + $0x16a8] sm:$0xff] %v1650_v21  ;;  %v1652_v22 = vld [vmem:[%s10623_s6 + $0x2d60] sm:$0xff]  ;;  %v1654_v23 = vld [vmem:[%s10623_s6 + $0x2d68] sm:$0xff] }
 0x17d   : > { %v1656_v24 = vld [vmem:[%s10623_s6 + $0x2d80] sm:$0xff]  ;;  %1653 = vst [vmem:[%s10631_s7 + $0x16b0] sm:$0xff] %v1652_v22  ;;  %1655 = vst [vmem:[%s10631_s7 + $0x16b8] sm:$0xff] %v1654_v23  ;;  %v1658_v25 = vld [vmem:[%s10623_s6 + $0x2d88] sm:$0xff] }
 0x17e   : > { %1657 = vst [vmem:[%s10631_s7 + $0x16c0] sm:$0xff] %v1656_v24  ;;  %v1660_v26 = vld [vmem:[%s10623_s6 + $0x2da0] sm:$0xff]  ;;  %v1662_v27 = vld [vmem:[%s10623_s6 + $0x2da8] sm:$0xff]  ;;  %1659 = vst [vmem:[%s10631_s7 + $0x16c8] sm:$0xff] %v1658_v25 }
 0x17f   : > { %1661 = vst [vmem:[%s10631_s7 + $0x16d0] sm:$0xff] %v1660_v26  ;;  %1663 = vst [vmem:[%s10631_s7 + $0x16d8] sm:$0xff] %v1662_v27  ;;  %v1664_v28 = vld [vmem:[%s10623_s6 + $0x2dc0] sm:$0xff]  ;;  %v1666_v29 = vld [vmem:[%s10623_s6 + $0x2dc8] sm:$0xff] }
 0x180   : > { %v1668_v30 = vld [vmem:[%s10623_s6 + $0x2de0] sm:$0xff]  ;;  %1665 = vst [vmem:[%s10631_s7 + $0x16e0] sm:$0xff] %v1664_v28  ;;  %1667 = vst [vmem:[%s10631_s7 + $0x16e8] sm:$0xff] %v1666_v29  ;;  %v1670_v31 = vld [vmem:[%s10623_s6 + $0x2de8] sm:$0xff] }
 0x181   : > { %1669 = vst [vmem:[%s10631_s7 + $0x16f0] sm:$0xff] %v1668_v30  ;;  %v1672_v32 = vld [vmem:[%s10623_s6 + $0x2e00] sm:$0xff]  ;;  %v1674_v33 = vld [vmem:[%s10623_s6 + $0x2e08] sm:$0xff]  ;;  %1671 = vst [vmem:[%s10631_s7 + $0x16f8] sm:$0xff] %v1670_v31 }
 0x182   : > { %1673 = vst [vmem:[%s10631_s7 + $0x1700] sm:$0xff] %v1672_v32  ;;  %1675 = vst [vmem:[%s10631_s7 + $0x1708] sm:$0xff] %v1674_v33  ;;  %v1676_v34 = vld [vmem:[%s10623_s6 + $0x2e20] sm:$0xff]  ;;  %v1678_v35 = vld [vmem:[%s10623_s6 + $0x2e28] sm:$0xff] }
 0x183   : > { %v1680_v36 = vld [vmem:[%s10623_s6 + $0x2e40] sm:$0xff]  ;;  %1677 = vst [vmem:[%s10631_s7 + $0x1710] sm:$0xff] %v1676_v34  ;;  %1679 = vst [vmem:[%s10631_s7 + $0x1718] sm:$0xff] %v1678_v35  ;;  %v1682_v37 = vld [vmem:[%s10623_s6 + $0x2e48] sm:$0xff] }
 0x184   : > { %1681 = vst [vmem:[%s10631_s7 + $0x1720] sm:$0xff] %v1680_v36  ;;  %v1684_v38 = vld [vmem:[%s10623_s6 + $0x2e60] sm:$0xff]  ;;  %v1686_v39 = vld [vmem:[%s10623_s6 + $0x2e68] sm:$0xff]  ;;  %1683 = vst [vmem:[%s10631_s7 + $0x1728] sm:$0xff] %v1682_v37 }
 0x185   : > { %1685 = vst [vmem:[%s10631_s7 + $0x1730] sm:$0xff] %v1684_v38  ;;  %1687 = vst [vmem:[%s10631_s7 + $0x1738] sm:$0xff] %v1686_v39  ;;  %v1688_v40 = vld [vmem:[%s10623_s6 + $0x2e80] sm:$0xff]  ;;  %v1690_v41 = vld [vmem:[%s10623_s6 + $0x2e88] sm:$0xff] }
 0x186   : > { %v1692_v42 = vld [vmem:[%s10623_s6 + $0x2ea0] sm:$0xff]  ;;  %1689 = vst [vmem:[%s10631_s7 + $0x1740] sm:$0xff] %v1688_v40  ;;  %1691 = vst [vmem:[%s10631_s7 + $0x1748] sm:$0xff] %v1690_v41  ;;  %v1694_v43 = vld [vmem:[%s10623_s6 + $0x2ea8] sm:$0xff] }
 0x187   : > { %1693 = vst [vmem:[%s10631_s7 + $0x1750] sm:$0xff] %v1692_v42  ;;  %v1696_v44 = vld [vmem:[%s10623_s6 + $0x2ec0] sm:$0xff]  ;;  %v1698_v45 = vld [vmem:[%s10623_s6 + $0x2ec8] sm:$0xff]  ;;  %1695 = vst [vmem:[%s10631_s7 + $0x1758] sm:$0xff] %v1694_v43 }
 0x188   : > { %1697 = vst [vmem:[%s10631_s7 + $0x1760] sm:$0xff] %v1696_v44  ;;  %1699 = vst [vmem:[%s10631_s7 + $0x1768] sm:$0xff] %v1698_v45  ;;  %v1700_v46 = vld [vmem:[%s10623_s6 + $0x2ee0] sm:$0xff]  ;;  %v1702_v47 = vld [vmem:[%s10623_s6 + $0x2ee8] sm:$0xff] }
 0x189   : > { %v1704_v48 = vld [vmem:[%s10623_s6 + $0x2f00] sm:$0xff]  ;;  %1701 = vst [vmem:[%s10631_s7 + $0x1770] sm:$0xff] %v1700_v46  ;;  %1703 = vst [vmem:[%s10631_s7 + $0x1778] sm:$0xff] %v1702_v47  ;;  %v1706_v49 = vld [vmem:[%s10623_s6 + $0x2f08] sm:$0xff] }
 0x18a   : > { %1705 = vst [vmem:[%s10631_s7 + $0x1780] sm:$0xff] %v1704_v48  ;;  %v1708_v50 = vld [vmem:[%s10623_s6 + $0x2f20] sm:$0xff]  ;;  %v1710_v51 = vld [vmem:[%s10623_s6 + $0x2f28] sm:$0xff]  ;;  %1707 = vst [vmem:[%s10631_s7 + $0x1788] sm:$0xff] %v1706_v49 }
 0x18b   : > { %1709 = vst [vmem:[%s10631_s7 + $0x1790] sm:$0xff] %v1708_v50  ;;  %1711 = vst [vmem:[%s10631_s7 + $0x1798] sm:$0xff] %v1710_v51  ;;  %v1712_v52 = vld [vmem:[%s10623_s6 + $0x2f40] sm:$0xff]  ;;  %v1714_v53 = vld [vmem:[%s10623_s6 + $0x2f48] sm:$0xff] }
 0x18c   : > { %v1716_v54 = vld [vmem:[%s10623_s6 + $0x2f60] sm:$0xff]  ;;  %1713 = vst [vmem:[%s10631_s7 + $0x17a0] sm:$0xff] %v1712_v52  ;;  %1715 = vst [vmem:[%s10631_s7 + $0x17a8] sm:$0xff] %v1714_v53  ;;  %v1718_v55 = vld [vmem:[%s10623_s6 + $0x2f68] sm:$0xff] }
 0x18d   : > { %1717 = vst [vmem:[%s10631_s7 + $0x17b0] sm:$0xff] %v1716_v54  ;;  %v1720_v56 = vld [vmem:[%s10623_s6 + $0x2f80] sm:$0xff]  ;;  %v1722_v57 = vld [vmem:[%s10623_s6 + $0x2f88] sm:$0xff]  ;;  %1719 = vst [vmem:[%s10631_s7 + $0x17b8] sm:$0xff] %v1718_v55 }
 0x18e   : > { %1721 = vst [vmem:[%s10631_s7 + $0x17c0] sm:$0xff] %v1720_v56  ;;  %1723 = vst [vmem:[%s10631_s7 + $0x17c8] sm:$0xff] %v1722_v57  ;;  %v1724_v58 = vld [vmem:[%s10623_s6 + $0x2fa0] sm:$0xff]  ;;  %v1726_v59 = vld [vmem:[%s10623_s6 + $0x2fa8] sm:$0xff] }
 0x18f   : > { %v1728_v60 = vld [vmem:[%s10623_s6 + $0x2fc0] sm:$0xff]  ;;  %1725 = vst [vmem:[%s10631_s7 + $0x17d0] sm:$0xff] %v1724_v58  ;;  %1727 = vst [vmem:[%s10631_s7 + $0x17d8] sm:$0xff] %v1726_v59  ;;  %v1730_v61 = vld [vmem:[%s10623_s6 + $0x2fc8] sm:$0xff] }
 0x190   : > { %1729 = vst [vmem:[%s10631_s7 + $0x17e0] sm:$0xff] %v1728_v60  ;;  %v1732_v62 = vld [vmem:[%s10623_s6 + $0x2fe0] sm:$0xff]  ;;  %v1734_v63 = vld [vmem:[%s10623_s6 + $0x2fe8] sm:$0xff]  ;;  %1731 = vst [vmem:[%s10631_s7 + $0x17e8] sm:$0xff] %v1730_v61 }
 0x191   : > { %1733 = vst [vmem:[%s10631_s7 + $0x17f0] sm:$0xff] %v1732_v62  ;;  %1735 = vst [vmem:[%s10631_s7 + $0x17f8] sm:$0xff] %v1734_v63  ;;  %v1736_v0 = vld [vmem:[%s10623_s6 + $0x3000] sm:$0xff]  ;;  %v1738_v1 = vld [vmem:[%s10623_s6 + $0x3008] sm:$0xff] }
 0x192   : > { %v1740_v2 = vld [vmem:[%s10623_s6 + $0x3020] sm:$0xff]  ;;  %1737 = vst [vmem:[%s10631_s7 + $0x1800] sm:$0xff] %v1736_v0  ;;  %1739 = vst [vmem:[%s10631_s7 + $0x1808] sm:$0xff] %v1738_v1  ;;  %v1742_v3 = vld [vmem:[%s10623_s6 + $0x3028] sm:$0xff] }
 0x193   : > { %1741 = vst [vmem:[%s10631_s7 + $0x1810] sm:$0xff] %v1740_v2  ;;  %v1744_v4 = vld [vmem:[%s10623_s6 + $0x3040] sm:$0xff]  ;;  %v1746_v5 = vld [vmem:[%s10623_s6 + $0x3048] sm:$0xff]  ;;  %1743 = vst [vmem:[%s10631_s7 + $0x1818] sm:$0xff] %v1742_v3 }
 0x194   : > { %1745 = vst [vmem:[%s10631_s7 + $0x1820] sm:$0xff] %v1744_v4  ;;  %1747 = vst [vmem:[%s10631_s7 + $0x1828] sm:$0xff] %v1746_v5  ;;  %v1748_v6 = vld [vmem:[%s10623_s6 + $0x3060] sm:$0xff]  ;;  %v1750_v7 = vld [vmem:[%s10623_s6 + $0x3068] sm:$0xff] }
 0x195   : > { %v1752_v8 = vld [vmem:[%s10623_s6 + $0x3080] sm:$0xff]  ;;  %1749 = vst [vmem:[%s10631_s7 + $0x1830] sm:$0xff] %v1748_v6  ;;  %1751 = vst [vmem:[%s10631_s7 + $0x1838] sm:$0xff] %v1750_v7  ;;  %v1754_v9 = vld [vmem:[%s10623_s6 + $0x3088] sm:$0xff] }
 0x196   : > { %1753 = vst [vmem:[%s10631_s7 + $0x1840] sm:$0xff] %v1752_v8  ;;  %v1756_v10 = vld [vmem:[%s10623_s6 + $0x30a0] sm:$0xff]  ;;  %v1758_v11 = vld [vmem:[%s10623_s6 + $0x30a8] sm:$0xff]  ;;  %1755 = vst [vmem:[%s10631_s7 + $0x1848] sm:$0xff] %v1754_v9 }
 0x197   : > { %1757 = vst [vmem:[%s10631_s7 + $0x1850] sm:$0xff] %v1756_v10  ;;  %1759 = vst [vmem:[%s10631_s7 + $0x1858] sm:$0xff] %v1758_v11  ;;  %v1760_v12 = vld [vmem:[%s10623_s6 + $0x30c0] sm:$0xff]  ;;  %v1762_v13 = vld [vmem:[%s10623_s6 + $0x30c8] sm:$0xff] }
 0x198   : > { %v1764_v14 = vld [vmem:[%s10623_s6 + $0x30e0] sm:$0xff]  ;;  %1761 = vst [vmem:[%s10631_s7 + $0x1860] sm:$0xff] %v1760_v12  ;;  %1763 = vst [vmem:[%s10631_s7 + $0x1868] sm:$0xff] %v1762_v13  ;;  %v1766_v15 = vld [vmem:[%s10623_s6 + $0x30e8] sm:$0xff] }
 0x199   : > { %1765 = vst [vmem:[%s10631_s7 + $0x1870] sm:$0xff] %v1764_v14  ;;  %1767 = vst [vmem:[%s10631_s7 + $0x1878] sm:$0xff] %v1766_v15 }
 0x19a PF: > { %p8275_p5 = scmp.ge.s32.totalorder %s10551_s20, 1  ;;  %p1789_p6 = scmp.lt.s32.totalorder %s10551_s20, 3 }
 0x19c   : > { %p1790_p7 = pnand %p8275_p5, %p1789_p6 }
 0x19d   : > { %s1796_s8 = sand.u32 (!%p1790_p7), 1, %s10543_s18   ;;  %s8276_s9 = sshll.u32 (!%p1790_p7), %s10603_s21, 2 }
 0x19e   : > { %1793 = sbr.rel (%p1790_p7) target bundleno = 1690 (0x69a), region = 59  ;;  %p1829_p8 = scmp.lt.s32.totalorder (!%p1790_p7), %s8276_s9, 7 }
 0x19f   : > { %s9251_s10 = smul.u32 (!%p1790_p7), 6272, %s1796_s8  ;;  %s8277_s11 = sshll.u32 (!%p1790_p7), %s10603_s21, 6 }
 0x1a0   : > { %p1834_p9 = scmp.lt.s32.totalorder (!%p1790_p7), %s8277_s11, 127  ;;  %p8279_p10 = scmp.ne.s32.totalorder (!%p1790_p7), %s10603_s21, 0 }
 0x1a1   : > { %s12211_s18 = scalar_lea.vmem (!%p1790_p7), [#allocation3], %s9251_s10 }
 0x1a5   : > { %s13225_s9 = smov (!%p1829_p8, %s8276_s9), 7  ;;  %s13227_s11 = smov (!%p1834_p9, %s8277_s11), 127 }
 0x1a6   : > { %s1831_s14 = scalar_lea.vmem %s13217_s2, %s13225_s9  ;;  %s8278_s15 = sshll.u32 %s13227_s11, 2  ;;  %vm1844_vm0 = vcmask (!%p8279_p10), 74752   ;;  %v10553_v16 = vmov (!%p8279_p10), 0.0  }
 0x1a7   : > { %s12209_s20 = scalar_lea.vmem %s13218_s3, %s8278_s15  ;;  %1843 = sbr.rel (%p8279_p10) target bundleno = 430 (0x1ae), region = 67  ;;  %1845 = vst.msk [vmem:[#allocation2] sm:$0x3] (!%p8279_p10), %vm1844_vm0, %v10553_v16 }
 0x1ae PF: > { %v9286_v17 = vld [vmem:[%s12211_s18 + $0x4] ss:$16 sps:$4 sm:$0xff]   ;;  %v9288_v18 = vld [vmem:[%s12211_s18 + $0xc] ss:$16 sps:$4 sm:$0xff]   ;;  %v9290_v19 = vld [vmem:[%s12211_s18] ss:$16 sps:$4 sm:$0xff]   ;;  %v2636_v53 = vlaneseq }
 0x1af   : > { %6769 = vmatprep.subr.bf16.mxu0 %v9286_v17  ;;  %v9291_v20 = vld [vmem:[%s12211_s18 + $0x8] ss:$16 sps:$4 sm:$0xff]   ;;  %7302 = vmatprep.subr.bf16.mxu1 %v9288_v18  ;;  %v9292_v21 = vld [vmem:[%s12211_s18 + $0x24] ss:$16 sps:$4 sm:$0xff]   ;;  %v9294_v22 = vld [vmem:[%s12211_s18 + $0x2c] ss:$16 sps:$4 sm:$0xff]  }
 0x1b0   : > { %6770 = vmatpush1.bf16.msra.mxu0 %v9290_v19  ;;  %7303 = vmatpush1.bf16.msra.mxu1 %v9291_v20  ;;  %v9296_v23 = vld [vmem:[%s12211_s18 + $0x20] ss:$16 sps:$4 sm:$0xff]   ;;  %v9297_v24 = vld [vmem:[%s12211_s18 + $0x28] ss:$16 sps:$4 sm:$0xff]   ;;  %v9298_v25 = vld [vmem:[%s12211_s18 + $0x44] ss:$16 sps:$4 sm:$0xff]  }
 0x1b1   : > { %6771 = vmatprep.subr.bf16.mxu0 %v9292_v21  ;;  %7304 = vmatprep.subr.bf16.mxu1 %v9294_v22  ;;  %v9300_v26 = vld [vmem:[%s12211_s18 + $0x4c] ss:$16 sps:$4 sm:$0xff]   ;;  %v9302_v27 = vld [vmem:[%s12211_s18 + $0x40] ss:$16 sps:$4 sm:$0xff]   ;;  %v9303_v28 = vld [vmem:[%s12211_s18 + $0x48] ss:$16 sps:$4 sm:$0xff]  }
 0x1b2   : > { %v9304_v29 = vld [vmem:[%s12211_s18 + $0x64] ss:$16 sps:$4 sm:$0xff]   ;;  %v9306_v30 = vld [vmem:[%s12211_s18 + $0x6c] ss:$16 sps:$4 sm:$0xff]   ;;  %v9308_v31 = vld [vmem:[%s12211_s18 + $0x60] ss:$16 sps:$4 sm:$0xff]  }
 0x1b3   : > { %v9309_v32 = vld [vmem:[%s12211_s18 + $0x68] ss:$16 sps:$4 sm:$0xff]   ;;  %v9310_v33 = vld [vmem:[%s12211_s18 + $0x84] ss:$16 sps:$4 sm:$0xff]   ;;  %v9312_v34 = vld [vmem:[%s12211_s18 + $0x8c] ss:$16 sps:$4 sm:$0xff]  }
 0x1b4   : > { %6772 = vmatpush1.bf16.msra.mxu0 %v9296_v23  ;;  %7305 = vmatpush1.bf16.msra.mxu1 %v9297_v24  ;;  %v9314_v35 = vld [vmem:[%s12211_s18 + $0x80] ss:$16 sps:$4 sm:$0xff]   ;;  %v9315_v36 = vld [vmem:[%s12211_s18 + $0x88] ss:$16 sps:$4 sm:$0xff]   ;;  %v9316_v37 = vld [vmem:[%s12211_s18 + $0xa4] ss:$16 sps:$4 sm:$0xff]  }
 0x1b5   : > { %6773 = vmatprep.subr.bf16.mxu0 %v9298_v25  ;;  %7306 = vmatprep.subr.bf16.mxu1 %v9300_v26  ;;  %v9318_v38 = vld [vmem:[%s12211_s18 + $0xac] ss:$16 sps:$4 sm:$0xff]   ;;  %v9320_v39 = vld [vmem:[%s12211_s18 + $0xa0] ss:$16 sps:$4 sm:$0xff]   ;;  %v9321_v40 = vld [vmem:[%s12211_s18 + $0xa8] ss:$16 sps:$4 sm:$0xff]  }
 0x1b6   : > { %v9322_v41 = vld [vmem:[%s12211_s18 + $0xc4] ss:$16 sps:$4 sm:$0xff]   ;;  %v9324_v42 = vld [vmem:[%s12211_s18 + $0xcc] ss:$16 sps:$4 sm:$0xff]   ;;  %v9326_v43 = vld [vmem:[%s12211_s18 + $0xc0] ss:$16 sps:$4 sm:$0xff]  }
 0x1b7   : > { %v9327_v44 = vld [vmem:[%s12211_s18 + $0xc8] ss:$16 sps:$4 sm:$0xff]   ;;  %v9328_v45 = vld [vmem:[%s12211_s18 + $0xe4] ss:$16 sps:$4 sm:$0xff]   ;;  %v9330_v46 = vld [vmem:[%s12211_s18 + $0xec] ss:$16 sps:$4 sm:$0xff]  }
 0x1b8   : > { %6774 = vmatpush1.bf16.msra.mxu0 %v9302_v27  ;;  %7307 = vmatpush1.bf16.msra.mxu1 %v9303_v28  ;;  %v9332_v47 = vld [vmem:[%s12211_s18 + $0xe0] ss:$16 sps:$4 sm:$0xff]   ;;  %v9333_v48 = vld [vmem:[%s12211_s18 + $0xe8] ss:$16 sps:$4 sm:$0xff]   ;;  %v9334_v49 = vld [vmem:[%s12211_s18 + $0x104] ss:$16 sps:$4 sm:$0xff]  }
 0x1b9   : > { %6775 = vmatprep.subr.bf16.mxu0 %v9304_v29  ;;  %7308 = vmatprep.subr.bf16.mxu1 %v9306_v30  ;;  %v9336_v50 = vld [vmem:[%s12211_s18 + $0x10c] ss:$16 sps:$4 sm:$0xff]   ;;  %v9338_v51 = vld [vmem:[%s12211_s18 + $0x100] ss:$16 sps:$4 sm:$0xff]   ;;  %v9339_v52 = vld [vmem:[%s12211_s18 + $0x108] ss:$16 sps:$4 sm:$0xff]  }
 0x1ba   : > { %v10554_v54 = vmov 1966171168   ;;  %v9340_v56 = vld [vmem:[%s12211_s18 + $0x124] ss:$16 sps:$4 sm:$0xff]   ;;  %v9342_v57 = vld [vmem:[%s12211_s18 + $0x12c] ss:$16 sps:$4 sm:$0xff]  }
 0x1bb   : > { %v2662_v55 = vunpack.c.l.s4 %v10554_v54  ;;  %v9344_v58 = vld [vmem:[%s12211_s18 + $0x120] ss:$16 sps:$4 sm:$0xff]   ;;  %v12253_v59 = vshrl.u32 %v2636_v53, 7  ;;  %v9345_v61 = vld [vmem:[%s12211_s18 + $0x128] ss:$16 sps:$4 sm:$0xff]   ;;  %vm6765_vm1 = vcmask 523264  }
 0x1bc   : > { %6776 = vmatpush1.bf16.msra.mxu0 %v9308_v31  ;;  %7309 = vmatpush1.bf16.msra.mxu1 %v9309_v32  ;;  %v9346_v62 = vld [vmem:[%s12211_s18 + $0x144] ss:$16 sps:$4 sm:$0xff]   ;;  %v9348_v63 = vld [vmem:[%s12211_s18 + $0x14c] ss:$16 sps:$4 sm:$0xff]   ;;  %v9350_v0 = vld [vmem:[%s12211_s18 + $0x140] ss:$16 sps:$4 sm:$0xff]  }
 0x1bd   : > { %6777 = vmatprep.subr.bf16.mxu0 %v9310_v33  ;;  %7310 = vmatprep.subr.bf16.mxu1 %v9312_v34  ;;  %v2663_v60 = vunpack.c.0.s8 %v2662_v55  ;;  %v9351_v1 = vld [vmem:[%s12211_s18 + $0x148] ss:$16 sps:$4 sm:$0xff]   ;;  %v9352_v3 = vld [vmem:[%s12211_s18 + $0x164] ss:$16 sps:$4 sm:$0xff]   ;;  %v9354_v4 = vld [vmem:[%s12211_s18 + $0x16c] ss:$16 sps:$4 sm:$0xff]  }
 0x1be   : > { %v12268_v5 = vld [vmem:[%s13215_s0] sm:$0xff]  ;;  %v9357_v8 = vld [vmem:[%s12211_s18 + $0x168] ss:$16 sps:$4 sm:$0xff]   ;;  %vm8181_vm2 = vcmask 74752   ;;  %p9099_p11 = scmp.ne.s32.totalorder %s10603_s21, 1 }
 0x1bf   : > { %v12261_v2 = vsub.s32 %v2663_v60, %v12253_v59  ;;  %v9356_v6 = vld [vmem:[%s12211_s18 + $0x160] ss:$16 sps:$4 sm:$0xff]   ;;  %v9358_v9 = vld [vmem:[%s12211_s18 + $0x184] ss:$16 sps:$4 sm:$0xff]   ;;  %v9360_v10 = vld [vmem:[%s12211_s18 + $0x18c] ss:$16 sps:$4 sm:$0xff]  }
 0x1c0   : > { %6778 = vmatpush1.bf16.msra.mxu0 %v9314_v35  ;;  %7311 = vmatpush1.bf16.msra.mxu1 %v9315_v36  ;;  %v9362_v12 = vld [vmem:[%s12211_s18 + $0x180] ss:$16 sps:$4 sm:$0xff]   ;;  %v9363_v14 = vld [vmem:[%s12211_s18 + $0x188] ss:$16 sps:$4 sm:$0xff]   ;;  %v9364_v15 = vld [vmem:[%s12211_s18 + $0x1a4] ss:$16 sps:$4 sm:$0xff]  }
 0x1c1   : > { %6779 = vmatprep.subr.bf16.mxu0 %v9316_v37  ;;  %7312 = vmatprep.subr.bf16.mxu1 %v9318_v38  ;;  %v2667_v7 = vrot.slane %v12268_v5, %v12261_v2  ;;  %v9366_v16 = vld [vmem:[%s12211_s18 + $0x1ac] ss:$16 sps:$4 sm:$0xff]   ;;  %v9368_v17 = vld [vmem:[%s12211_s18 + $0x1a0] ss:$16 sps:$4 sm:$0xff]   ;;  %v9369_v18 = vld [vmem:[%s12211_s18 + $0x1a8] ss:$16 sps:$4 sm:$0xff]  }
 0x1c2   : > { %v9370_v19 = vld [vmem:[%s12211_s18 + $0x1c4] ss:$16 sps:$4 sm:$0xff]   ;;  %v9372_v20 = vld [vmem:[%s12211_s18 + $0x1cc] ss:$16 sps:$4 sm:$0xff]   ;;  %v9374_v21 = vld [vmem:[%s12211_s18 + $0x1c0] ss:$16 sps:$4 sm:$0xff]  }
 0x1c3   : > { %v2675_v11 = vcombine.high %v2667_v7, %v2667_v7  ;;  %v9375_v22 = vld [vmem:[%s12211_s18 + $0x1c8] ss:$16 sps:$4 sm:$0xff]   ;;  %v9376_v23 = vld [vmem:[%s12211_s18 + $0x1e4] ss:$16 sps:$4 sm:$0xff]   ;;  %v9378_v24 = vld [vmem:[%s12211_s18 + $0x1ec] ss:$16 sps:$4 sm:$0xff]   ;;  %v12295_v30 = vrot.slane %v2667_v7, %v12261_v2 }
 0x1c4   : > { %6780 = vmatpush1.bf16.msra.mxu0 %v9320_v39  ;;  %7313 = vmatpush1.bf16.msra.mxu1 %v9321_v40  ;;  %v9380_v25 = vld [vmem:[%s12211_s18 + $0x1e0] ss:$16 sps:$4 sm:$0xff]   ;;  %v9381_v26 = vld [vmem:[%s12211_s18 + $0x1e8] ss:$16 sps:$4 sm:$0xff]   ;;  %v9384_v27 = vld [vmem:[%s12211_s18 + $0x204] ss:$16 sps:$4 sm:$0xff]  }
 0x1c5   : > { %6781 = vmatprep.subr.bf16.mxu0 %v9322_v41  ;;  %7314 = vmatprep.subr.bf16.mxu1 %v9324_v42  ;;  %v2697_v13 = vrot.slane %v2675_v11, %v12261_v2  ;;  %v9387_v28 = vld [vmem:[%s12211_s18 + $0x20c] ss:$16 sps:$4 sm:$0xff]   ;;  %v9382_v29 = vld [vmem:[%s12211_s18 + $0x200] ss:$16 sps:$4 sm:$0xff]   ;;  %v9385_v31 = vld [vmem:[%s12211_s18 + $0x208] ss:$16 sps:$4 sm:$0xff]  }
 0x1c6   : > { %v9390_v32 = vld [vmem:[%s12211_s18 + $0x224] ss:$16 sps:$4 sm:$0xff]   ;;  %v9393_v33 = vld [vmem:[%s12211_s18 + $0x22c] ss:$16 sps:$4 sm:$0xff]   ;;  %v9388_v35 = vld [vmem:[%s12211_s18 + $0x220] ss:$16 sps:$4 sm:$0xff]  }
 0x1c7   : > { %6801 = vmatprep.mubr.bf16.mxu0 %v2697_v13  ;;  %7334 = vmatprep.mubr.bf16.mxu1 %v2697_v13  ;;  %v2707_v34 = vcombine.high %v2697_v13, %v2697_v13  ;;  %v9391_v36 = vld [vmem:[%s12211_s18 + $0x228] ss:$16 sps:$4 sm:$0xff]   ;;  %v9396_v37 = vld [vmem:[%s12211_s18 + $0x244] ss:$16 sps:$4 sm:$0xff]   ;;  %v9399_v38 = vld [vmem:[%s12211_s18 + $0x24c] ss:$16 sps:$4 sm:$0xff]  }
 0x1c8   : > { %6782 = vmatpush1.bf16.msra.mxu0 %v9326_v43  ;;  %7315 = vmatpush1.bf16.msra.mxu1 %v9327_v44  ;;  %v9394_v39 = vld [vmem:[%s12211_s18 + $0x240] ss:$16 sps:$4 sm:$0xff]   ;;  %v9397_v40 = vld [vmem:[%s12211_s18 + $0x248] ss:$16 sps:$4 sm:$0xff]   ;;  %v9402_v41 = vld [vmem:[%s12211_s18 + $0x264] ss:$16 sps:$4 sm:$0xff]  }
 0x1c9   : > { %6783 = vmatprep.subr.bf16.mxu0 %v9328_v45  ;;  %7316 = vmatprep.subr.bf16.mxu1 %v9330_v46  ;;  %v9405_v42 = vld [vmem:[%s12211_s18 + $0x26c] ss:$16 sps:$4 sm:$0xff]   ;;  %v9400_v43 = vld [vmem:[%s12211_s18 + $0x260] ss:$16 sps:$4 sm:$0xff]   ;;  %v9403_v44 = vld [vmem:[%s12211_s18 + $0x268] ss:$16 sps:$4 sm:$0xff]  }
 0x1ca   : > { %v9408_v45 = vld [vmem:[%s12211_s18 + $0x284] ss:$16 sps:$4 sm:$0xff]   ;;  %v9411_v46 = vld [vmem:[%s12211_s18 + $0x28c] ss:$16 sps:$4 sm:$0xff]   ;;  %v9418_v55 = vld [vmem:[%s12211_s18 + $0x2c0] ss:$16 sps:$4 sm:$0xff]  }
 0x1cb   : > { %v9420_v53 = vld [vmem:[%s12211_s18 + $0x2c4] ss:$16 sps:$4 sm:$0xff]   ;;  %v9423_v54 = vld [vmem:[%s12211_s18 + $0x2cc] ss:$16 sps:$4 sm:$0xff]   ;;  %v9424_v60 = vld [vmem:[%s12211_s18 + $0x2e0] ss:$16 sps:$4 sm:$0xff]  }
 0x1cc   : > { %6784 = vmatpush1.bf16.msra.mxu0 %v9332_v47  ;;  %7317 = vmatpush1.bf16.msra.mxu1 %v9333_v48  ;;  %v9406_v47 = vld [vmem:[%s12211_s18 + $0x280] ss:$16 sps:$4 sm:$0xff]   ;;  %v9409_v48 = vld [vmem:[%s12211_s18 + $0x288] ss:$16 sps:$4 sm:$0xff]   ;;  %v9453_v13 = vld [vmem:[%s12211_s18 + $0x36c] ss:$16 sps:$4 sm:$0xff]  }
 0x1cd   : > { %6785 = vmatprep.subr.bf16.mxu0 %v9334_v49  ;;  %7318 = vmatprep.subr.bf16.mxu1 %v9336_v50  ;;  %v9414_v49 = vld [vmem:[%s12211_s18 + $0x2a4] ss:$16 sps:$4 sm:$0xff]   ;;  %v9417_v50 = vld [vmem:[%s12211_s18 + $0x2ac] ss:$16 sps:$4 sm:$0xff]   ;;  %v9439_v7 = vld [vmem:[%s12211_s18 + $0x328] ss:$16 sps:$4 sm:$0xff]  }
 0x1ce   : > { %v9445_v11 = vld [vmem:[%s12211_s18 + $0x348] ss:$16 sps:$4 sm:$0xff]  }
 0x1d0   : > { %6786 = vmatpush1.bf16.msra.mxu0 %v9338_v51  ;;  %7319 = vmatpush1.bf16.msra.mxu1 %v9339_v52  ;;  %v9412_v51 = vld [vmem:[%s12211_s18 + $0x2a0] ss:$16 sps:$4 sm:$0xff]   ;;  %v9415_v52 = vld [vmem:[%s12211_s18 + $0x2a8] ss:$16 sps:$4 sm:$0xff]  }
 0x1d1   : > { %6787 = vmatprep.subr.bf16.mxu0 %v9340_v56  ;;  %7320 = vmatprep.subr.bf16.mxu1 %v9342_v57  ;;  %v9421_v56 = vld [vmem:[%s12211_s18 + $0x2c8] ss:$16 sps:$4 sm:$0xff]   ;;  %v9426_v57 = vld [vmem:[%s12211_s18 + $0x2e4] ss:$16 sps:$4 sm:$0xff]  }
 0x1d4   : > { %6788 = vmatpush1.bf16.msra.mxu0 %v9344_v58  ;;  %7321 = vmatpush1.bf16.msra.mxu1 %v9345_v61  ;;  %v9429_v58 = vld [vmem:[%s12211_s18 + $0x2ec] ss:$16 sps:$4 sm:$0xff]   ;;  %v9427_v61 = vld [vmem:[%s12211_s18 + $0x2e8] ss:$16 sps:$4 sm:$0xff]  }
 0x1d5   : > { %6789 = vmatprep.subr.bf16.mxu0 %v9346_v62  ;;  %7322 = vmatprep.subr.bf16.mxu1 %v9348_v63  ;;  %v9432_v62 = vld [vmem:[%s12211_s18 + $0x304] ss:$16 sps:$4 sm:$0xff]   ;;  %v9435_v63 = vld [vmem:[%s12211_s18 + $0x30c] ss:$16 sps:$4 sm:$0xff]  }
 0x1d8   : > { %6790 = vmatpush1.bf16.msra.mxu0 %v9350_v0  ;;  %7323 = vmatpush1.bf16.msra.mxu1 %v9351_v1  ;;  %v9430_v0 = vld [vmem:[%s12211_s18 + $0x300] ss:$16 sps:$4 sm:$0xff]   ;;  %v9433_v1 = vld [vmem:[%s12211_s18 + $0x308] ss:$16 sps:$4 sm:$0xff]  }
 0x1d9   : > { %6791 = vmatprep.subr.bf16.mxu0 %v9352_v3  ;;  %7324 = vmatprep.subr.bf16.mxu1 %v9354_v4  ;;  %v9438_v3 = vld [vmem:[%s12211_s18 + $0x324] ss:$16 sps:$4 sm:$0xff]   ;;  %v9441_v4 = vld [vmem:[%s12211_s18 + $0x32c] ss:$16 sps:$4 sm:$0xff]  }
 0x1dc   : > { %6792 = vmatpush1.bf16.msra.mxu0 %v9356_v6  ;;  %7325 = vmatpush1.bf16.msra.mxu1 %v9357_v8  ;;  %v9436_v6 = vld [vmem:[%s12211_s18 + $0x320] ss:$16 sps:$4 sm:$0xff]   ;;  %v9444_v8 = vld [vmem:[%s12211_s18 + $0x344] ss:$16 sps:$4 sm:$0xff]  }
 0x1dd   : > { %6793 = vmatprep.subr.bf16.mxu0 %v9358_v9  ;;  %7326 = vmatprep.subr.bf16.mxu1 %v9360_v10  ;;  %v9447_v9 = vld [vmem:[%s12211_s18 + $0x34c] ss:$16 sps:$4 sm:$0xff]   ;;  %v9442_v10 = vld [vmem:[%s12211_s18 + $0x340] ss:$16 sps:$4 sm:$0xff]  }
 0x1e0   : > { %6794 = vmatpush1.bf16.msra.mxu0 %v9362_v12  ;;  %7327 = vmatpush1.bf16.msra.mxu1 %v9363_v14  ;;  %v9450_v12 = vld [vmem:[%s12211_s18 + $0x364] ss:$16 sps:$4 sm:$0xff]   ;;  %v9448_v14 = vld [vmem:[%s12211_s18 + $0x360] ss:$16 sps:$4 sm:$0xff]  }
 0x1e1   : > { %6795 = vmatprep.subr.bf16.mxu0 %v9364_v15  ;;  %7328 = vmatprep.subr.bf16.mxu1 %v9366_v16  ;;  %v9451_v15 = vld [vmem:[%s12211_s18 + $0x368] ss:$16 sps:$4 sm:$0xff]   ;;  %v9456_v16 = vld [vmem:[%s12211_s18 + $0x384] ss:$16 sps:$4 sm:$0xff]  }
 0x1e4   : > { %6796 = vmatpush1.bf16.msra.mxu0 %v9368_v17  ;;  %7329 = vmatpush1.bf16.msra.mxu1 %v9369_v18  ;;  %v9459_v17 = vld [vmem:[%s12211_s18 + $0x38c] ss:$16 sps:$4 sm:$0xff]   ;;  %v9454_v18 = vld [vmem:[%s12211_s18 + $0x380] ss:$16 sps:$4 sm:$0xff]  }
 0x1e5   : > { %6797 = vmatprep.subr.bf16.mxu0 %v9370_v19  ;;  %7330 = vmatprep.subr.bf16.mxu1 %v9372_v20  ;;  %v9457_v19 = vld [vmem:[%s12211_s18 + $0x388] ss:$16 sps:$4 sm:$0xff]   ;;  %v9462_v20 = vld [vmem:[%s12211_s18 + $0x3a4] ss:$16 sps:$4 sm:$0xff]  }
 0x1e8   : > { %6798 = vmatpush1.bf16.msra.mxu0 %v9374_v21  ;;  %7331 = vmatpush1.bf16.msra.mxu1 %v9375_v22  ;;  %v9465_v21 = vld [vmem:[%s12211_s18 + $0x3ac] ss:$16 sps:$4 sm:$0xff]   ;;  %v9460_v22 = vld [vmem:[%s12211_s18 + $0x3a0] ss:$16 sps:$4 sm:$0xff]  }
 0x1e9   : > { %6799 = vmatprep.subr.bf16.mxu0 %v9376_v23  ;;  %7332 = vmatprep.subr.bf16.mxu1 %v9378_v24  ;;  %v9463_v23 = vld [vmem:[%s12211_s18 + $0x3a8] ss:$16 sps:$4 sm:$0xff]   ;;  %v9468_v24 = vld [vmem:[%s12211_s18 + $0x3c4] ss:$16 sps:$4 sm:$0xff]  }
 0x1ec   : > { %6800 = vmatpush1.bf16.msra.mxu0 %v9380_v25  ;;  %7333 = vmatpush1.bf16.msra.mxu1 %v9381_v26  ;;  %v9471_v25 = vld [vmem:[%s12211_s18 + $0x3cc] ss:$16 sps:$4 sm:$0xff]   ;;  %v2660_v26 = vcombine.high %v12268_v5, %v12268_v5  ;;  %v9475_v5 = vld [vmem:[%s12211_s18 + $0x3e8] ss:$16 sps:$4 sm:$0xff]  }
 0x1ed   : > { %6810 = vmatprep.subr.bf16.mxu0 %v9384_v27  ;;  %7343 = vmatprep.subr.bf16.mxu1 %v9387_v28  ;;  %v9466_v27 = vld [vmem:[%s12211_s18 + $0x3c0] ss:$16 sps:$4 sm:$0xff]   ;;  %v9469_v28 = vld [vmem:[%s12211_s18 + $0x3c8] ss:$16 sps:$4 sm:$0xff]  }
 0x1ef   : > { %6802 = vmatmul.mubr.bf16.vlgmr.msra.gmra.mrb[0].mxu0 %v12295_v30  ;;  %7335 = vmatmul.mubr.bf16.vlgmr.msra.gmra.mrb[0].mxu1 %v12295_v30 }
 0x1f0   : > { %6811 = vmatpush1.bf16.msra.mxu0 %v9382_v29  ;;  %7344 = vmatpush1.bf16.msra.mxu1 %v9385_v31  ;;  %v9474_v29 = vld [vmem:[%s12211_s18 + $0x3e4] ss:$16 sps:$4 sm:$0xff]   ;;  %v9477_v31 = vld [vmem:[%s12211_s18 + $0x3ec] ss:$16 sps:$4 sm:$0xff]  }
 0x1f1   : > { %6812 = vmatprep.subr.bf16.mxu0 %v9390_v32  ;;  %7345 = vmatprep.subr.bf16.mxu1 %v9393_v33  ;;  %v12361_v32 = vrot.slane %v2660_v26, %v12261_v2  ;;  %v9472_v33 = vld [vmem:[%s12211_s18 + $0x3e0] ss:$16 sps:$4 sm:$0xff]   ;;  %v9553_v26 = vld [vmem:[%s12211_s18 + $0x588] ss:$16 sps:$4 sm:$0xff]  }
 0x1f2   : > { %6842 = vmatprep.mubr.bf16.mxu0 %v2707_v34  ;;  %7375 = vmatprep.mubr.bf16.mxu1 %v2707_v34  ;;  %v9480_v34 = vld [vmem:[%s12211_s18 + $0x404] ss:$16 sps:$4 sm:$0xff]  }
 0x1f4   : > { %6813 = vmatpush1.bf16.msra.mxu0 %v9388_v35  ;;  %7346 = vmatpush1.bf16.msra.mxu1 %v9391_v36  ;;  %v9483_v35 = vld [vmem:[%s12211_s18 + $0x40c] ss:$16 sps:$4 sm:$0xff]   ;;  %v2676_v36 = vcombine.high %v12361_v32, %v12361_v32 }
 0x1f5   : > { %6814 = vmatprep.subr.bf16.mxu0 %v9396_v37  ;;  %7347 = vmatprep.subr.bf16.mxu1 %v9399_v38  ;;  %v9478_v37 = vld [vmem:[%s12211_s18 + $0x400] ss:$16 sps:$4 sm:$0xff]   ;;  %v2705_v38 = vcombine.high %v12295_v30, %v12295_v30  ;;  %v9487_v30 = vld [vmem:[%s12211_s18 + $0x428] ss:$16 sps:$4 sm:$0xff]  }
 0x1f8   : > { %6815 = vmatpush1.bf16.msra.mxu0 %v9394_v39  ;;  %7348 = vmatpush1.bf16.msra.mxu1 %v9397_v40  ;;  %v9481_v39 = vld [vmem:[%s12211_s18 + $0x408] ss:$16 sps:$4 sm:$0xff]   ;;  %v9486_v40 = vld [vmem:[%s12211_s18 + $0x424] ss:$16 sps:$4 sm:$0xff]  }
 0x1f9   : > { %6816 = vmatprep.subr.bf16.mxu0 %v9402_v41  ;;  %7349 = vmatprep.subr.bf16.mxu1 %v9405_v42  ;;  %v9489_v41 = vld [vmem:[%s12211_s18 + $0x42c] ss:$16 sps:$4 sm:$0xff]   ;;  %v12376_v42 = vrot.slane %v2676_v36, %v12261_v2  ;;  %v9570_v36 = vld [vmem:[%s12211_s18 + $0x5e4] ss:$16 sps:$4 sm:$0xff]  }
 0x1fc   : > { %6817 = vmatpush1.bf16.msra.mxu0 %v9400_v43  ;;  %7350 = vmatpush1.bf16.msra.mxu1 %v9403_v44  ;;  %v9484_v43 = vld [vmem:[%s12211_s18 + $0x420] ss:$16 sps:$4 sm:$0xff]   ;;  %v9492_v44 = vld [vmem:[%s12211_s18 + $0x444] ss:$16 sps:$4 sm:$0xff]  }
 0x1fd   : > { %6818 = vmatprep.subr.bf16.mxu0 %v9408_v45  ;;  %7351 = vmatprep.subr.bf16.mxu1 %v9411_v46  ;;  %v9495_v45 = vld [vmem:[%s12211_s18 + $0x44c] ss:$16 sps:$4 sm:$0xff]   ;;  %v9490_v46 = vld [vmem:[%s12211_s18 + $0x440] ss:$16 sps:$4 sm:$0xff]  }
 0x200   : > { %6819 = vmatpush1.bf16.msra.mxu0 %v9406_v47  ;;  %7352 = vmatpush1.bf16.msra.mxu1 %v9409_v48  ;;  %v9493_v47 = vld [vmem:[%s12211_s18 + $0x448] ss:$16 sps:$4 sm:$0xff]   ;;  %v9498_v48 = vld [vmem:[%s12211_s18 + $0x464] ss:$16 sps:$4 sm:$0xff]  }
 0x201   : > { %6820 = vmatprep.subr.bf16.mxu0 %v9414_v49  ;;  %7353 = vmatprep.subr.bf16.mxu1 %v9417_v50  ;;  %v9501_v49 = vld [vmem:[%s12211_s18 + $0x46c] ss:$16 sps:$4 sm:$0xff]   ;;  %v9496_v50 = vld [vmem:[%s12211_s18 + $0x460] ss:$16 sps:$4 sm:$0xff]  }
 0x204   : > { %6821 = vmatpush1.bf16.msra.mxu0 %v9412_v51  ;;  %7354 = vmatpush1.bf16.msra.mxu1 %v9415_v52  ;;  %v9499_v51 = vld [vmem:[%s12211_s18 + $0x468] ss:$16 sps:$4 sm:$0xff]   ;;  %v9504_v52 = vld [vmem:[%s12211_s18 + $0x484] ss:$16 sps:$4 sm:$0xff]  }
 0x205   : > { %6822 = vmatprep.subr.bf16.mxu0 %v9420_v53  ;;  %7355 = vmatprep.subr.bf16.mxu1 %v9423_v54  ;;  %v9507_v53 = vld [vmem:[%s12211_s18 + $0x48c] ss:$16 sps:$4 sm:$0xff]   ;;  %v9502_v54 = vld [vmem:[%s12211_s18 + $0x480] ss:$16 sps:$4 sm:$0xff]  }
 0x208   : > { %6823 = vmatpush1.bf16.msra.mxu0 %v9418_v55  ;;  %7356 = vmatpush1.bf16.msra.mxu1 %v9421_v56  ;;  %v9505_v55 = vld [vmem:[%s12211_s18 + $0x488] ss:$16 sps:$4 sm:$0xff]   ;;  %v9510_v56 = vld [vmem:[%s12211_s18 + $0x4a4] ss:$16 sps:$4 sm:$0xff]  }
 0x209   : > { %6824 = vmatprep.subr.bf16.mxu0 %v9426_v57  ;;  %7357 = vmatprep.subr.bf16.mxu1 %v9429_v58  ;;  %v9513_v57 = vld [vmem:[%s12211_s18 + $0x4ac] ss:$16 sps:$4 sm:$0xff]   ;;  %v9508_v58 = vld [vmem:[%s12211_s18 + $0x4a0] ss:$16 sps:$4 sm:$0xff]  }
 0x20c   : > { %6825 = vmatpush1.bf16.msra.mxu0 %v9424_v60  ;;  %7358 = vmatpush1.bf16.msra.mxu1 %v9427_v61  ;;  %v9511_v60 = vld [vmem:[%s12211_s18 + $0x4a8] ss:$16 sps:$4 sm:$0xff]   ;;  %v9516_v61 = vld [vmem:[%s12211_s18 + $0x4c4] ss:$16 sps:$4 sm:$0xff]  }
 0x20d   : > { %6826 = vmatprep.subr.bf16.mxu0 %v9432_v62  ;;  %7359 = vmatprep.subr.bf16.mxu1 %v9435_v63  ;;  %v9519_v62 = vld [vmem:[%s12211_s18 + $0x4cc] ss:$16 sps:$4 sm:$0xff]   ;;  %v9514_v63 = vld [vmem:[%s12211_s18 + $0x4c0] ss:$16 sps:$4 sm:$0xff]  }
 0x210   : > { %6827 = vmatpush1.bf16.msra.mxu0 %v9430_v0  ;;  %7360 = vmatpush1.bf16.msra.mxu1 %v9433_v1  ;;  %v9517_v0 = vld [vmem:[%s12211_s18 + $0x4c8] ss:$16 sps:$4 sm:$0xff]   ;;  %v9522_v1 = vld [vmem:[%s12211_s18 + $0x4e4] ss:$16 sps:$4 sm:$0xff]  }
 0x211   : > { %6828 = vmatprep.subr.bf16.mxu0 %v9438_v3  ;;  %7361 = vmatprep.subr.bf16.mxu1 %v9441_v4  ;;  %v9525_v3 = vld [vmem:[%s12211_s18 + $0x4ec] ss:$16 sps:$4 sm:$0xff]   ;;  %v9520_v4 = vld [vmem:[%s12211_s18 + $0x4e0] ss:$16 sps:$4 sm:$0xff]  }
 0x214   : > { %6829 = vmatpush1.bf16.msra.mxu0 %v9436_v6  ;;  %7362 = vmatpush1.bf16.msra.mxu1 %v9439_v7  ;;  %v9523_v6 = vld [vmem:[%s12211_s18 + $0x4e8] ss:$16 sps:$4 sm:$0xff]   ;;  %v9528_v7 = vld [vmem:[%s12211_s18 + $0x504] ss:$16 sps:$4 sm:$0xff]  }
 0x215   : > { %6830 = vmatprep.subr.bf16.mxu0 %v9444_v8  ;;  %7363 = vmatprep.subr.bf16.mxu1 %v9447_v9  ;;  %v9531_v8 = vld [vmem:[%s12211_s18 + $0x50c] ss:$16 sps:$4 sm:$0xff]   ;;  %v9526_v9 = vld [vmem:[%s12211_s18 + $0x500] ss:$16 sps:$4 sm:$0xff]  }
 0x218   : > { %6831 = vmatpush1.bf16.msra.mxu0 %v9442_v10  ;;  %7364 = vmatpush1.bf16.msra.mxu1 %v9445_v11  ;;  %v9529_v10 = vld [vmem:[%s12211_s18 + $0x508] ss:$16 sps:$4 sm:$0xff]   ;;  %v9534_v11 = vld [vmem:[%s12211_s18 + $0x524] ss:$16 sps:$4 sm:$0xff]  }
 0x219   : > { %6832 = vmatprep.subr.bf16.mxu0 %v9450_v12  ;;  %7365 = vmatprep.subr.bf16.mxu1 %v9453_v13  ;;  %v9537_v12 = vld [vmem:[%s12211_s18 + $0x52c] ss:$16 sps:$4 sm:$0xff]   ;;  %v9532_v13 = vld [vmem:[%s12211_s18 + $0x520] ss:$16 sps:$4 sm:$0xff]  }
 0x21c   : > { %6833 = vmatpush1.bf16.msra.mxu0 %v9448_v14  ;;  %7366 = vmatpush1.bf16.msra.mxu1 %v9451_v15  ;;  %v9535_v14 = vld [vmem:[%s12211_s18 + $0x528] ss:$16 sps:$4 sm:$0xff]   ;;  %v9540_v15 = vld [vmem:[%s12211_s18 + $0x544] ss:$16 sps:$4 sm:$0xff]  }
 0x21d   : > { %6834 = vmatprep.subr.bf16.mxu0 %v9456_v16  ;;  %7367 = vmatprep.subr.bf16.mxu1 %v9459_v17  ;;  %v9543_v16 = vld [vmem:[%s12211_s18 + $0x54c] ss:$16 sps:$4 sm:$0xff]   ;;  %v9538_v17 = vld [vmem:[%s12211_s18 + $0x540] ss:$16 sps:$4 sm:$0xff]  }
 0x220   : > { %6835 = vmatpush1.bf16.msra.mxu0 %v9454_v18  ;;  %7368 = vmatpush1.bf16.msra.mxu1 %v9457_v19  ;;  %v9541_v18 = vld [vmem:[%s12211_s18 + $0x548] ss:$16 sps:$4 sm:$0xff]   ;;  %v9546_v19 = vld [vmem:[%s12211_s18 + $0x564] ss:$16 sps:$4 sm:$0xff]  }
 0x221   : > { %6836 = vmatprep.subr.bf16.mxu0 %v9462_v20  ;;  %7369 = vmatprep.subr.bf16.mxu1 %v9465_v21  ;;  %v9549_v20 = vld [vmem:[%s12211_s18 + $0x56c] ss:$16 sps:$4 sm:$0xff]   ;;  %v9544_v21 = vld [vmem:[%s12211_s18 + $0x560] ss:$16 sps:$4 sm:$0xff]  }
 0x224   : > { %6837 = vmatpush1.bf16.msra.mxu0 %v9460_v22  ;;  %7370 = vmatpush1.bf16.msra.mxu1 %v9463_v23  ;;  %v9547_v22 = vld [vmem:[%s12211_s18 + $0x568] ss:$16 sps:$4 sm:$0xff]   ;;  %v9552_v23 = vld [vmem:[%s12211_s18 + $0x584] ss:$16 sps:$4 sm:$0xff]  }
 0x225   : > { %6838 = vmatprep.subr.bf16.mxu0 %v9468_v24  ;;  %7371 = vmatprep.subr.bf16.mxu1 %v9471_v25  ;;  %v9555_v24 = vld [vmem:[%s12211_s18 + $0x58c] ss:$16 sps:$4 sm:$0xff]   ;;  %v9550_v25 = vld [vmem:[%s12211_s18 + $0x580] ss:$16 sps:$4 sm:$0xff]  }
 0x228   : > { %6839 = vmatpush1.bf16.msra.mxu0 %v9466_v27  ;;  %7372 = vmatpush1.bf16.msra.mxu1 %v9469_v28  ;;  %v9558_v27 = vld [vmem:[%s12211_s18 + $0x5a4] ss:$16 sps:$4 sm:$0xff]   ;;  %v9561_v28 = vld [vmem:[%s12211_s18 + $0x5ac] ss:$16 sps:$4 sm:$0xff]  }
 0x229   : > { %6840 = vmatprep.subr.bf16.mxu0 %v9474_v29  ;;  %7373 = vmatprep.subr.bf16.mxu1 %v9477_v31  ;;  %v9556_v29 = vld [vmem:[%s12211_s18 + $0x5a0] ss:$16 sps:$4 sm:$0xff]   ;;  %v9559_v31 = vld [vmem:[%s12211_s18 + $0x5a8] ss:$16 sps:$4 sm:$0xff]  }
 0x22c   : > { %6841 = vmatpush1.bf16.msra.mxu0 %v9472_v33  ;;  %7374 = vmatpush1.bf16.msra.mxu1 %v9475_v5  ;;  %v9564_v33 = vld [vmem:[%s12211_s18 + $0x5c4] ss:$16 sps:$4 sm:$0xff]   ;;  %v9567_v5 = vld [vmem:[%s12211_s18 + $0x5cc] ss:$16 sps:$4 sm:$0xff]  }
 0x22d   : > { %6851 = vmatprep.subr.bf16.mxu0 %v9480_v34  ;;  %7384 = vmatprep.subr.bf16.mxu1 %v9483_v35  ;;  %v9562_v34 = vld [vmem:[%s12211_s18 + $0x5c0] ss:$16 sps:$4 sm:$0xff]   ;;  %v9565_v35 = vld [vmem:[%s12211_s18 + $0x5c8] ss:$16 sps:$4 sm:$0xff]  }
 0x22f   : > { %6843 = vmatmul.mubr.bf16.vlgmr.msra.gmra.mrb[0].mxu0 %v2705_v38  ;;  %7376 = vmatmul.mubr.bf16.vlgmr.msra.gmra.mrb[0].mxu1 %v2705_v38  ;;  %v9568_v38 = vld [vmem:[%s12211_s18 + $0x5e0] ss:$16 sps:$4 sm:$0xff]  }
 0x230   : > { %6852 = vmatpush1.bf16.msra.mxu0 %v9478_v37  ;;  %7385 = vmatpush1.bf16.msra.mxu1 %v9481_v39  ;;  %v9573_v37 = vld [vmem:[%s12211_s18 + $0x5ec] ss:$16 sps:$4 sm:$0xff]   ;;  %v9571_v39 = vld [vmem:[%s12211_s18 + $0x5e8] ss:$16 sps:$4 sm:$0xff]  }
 0x231   : > { %6853 = vmatprep.subr.bf16.mxu0 %v9486_v40  ;;  %7386 = vmatprep.subr.bf16.mxu1 %v9489_v41  ;;  %v9577_v40 = vld [vmem:[%s12211_s18 + $0x604] ss:$16 sps:$4 sm:$0xff]   ;;  %v9580_v41 = vld [vmem:[%s12211_s18 + $0x60c] ss:$16 sps:$4 sm:$0xff]  }
 0x232   : > { %6883 = vmatprep.mubr.bf16.mxu0 %v12376_v42  ;;  %7416 = vmatprep.mubr.bf16.mxu1 %v12376_v42 }
 0x234   : > { %6854 = vmatpush1.bf16.msra.mxu0 %v9484_v43  ;;  %7387 = vmatpush1.bf16.msra.mxu1 %v9487_v30  ;;  %v9575_v43 = vld [vmem:[%s12211_s18 + $0x600] ss:$16 sps:$4 sm:$0xff]   ;;  %v12443_v30 = vrot.slane %v12361_v32, %v12261_v2 }
 0x235   : > { %6855 = vmatprep.subr.bf16.mxu0 %v9492_v44  ;;  %7388 = vmatprep.subr.bf16.mxu1 %v9495_v45  ;;  %v9578_v44 = vld [vmem:[%s12211_s18 + $0x608] ss:$16 sps:$4 sm:$0xff]   ;;  %v9583_v45 = vld [vmem:[%s12211_s18 + $0x624] ss:$16 sps:$4 sm:$0xff]   ;;  %v9581_v32 = vld [vmem:[%s12211_s18 + $0x620] ss:$16 sps:$4 sm:$0xff]  }
 0x238   : > { %6856 = vmatpush1.bf16.msra.mxu0 %v9490_v46  ;;  %7389 = vmatpush1.bf16.msra.mxu1 %v9493_v47  ;;  %v9586_v46 = vld [vmem:[%s12211_s18 + $0x62c] ss:$16 sps:$4 sm:$0xff]   ;;  %v2708_v47 = vcombine.high %v12376_v42, %v12376_v42  ;;  %v9587_v42 = vld [vmem:[%s12211_s18 + $0x640] ss:$16 sps:$4 sm:$0xff]  }
 0x239   : > { %6857 = vmatprep.subr.bf16.mxu0 %v9498_v48  ;;  %7390 = vmatprep.subr.bf16.mxu1 %v9501_v49  ;;  %v9584_v48 = vld [vmem:[%s12211_s18 + $0x628] ss:$16 sps:$4 sm:$0xff]   ;;  %v9589_v49 = vld [vmem:[%s12211_s18 + $0x644] ss:$16 sps:$4 sm:$0xff]  }
 0x23c   : > { %6858 = vmatpush1.bf16.msra.mxu0 %v9496_v50  ;;  %7391 = vmatpush1.bf16.msra.mxu1 %v9499_v51  ;;  %v9592_v50 = vld [vmem:[%s12211_s18 + $0x64c] ss:$16 sps:$4 sm:$0xff]   ;;  %v9590_v51 = vld [vmem:[%s12211_s18 + $0x648] ss:$16 sps:$4 sm:$0xff]  }
 0x23d   : > { %6859 = vmatprep.subr.bf16.mxu0 %v9504_v52  ;;  %7392 = vmatprep.subr.bf16.mxu1 %v9507_v53  ;;  %v9595_v52 = vld [vmem:[%s12211_s18 + $0x664] ss:$16 sps:$4 sm:$0xff]   ;;  %v9598_v53 = vld [vmem:[%s12211_s18 + $0x66c] ss:$16 sps:$4 sm:$0xff]  }
 0x240   : > { %6860 = vmatpush1.bf16.msra.mxu0 %v9502_v54  ;;  %7393 = vmatpush1.bf16.msra.mxu1 %v9505_v55  ;;  %v9593_v54 = vld [vmem:[%s12211_s18 + $0x660] ss:$16 sps:$4 sm:$0xff]   ;;  %v9596_v55 = vld [vmem:[%s12211_s18 + $0x668] ss:$16 sps:$4 sm:$0xff]  }
 0x241   : > { %6861 = vmatprep.subr.bf16.mxu0 %v9510_v56  ;;  %7394 = vmatprep.subr.bf16.mxu1 %v9513_v57  ;;  %v9601_v56 = vld [vmem:[%s12211_s18 + $0x684] ss:$16 sps:$4 sm:$0xff]   ;;  %v9604_v57 = vld [vmem:[%s12211_s18 + $0x68c] ss:$16 sps:$4 sm:$0xff]  }
 0x244   : > { %6862 = vmatpush1.bf16.msra.mxu0 %v9508_v58  ;;  %7395 = vmatpush1.bf16.msra.mxu1 %v9511_v60  ;;  %v9599_v58 = vld [vmem:[%s12211_s18 + $0x680] ss:$16 sps:$4 sm:$0xff]   ;;  %v9602_v60 = vld [vmem:[%s12211_s18 + $0x688] ss:$16 sps:$4 sm:$0xff]  }
 0x245   : > { %6863 = vmatprep.subr.bf16.mxu0 %v9516_v61  ;;  %7396 = vmatprep.subr.bf16.mxu1 %v9519_v62  ;;  %v9607_v61 = vld [vmem:[%s12211_s18 + $0x6a4] ss:$16 sps:$4 sm:$0xff]   ;;  %v9610_v62 = vld [vmem:[%s12211_s18 + $0x6ac] ss:$16 sps:$4 sm:$0xff]  }
 0x248   : > { %6864 = vmatpush1.bf16.msra.mxu0 %v9514_v63  ;;  %7397 = vmatpush1.bf16.msra.mxu1 %v9517_v0  ;;  %v9605_v63 = vld [vmem:[%s12211_s18 + $0x6a0] ss:$16 sps:$4 sm:$0xff]   ;;  %v9608_v0 = vld [vmem:[%s12211_s18 + $0x6a8] ss:$16 sps:$4 sm:$0xff]  }
 0x249   : > { %6865 = vmatprep.subr.bf16.mxu0 %v9522_v1  ;;  %7398 = vmatprep.subr.bf16.mxu1 %v9525_v3  ;;  %v9613_v1 = vld [vmem:[%s12211_s18 + $0x6c4] ss:$16 sps:$4 sm:$0xff]   ;;  %v9616_v3 = vld [vmem:[%s12211_s18 + $0x6cc] ss:$16 sps:$4 sm:$0xff]  }
 0x24c   : > { %6866 = vmatpush1.bf16.msra.mxu0 %v9520_v4  ;;  %7399 = vmatpush1.bf16.msra.mxu1 %v9523_v6  ;;  %v9611_v4 = vld [vmem:[%s12211_s18 + $0x6c0] ss:$16 sps:$4 sm:$0xff]   ;;  %v9614_v6 = vld [vmem:[%s12211_s18 + $0x6c8] ss:$16 sps:$4 sm:$0xff]  }
 0x24d   : > { %6867 = vmatprep.subr.bf16.mxu0 %v9528_v7  ;;  %7400 = vmatprep.subr.bf16.mxu1 %v9531_v8  ;;  %v9619_v7 = vld [vmem:[%s12211_s18 + $0x6e4] ss:$16 sps:$4 sm:$0xff]   ;;  %v9622_v8 = vld [vmem:[%s12211_s18 + $0x6ec] ss:$16 sps:$4 sm:$0xff]  }
 0x250   : > { %6868 = vmatpush1.bf16.msra.mxu0 %v9526_v9  ;;  %7401 = vmatpush1.bf16.msra.mxu1 %v9529_v10  ;;  %v9617_v9 = vld [vmem:[%s12211_s18 + $0x6e0] ss:$16 sps:$4 sm:$0xff]   ;;  %v9620_v10 = vld [vmem:[%s12211_s18 + $0x6e8] ss:$16 sps:$4 sm:$0xff]  }
 0x251   : > { %6869 = vmatprep.subr.bf16.mxu0 %v9534_v11  ;;  %7402 = vmatprep.subr.bf16.mxu1 %v9537_v12  ;;  %v9625_v11 = vld [vmem:[%s12211_s18 + $0x704] ss:$16 sps:$4 sm:$0xff]   ;;  %v9628_v12 = vld [vmem:[%s12211_s18 + $0x70c] ss:$16 sps:$4 sm:$0xff]  }
 0x254   : > { %6870 = vmatpush1.bf16.msra.mxu0 %v9532_v13  ;;  %7403 = vmatpush1.bf16.msra.mxu1 %v9535_v14  ;;  %v9623_v13 = vld [vmem:[%s12211_s18 + $0x700] ss:$16 sps:$4 sm:$0xff]   ;;  %v9626_v14 = vld [vmem:[%s12211_s18 + $0x708] ss:$16 sps:$4 sm:$0xff]  }
 0x255   : > { %6871 = vmatprep.subr.bf16.mxu0 %v9540_v15  ;;  %7404 = vmatprep.subr.bf16.mxu1 %v9543_v16  ;;  %v9631_v15 = vld [vmem:[%s12211_s18 + $0x724] ss:$16 sps:$4 sm:$0xff]   ;;  %v9634_v16 = vld [vmem:[%s12211_s18 + $0x72c] ss:$16 sps:$4 sm:$0xff]  }
 0x258   : > { %6872 = vmatpush1.bf16.msra.mxu0 %v9538_v17  ;;  %7405 = vmatpush1.bf16.msra.mxu1 %v9541_v18  ;;  %v9629_v17 = vld [vmem:[%s12211_s18 + $0x720] ss:$16 sps:$4 sm:$0xff]   ;;  %v9632_v18 = vld [vmem:[%s12211_s18 + $0x728] ss:$16 sps:$4 sm:$0xff]  }
 0x259   : > { %6873 = vmatprep.subr.bf16.mxu0 %v9546_v19  ;;  %7406 = vmatprep.subr.bf16.mxu1 %v9549_v20  ;;  %v9637_v19 = vld [vmem:[%s12211_s18 + $0x744] ss:$16 sps:$4 sm:$0xff]   ;;  %v9640_v20 = vld [vmem:[%s12211_s18 + $0x74c] ss:$16 sps:$4 sm:$0xff]  }
 0x25c   : > { %6874 = vmatpush1.bf16.msra.mxu0 %v9544_v21  ;;  %7407 = vmatpush1.bf16.msra.mxu1 %v9547_v22  ;;  %v9635_v21 = vld [vmem:[%s12211_s18 + $0x740] ss:$16 sps:$4 sm:$0xff]   ;;  %v9638_v22 = vld [vmem:[%s12211_s18 + $0x748] ss:$16 sps:$4 sm:$0xff]  }
 0x25d   : > { %6875 = vmatprep.subr.bf16.mxu0 %v9552_v23  ;;  %7408 = vmatprep.subr.bf16.mxu1 %v9555_v24  ;;  %v9643_v23 = vld [vmem:[%s12211_s18 + $0x764] ss:$16 sps:$4 sm:$0xff]   ;;  %v9646_v24 = vld [vmem:[%s12211_s18 + $0x76c] ss:$16 sps:$4 sm:$0xff]  }
 0x260   : > { %6876 = vmatpush1.bf16.msra.mxu0 %v9550_v25  ;;  %7409 = vmatpush1.bf16.msra.mxu1 %v9553_v26  ;;  %v9641_v25 = vld [vmem:[%s12211_s18 + $0x760] ss:$16 sps:$4 sm:$0xff]   ;;  %v9644_v26 = vld [vmem:[%s12211_s18 + $0x768] ss:$16 sps:$4 sm:$0xff]  }
 0x261   : > { %6877 = vmatprep.subr.bf16.mxu0 %v9558_v27  ;;  %7410 = vmatprep.subr.bf16.mxu1 %v9561_v28  ;;  %v9649_v27 = vld [vmem:[%s12211_s18 + $0x784] ss:$16 sps:$4 sm:$0xff]   ;;  %v9652_v28 = vld [vmem:[%s12211_s18 + $0x78c] ss:$16 sps:$4 sm:$0xff]  }
 0x264   : > { %6878 = vmatpush1.bf16.msra.mxu0 %v9556_v29  ;;  %7411 = vmatpush1.bf16.msra.mxu1 %v9559_v31  ;;  %v9647_v29 = vld [vmem:[%s12211_s18 + $0x780] ss:$16 sps:$4 sm:$0xff]   ;;  %v9650_v31 = vld [vmem:[%s12211_s18 + $0x788] ss:$16 sps:$4 sm:$0xff]  }
 0x265   : > { %6879 = vmatprep.subr.bf16.mxu0 %v9564_v33  ;;  %7412 = vmatprep.subr.bf16.mxu1 %v9567_v5  ;;  %v9655_v33 = vld [vmem:[%s12211_s18 + $0x7a4] ss:$16 sps:$4 sm:$0xff]   ;;  %v9658_v5 = vld [vmem:[%s12211_s18 + $0x7ac] ss:$16 sps:$4 sm:$0xff]  }
 0x268   : > { %6880 = vmatpush1.bf16.msra.mxu0 %v9562_v34  ;;  %7413 = vmatpush1.bf16.msra.mxu1 %v9565_v35  ;;  %v9653_v34 = vld [vmem:[%s12211_s18 + $0x7a0] ss:$16 sps:$4 sm:$0xff]   ;;  %v9656_v35 = vld [vmem:[%s12211_s18 + $0x7a8] ss:$16 sps:$4 sm:$0xff]  }
 0x269   : > { %6881 = vmatprep.subr.bf16.mxu0 %v9570_v36  ;;  %7414 = vmatprep.subr.bf16.mxu1 %v9573_v37  ;;  %v9661_v36 = vld [vmem:[%s12211_s18 + $0x7c4] ss:$16 sps:$4 sm:$0xff]   ;;  %v9664_v37 = vld [vmem:[%s12211_s18 + $0x7cc] ss:$16 sps:$4 sm:$0xff]  }
 0x26c   : > { %6882 = vmatpush1.bf16.msra.mxu0 %v9568_v38  ;;  %7415 = vmatpush1.bf16.msra.mxu1 %v9571_v39  ;;  %v12507_v38 = vld.sshfl [vmem:[%s13215_s0 + $0x8] sm:$0xff pattern:$0x75316420]  ;;  %v9659_v39 = vld [vmem:[%s12211_s18 + $0x7c0] ss:$16 sps:$4 sm:$0xff]  }
 0x26d   : > { %6892 = vmatprep.subr.bf16.mxu0 %v9577_v40  ;;  %7425 = vmatprep.subr.bf16.mxu1 %v9580_v41  ;;  %v9662_v40 = vld [vmem:[%s12211_s18 + $0x7c8] ss:$16 sps:$4 sm:$0xff]   ;;  %v9667_v41 = vld [vmem:[%s12211_s18 + $0x7e4] ss:$16 sps:$4 sm:$0xff]  }
 0x26f   : > { %6884 = vmatmul.mubr.bf16.vlgmr.msra.gmra.mrb[0].mxu0 %v12443_v30  ;;  %7417 = vmatmul.mubr.bf16.vlgmr.msra.gmra.mrb[0].mxu1 %v12443_v30 }
 0x270   : > { %6893 = vmatpush1.bf16.msra.mxu0 %v9575_v43  ;;  %7426 = vmatpush1.bf16.msra.mxu1 %v9578_v44  ;;  %v9670_v43 = vld [vmem:[%s12211_s18 + $0x7ec] ss:$16 sps:$4 sm:$0xff]   ;;  %v9665_v44 = vld [vmem:[%s12211_s18 + $0x7e0] ss:$16 sps:$4 sm:$0xff]  }
 0x271   : > { %6894 = vmatprep.subr.bf16.mxu0 %v9583_v45  ;;  %7427 = vmatprep.subr.bf16.mxu1 %v9586_v46  ;;  %v9668_v45 = vld [vmem:[%s12211_s18 + $0x7e8] ss:$16 sps:$4 sm:$0xff]   ;;  %v9673_v46 = vld [vmem:[%s12211_s18 + $0x804] ss:$16 sps:$4 sm:$0xff]  }
 0x272   : > { %6924 = vmatprep.mubr.bf16.mxu0 %v2708_v47  ;;  %7457 = vmatprep.mubr.bf16.mxu1 %v2708_v47  ;;  %v9676_v47 = vld [vmem:[%s12211_s18 + $0x80c] ss:$16 sps:$4 sm:$0xff]  }
 0x274   : > { %6895 = vmatpush1.bf16.msra.mxu0 %v9581_v32  ;;  %7428 = vmatpush1.bf16.msra.mxu1 %v9584_v48  ;;  %v2724_v32 = vcombine.high %v12507_v38, %v12507_v38  ;;  %v2706_v48 = vcombine.high %v12443_v30, %v12443_v30  ;;  %v9677_v30 = vld [vmem:[%s12211_s18 + $0x820] ss:$16 sps:$4 sm:$0xff]  }
 0x275   : > { %6896 = vmatprep.subr.bf16.mxu0 %v9589_v49  ;;  %7429 = vmatprep.subr.bf16.mxu1 %v9592_v50  ;;  %v9671_v49 = vld [vmem:[%s12211_s18 + $0x800] ss:$16 sps:$4 sm:$0xff]   ;;  %v9674_v50 = vld [vmem:[%s12211_s18 + $0x808] ss:$16 sps:$4 sm:$0xff]  }
 0x278   : > { %6897 = vmatpush1.bf16.msra.mxu0 %v9587_v42  ;;  %7430 = vmatpush1.bf16.msra.mxu1 %v9590_v51  ;;  %v9679_v42 = vld [vmem:[%s12211_s18 + $0x824] ss:$16 sps:$4 sm:$0xff]   ;;  %v9682_v51 = vld [vmem:[%s12211_s18 + $0x82c] ss:$16 sps:$4 sm:$0xff]  }
 0x279   : > { %6898 = vmatprep.subr.bf16.mxu0 %v9595_v52  ;;  %7431 = vmatprep.subr.bf16.mxu1 %v9598_v53  ;;  %v12526_v52 = vrot.slane %v2724_v32, %v12261_v2  ;;  %v9680_v53 = vld [vmem:[%s12211_s18 + $0x828] ss:$16 sps:$4 sm:$0xff]   ;;  %v9763_v32 = vld [vmem:[%s12211_s18 + $0x9e4] ss:$16 sps:$4 sm:$0xff]  }
 0x27c   : > { %6899 = vmatpush1.bf16.msra.mxu0 %v9593_v54  ;;  %7432 = vmatpush1.bf16.msra.mxu1 %v9596_v55  ;;  %v9685_v54 = vld [vmem:[%s12211_s18 + $0x844] ss:$16 sps:$4 sm:$0xff]   ;;  %v9688_v55 = vld [vmem:[%s12211_s18 + $0x84c] ss:$16 sps:$4 sm:$0xff]  }
 0x27d   : > { %6900 = vmatprep.subr.bf16.mxu0 %v9601_v56  ;;  %7433 = vmatprep.subr.bf16.mxu1 %v9604_v57  ;;  %v9683_v56 = vld [vmem:[%s12211_s18 + $0x840] ss:$16 sps:$4 sm:$0xff]   ;;  %v9686_v57 = vld [vmem:[%s12211_s18 + $0x848] ss:$16 sps:$4 sm:$0xff]  }
 0x280   : > { %6901 = vmatpush1.bf16.msra.mxu0 %v9599_v58  ;;  %7434 = vmatpush1.bf16.msra.mxu1 %v9602_v60  ;;  %v9691_v58 = vld [vmem:[%s12211_s18 + $0x864] ss:$16 sps:$4 sm:$0xff]   ;;  %v9694_v60 = vld [vmem:[%s12211_s18 + $0x86c] ss:$16 sps:$4 sm:$0xff]  }
 0x281   : > { %6902 = vmatprep.subr.bf16.mxu0 %v9607_v61  ;;  %7435 = vmatprep.subr.bf16.mxu1 %v9610_v62  ;;  %v9689_v61 = vld [vmem:[%s12211_s18 + $0x860] ss:$16 sps:$4 sm:$0xff]   ;;  %v9692_v62 = vld [vmem:[%s12211_s18 + $0x868] ss:$16 sps:$4 sm:$0xff]  }
 0x284   : > { %6903 = vmatpush1.bf16.msra.mxu0 %v9605_v63  ;;  %7436 = vmatpush1.bf16.msra.mxu1 %v9608_v0  ;;  %v9697_v63 = vld [vmem:[%s12211_s18 + $0x884] ss:$16 sps:$4 sm:$0xff]   ;;  %v9700_v0 = vld [vmem:[%s12211_s18 + $0x88c] ss:$16 sps:$4 sm:$0xff]  }
 0x285   : > { %6904 = vmatprep.subr.bf16.mxu0 %v9613_v1  ;;  %7437 = vmatprep.subr.bf16.mxu1 %v9616_v3  ;;  %v9695_v1 = vld [vmem:[%s12211_s18 + $0x880] ss:$16 sps:$4 sm:$0xff]   ;;  %v9698_v3 = vld [vmem:[%s12211_s18 + $0x888] ss:$16 sps:$4 sm:$0xff]  }
 0x288   : > { %6905 = vmatpush1.bf16.msra.mxu0 %v9611_v4  ;;  %7438 = vmatpush1.bf16.msra.mxu1 %v9614_v6  ;;  %v9703_v4 = vld [vmem:[%s12211_s18 + $0x8a4] ss:$16 sps:$4 sm:$0xff]   ;;  %v9706_v6 = vld [vmem:[%s12211_s18 + $0x8ac] ss:$16 sps:$4 sm:$0xff]  }
 0x289   : > { %6906 = vmatprep.subr.bf16.mxu0 %v9619_v7  ;;  %7439 = vmatprep.subr.bf16.mxu1 %v9622_v8  ;;  %v9701_v7 = vld [vmem:[%s12211_s18 + $0x8a0] ss:$16 sps:$4 sm:$0xff]   ;;  %v9704_v8 = vld [vmem:[%s12211_s18 + $0x8a8] ss:$16 sps:$4 sm:$0xff]  }
 0x28c   : > { %6907 = vmatpush1.bf16.msra.mxu0 %v9617_v9  ;;  %7440 = vmatpush1.bf16.msra.mxu1 %v9620_v10  ;;  %v9709_v9 = vld [vmem:[%s12211_s18 + $0x8c4] ss:$16 sps:$4 sm:$0xff]   ;;  %v9712_v10 = vld [vmem:[%s12211_s18 + $0x8cc] ss:$16 sps:$4 sm:$0xff]  }
 0x28d   : > { %6908 = vmatprep.subr.bf16.mxu0 %v9625_v11  ;;  %7441 = vmatprep.subr.bf16.mxu1 %v9628_v12  ;;  %v9707_v11 = vld [vmem:[%s12211_s18 + $0x8c0] ss:$16 sps:$4 sm:$0xff]   ;;  %v9710_v12 = vld [vmem:[%s12211_s18 + $0x8c8] ss:$16 sps:$4 sm:$0xff]  }
 0x290   : > { %6909 = vmatpush1.bf16.msra.mxu0 %v9623_v13  ;;  %7442 = vmatpush1.bf16.msra.mxu1 %v9626_v14  ;;  %v9715_v13 = vld [vmem:[%s12211_s18 + $0x8e4] ss:$16 sps:$4 sm:$0xff]   ;;  %v9718_v14 = vld [vmem:[%s12211_s18 + $0x8ec] ss:$16 sps:$4 sm:$0xff]  }
 0x291   : > { %6910 = vmatprep.subr.bf16.mxu0 %v9631_v15  ;;  %7443 = vmatprep.subr.bf16.mxu1 %v9634_v16  ;;  %v9713_v15 = vld [vmem:[%s12211_s18 + $0x8e0] ss:$16 sps:$4 sm:$0xff]   ;;  %v9716_v16 = vld [vmem:[%s12211_s18 + $0x8e8] ss:$16 sps:$4 sm:$0xff]  }
 0x294   : > { %6911 = vmatpush1.bf16.msra.mxu0 %v9629_v17  ;;  %7444 = vmatpush1.bf16.msra.mxu1 %v9632_v18  ;;  %v9721_v17 = vld [vmem:[%s12211_s18 + $0x904] ss:$16 sps:$4 sm:$0xff]   ;;  %v9724_v18 = vld [vmem:[%s12211_s18 + $0x90c] ss:$16 sps:$4 sm:$0xff]  }
 0x295   : > { %6912 = vmatprep.subr.bf16.mxu0 %v9637_v19  ;;  %7445 = vmatprep.subr.bf16.mxu1 %v9640_v20  ;;  %v9719_v19 = vld [vmem:[%s12211_s18 + $0x900] ss:$16 sps:$4 sm:$0xff]   ;;  %v9722_v20 = vld [vmem:[%s12211_s18 + $0x908] ss:$16 sps:$4 sm:$0xff]  }
 0x298   : > { %6913 = vmatpush1.bf16.msra.mxu0 %v9635_v21  ;;  %7446 = vmatpush1.bf16.msra.mxu1 %v9638_v22  ;;  %v9727_v21 = vld [vmem:[%s12211_s18 + $0x924] ss:$16 sps:$4 sm:$0xff]   ;;  %v9730_v22 = vld [vmem:[%s12211_s18 + $0x92c] ss:$16 sps:$4 sm:$0xff]  }
 0x299   : > { %6914 = vmatprep.subr.bf16.mxu0 %v9643_v23  ;;  %7447 = vmatprep.subr.bf16.mxu1 %v9646_v24  ;;  %v9725_v23 = vld [vmem:[%s12211_s18 + $0x920] ss:$16 sps:$4 sm:$0xff]   ;;  %v9728_v24 = vld [vmem:[%s12211_s18 + $0x928] ss:$16 sps:$4 sm:$0xff]  }
 0x29c   : > { %6915 = vmatpush1.bf16.msra.mxu0 %v9641_v25  ;;  %7448 = vmatpush1.bf16.msra.mxu1 %v9644_v26  ;;  %v9733_v25 = vld [vmem:[%s12211_s18 + $0x944] ss:$16 sps:$4 sm:$0xff]   ;;  %v9736_v26 = vld [vmem:[%s12211_s18 + $0x94c] ss:$16 sps:$4 sm:$0xff]  }
 0x29d   : > { %6916 = vmatprep.subr.bf16.mxu0 %v9649_v27  ;;  %7449 = vmatprep.subr.bf16.mxu1 %v9652_v28  ;;  %v9731_v27 = vld [vmem:[%s12211_s18 + $0x940] ss:$16 sps:$4 sm:$0xff]   ;;  %v9734_v28 = vld [vmem:[%s12211_s18 + $0x948] ss:$16 sps:$4 sm:$0xff]  }
 0x2a0   : > { %6917 = vmatpush1.bf16.msra.mxu0 %v9647_v29  ;;  %7450 = vmatpush1.bf16.msra.mxu1 %v9650_v31  ;;  %v9739_v29 = vld [vmem:[%s12211_s18 + $0x964] ss:$16 sps:$4 sm:$0xff]   ;;  %v9742_v31 = vld [vmem:[%s12211_s18 + $0x96c] ss:$16 sps:$4 sm:$0xff]  }
 0x2a1   : > { %6918 = vmatprep.subr.bf16.mxu0 %v9655_v33  ;;  %7451 = vmatprep.subr.bf16.mxu1 %v9658_v5  ;;  %v9737_v33 = vld [vmem:[%s12211_s18 + $0x960] ss:$16 sps:$4 sm:$0xff]   ;;  %v9740_v5 = vld [vmem:[%s12211_s18 + $0x968] ss:$16 sps:$4 sm:$0xff]  }
 0x2a4   : > { %6919 = vmatpush1.bf16.msra.mxu0 %v9653_v34  ;;  %7452 = vmatpush1.bf16.msra.mxu1 %v9656_v35  ;;  %v9745_v34 = vld [vmem:[%s12211_s18 + $0x984] ss:$16 sps:$4 sm:$0xff]   ;;  %v9748_v35 = vld [vmem:[%s12211_s18 + $0x98c] ss:$16 sps:$4 sm:$0xff]  }
 0x2a5   : > { %6920 = vmatprep.subr.bf16.mxu0 %v9661_v36  ;;  %7453 = vmatprep.subr.bf16.mxu1 %v9664_v37  ;;  %v9743_v36 = vld [vmem:[%s12211_s18 + $0x980] ss:$16 sps:$4 sm:$0xff]   ;;  %v9746_v37 = vld [vmem:[%s12211_s18 + $0x988] ss:$16 sps:$4 sm:$0xff]  }
 0x2a8   : > { %6921 = vmatpush1.bf16.msra.mxu0 %v9659_v39  ;;  %7454 = vmatpush1.bf16.msra.mxu1 %v9662_v40  ;;  %v9751_v39 = vld [vmem:[%s12211_s18 + $0x9a4] ss:$16 sps:$4 sm:$0xff]   ;;  %v9754_v40 = vld [vmem:[%s12211_s18 + $0x9ac] ss:$16 sps:$4 sm:$0xff]  }
 0x2a9   : > { %6922 = vmatprep.subr.bf16.mxu0 %v9667_v41  ;;  %7455 = vmatprep.subr.bf16.mxu1 %v9670_v43  ;;  %v9749_v41 = vld [vmem:[%s12211_s18 + $0x9a0] ss:$16 sps:$4 sm:$0xff]   ;;  %v9752_v43 = vld [vmem:[%s12211_s18 + $0x9a8] ss:$16 sps:$4 sm:$0xff]  }
 0x2ac   : > { %6923 = vmatpush1.bf16.msra.mxu0 %v9665_v44  ;;  %7456 = vmatpush1.bf16.msra.mxu1 %v9668_v45  ;;  %v9757_v44 = vld [vmem:[%s12211_s18 + $0x9c4] ss:$16 sps:$4 sm:$0xff]   ;;  %v9760_v45 = vld [vmem:[%s12211_s18 + $0x9cc] ss:$16 sps:$4 sm:$0xff]  }
 0x2ad   : > { %6933 = vmatprep.subr.bf16.mxu0 %v9673_v46  ;;  %7466 = vmatprep.subr.bf16.mxu1 %v9676_v47  ;;  %v9755_v46 = vld [vmem:[%s12211_s18 + $0x9c0] ss:$16 sps:$4 sm:$0xff]   ;;  %v9758_v47 = vld [vmem:[%s12211_s18 + $0x9c8] ss:$16 sps:$4 sm:$0xff]  }
 0x2af   : > { %6925 = vmatmul.mubr.bf16.vlgmr.msra.gmra.mrb[0].mxu0 %v2706_v48  ;;  %7458 = vmatmul.mubr.bf16.vlgmr.msra.gmra.mrb[0].mxu1 %v2706_v48  ;;  %v9766_v48 = vld [vmem:[%s12211_s18 + $0x9ec] ss:$16 sps:$4 sm:$0xff]  }
 0x2b0   : > { %6934 = vmatpush1.bf16.msra.mxu0 %v9671_v49  ;;  %7467 = vmatpush1.bf16.msra.mxu1 %v9674_v50  ;;  %v9761_v49 = vld [vmem:[%s12211_s18 + $0x9e0] ss:$16 sps:$4 sm:$0xff]   ;;  %v9764_v50 = vld [vmem:[%s12211_s18 + $0x9e8] ss:$16 sps:$4 sm:$0xff]  }
 0x2b1   : > { %6935 = vmatprep.subr.bf16.mxu0 %v9679_v42  ;;  %7468 = vmatprep.subr.bf16.mxu1 %v9682_v51  ;;  %v9769_v42 = vld [vmem:[%s12211_s18 + $0xa04] ss:$16 sps:$4 sm:$0xff]   ;;  %v9772_v51 = vld [vmem:[%s12211_s18 + $0xa0c] ss:$16 sps:$4 sm:$0xff]  }
 0x2b2   : > { %6965 = vmatprep.mubr.bf16.mxu0 %v12526_v52  ;;  %7498 = vmatprep.mubr.bf16.mxu1 %v12526_v52 }
 0x2b4   : > { %6936 = vmatpush1.bf16.msra.mxu0 %v9677_v30  ;;  %7469 = vmatpush1.bf16.msra.mxu1 %v9680_v53  ;;  %v12592_v30 = vrot.slane %v12507_v38, %v12261_v2  ;;  %v9767_v53 = vld [vmem:[%s12211_s18 + $0xa00] ss:$16 sps:$4 sm:$0xff]  }
 0x2b5   : > { %6937 = vmatprep.subr.bf16.mxu0 %v9685_v54  ;;  %7470 = vmatprep.subr.bf16.mxu1 %v9688_v55  ;;  %v9770_v54 = vld [vmem:[%s12211_s18 + $0xa08] ss:$16 sps:$4 sm:$0xff]   ;;  %v9775_v55 = vld [vmem:[%s12211_s18 + $0xa24] ss:$16 sps:$4 sm:$0xff]   ;;  %v9773_v38 = vld [vmem:[%s12211_s18 + $0xa20] ss:$16 sps:$4 sm:$0xff]  }
 0x2b8   : > { %6938 = vmatpush1.bf16.msra.mxu0 %v9683_v56  ;;  %7471 = vmatpush1.bf16.msra.mxu1 %v9686_v57  ;;  %v9778_v56 = vld [vmem:[%s12211_s18 + $0xa2c] ss:$16 sps:$4 sm:$0xff]   ;;  %v2756_v57 = vcombine.high %v12526_v52, %v12526_v52  ;;  %v9779_v52 = vld [vmem:[%s12211_s18 + $0xa40] ss:$16 sps:$4 sm:$0xff]  }
 0x2b9   : > { %6939 = vmatprep.subr.bf16.mxu0 %v9691_v58  ;;  %7472 = vmatprep.subr.bf16.mxu1 %v9694_v60  ;;  %v9776_v58 = vld [vmem:[%s12211_s18 + $0xa28] ss:$16 sps:$4 sm:$0xff]   ;;  %v9781_v60 = vld [vmem:[%s12211_s18 + $0xa44] ss:$16 sps:$4 sm:$0xff]  }
 0x2bc   : > { %6940 = vmatpush1.bf16.msra.mxu0 %v9689_v61  ;;  %7473 = vmatpush1.bf16.msra.mxu1 %v9692_v62  ;;  %v9784_v61 = vld [vmem:[%s12211_s18 + $0xa4c] ss:$16 sps:$4 sm:$0xff]   ;;  %v9782_v62 = vld [vmem:[%s12211_s18 + $0xa48] ss:$16 sps:$4 sm:$0xff]  }
 0x2bd   : > { %6941 = vmatprep.subr.bf16.mxu0 %v9697_v63  ;;  %7474 = vmatprep.subr.bf16.mxu1 %v9700_v0  ;;  %v9787_v63 = vld [vmem:[%s12211_s18 + $0xa64] ss:$16 sps:$4 sm:$0xff]   ;;  %v9790_v0 = vld [vmem:[%s12211_s18 + $0xa6c] ss:$16 sps:$4 sm:$0xff]  }
 0x2c0   : > { %6942 = vmatpush1.bf16.msra.mxu0 %v9695_v1  ;;  %7475 = vmatpush1.bf16.msra.mxu1 %v9698_v3  ;;  %v9785_v1 = vld [vmem:[%s12211_s18 + $0xa60] ss:$16 sps:$4 sm:$0xff]   ;;  %v9788_v3 = vld [vmem:[%s12211_s18 + $0xa68] ss:$16 sps:$4 sm:$0xff]  }
 0x2c1   : > { %6943 = vmatprep.subr.bf16.mxu0 %v9703_v4  ;;  %7476 = vmatprep.subr.bf16.mxu1 %v9706_v6  ;;  %v9793_v4 = vld [vmem:[%s12211_s18 + $0xa84] ss:$16 sps:$4 sm:$0xff]   ;;  %v9796_v6 = vld [vmem:[%s12211_s18 + $0xa8c] ss:$16 sps:$4 sm:$0xff]  }
 0x2c4   : > { %6944 = vmatpush1.bf16.msra.mxu0 %v9701_v7  ;;  %7477 = vmatpush1.bf16.msra.mxu1 %v9704_v8  ;;  %v9791_v7 = vld [vmem:[%s12211_s18 + $0xa80] ss:$16 sps:$4 sm:$0xff]   ;;  %v9794_v8 = vld [vmem:[%s12211_s18 + $0xa88] ss:$16 sps:$4 sm:$0xff]  }
 0x2c5   : > { %6945 = vmatprep.subr.bf16.mxu0 %v9709_v9  ;;  %7478 = vmatprep.subr.bf16.mxu1 %v9712_v10  ;;  %v9799_v9 = vld [vmem:[%s12211_s18 + $0xaa4] ss:$16 sps:$4 sm:$0xff]   ;;  %v9802_v10 = vld [vmem:[%s12211_s18 + $0xaac] ss:$16 sps:$4 sm:$0xff]  }
 0x2c8   : > { %6946 = vmatpush1.bf16.msra.mxu0 %v9707_v11  ;;  %7479 = vmatpush1.bf16.msra.mxu1 %v9710_v12  ;;  %v9797_v11 = vld [vmem:[%s12211_s18 + $0xaa0] ss:$16 sps:$4 sm:$0xff]   ;;  %v9800_v12 = vld [vmem:[%s12211_s18 + $0xaa8] ss:$16 sps:$4 sm:$0xff]  }
 0x2c9   : > { %6947 = vmatprep.subr.bf16.mxu0 %v9715_v13  ;;  %7480 = vmatprep.subr.bf16.mxu1 %v9718_v14  ;;  %v9805_v13 = vld [vmem:[%s12211_s18 + $0xac4] ss:$16 sps:$4 sm:$0xff]   ;;  %v9808_v14 = vld [vmem:[%s12211_s18 + $0xacc] ss:$16 sps:$4 sm:$0xff]  }
 0x2cc   : > { %6948 = vmatpush1.bf16.msra.mxu0 %v9713_v15  ;;  %7481 = vmatpush1.bf16.msra.mxu1 %v9716_v16  ;;  %v9803_v15 = vld [vmem:[%s12211_s18 + $0xac0] ss:$16 sps:$4 sm:$0xff]   ;;  %v9806_v16 = vld [vmem:[%s12211_s18 + $0xac8] ss:$16 sps:$4 sm:$0xff]  }
 0x2cd   : > { %6949 = vmatprep.subr.bf16.mxu0 %v9721_v17  ;;  %7482 = vmatprep.subr.bf16.mxu1 %v9724_v18  ;;  %v9811_v17 = vld [vmem:[%s12211_s18 + $0xae4] ss:$16 sps:$4 sm:$0xff]   ;;  %v9814_v18 = vld [vmem:[%s12211_s18 + $0xaec] ss:$16 sps:$4 sm:$0xff]  }
 0x2d0   : > { %6950 = vmatpush1.bf16.msra.mxu0 %v9719_v19  ;;  %7483 = vmatpush1.bf16.msra.mxu1 %v9722_v20  ;;  %v9809_v19 = vld [vmem:[%s12211_s18 + $0xae0] ss:$16 sps:$4 sm:$0xff]   ;;  %v9812_v20 = vld [vmem:[%s12211_s18 + $0xae8] ss:$16 sps:$4 sm:$0xff]  }
 0x2d1   : > { %6951 = vmatprep.subr.bf16.mxu0 %v9727_v21  ;;  %7484 = vmatprep.subr.bf16.mxu1 %v9730_v22  ;;  %v9817_v21 = vld [vmem:[%s12211_s18 + $0xb04] ss:$16 sps:$4 sm:$0xff]   ;;  %v9820_v22 = vld [vmem:[%s12211_s18 + $0xb0c] ss:$16 sps:$4 sm:$0xff]  }
 0x2d4   : > { %6952 = vmatpush1.bf16.msra.mxu0 %v9725_v23  ;;  %7485 = vmatpush1.bf16.msra.mxu1 %v9728_v24  ;;  %v9815_v23 = vld [vmem:[%s12211_s18 + $0xb00] ss:$16 sps:$4 sm:$0xff]   ;;  %v9818_v24 = vld [vmem:[%s12211_s18 + $0xb08] ss:$16 sps:$4 sm:$0xff]  }
 0x2d5   : > { %6953 = vmatprep.subr.bf16.mxu0 %v9733_v25  ;;  %7486 = vmatprep.subr.bf16.mxu1 %v9736_v26  ;;  %v9823_v25 = vld [vmem:[%s12211_s18 + $0xb24] ss:$16 sps:$4 sm:$0xff]   ;;  %v9826_v26 = vld [vmem:[%s12211_s18 + $0xb2c] ss:$16 sps:$4 sm:$0xff]  }
 0x2d8   : > { %6954 = vmatpush1.bf16.msra.mxu0 %v9731_v27  ;;  %7487 = vmatpush1.bf16.msra.mxu1 %v9734_v28  ;;  %v9821_v27 = vld [vmem:[%s12211_s18 + $0xb20] ss:$16 sps:$4 sm:$0xff]   ;;  %v9824_v28 = vld [vmem:[%s12211_s18 + $0xb28] ss:$16 sps:$4 sm:$0xff]  }
 0x2d9   : > { %6955 = vmatprep.subr.bf16.mxu0 %v9739_v29  ;;  %7488 = vmatprep.subr.bf16.mxu1 %v9742_v31  ;;  %v9829_v29 = vld [vmem:[%s12211_s18 + $0xb44] ss:$16 sps:$4 sm:$0xff]   ;;  %v9832_v31 = vld [vmem:[%s12211_s18 + $0xb4c] ss:$16 sps:$4 sm:$0xff]  }
 0x2dc   : > { %6956 = vmatpush1.bf16.msra.mxu0 %v9737_v33  ;;  %7489 = vmatpush1.bf16.msra.mxu1 %v9740_v5  ;;  %v9827_v33 = vld [vmem:[%s12211_s18 + $0xb40] ss:$16 sps:$4 sm:$0xff]   ;;  %v9830_v5 = vld [vmem:[%s12211_s18 + $0xb48] ss:$16 sps:$4 sm:$0xff]  }
 0x2dd   : > { %6957 = vmatprep.subr.bf16.mxu0 %v9745_v34  ;;  %7490 = vmatprep.subr.bf16.mxu1 %v9748_v35  ;;  %v9835_v34 = vld [vmem:[%s12211_s18 + $0xb64] ss:$16 sps:$4 sm:$0xff]   ;;  %v9838_v35 = vld [vmem:[%s12211_s18 + $0xb6c] ss:$16 sps:$4 sm:$0xff]  }
 0x2e0   : > { %6958 = vmatpush1.bf16.msra.mxu0 %v9743_v36  ;;  %7491 = vmatpush1.bf16.msra.mxu1 %v9746_v37  ;;  %v9833_v36 = vld [vmem:[%s12211_s18 + $0xb60] ss:$16 sps:$4 sm:$0xff]   ;;  %v9836_v37 = vld [vmem:[%s12211_s18 + $0xb68] ss:$16 sps:$4 sm:$0xff]  }
 0x2e1   : > { %6959 = vmatprep.subr.bf16.mxu0 %v9751_v39  ;;  %7492 = vmatprep.subr.bf16.mxu1 %v9754_v40  ;;  %v9841_v39 = vld [vmem:[%s12211_s18 + $0xb84] ss:$16 sps:$4 sm:$0xff]   ;;  %v9844_v40 = vld [vmem:[%s12211_s18 + $0xb8c] ss:$16 sps:$4 sm:$0xff]  }
 0x2e4   : > { %6960 = vmatpush1.bf16.msra.mxu0 %v9749_v41  ;;  %7493 = vmatpush1.bf16.msra.mxu1 %v9752_v43  ;;  %v9839_v41 = vld [vmem:[%s12211_s18 + $0xb80] ss:$16 sps:$4 sm:$0xff]   ;;  %v9842_v43 = vld [vmem:[%s12211_s18 + $0xb88] ss:$16 sps:$4 sm:$0xff]  }
 0x2e5   : > { %6961 = vmatprep.subr.bf16.mxu0 %v9757_v44  ;;  %7494 = vmatprep.subr.bf16.mxu1 %v9760_v45  ;;  %v9847_v44 = vld [vmem:[%s12211_s18 + $0xba4] ss:$16 sps:$4 sm:$0xff]   ;;  %v9850_v45 = vld [vmem:[%s12211_s18 + $0xbac] ss:$16 sps:$4 sm:$0xff]  }
 0x2e8   : > { %6962 = vmatpush1.bf16.msra.mxu0 %v9755_v46  ;;  %7495 = vmatpush1.bf16.msra.mxu1 %v9758_v47  ;;  %v9845_v46 = vld [vmem:[%s12211_s18 + $0xba0] ss:$16 sps:$4 sm:$0xff]   ;;  %v9848_v47 = vld [vmem:[%s12211_s18 + $0xba8] ss:$16 sps:$4 sm:$0xff]  }
 0x2e9   : > { %6963 = vmatprep.subr.bf16.mxu0 %v9763_v32  ;;  %7496 = vmatprep.subr.bf16.mxu1 %v9766_v48  ;;  %v9853_v32 = vld [vmem:[%s12211_s18 + $0xbc4] ss:$16 sps:$4 sm:$0xff]   ;;  %v9856_v48 = vld [vmem:[%s12211_s18 + $0xbcc] ss:$16 sps:$4 sm:$0xff]  }
 0x2ec   : > { %6964 = vmatpush1.bf16.msra.mxu0 %v9761_v49  ;;  %7497 = vmatpush1.bf16.msra.mxu1 %v9764_v50  ;;  %v10497_v49 = vld [vmem:[%s13215_s0 + $0x8] sm:$0xff] }
 0x2ed   : > { %6974 = vmatprep.subr.bf16.mxu0 %v9769_v42  ;;  %7507 = vmatprep.subr.bf16.mxu1 %v9772_v51  ;;  %v2709_v50 = vcombine.high %v10497_v49, %v10497_v49  ;;  %v9851_v42 = vld [vmem:[%s12211_s18 + $0xbc0] ss:$16 sps:$4 sm:$0xff]   ;;  %v9854_v51 = vld [vmem:[%s12211_s18 + $0xbc8] ss:$16 sps:$4 sm:$0xff]  }
 0x2ee   : > { %v9935_v49 = vld [vmem:[%s12211_s18 + $0xd80] ss:$16 sps:$4 sm:$0xff]  }
 0x2ef   : > { %6966 = vmatmul.mubr.bf16.vlgmr.msra.gmra.mrb[0].mxu0 %v12592_v30  ;;  %7499 = vmatmul.mubr.bf16.vlgmr.msra.gmra.mrb[0].mxu1 %v12592_v30 }
 0x2f0   : > { %6975 = vmatpush1.bf16.msra.mxu0 %v9767_v53  ;;  %7508 = vmatpush1.bf16.msra.mxu1 %v9770_v54  ;;  %v9859_v53 = vld [vmem:[%s12211_s18 + $0xbe4] ss:$16 sps:$4 sm:$0xff]   ;;  %v9862_v54 = vld [vmem:[%s12211_s18 + $0xbec] ss:$16 sps:$4 sm:$0xff]  }
 0x2f1   : > { %6976 = vmatprep.subr.bf16.mxu0 %v9775_v55  ;;  %7509 = vmatprep.subr.bf16.mxu1 %v9778_v56  ;;  %v12662_v55 = vrot.slane %v2709_v50, %v12261_v2  ;;  %v9857_v56 = vld [vmem:[%s12211_s18 + $0xbe0] ss:$16 sps:$4 sm:$0xff]   ;;  %v9938_v50 = vld [vmem:[%s12211_s18 + $0xd88] ss:$16 sps:$4 sm:$0xff]  }
 0x2f2   : > { %7006 = vmatprep.mubr.bf16.mxu0 %v2756_v57  ;;  %7539 = vmatprep.mubr.bf16.mxu1 %v2756_v57  ;;  %v9860_v57 = vld [vmem:[%s12211_s18 + $0xbe8] ss:$16 sps:$4 sm:$0xff]  }
 0x2f4   : > { %6977 = vmatpush1.bf16.msra.mxu0 %v9773_v38  ;;  %7510 = vmatpush1.bf16.msra.mxu1 %v9776_v58  ;;  %v9865_v38 = vld [vmem:[%s12211_s18 + $0xc04] ss:$16 sps:$4 sm:$0xff]   ;;  %v9868_v58 = vld [vmem:[%s12211_s18 + $0xc0c] ss:$16 sps:$4 sm:$0xff]  }
 0x2f5   : > { %6978 = vmatprep.subr.bf16.mxu0 %v9781_v60  ;;  %7511 = vmatprep.subr.bf16.mxu1 %v9784_v61  ;;  %v2725_v60 = vcombine.high %v12662_v55, %v12662_v55  ;;  %v2754_v61 = vcombine.high %v12592_v30, %v12592_v30  ;;  %v9869_v30 = vld [vmem:[%s12211_s18 + $0xc20] ss:$16 sps:$4 sm:$0xff]  }
 0x2f8   : > { %6979 = vmatpush1.bf16.msra.mxu0 %v9779_v52  ;;  %7512 = vmatpush1.bf16.msra.mxu1 %v9782_v62  ;;  %v9863_v52 = vld [vmem:[%s12211_s18 + $0xc00] ss:$16 sps:$4 sm:$0xff]   ;;  %v9866_v62 = vld [vmem:[%s12211_s18 + $0xc08] ss:$16 sps:$4 sm:$0xff]  }
 0x2f9   : > { %6980 = vmatprep.subr.bf16.mxu0 %v9787_v63  ;;  %7513 = vmatprep.subr.bf16.mxu1 %v9790_v0  ;;  %v9871_v63 = vld [vmem:[%s12211_s18 + $0xc24] ss:$16 sps:$4 sm:$0xff]   ;;  %v9874_v0 = vld [vmem:[%s12211_s18 + $0xc2c] ss:$16 sps:$4 sm:$0xff]  }
 0x2fc   : > { %6981 = vmatpush1.bf16.msra.mxu0 %v9785_v1  ;;  %7514 = vmatpush1.bf16.msra.mxu1 %v9788_v3  ;;  %v12677_v1 = vrot.slane %v2725_v60, %v12261_v2  ;;  %v9872_v3 = vld [vmem:[%s12211_s18 + $0xc28] ss:$16 sps:$4 sm:$0xff]   ;;  %v9955_v60 = vld [vmem:[%s12211_s18 + $0xde4] ss:$16 sps:$4 sm:$0xff]  }
 0x2fd   : > { %6982 = vmatprep.subr.bf16.mxu0 %v9793_v4  ;;  %7515 = vmatprep.subr.bf16.mxu1 %v9796_v6  ;;  %v9877_v4 = vld [vmem:[%s12211_s18 + $0xc44] ss:$16 sps:$4 sm:$0xff]   ;;  %v9880_v6 = vld [vmem:[%s12211_s18 + $0xc4c] ss:$16 sps:$4 sm:$0xff]  }
 0x300   : > { %6983 = vmatpush1.bf16.msra.mxu0 %v9791_v7  ;;  %7516 = vmatpush1.bf16.msra.mxu1 %v9794_v8  ;;  %v9875_v7 = vld [vmem:[%s12211_s18 + $0xc40] ss:$16 sps:$4 sm:$0xff]   ;;  %v9878_v8 = vld [vmem:[%s12211_s18 + $0xc48] ss:$16 sps:$4 sm:$0xff]  }
 0x301   : > { %6984 = vmatprep.subr.bf16.mxu0 %v9799_v9  ;;  %7517 = vmatprep.subr.bf16.mxu1 %v9802_v10  ;;  %v9883_v9 = vld [vmem:[%s12211_s18 + $0xc64] ss:$16 sps:$4 sm:$0xff]   ;;  %v9886_v10 = vld [vmem:[%s12211_s18 + $0xc6c] ss:$16 sps:$4 sm:$0xff]  }
 0x304   : > { %6985 = vmatpush1.bf16.msra.mxu0 %v9797_v11  ;;  %7518 = vmatpush1.bf16.msra.mxu1 %v9800_v12  ;;  %v9881_v11 = vld [vmem:[%s12211_s18 + $0xc60] ss:$16 sps:$4 sm:$0xff]   ;;  %v9884_v12 = vld [vmem:[%s12211_s18 + $0xc68] ss:$16 sps:$4 sm:$0xff]  }
 0x305   : > { %6986 = vmatprep.subr.bf16.mxu0 %v9805_v13  ;;  %7519 = vmatprep.subr.bf16.mxu1 %v9808_v14  ;;  %v9889_v13 = vld [vmem:[%s12211_s18 + $0xc84] ss:$16 sps:$4 sm:$0xff]   ;;  %v9892_v14 = vld [vmem:[%s12211_s18 + $0xc8c] ss:$16 sps:$4 sm:$0xff]  }
 0x308   : > { %6987 = vmatpush1.bf16.msra.mxu0 %v9803_v15  ;;  %7520 = vmatpush1.bf16.msra.mxu1 %v9806_v16  ;;  %v9887_v15 = vld [vmem:[%s12211_s18 + $0xc80] ss:$16 sps:$4 sm:$0xff]   ;;  %v9890_v16 = vld [vmem:[%s12211_s18 + $0xc88] ss:$16 sps:$4 sm:$0xff]  }
 0x309   : > { %6988 = vmatprep.subr.bf16.mxu0 %v9811_v17  ;;  %7521 = vmatprep.subr.bf16.mxu1 %v9814_v18  ;;  %v9895_v17 = vld [vmem:[%s12211_s18 + $0xca4] ss:$16 sps:$4 sm:$0xff]   ;;  %v9898_v18 = vld [vmem:[%s12211_s18 + $0xcac] ss:$16 sps:$4 sm:$0xff]  }
 0x30c   : > { %6989 = vmatpush1.bf16.msra.mxu0 %v9809_v19  ;;  %7522 = vmatpush1.bf16.msra.mxu1 %v9812_v20  ;;  %v9893_v19 = vld [vmem:[%s12211_s18 + $0xca0] ss:$16 sps:$4 sm:$0xff]   ;;  %v9896_v20 = vld [vmem:[%s12211_s18 + $0xca8] ss:$16 sps:$4 sm:$0xff]  }
 0x30d   : > { %6990 = vmatprep.subr.bf16.mxu0 %v9817_v21  ;;  %7523 = vmatprep.subr.bf16.mxu1 %v9820_v22  ;;  %v9901_v21 = vld [vmem:[%s12211_s18 + $0xcc4] ss:$16 sps:$4 sm:$0xff]   ;;  %v9904_v22 = vld [vmem:[%s12211_s18 + $0xccc] ss:$16 sps:$4 sm:$0xff]  }
 0x310   : > { %6991 = vmatpush1.bf16.msra.mxu0 %v9815_v23  ;;  %7524 = vmatpush1.bf16.msra.mxu1 %v9818_v24  ;;  %v9899_v23 = vld [vmem:[%s12211_s18 + $0xcc0] ss:$16 sps:$4 sm:$0xff]   ;;  %v9902_v24 = vld [vmem:[%s12211_s18 + $0xcc8] ss:$16 sps:$4 sm:$0xff]  }
 0x311   : > { %6992 = vmatprep.subr.bf16.mxu0 %v9823_v25  ;;  %7525 = vmatprep.subr.bf16.mxu1 %v9826_v26  ;;  %v9907_v25 = vld [vmem:[%s12211_s18 + $0xce4] ss:$16 sps:$4 sm:$0xff]   ;;  %v9910_v26 = vld [vmem:[%s12211_s18 + $0xcec] ss:$16 sps:$4 sm:$0xff]  }
 0x314   : > { %6993 = vmatpush1.bf16.msra.mxu0 %v9821_v27  ;;  %7526 = vmatpush1.bf16.msra.mxu1 %v9824_v28  ;;  %v9905_v27 = vld [vmem:[%s12211_s18 + $0xce0] ss:$16 sps:$4 sm:$0xff]   ;;  %v9908_v28 = vld [vmem:[%s12211_s18 + $0xce8] ss:$16 sps:$4 sm:$0xff]  }
 0x315   : > { %6994 = vmatprep.subr.bf16.mxu0 %v9829_v29  ;;  %7527 = vmatprep.subr.bf16.mxu1 %v9832_v31  ;;  %v9913_v29 = vld [vmem:[%s12211_s18 + $0xd04] ss:$16 sps:$4 sm:$0xff]   ;;  %v9916_v31 = vld [vmem:[%s12211_s18 + $0xd0c] ss:$16 sps:$4 sm:$0xff]  }
 0x318   : > { %6995 = vmatpush1.bf16.msra.mxu0 %v9827_v33  ;;  %7528 = vmatpush1.bf16.msra.mxu1 %v9830_v5  ;;  %v9911_v33 = vld [vmem:[%s12211_s18 + $0xd00] ss:$16 sps:$4 sm:$0xff]   ;;  %v9914_v5 = vld [vmem:[%s12211_s18 + $0xd08] ss:$16 sps:$4 sm:$0xff]  }
 0x319   : > { %6996 = vmatprep.subr.bf16.mxu0 %v9835_v34  ;;  %7529 = vmatprep.subr.bf16.mxu1 %v9838_v35  ;;  %v9919_v34 = vld [vmem:[%s12211_s18 + $0xd24] ss:$16 sps:$4 sm:$0xff]   ;;  %v9922_v35 = vld [vmem:[%s12211_s18 + $0xd2c] ss:$16 sps:$4 sm:$0xff]  }
 0x31c   : > { %6997 = vmatpush1.bf16.msra.mxu0 %v9833_v36  ;;  %7530 = vmatpush1.bf16.msra.mxu1 %v9836_v37  ;;  %v9917_v36 = vld [vmem:[%s12211_s18 + $0xd20] ss:$16 sps:$4 sm:$0xff]   ;;  %v9920_v37 = vld [vmem:[%s12211_s18 + $0xd28] ss:$16 sps:$4 sm:$0xff]  }
 0x31d   : > { %6998 = vmatprep.subr.bf16.mxu0 %v9841_v39  ;;  %7531 = vmatprep.subr.bf16.mxu1 %v9844_v40  ;;  %v9925_v39 = vld [vmem:[%s12211_s18 + $0xd44] ss:$16 sps:$4 sm:$0xff]   ;;  %v9928_v40 = vld [vmem:[%s12211_s18 + $0xd4c] ss:$16 sps:$4 sm:$0xff]  }
 0x320   : > { %6999 = vmatpush1.bf16.msra.mxu0 %v9839_v41  ;;  %7532 = vmatpush1.bf16.msra.mxu1 %v9842_v43  ;;  %v9923_v41 = vld [vmem:[%s12211_s18 + $0xd40] ss:$16 sps:$4 sm:$0xff]   ;;  %v9926_v43 = vld [vmem:[%s12211_s18 + $0xd48] ss:$16 sps:$4 sm:$0xff]  }
 0x321   : > { %7000 = vmatprep.subr.bf16.mxu0 %v9847_v44  ;;  %7533 = vmatprep.subr.bf16.mxu1 %v9850_v45  ;;  %v9931_v44 = vld [vmem:[%s12211_s18 + $0xd64] ss:$16 sps:$4 sm:$0xff]   ;;  %v9934_v45 = vld [vmem:[%s12211_s18 + $0xd6c] ss:$16 sps:$4 sm:$0xff]  }
 0x324   : > { %7001 = vmatpush1.bf16.msra.mxu0 %v9845_v46  ;;  %7534 = vmatpush1.bf16.msra.mxu1 %v9848_v47  ;;  %v9929_v46 = vld [vmem:[%s12211_s18 + $0xd60] ss:$16 sps:$4 sm:$0xff]   ;;  %v9932_v47 = vld [vmem:[%s12211_s18 + $0xd68] ss:$16 sps:$4 sm:$0xff]  }
 0x325   : > { %7002 = vmatprep.subr.bf16.mxu0 %v9853_v32  ;;  %7535 = vmatprep.subr.bf16.mxu1 %v9856_v48  ;;  %v9937_v32 = vld [vmem:[%s12211_s18 + $0xd84] ss:$16 sps:$4 sm:$0xff]   ;;  %v9940_v48 = vld [vmem:[%s12211_s18 + $0xd8c] ss:$16 sps:$4 sm:$0xff]  }
 0x328   : > { %7003 = vmatpush1.bf16.msra.mxu0 %v9851_v42  ;;  %7536 = vmatpush1.bf16.msra.mxu1 %v9854_v51  ;;  %v9943_v42 = vld [vmem:[%s12211_s18 + $0xda4] ss:$16 sps:$4 sm:$0xff]   ;;  %v9946_v51 = vld [vmem:[%s12211_s18 + $0xdac] ss:$16 sps:$4 sm:$0xff]  }
 0x329   : > { %7004 = vmatprep.subr.bf16.mxu0 %v9859_v53  ;;  %7537 = vmatprep.subr.bf16.mxu1 %v9862_v54  ;;  %v9941_v53 = vld [vmem:[%s12211_s18 + $0xda0] ss:$16 sps:$4 sm:$0xff]   ;;  %v9944_v54 = vld [vmem:[%s12211_s18 + $0xda8] ss:$16 sps:$4 sm:$0xff]  }
 0x32c   : > { %7005 = vmatpush1.bf16.msra.mxu0 %v9857_v56  ;;  %7538 = vmatpush1.bf16.msra.mxu1 %v9860_v57  ;;  %v9949_v56 = vld [vmem:[%s12211_s18 + $0xdc4] ss:$16 sps:$4 sm:$0xff]   ;;  %v9952_v57 = vld [vmem:[%s12211_s18 + $0xdcc] ss:$16 sps:$4 sm:$0xff]  }
 0x32d   : > { %7015 = vmatprep.subr.bf16.mxu0 %v9865_v38  ;;  %7548 = vmatprep.subr.bf16.mxu1 %v9868_v58  ;;  %v9947_v38 = vld [vmem:[%s12211_s18 + $0xdc0] ss:$16 sps:$4 sm:$0xff]   ;;  %v9950_v58 = vld [vmem:[%s12211_s18 + $0xdc8] ss:$16 sps:$4 sm:$0xff]  }
 0x32f   : > { %7007 = vmatmul.mubr.bf16.vlgmr.msra.gmra.mrb[0].mxu0 %v2754_v61  ;;  %7540 = vmatmul.mubr.bf16.vlgmr.msra.gmra.mrb[0].mxu1 %v2754_v61  ;;  %v9958_v61 = vld [vmem:[%s12211_s18 + $0xdec] ss:$16 sps:$4 sm:$0xff]  }
 0x330   : > { %7016 = vmatpush1.bf16.msra.mxu0 %v9863_v52  ;;  %7549 = vmatpush1.bf16.msra.mxu1 %v9866_v62  ;;  %v9953_v52 = vld [vmem:[%s12211_s18 + $0xde0] ss:$16 sps:$4 sm:$0xff]   ;;  %v9956_v62 = vld [vmem:[%s12211_s18 + $0xde8] ss:$16 sps:$4 sm:$0xff]  }
 0x331   : > { %7017 = vmatprep.subr.bf16.mxu0 %v9871_v63  ;;  %7550 = vmatprep.subr.bf16.mxu1 %v9874_v0  ;;  %v9962_v63 = vld [vmem:[%s12211_s18 + $0xe04] ss:$16 sps:$4 sm:$0xff]   ;;  %v9965_v0 = vld [vmem:[%s12211_s18 + $0xe0c] ss:$16 sps:$4 sm:$0xff]  }
 0x332   : > { %7047 = vmatprep.mubr.bf16.mxu0 %v12677_v1  ;;  %7580 = vmatprep.mubr.bf16.mxu1 %v12677_v1 }
 0x334   : > { %7018 = vmatpush1.bf16.msra.mxu0 %v9869_v30  ;;  %7551 = vmatpush1.bf16.msra.mxu1 %v9872_v3  ;;  %v12743_v30 = vrot.slane %v12662_v55, %v12261_v2  ;;  %v9960_v3 = vld [vmem:[%s12211_s18 + $0xe00] ss:$16 sps:$4 sm:$0xff]  }
 0x335   : > { %7019 = vmatprep.subr.bf16.mxu0 %v9877_v4  ;;  %7552 = vmatprep.subr.bf16.mxu1 %v9880_v6  ;;  %v9963_v4 = vld [vmem:[%s12211_s18 + $0xe08] ss:$16 sps:$4 sm:$0xff]   ;;  %v9968_v6 = vld [vmem:[%s12211_s18 + $0xe24] ss:$16 sps:$4 sm:$0xff]   ;;  %v9966_v55 = vld [vmem:[%s12211_s18 + $0xe20] ss:$16 sps:$4 sm:$0xff]  }
 0x338   : > { %7020 = vmatpush1.bf16.msra.mxu0 %v9875_v7  ;;  %7553 = vmatpush1.bf16.msra.mxu1 %v9878_v8  ;;  %v9971_v7 = vld [vmem:[%s12211_s18 + $0xe2c] ss:$16 sps:$4 sm:$0xff]   ;;  %v2757_v8 = vcombine.high %v12677_v1, %v12677_v1  ;;  %v9972_v1 = vld [vmem:[%s12211_s18 + $0xe40] ss:$16 sps:$4 sm:$0xff]  }
 0x339   : > { %7021 = vmatprep.subr.bf16.mxu0 %v9883_v9  ;;  %7554 = vmatprep.subr.bf16.mxu1 %v9886_v10  ;;  %v9969_v9 = vld [vmem:[%s12211_s18 + $0xe28] ss:$16 sps:$4 sm:$0xff]   ;;  %v9974_v10 = vld [vmem:[%s12211_s18 + $0xe44] ss:$16 sps:$4 sm:$0xff]  }
 0x33c   : > { %7022 = vmatpush1.bf16.msra.mxu0 %v9881_v11  ;;  %7555 = vmatpush1.bf16.msra.mxu1 %v9884_v12  ;;  %v9977_v11 = vld [vmem:[%s12211_s18 + $0xe4c] ss:$16 sps:$4 sm:$0xff]   ;;  %v9975_v12 = vld [vmem:[%s12211_s18 + $0xe48] ss:$16 sps:$4 sm:$0xff]  }
 0x33d   : > { %7023 = vmatprep.subr.bf16.mxu0 %v9889_v13  ;;  %7556 = vmatprep.subr.bf16.mxu1 %v9892_v14  ;;  %v9980_v13 = vld [vmem:[%s12211_s18 + $0xe64] ss:$16 sps:$4 sm:$0xff]   ;;  %v9983_v14 = vld [vmem:[%s12211_s18 + $0xe6c] ss:$16 sps:$4 sm:$0xff]  }
 0x340   : > { %7024 = vmatpush1.bf16.msra.mxu0 %v9887_v15  ;;  %7557 = vmatpush1.bf16.msra.mxu1 %v9890_v16  ;;  %v9978_v15 = vld [vmem:[%s12211_s18 + $0xe60] ss:$16 sps:$4 sm:$0xff]   ;;  %v9981_v16 = vld [vmem:[%s12211_s18 + $0xe68] ss:$16 sps:$4 sm:$0xff]  }
 0x341   : > { %7025 = vmatprep.subr.bf16.mxu0 %v9895_v17  ;;  %7558 = vmatprep.subr.bf16.mxu1 %v9898_v18  ;;  %v9986_v17 = vld [vmem:[%s12211_s18 + $0xe84] ss:$16 sps:$4 sm:$0xff]   ;;  %v9989_v18 = vld [vmem:[%s12211_s18 + $0xe8c] ss:$16 sps:$4 sm:$0xff]  }
 0x344   : > { %7026 = vmatpush1.bf16.msra.mxu0 %v9893_v19  ;;  %7559 = vmatpush1.bf16.msra.mxu1 %v9896_v20  ;;  %v9984_v19 = vld [vmem:[%s12211_s18 + $0xe80] ss:$16 sps:$4 sm:$0xff]   ;;  %v9987_v20 = vld [vmem:[%s12211_s18 + $0xe88] ss:$16 sps:$4 sm:$0xff]  }
 0x345   : > { %7027 = vmatprep.subr.bf16.mxu0 %v9901_v21  ;;  %7560 = vmatprep.subr.bf16.mxu1 %v9904_v22  ;;  %v9992_v21 = vld [vmem:[%s12211_s18 + $0xea4] ss:$16 sps:$4 sm:$0xff]   ;;  %v9995_v22 = vld [vmem:[%s12211_s18 + $0xeac] ss:$16 sps:$4 sm:$0xff]  }
 0x348   : > { %7028 = vmatpush1.bf16.msra.mxu0 %v9899_v23  ;;  %7561 = vmatpush1.bf16.msra.mxu1 %v9902_v24  ;;  %v9990_v23 = vld [vmem:[%s12211_s18 + $0xea0] ss:$16 sps:$4 sm:$0xff]   ;;  %v9993_v24 = vld [vmem:[%s12211_s18 + $0xea8] ss:$16 sps:$4 sm:$0xff]  }
 0x349   : > { %7029 = vmatprep.subr.bf16.mxu0 %v9907_v25  ;;  %7562 = vmatprep.subr.bf16.mxu1 %v9910_v26  ;;  %v9998_v25 = vld [vmem:[%s12211_s18 + $0xec4] ss:$16 sps:$4 sm:$0xff]   ;;  %v10001_v26 = vld [vmem:[%s12211_s18 + $0xecc] ss:$16 sps:$4 sm:$0xff]  }
 0x34c   : > { %7030 = vmatpush1.bf16.msra.mxu0 %v9905_v27  ;;  %7563 = vmatpush1.bf16.msra.mxu1 %v9908_v28  ;;  %v9996_v27 = vld [vmem:[%s12211_s18 + $0xec0] ss:$16 sps:$4 sm:$0xff]   ;;  %v9999_v28 = vld [vmem:[%s12211_s18 + $0xec8] ss:$16 sps:$4 sm:$0xff]  }
 0x34d   : > { %7031 = vmatprep.subr.bf16.mxu0 %v9913_v29  ;;  %7564 = vmatprep.subr.bf16.mxu1 %v9916_v31  ;;  %v10004_v29 = vld [vmem:[%s12211_s18 + $0xee4] ss:$16 sps:$4 sm:$0xff]   ;;  %v10007_v31 = vld [vmem:[%s12211_s18 + $0xeec] ss:$16 sps:$4 sm:$0xff]  }
 0x350   : > { %7032 = vmatpush1.bf16.msra.mxu0 %v9911_v33  ;;  %7565 = vmatpush1.bf16.msra.mxu1 %v9914_v5  ;;  %v10002_v33 = vld [vmem:[%s12211_s18 + $0xee0] ss:$16 sps:$4 sm:$0xff]   ;;  %v10005_v5 = vld [vmem:[%s12211_s18 + $0xee8] ss:$16 sps:$4 sm:$0xff]  }
 0x351   : > { %7033 = vmatprep.subr.bf16.mxu0 %v9919_v34  ;;  %7566 = vmatprep.subr.bf16.mxu1 %v9922_v35  ;;  %v10010_v34 = vld [vmem:[%s12211_s18 + $0xf04] ss:$16 sps:$4 sm:$0xff]   ;;  %v10013_v35 = vld [vmem:[%s12211_s18 + $0xf0c] ss:$16 sps:$4 sm:$0xff]  }
 0x354   : > { %7034 = vmatpush1.bf16.msra.mxu0 %v9917_v36  ;;  %7567 = vmatpush1.bf16.msra.mxu1 %v9920_v37  ;;  %v10008_v36 = vld [vmem:[%s12211_s18 + $0xf00] ss:$16 sps:$4 sm:$0xff]   ;;  %v10011_v37 = vld [vmem:[%s12211_s18 + $0xf08] ss:$16 sps:$4 sm:$0xff]  }
 0x355   : > { %7035 = vmatprep.subr.bf16.mxu0 %v9925_v39  ;;  %7568 = vmatprep.subr.bf16.mxu1 %v9928_v40  ;;  %v10016_v39 = vld [vmem:[%s12211_s18 + $0xf24] ss:$16 sps:$4 sm:$0xff]   ;;  %v10019_v40 = vld [vmem:[%s12211_s18 + $0xf2c] ss:$16 sps:$4 sm:$0xff]  }
 0x358   : > { %7036 = vmatpush1.bf16.msra.mxu0 %v9923_v41  ;;  %7569 = vmatpush1.bf16.msra.mxu1 %v9926_v43  ;;  %v10014_v41 = vld [vmem:[%s12211_s18 + $0xf20] ss:$16 sps:$4 sm:$0xff]   ;;  %v10017_v43 = vld [vmem:[%s12211_s18 + $0xf28] ss:$16 sps:$4 sm:$0xff]  }
 0x359   : > { %7037 = vmatprep.subr.bf16.mxu0 %v9931_v44  ;;  %7570 = vmatprep.subr.bf16.mxu1 %v9934_v45  ;;  %v10022_v44 = vld [vmem:[%s12211_s18 + $0xf44] ss:$16 sps:$4 sm:$0xff]   ;;  %v10025_v45 = vld [vmem:[%s12211_s18 + $0xf4c] ss:$16 sps:$4 sm:$0xff]  }
 0x35c   : > { %7038 = vmatpush1.bf16.msra.mxu0 %v9929_v46  ;;  %7571 = vmatpush1.bf16.msra.mxu1 %v9932_v47  ;;  %v10020_v46 = vld [vmem:[%s12211_s18 + $0xf40] ss:$16 sps:$4 sm:$0xff]   ;;  %v10023_v47 = vld [vmem:[%s12211_s18 + $0xf48] ss:$16 sps:$4 sm:$0xff]  }
 0x35d   : > { %7039 = vmatprep.subr.bf16.mxu0 %v9937_v32  ;;  %7572 = vmatprep.subr.bf16.mxu1 %v9940_v48  ;;  %v10028_v32 = vld [vmem:[%s12211_s18 + $0xf64] ss:$16 sps:$4 sm:$0xff]   ;;  %v10031_v48 = vld [vmem:[%s12211_s18 + $0xf6c] ss:$16 sps:$4 sm:$0xff]  }
 0x360   : > { %7040 = vmatpush1.bf16.msra.mxu0 %v9935_v49  ;;  %7573 = vmatpush1.bf16.msra.mxu1 %v9938_v50  ;;  %v10026_v49 = vld [vmem:[%s12211_s18 + $0xf60] ss:$16 sps:$4 sm:$0xff]   ;;  %v10029_v50 = vld [vmem:[%s12211_s18 + $0xf68] ss:$16 sps:$4 sm:$0xff]  }
 0x361   : > { %7041 = vmatprep.subr.bf16.mxu0 %v9943_v42  ;;  %7574 = vmatprep.subr.bf16.mxu1 %v9946_v51  ;;  %v10034_v42 = vld [vmem:[%s12211_s18 + $0xf84] ss:$16 sps:$4 sm:$0xff]   ;;  %v10037_v51 = vld [vmem:[%s12211_s18 + $0xf8c] ss:$16 sps:$4 sm:$0xff]  }
 0x364   : > { %7042 = vmatpush1.bf16.msra.mxu0 %v9941_v53  ;;  %7575 = vmatpush1.bf16.msra.mxu1 %v9944_v54  ;;  %v10032_v53 = vld [vmem:[%s12211_s18 + $0xf80] ss:$16 sps:$4 sm:$0xff]   ;;  %v10035_v54 = vld [vmem:[%s12211_s18 + $0xf88] ss:$16 sps:$4 sm:$0xff]  }
 0x365   : > { %7043 = vmatprep.subr.bf16.mxu0 %v9949_v56  ;;  %7576 = vmatprep.subr.bf16.mxu1 %v9952_v57  ;;  %v10040_v56 = vld [vmem:[%s12211_s18 + $0xfa4] ss:$16 sps:$4 sm:$0xff]   ;;  %v10043_v57 = vld [vmem:[%s12211_s18 + $0xfac] ss:$16 sps:$4 sm:$0xff]  }
 0x368   : > { %7044 = vmatpush1.bf16.msra.mxu0 %v9947_v38  ;;  %7577 = vmatpush1.bf16.msra.mxu1 %v9950_v58  ;;  %v10038_v38 = vld [vmem:[%s12211_s18 + $0xfa0] ss:$16 sps:$4 sm:$0xff]   ;;  %v10041_v58 = vld [vmem:[%s12211_s18 + $0xfa8] ss:$16 sps:$4 sm:$0xff]  }
 0x369   : > { %7045 = vmatprep.subr.bf16.mxu0 %v9955_v60  ;;  %7578 = vmatprep.subr.bf16.mxu1 %v9958_v61  ;;  %v10046_v60 = vld [vmem:[%s12211_s18 + $0xfc4] ss:$16 sps:$4 sm:$0xff]   ;;  %v10049_v61 = vld [vmem:[%s12211_s18 + $0xfcc] ss:$16 sps:$4 sm:$0xff]  }
 0x36c   : > { %7046 = vmatpush1.bf16.msra.mxu0 %v9953_v52  ;;  %7579 = vmatpush1.bf16.msra.mxu1 %v9956_v62  ;;  %v12808_v52 = vld [vmem:[%s13215_s0 + $0x10] sm:$0xff] }
 0x36d   : > { %7056 = vmatprep.subr.bf16.mxu0 %v9962_v63  ;;  %7589 = vmatprep.subr.bf16.mxu1 %v9965_v0  ;;  %v10044_v62 = vld [vmem:[%s12211_s18 + $0xfc0] ss:$16 sps:$4 sm:$0xff]   ;;  %v10047_v63 = vld [vmem:[%s12211_s18 + $0xfc8] ss:$16 sps:$4 sm:$0xff]   ;;  %v10052_v0 = vld [vmem:[%s12211_s18 + $0xfe4] ss:$16 sps:$4 sm:$0xff]  }
 0x36f   : > { %7048 = vmatmul.mubr.bf16.vlgmr.msra.gmra.mrb[0].mxu0 %v12743_v30  ;;  %7581 = vmatmul.mubr.bf16.vlgmr.msra.gmra.mrb[0].mxu1 %v12743_v30 }
 0x370   : > { %7057 = vmatpush1.bf16.msra.mxu0 %v9960_v3  ;;  %7590 = vmatpush1.bf16.msra.mxu1 %v9963_v4  ;;  %v10055_v3 = vld [vmem:[%s12211_s18 + $0xfec] ss:$16 sps:$4 sm:$0xff]   ;;  %v12816_v4 = vrot.slane %v12808_v52, %v12261_v2 }
 0x371   : > { %7058 = vmatprep.subr.bf16.mxu0 %v9968_v6  ;;  %7591 = vmatprep.subr.bf16.mxu1 %v9971_v7  ;;  %v10050_v6 = vld [vmem:[%s12211_s18 + $0xfe0] ss:$16 sps:$4 sm:$0xff]   ;;  %v10053_v7 = vld [vmem:[%s12211_s18 + $0xfe8] ss:$16 sps:$4 sm:$0xff]  }
 0x372   : > { %7088 = vmatprep.mubr.bf16.mxu0 %v2757_v8  ;;  %7621 = vmatprep.mubr.bf16.mxu1 %v2757_v8  ;;  %v10058_v8 = vld [vmem:[%s12211_s18 + $0x1004] ss:$16 sps:$4 sm:$0xff]  }
 0x374   : > { %7059 = vmatpush1.bf16.msra.mxu0 %v9966_v55  ;;  %7592 = vmatpush1.bf16.msra.mxu1 %v9969_v9  ;;  %v10061_v55 = vld [vmem:[%s12211_s18 + $0x100c] ss:$16 sps:$4 sm:$0xff]   ;;  %v2773_v9 = vcombine.high %v12816_v4, %v12816_v4 }
 0x375   : > { %7060 = vmatprep.subr.bf16.mxu0 %v9974_v10  ;;  %7593 = vmatprep.subr.bf16.mxu1 %v9977_v11  ;;  %v2755_v10 = vcombine.high %v12743_v30, %v12743_v30  ;;  %v10056_v11 = vld [vmem:[%s12211_s18 + $0x1000] ss:$16 sps:$4 sm:$0xff]  }
 0x376   : > { %v10062_v30 = vld [vmem:[%s12211_s18 + $0x1020] ss:$16 sps:$4 sm:$0xff]  }
 0x378   : > { %7061 = vmatpush1.bf16.msra.mxu0 %v9972_v1  ;;  %7594 = vmatpush1.bf16.msra.mxu1 %v9975_v12  ;;  %v10059_v1 = vld [vmem:[%s12211_s18 + $0x1008] ss:$16 sps:$4 sm:$0xff]   ;;  %v10064_v12 = vld [vmem:[%s12211_s18 + $0x1024] ss:$16 sps:$4 sm:$0xff]  }
 0x379   : > { %7062 = vmatprep.subr.bf16.mxu0 %v9980_v13  ;;  %7595 = vmatprep.subr.bf16.mxu1 %v9983_v14  ;;  %v10067_v13 = vld [vmem:[%s12211_s18 + $0x102c] ss:$16 sps:$4 sm:$0xff]   ;;  %v12831_v14 = vrot.slane %v2773_v9, %v12261_v2  ;;  %v10143_v9 = vld [vmem:[%s12211_s18 + $0x11c8] ss:$16 sps:$4 sm:$0xff]  }
 0x37c   : > { %7063 = vmatpush1.bf16.msra.mxu0 %v9978_v15  ;;  %7596 = vmatpush1.bf16.msra.mxu1 %v9981_v16  ;;  %v10065_v15 = vld [vmem:[%s12211_s18 + $0x1028] ss:$16 sps:$4 sm:$0xff]   ;;  %v10070_v16 = vld [vmem:[%s12211_s18 + $0x1044] ss:$16 sps:$4 sm:$0xff]  }
 0x37d   : > { %7064 = vmatprep.subr.bf16.mxu0 %v9986_v17  ;;  %7597 = vmatprep.subr.bf16.mxu1 %v9989_v18  ;;  %v10073_v17 = vld [vmem:[%s12211_s18 + $0x104c] ss:$16 sps:$4 sm:$0xff]   ;;  %v10068_v18 = vld [vmem:[%s12211_s18 + $0x1040] ss:$16 sps:$4 sm:$0xff]  }
 0x380   : > { %7065 = vmatpush1.bf16.msra.mxu0 %v9984_v19  ;;  %7598 = vmatpush1.bf16.msra.mxu1 %v9987_v20  ;;  %v10071_v19 = vld [vmem:[%s12211_s18 + $0x1048] ss:$16 sps:$4 sm:$0xff]   ;;  %v10076_v20 = vld [vmem:[%s12211_s18 + $0x1064] ss:$16 sps:$4 sm:$0xff]  }
 0x381   : > { %7066 = vmatprep.subr.bf16.mxu0 %v9992_v21  ;;  %7599 = vmatprep.subr.bf16.mxu1 %v9995_v22  ;;  %v10079_v21 = vld [vmem:[%s12211_s18 + $0x106c] ss:$16 sps:$4 sm:$0xff]   ;;  %v10074_v22 = vld [vmem:[%s12211_s18 + $0x1060] ss:$16 sps:$4 sm:$0xff]  }
 0x384   : > { %7067 = vmatpush1.bf16.msra.mxu0 %v9990_v23  ;;  %7600 = vmatpush1.bf16.msra.mxu1 %v9993_v24  ;;  %v10077_v23 = vld [vmem:[%s12211_s18 + $0x1068] ss:$16 sps:$4 sm:$0xff]   ;;  %v10082_v24 = vld [vmem:[%s12211_s18 + $0x1084] ss:$16 sps:$4 sm:$0xff]  }
 0x385   : > { %7068 = vmatprep.subr.bf16.mxu0 %v9998_v25  ;;  %7601 = vmatprep.subr.bf16.mxu1 %v10001_v26  ;;  %v10085_v25 = vld [vmem:[%s12211_s18 + $0x108c] ss:$16 sps:$4 sm:$0xff]   ;;  %v10080_v26 = vld [vmem:[%s12211_s18 + $0x1080] ss:$16 sps:$4 sm:$0xff]  }
 0x388   : > { %7069 = vmatpush1.bf16.msra.mxu0 %v9996_v27  ;;  %7602 = vmatpush1.bf16.msra.mxu1 %v9999_v28  ;;  %v10083_v27 = vld [vmem:[%s12211_s18 + $0x1088] ss:$16 sps:$4 sm:$0xff]   ;;  %v10088_v28 = vld [vmem:[%s12211_s18 + $0x10a4] ss:$16 sps:$4 sm:$0xff]  }
 0x389   : > { %7070 = vmatprep.subr.bf16.mxu0 %v10004_v29  ;;  %7603 = vmatprep.subr.bf16.mxu1 %v10007_v31  ;;  %v10091_v29 = vld [vmem:[%s12211_s18 + $0x10ac] ss:$16 sps:$4 sm:$0xff]   ;;  %v10086_v31 = vld [vmem:[%s12211_s18 + $0x10a0] ss:$16 sps:$4 sm:$0xff]  }
 0x38c   : > { %7071 = vmatpush1.bf16.msra.mxu0 %v10002_v33  ;;  %7604 = vmatpush1.bf16.msra.mxu1 %v10005_v5  ;;  %v10089_v33 = vld [vmem:[%s12211_s18 + $0x10a8] ss:$16 sps:$4 sm:$0xff]   ;;  %v10094_v5 = vld [vmem:[%s12211_s18 + $0x10c4] ss:$16 sps:$4 sm:$0xff]  }
 0x38d   : > { %7072 = vmatprep.subr.bf16.mxu0 %v10010_v34  ;;  %7605 = vmatprep.subr.bf16.mxu1 %v10013_v35  ;;  %v10097_v34 = vld [vmem:[%s12211_s18 + $0x10cc] ss:$16 sps:$4 sm:$0xff]   ;;  %v10092_v35 = vld [vmem:[%s12211_s18 + $0x10c0] ss:$16 sps:$4 sm:$0xff]  }
 0x390   : > { %7073 = vmatpush1.bf16.msra.mxu0 %v10008_v36  ;;  %7606 = vmatpush1.bf16.msra.mxu1 %v10011_v37  ;;  %v10095_v36 = vld [vmem:[%s12211_s18 + $0x10c8] ss:$16 sps:$4 sm:$0xff]   ;;  %v10100_v37 = vld [vmem:[%s12211_s18 + $0x10e4] ss:$16 sps:$4 sm:$0xff]  }
 0x391   : > { %7074 = vmatprep.subr.bf16.mxu0 %v10016_v39  ;;  %7607 = vmatprep.subr.bf16.mxu1 %v10019_v40  ;;  %v10103_v39 = vld [vmem:[%s12211_s18 + $0x10ec] ss:$16 sps:$4 sm:$0xff]   ;;  %v10098_v40 = vld [vmem:[%s12211_s18 + $0x10e0] ss:$16 sps:$4 sm:$0xff]  }
 0x394   : > { %7075 = vmatpush1.bf16.msra.mxu0 %v10014_v41  ;;  %7608 = vmatpush1.bf16.msra.mxu1 %v10017_v43  ;;  %v10101_v41 = vld [vmem:[%s12211_s18 + $0x10e8] ss:$16 sps:$4 sm:$0xff]   ;;  %v10106_v43 = vld [vmem:[%s12211_s18 + $0x1104] ss:$16 sps:$4 sm:$0xff]  }
 0x395   : > { %7076 = vmatprep.subr.bf16.mxu0 %v10022_v44  ;;  %7609 = vmatprep.subr.bf16.mxu1 %v10025_v45  ;;  %v10109_v44 = vld [vmem:[%s12211_s18 + $0x110c] ss:$16 sps:$4 sm:$0xff]   ;;  %v10104_v45 = vld [vmem:[%s12211_s18 + $0x1100] ss:$16 sps:$4 sm:$0xff]  }
 0x398   : > { %7077 = vmatpush1.bf16.msra.mxu0 %v10020_v46  ;;  %7610 = vmatpush1.bf16.msra.mxu1 %v10023_v47  ;;  %v10107_v46 = vld [vmem:[%s12211_s18 + $0x1108] ss:$16 sps:$4 sm:$0xff]   ;;  %v10112_v47 = vld [vmem:[%s12211_s18 + $0x1124] ss:$16 sps:$4 sm:$0xff]  }
 0x399   : > { %7078 = vmatprep.subr.bf16.mxu0 %v10028_v32  ;;  %7611 = vmatprep.subr.bf16.mxu1 %v10031_v48  ;;  %v10115_v32 = vld [vmem:[%s12211_s18 + $0x112c] ss:$16 sps:$4 sm:$0xff]   ;;  %v10110_v48 = vld [vmem:[%s12211_s18 + $0x1120] ss:$16 sps:$4 sm:$0xff]  }
 0x39c   : > { %7079 = vmatpush1.bf16.msra.mxu0 %v10026_v49  ;;  %7612 = vmatpush1.bf16.msra.mxu1 %v10029_v50  ;;  %v10113_v49 = vld [vmem:[%s12211_s18 + $0x1128] ss:$16 sps:$4 sm:$0xff]   ;;  %v10118_v50 = vld [vmem:[%s12211_s18 + $0x1144] ss:$16 sps:$4 sm:$0xff]  }
 0x39d   : > { %7080 = vmatprep.subr.bf16.mxu0 %v10034_v42  ;;  %7613 = vmatprep.subr.bf16.mxu1 %v10037_v51  ;;  %v10121_v42 = vld [vmem:[%s12211_s18 + $0x114c] ss:$16 sps:$4 sm:$0xff]   ;;  %v10116_v51 = vld [vmem:[%s12211_s18 + $0x1140] ss:$16 sps:$4 sm:$0xff]  }
 0x3a0   : > { %7081 = vmatpush1.bf16.msra.mxu0 %v10032_v53  ;;  %7614 = vmatpush1.bf16.msra.mxu1 %v10035_v54  ;;  %v10119_v53 = vld [vmem:[%s12211_s18 + $0x1148] ss:$16 sps:$4 sm:$0xff]   ;;  %v10124_v54 = vld [vmem:[%s12211_s18 + $0x1164] ss:$16 sps:$4 sm:$0xff]  }
 0x3a1   : > { %7082 = vmatprep.subr.bf16.mxu0 %v10040_v56  ;;  %7615 = vmatprep.subr.bf16.mxu1 %v10043_v57  ;;  %v10127_v56 = vld [vmem:[%s12211_s18 + $0x116c] ss:$16 sps:$4 sm:$0xff]   ;;  %v10122_v57 = vld [vmem:[%s12211_s18 + $0x1160] ss:$16 sps:$4 sm:$0xff]  }
 0x3a4   : > { %7083 = vmatpush1.bf16.msra.mxu0 %v10038_v38  ;;  %7616 = vmatpush1.bf16.msra.mxu1 %v10041_v58  ;;  %v10125_v38 = vld [vmem:[%s12211_s18 + $0x1168] ss:$16 sps:$4 sm:$0xff]   ;;  %v10130_v58 = vld [vmem:[%s12211_s18 + $0x1184] ss:$16 sps:$4 sm:$0xff]  }
 0x3a5   : > { %7084 = vmatprep.subr.bf16.mxu0 %v10046_v60  ;;  %7617 = vmatprep.subr.bf16.mxu1 %v10049_v61  ;;  %v10133_v60 = vld [vmem:[%s12211_s18 + $0x118c] ss:$16 sps:$4 sm:$0xff]   ;;  %v10128_v61 = vld [vmem:[%s12211_s18 + $0x1180] ss:$16 sps:$4 sm:$0xff]  }
 0x3a8   : > { %7085 = vmatpush1.bf16.msra.mxu0 %v10044_v62  ;;  %7618 = vmatpush1.bf16.msra.mxu1 %v10047_v63  ;;  %v10131_v62 = vld [vmem:[%s12211_s18 + $0x1188] ss:$16 sps:$4 sm:$0xff]   ;;  %v10136_v63 = vld [vmem:[%s12211_s18 + $0x11a4] ss:$16 sps:$4 sm:$0xff]  }
 0x3a9   : > { %7086 = vmatprep.subr.bf16.mxu0 %v10052_v0  ;;  %7619 = vmatprep.subr.bf16.mxu1 %v10055_v3  ;;  %v10139_v0 = vld [vmem:[%s12211_s18 + $0x11ac] ss:$16 sps:$4 sm:$0xff]   ;;  %v10134_v3 = vld [vmem:[%s12211_s18 + $0x11a0] ss:$16 sps:$4 sm:$0xff]  }
 0x3ac   : > { %7087 = vmatpush1.bf16.msra.mxu0 %v10050_v6  ;;  %7620 = vmatpush1.bf16.msra.mxu1 %v10053_v7  ;;  %v10137_v6 = vld [vmem:[%s12211_s18 + $0x11a8] ss:$16 sps:$4 sm:$0xff]   ;;  %v10142_v7 = vld [vmem:[%s12211_s18 + $0x11c4] ss:$16 sps:$4 sm:$0xff]  }
 0x3ad   : > { %7097 = vmatprep.subr.bf16.mxu0 %v10058_v8  ;;  %7630 = vmatprep.subr.bf16.mxu1 %v10061_v55  ;;  %v10145_v8 = vld [vmem:[%s12211_s18 + $0x11cc] ss:$16 sps:$4 sm:$0xff]   ;;  %v10140_v55 = vld [vmem:[%s12211_s18 + $0x11c0] ss:$16 sps:$4 sm:$0xff]  }
 0x3af   : > { %7089 = vmatmul.mubr.bf16.vlgmr.msra.gmra.mrb[0].mxu0 %v2755_v10  ;;  %7622 = vmatmul.mubr.bf16.vlgmr.msra.gmra.mrb[0].mxu1 %v2755_v10  ;;  %v10148_v10 = vld [vmem:[%s12211_s18 + $0x11e4] ss:$16 sps:$4 sm:$0xff]  }
 0x3b0   : > { %7098 = vmatpush1.bf16.msra.mxu0 %v10056_v11  ;;  %7631 = vmatpush1.bf16.msra.mxu1 %v10059_v1  ;;  %v10151_v11 = vld [vmem:[%s12211_s18 + $0x11ec] ss:$16 sps:$4 sm:$0xff]   ;;  %v10146_v1 = vld [vmem:[%s12211_s18 + $0x11e0] ss:$16 sps:$4 sm:$0xff]  }
 0x3b1   : > { %7099 = vmatprep.subr.bf16.mxu0 %v10064_v12  ;;  %7632 = vmatprep.subr.bf16.mxu1 %v10067_v13  ;;  %v10149_v12 = vld [vmem:[%s12211_s18 + $0x11e8] ss:$16 sps:$4 sm:$0xff]   ;;  %v10154_v13 = vld [vmem:[%s12211_s18 + $0x1204] ss:$16 sps:$4 sm:$0xff]  }
 0x3b2   : > { %7129 = vmatprep.mubr.bf16.mxu0 %v12831_v14  ;;  %7662 = vmatprep.mubr.bf16.mxu1 %v12831_v14 }
 0x3b4   : > { %7100 = vmatpush1.bf16.msra.mxu0 %v10062_v30  ;;  %7633 = vmatpush1.bf16.msra.mxu1 %v10065_v15  ;;  %v10157_v30 = vld [vmem:[%s12211_s18 + $0x120c] ss:$16 sps:$4 sm:$0xff]   ;;  %v12897_v15 = vrot.slane %v12816_v4, %v12261_v2  ;;  %v10158_v4 = vld [vmem:[%s12211_s18 + $0x1220] ss:$16 sps:$4 sm:$0xff]  }
 0x3b5   : > { %7101 = vmatprep.subr.bf16.mxu0 %v10070_v16  ;;  %7634 = vmatprep.subr.bf16.mxu1 %v10073_v17  ;;  %v10152_v16 = vld [vmem:[%s12211_s18 + $0x1200] ss:$16 sps:$4 sm:$0xff]   ;;  %v10155_v17 = vld [vmem:[%s12211_s18 + $0x1208] ss:$16 sps:$4 sm:$0xff]  }
 0x3b8   : > { %7102 = vmatpush1.bf16.msra.mxu0 %v10068_v18  ;;  %7635 = vmatpush1.bf16.msra.mxu1 %v10071_v19  ;;  %v10160_v18 = vld [vmem:[%s12211_s18 + $0x1224] ss:$16 sps:$4 sm:$0xff]   ;;  %v10163_v19 = vld [vmem:[%s12211_s18 + $0x122c] ss:$16 sps:$4 sm:$0xff]  }
 0x3b9   : > { %7103 = vmatprep.subr.bf16.mxu0 %v10076_v20  ;;  %7636 = vmatprep.subr.bf16.mxu1 %v10079_v21  ;;  %v2805_v20 = vcombine.high %v12831_v14, %v12831_v14  ;;  %v10161_v21 = vld [vmem:[%s12211_s18 + $0x1228] ss:$16 sps:$4 sm:$0xff]   ;;  %v10164_v14 = vld [vmem:[%s12211_s18 + $0x1240] ss:$16 sps:$4 sm:$0xff]  }
 0x3bc   : > { %7104 = vmatpush1.bf16.msra.mxu0 %v10074_v22  ;;  %7637 = vmatpush1.bf16.msra.mxu1 %v10077_v23  ;;  %v10166_v22 = vld [vmem:[%s12211_s18 + $0x1244] ss:$16 sps:$4 sm:$0xff]   ;;  %v10169_v23 = vld [vmem:[%s12211_s18 + $0x124c] ss:$16 sps:$4 sm:$0xff]  }
 0x3bd   : > { %7105 = vmatprep.subr.bf16.mxu0 %v10082_v24  ;;  %7638 = vmatprep.subr.bf16.mxu1 %v10085_v25  ;;  %v10167_v24 = vld [vmem:[%s12211_s18 + $0x1248] ss:$16 sps:$4 sm:$0xff]   ;;  %v10172_v25 = vld [vmem:[%s12211_s18 + $0x1264] ss:$16 sps:$4 sm:$0xff]  }
 0x3c0   : > { %7106 = vmatpush1.bf16.msra.mxu0 %v10080_v26  ;;  %7639 = vmatpush1.bf16.msra.mxu1 %v10083_v27  ;;  %v10175_v26 = vld [vmem:[%s12211_s18 + $0x126c] ss:$16 sps:$4 sm:$0xff]   ;;  %v10170_v27 = vld [vmem:[%s12211_s18 + $0x1260] ss:$16 sps:$4 sm:$0xff]  }
 0x3c1   : > { %7107 = vmatprep.subr.bf16.mxu0 %v10088_v28  ;;  %7640 = vmatprep.subr.bf16.mxu1 %v10091_v29  ;;  %v10173_v28 = vld [vmem:[%s12211_s18 + $0x1268] ss:$16 sps:$4 sm:$0xff]   ;;  %v10178_v29 = vld [vmem:[%s12211_s18 + $0x1284] ss:$16 sps:$4 sm:$0xff]  }
 0x3c4   : > { %7108 = vmatpush1.bf16.msra.mxu0 %v10086_v31  ;;  %7641 = vmatpush1.bf16.msra.mxu1 %v10089_v33  ;;  %v10181_v31 = vld [vmem:[%s12211_s18 + $0x128c] ss:$16 sps:$4 sm:$0xff]   ;;  %v10176_v33 = vld [vmem:[%s12211_s18 + $0x1280] ss:$16 sps:$4 sm:$0xff]  }
 0x3c5   : > { %7109 = vmatprep.subr.bf16.mxu0 %v10094_v5  ;;  %7642 = vmatprep.subr.bf16.mxu1 %v10097_v34  ;;  %v10179_v5 = vld [vmem:[%s12211_s18 + $0x1288] ss:$16 sps:$4 sm:$0xff]   ;;  %v10184_v34 = vld [vmem:[%s12211_s18 + $0x12a4] ss:$16 sps:$4 sm:$0xff]  }
 0x3c8   : > { %7110 = vmatpush1.bf16.msra.mxu0 %v10092_v35  ;;  %7643 = vmatpush1.bf16.msra.mxu1 %v10095_v36  ;;  %v10187_v35 = vld [vmem:[%s12211_s18 + $0x12ac] ss:$16 sps:$4 sm:$0xff]   ;;  %v10182_v36 = vld [vmem:[%s12211_s18 + $0x12a0] ss:$16 sps:$4 sm:$0xff]  }
 0x3c9   : > { %7111 = vmatprep.subr.bf16.mxu0 %v10100_v37  ;;  %7644 = vmatprep.subr.bf16.mxu1 %v10103_v39  ;;  %v10185_v37 = vld [vmem:[%s12211_s18 + $0x12a8] ss:$16 sps:$4 sm:$0xff]   ;;  %v10190_v39 = vld [vmem:[%s12211_s18 + $0x12c4] ss:$16 sps:$4 sm:$0xff]  }
 0x3cc   : > { %7112 = vmatpush1.bf16.msra.mxu0 %v10098_v40  ;;  %7645 = vmatpush1.bf16.msra.mxu1 %v10101_v41  ;;  %v10193_v40 = vld [vmem:[%s12211_s18 + $0x12cc] ss:$16 sps:$4 sm:$0xff]   ;;  %v10188_v41 = vld [vmem:[%s12211_s18 + $0x12c0] ss:$16 sps:$4 sm:$0xff]  }
 0x3cd   : > { %7113 = vmatprep.subr.bf16.mxu0 %v10106_v43  ;;  %7646 = vmatprep.subr.bf16.mxu1 %v10109_v44  ;;  %v10191_v43 = vld [vmem:[%s12211_s18 + $0x12c8] ss:$16 sps:$4 sm:$0xff]   ;;  %v10196_v44 = vld [vmem:[%s12211_s18 + $0x12e4] ss:$16 sps:$4 sm:$0xff]  }
 0x3d0   : > { %7114 = vmatpush1.bf16.msra.mxu0 %v10104_v45  ;;  %7647 = vmatpush1.bf16.msra.mxu1 %v10107_v46  ;;  %v10199_v45 = vld [vmem:[%s12211_s18 + $0x12ec] ss:$16 sps:$4 sm:$0xff]   ;;  %v10194_v46 = vld [vmem:[%s12211_s18 + $0x12e0] ss:$16 sps:$4 sm:$0xff]  }
 0x3d1   : > { %7115 = vmatprep.subr.bf16.mxu0 %v10112_v47  ;;  %7648 = vmatprep.subr.bf16.mxu1 %v10115_v32  ;;  %v10197_v47 = vld [vmem:[%s12211_s18 + $0x12e8] ss:$16 sps:$4 sm:$0xff]   ;;  %v10202_v32 = vld [vmem:[%s12211_s18 + $0x1304] ss:$16 sps:$4 sm:$0xff]  }
 0x3d4   : > { %7116 = vmatpush1.bf16.msra.mxu0 %v10110_v48  ;;  %7649 = vmatpush1.bf16.msra.mxu1 %v10113_v49  ;;  %v10205_v48 = vld [vmem:[%s12211_s18 + $0x130c] ss:$16 sps:$4 sm:$0xff]   ;;  %v10200_v49 = vld [vmem:[%s12211_s18 + $0x1300] ss:$16 sps:$4 sm:$0xff]  }
 0x3d5   : > { %7117 = vmatprep.subr.bf16.mxu0 %v10118_v50  ;;  %7650 = vmatprep.subr.bf16.mxu1 %v10121_v42  ;;  %v10203_v50 = vld [vmem:[%s12211_s18 + $0x1308] ss:$16 sps:$4 sm:$0xff]   ;;  %v10208_v42 = vld [vmem:[%s12211_s18 + $0x1324] ss:$16 sps:$4 sm:$0xff]  }
 0x3d8   : > { %7118 = vmatpush1.bf16.msra.mxu0 %v10116_v51  ;;  %7651 = vmatpush1.bf16.msra.mxu1 %v10119_v53  ;;  %v10211_v51 = vld [vmem:[%s12211_s18 + $0x132c] ss:$16 sps:$4 sm:$0xff]   ;;  %v10206_v53 = vld [vmem:[%s12211_s18 + $0x1320] ss:$16 sps:$4 sm:$0xff]  }
 0x3d9   : > { %7119 = vmatprep.subr.bf16.mxu0 %v10124_v54  ;;  %7652 = vmatprep.subr.bf16.mxu1 %v10127_v56  ;;  %v10209_v54 = vld [vmem:[%s12211_s18 + $0x1328] ss:$16 sps:$4 sm:$0xff]   ;;  %v10214_v56 = vld [vmem:[%s12211_s18 + $0x1344] ss:$16 sps:$4 sm:$0xff]  }
 0x3dc   : > { %7120 = vmatpush1.bf16.msra.mxu0 %v10122_v57  ;;  %7653 = vmatpush1.bf16.msra.mxu1 %v10125_v38  ;;  %v10217_v57 = vld [vmem:[%s12211_s18 + $0x134c] ss:$16 sps:$4 sm:$0xff]   ;;  %v10212_v38 = vld [vmem:[%s12211_s18 + $0x1340] ss:$16 sps:$4 sm:$0xff]  }
 0x3dd   : > { %7121 = vmatprep.subr.bf16.mxu0 %v10130_v58  ;;  %7654 = vmatprep.subr.bf16.mxu1 %v10133_v60  ;;  %v10215_v58 = vld [vmem:[%s12211_s18 + $0x1348] ss:$16 sps:$4 sm:$0xff]   ;;  %v10220_v60 = vld [vmem:[%s12211_s18 + $0x1364] ss:$16 sps:$4 sm:$0xff]  }
 0x3e0   : > { %7122 = vmatpush1.bf16.msra.mxu0 %v10128_v61  ;;  %7655 = vmatpush1.bf16.msra.mxu1 %v10131_v62  ;;  %v10223_v61 = vld [vmem:[%s12211_s18 + $0x136c] ss:$16 sps:$4 sm:$0xff]   ;;  %v10218_v62 = vld [vmem:[%s12211_s18 + $0x1360] ss:$16 sps:$4 sm:$0xff]  }
 0x3e1   : > { %7123 = vmatprep.subr.bf16.mxu0 %v10136_v63  ;;  %7656 = vmatprep.subr.bf16.mxu1 %v10139_v0  ;;  %v10221_v63 = vld [vmem:[%s12211_s18 + $0x1368] ss:$16 sps:$4 sm:$0xff]   ;;  %v10226_v0 = vld [vmem:[%s12211_s18 + $0x1384] ss:$16 sps:$4 sm:$0xff]  }
 0x3e4   : > { %7124 = vmatpush1.bf16.msra.mxu0 %v10134_v3  ;;  %7657 = vmatpush1.bf16.msra.mxu1 %v10137_v6  ;;  %v10229_v3 = vld [vmem:[%s12211_s18 + $0x138c] ss:$16 sps:$4 sm:$0xff]   ;;  %v10224_v6 = vld [vmem:[%s12211_s18 + $0x1380] ss:$16 sps:$4 sm:$0xff]  }
 0x3e5   : > { %7125 = vmatprep.subr.bf16.mxu0 %v10142_v7  ;;  %7658 = vmatprep.subr.bf16.mxu1 %v10145_v8  ;;  %v10227_v7 = vld [vmem:[%s12211_s18 + $0x1388] ss:$16 sps:$4 sm:$0xff]   ;;  %v10232_v8 = vld [vmem:[%s12211_s18 + $0x13a4] ss:$16 sps:$4 sm:$0xff]  }
 0x3e8   : > { %7126 = vmatpush1.bf16.msra.mxu0 %v10140_v55  ;;  %7659 = vmatpush1.bf16.msra.mxu1 %v10143_v9  ;;  %v10235_v55 = vld [vmem:[%s12211_s18 + $0x13ac] ss:$16 sps:$4 sm:$0xff]   ;;  %v10230_v9 = vld [vmem:[%s12211_s18 + $0x13a0] ss:$16 sps:$4 sm:$0xff]  }
 0x3e9   : > { %7127 = vmatprep.subr.bf16.mxu0 %v10148_v10  ;;  %7660 = vmatprep.subr.bf16.mxu1 %v10151_v11  ;;  %v10233_v10 = vld [vmem:[%s12211_s18 + $0x13a8] ss:$16 sps:$4 sm:$0xff]   ;;  %v10238_v11 = vld [vmem:[%s12211_s18 + $0x13c4] ss:$16 sps:$4 sm:$0xff]  }
 0x3ec   : > { %7128 = vmatpush1.bf16.msra.mxu0 %v10146_v1  ;;  %7661 = vmatpush1.bf16.msra.mxu1 %v10149_v12  ;;  %v10241_v1 = vld [vmem:[%s12211_s18 + $0x13cc] ss:$16 sps:$4 sm:$0xff]   ;;  %v2758_v12 = vcombine.high %v12808_v52, %v12808_v52  ;;  %v10242_v52 = vld [vmem:[%s12211_s18 + $0x13e0] ss:$16 sps:$4 sm:$0xff]  }
 0x3ed   : > { %7138 = vmatprep.subr.bf16.mxu0 %v10154_v13  ;;  %7671 = vmatprep.subr.bf16.mxu1 %v10157_v30  ;;  %v10236_v13 = vld [vmem:[%s12211_s18 + $0x13c0] ss:$16 sps:$4 sm:$0xff]   ;;  %v10239_v30 = vld [vmem:[%s12211_s18 + $0x13c8] ss:$16 sps:$4 sm:$0xff]  }
 0x3ef   : > { %7130 = vmatmul.mubr.bf16.vlgmr.msra.gmra.mrb[0].mxu0 %v12897_v15  ;;  %7663 = vmatmul.mubr.bf16.vlgmr.msra.gmra.mrb[0].mxu1 %v12897_v15 }
 0x3f0   : > { %7139 = vmatpush1.bf16.msra.mxu0 %v10152_v16  ;;  %7672 = vmatpush1.bf16.msra.mxu1 %v10155_v17  ;;  %v10244_v16 = vld [vmem:[%s12211_s18 + $0x13e4] ss:$16 sps:$4 sm:$0xff]   ;;  %v10247_v17 = vld [vmem:[%s12211_s18 + $0x13ec] ss:$16 sps:$4 sm:$0xff]  }
 0x3f1   : > { %7140 = vmatprep.subr.bf16.mxu0 %v10160_v18  ;;  %7673 = vmatprep.subr.bf16.mxu1 %v10163_v19  ;;  %v12966_v18 = vrot.slane %v2758_v12, %v12261_v2  ;;  %v10245_v19 = vld [vmem:[%s12211_s18 + $0x13e8] ss:$16 sps:$4 sm:$0xff]  }
 0x3f2   : > { %7170 = vmatprep.mubr.bf16.mxu0 %v2805_v20  ;;  %7703 = vmatprep.mubr.bf16.mxu1 %v2805_v20  ;;  %v10250_v20 = vld [vmem:[%s12211_s18 + $0x1404] ss:$16 sps:$4 sm:$0xff]   ;;  %v10323_v12 = vld [vmem:[%s12211_s18 + $0x1588] ss:$16 sps:$4 sm:$0xff]  }
 0x3f4   : > { %7141 = vmatpush1.bf16.msra.mxu0 %v10158_v4  ;;  %7674 = vmatpush1.bf16.msra.mxu1 %v10161_v21  ;;  %v10253_v4 = vld [vmem:[%s12211_s18 + $0x140c] ss:$16 sps:$4 sm:$0xff]   ;;  %v2774_v21 = vcombine.high %v12966_v18, %v12966_v18 }
 0x3f5   : > { %7142 = vmatprep.subr.bf16.mxu0 %v10166_v22  ;;  %7675 = vmatprep.subr.bf16.mxu1 %v10169_v23  ;;  %v2803_v22 = vcombine.high %v12897_v15, %v12897_v15  ;;  %v10248_v23 = vld [vmem:[%s12211_s18 + $0x1400] ss:$16 sps:$4 sm:$0xff]  }
 0x3f6   : > { %v10254_v15 = vld [vmem:[%s12211_s18 + $0x1420] ss:$16 sps:$4 sm:$0xff]  }
 0x3f8   : > { %7143 = vmatpush1.bf16.msra.mxu0 %v10164_v14  ;;  %7676 = vmatpush1.bf16.msra.mxu1 %v10167_v24  ;;  %v10251_v14 = vld [vmem:[%s12211_s18 + $0x1408] ss:$16 sps:$4 sm:$0xff]   ;;  %v10256_v24 = vld [vmem:[%s12211_s18 + $0x1424] ss:$16 sps:$4 sm:$0xff]  }
 0x3f9   : > { %7144 = vmatprep.subr.bf16.mxu0 %v10172_v25  ;;  %7677 = vmatprep.subr.bf16.mxu1 %v10175_v26  ;;  %v10259_v25 = vld [vmem:[%s12211_s18 + $0x142c] ss:$16 sps:$4 sm:$0xff]   ;;  %v12981_v26 = vrot.slane %v2774_v21, %v12261_v2  ;;  %v10340_v21 = vld [vmem:[%s12211_s18 + $0x15e4] ss:$16 sps:$4 sm:$0xff]  }
 0x3fc   : > { %7145 = vmatpush1.bf16.msra.mxu0 %v10170_v27  ;;  %7678 = vmatpush1.bf16.msra.mxu1 %v10173_v28  ;;  %v10257_v27 = vld [vmem:[%s12211_s18 + $0x1428] ss:$16 sps:$4 sm:$0xff]   ;;  %v10262_v28 = vld [vmem:[%s12211_s18 + $0x1444] ss:$16 sps:$4 sm:$0xff]  }
 0x3fd   : > { %7146 = vmatprep.subr.bf16.mxu0 %v10178_v29  ;;  %7679 = vmatprep.subr.bf16.mxu1 %v10181_v31  ;;  %v10265_v29 = vld [vmem:[%s12211_s18 + $0x144c] ss:$16 sps:$4 sm:$0xff]   ;;  %v10260_v31 = vld [vmem:[%s12211_s18 + $0x1440] ss:$16 sps:$4 sm:$0xff]  }
 0x400   : > { %7147 = vmatpush1.bf16.msra.mxu0 %v10176_v33  ;;  %7680 = vmatpush1.bf16.msra.mxu1 %v10179_v5  ;;  %v10263_v33 = vld [vmem:[%s12211_s18 + $0x1448] ss:$16 sps:$4 sm:$0xff]   ;;  %v10268_v5 = vld [vmem:[%s12211_s18 + $0x1464] ss:$16 sps:$4 sm:$0xff]  }
 0x401   : > { %7148 = vmatprep.subr.bf16.mxu0 %v10184_v34  ;;  %7681 = vmatprep.subr.bf16.mxu1 %v10187_v35  ;;  %v10271_v34 = vld [vmem:[%s12211_s18 + $0x146c] ss:$16 sps:$4 sm:$0xff]   ;;  %v10266_v35 = vld [vmem:[%s12211_s18 + $0x1460] ss:$16 sps:$4 sm:$0xff]  }
 0x404   : > { %7149 = vmatpush1.bf16.msra.mxu0 %v10182_v36  ;;  %7682 = vmatpush1.bf16.msra.mxu1 %v10185_v37  ;;  %v10269_v36 = vld [vmem:[%s12211_s18 + $0x1468] ss:$16 sps:$4 sm:$0xff]   ;;  %v10274_v37 = vld [vmem:[%s12211_s18 + $0x1484] ss:$16 sps:$4 sm:$0xff]  }
 0x405   : > { %7150 = vmatprep.subr.bf16.mxu0 %v10190_v39  ;;  %7683 = vmatprep.subr.bf16.mxu1 %v10193_v40  ;;  %v10277_v39 = vld [vmem:[%s12211_s18 + $0x148c] ss:$16 sps:$4 sm:$0xff]   ;;  %v10272_v40 = vld [vmem:[%s12211_s18 + $0x1480] ss:$16 sps:$4 sm:$0xff]  }
 0x408   : > { %7151 = vmatpush1.bf16.msra.mxu0 %v10188_v41  ;;  %7684 = vmatpush1.bf16.msra.mxu1 %v10191_v43  ;;  %v10275_v41 = vld [vmem:[%s12211_s18 + $0x1488] ss:$16 sps:$4 sm:$0xff]   ;;  %v10280_v43 = vld [vmem:[%s12211_s18 + $0x14a4] ss:$16 sps:$4 sm:$0xff]  }
 0x409   : > { %7152 = vmatprep.subr.bf16.mxu0 %v10196_v44  ;;  %7685 = vmatprep.subr.bf16.mxu1 %v10199_v45  ;;  %v10283_v44 = vld [vmem:[%s12211_s18 + $0x14ac] ss:$16 sps:$4 sm:$0xff]   ;;  %v10278_v45 = vld [vmem:[%s12211_s18 + $0x14a0] ss:$16 sps:$4 sm:$0xff]  }
 0x40c   : > { %7153 = vmatpush1.bf16.msra.mxu0 %v10194_v46  ;;  %7686 = vmatpush1.bf16.msra.mxu1 %v10197_v47  ;;  %v10281_v46 = vld [vmem:[%s12211_s18 + $0x14a8] ss:$16 sps:$4 sm:$0xff]   ;;  %v10286_v47 = vld [vmem:[%s12211_s18 + $0x14c4] ss:$16 sps:$4 sm:$0xff]  }
 0x40d   : > { %7154 = vmatprep.subr.bf16.mxu0 %v10202_v32  ;;  %7687 = vmatprep.subr.bf16.mxu1 %v10205_v48  ;;  %v10289_v32 = vld [vmem:[%s12211_s18 + $0x14cc] ss:$16 sps:$4 sm:$0xff]   ;;  %v10284_v48 = vld [vmem:[%s12211_s18 + $0x14c0] ss:$16 sps:$4 sm:$0xff]  }
 0x410   : > { %7155 = vmatpush1.bf16.msra.mxu0 %v10200_v49  ;;  %7688 = vmatpush1.bf16.msra.mxu1 %v10203_v50  ;;  %v10287_v49 = vld [vmem:[%s12211_s18 + $0x14c8] ss:$16 sps:$4 sm:$0xff]   ;;  %v10292_v50 = vld [vmem:[%s12211_s18 + $0x14e4] ss:$16 sps:$4 sm:$0xff]  }
 0x411   : > { %7156 = vmatprep.subr.bf16.mxu0 %v10208_v42  ;;  %7689 = vmatprep.subr.bf16.mxu1 %v10211_v51  ;;  %v10295_v42 = vld [vmem:[%s12211_s18 + $0x14ec] ss:$16 sps:$4 sm:$0xff]   ;;  %v10290_v51 = vld [vmem:[%s12211_s18 + $0x14e0] ss:$16 sps:$4 sm:$0xff]  }
 0x414   : > { %7157 = vmatpush1.bf16.msra.mxu0 %v10206_v53  ;;  %7690 = vmatpush1.bf16.msra.mxu1 %v10209_v54  ;;  %v10293_v53 = vld [vmem:[%s12211_s18 + $0x14e8] ss:$16 sps:$4 sm:$0xff]   ;;  %v10298_v54 = vld [vmem:[%s12211_s18 + $0x1504] ss:$16 sps:$4 sm:$0xff]  }
 0x415   : > { %7158 = vmatprep.subr.bf16.mxu0 %v10214_v56  ;;  %7691 = vmatprep.subr.bf16.mxu1 %v10217_v57  ;;  %v10301_v56 = vld [vmem:[%s12211_s18 + $0x150c] ss:$16 sps:$4 sm:$0xff]   ;;  %v10296_v57 = vld [vmem:[%s12211_s18 + $0x1500] ss:$16 sps:$4 sm:$0xff]  }
 0x418   : > { %7159 = vmatpush1.bf16.msra.mxu0 %v10212_v38  ;;  %7692 = vmatpush1.bf16.msra.mxu1 %v10215_v58  ;;  %v10299_v38 = vld [vmem:[%s12211_s18 + $0x1508] ss:$16 sps:$4 sm:$0xff]   ;;  %v10304_v58 = vld [vmem:[%s12211_s18 + $0x1524] ss:$16 sps:$4 sm:$0xff]  }
 0x419   : > { %7160 = vmatprep.subr.bf16.mxu0 %v10220_v60  ;;  %7693 = vmatprep.subr.bf16.mxu1 %v10223_v61  ;;  %v10307_v60 = vld [vmem:[%s12211_s18 + $0x152c] ss:$16 sps:$4 sm:$0xff]   ;;  %v10302_v61 = vld [vmem:[%s12211_s18 + $0x1520] ss:$16 sps:$4 sm:$0xff]  }
 0x41c   : > { %7161 = vmatpush1.bf16.msra.mxu0 %v10218_v62  ;;  %7694 = vmatpush1.bf16.msra.mxu1 %v10221_v63  ;;  %v10305_v62 = vld [vmem:[%s12211_s18 + $0x1528] ss:$16 sps:$4 sm:$0xff]   ;;  %v10310_v63 = vld [vmem:[%s12211_s18 + $0x1544] ss:$16 sps:$4 sm:$0xff]  }
 0x41d   : > { %7162 = vmatprep.subr.bf16.mxu0 %v10226_v0  ;;  %7695 = vmatprep.subr.bf16.mxu1 %v10229_v3  ;;  %v10313_v0 = vld [vmem:[%s12211_s18 + $0x154c] ss:$16 sps:$4 sm:$0xff]   ;;  %v10308_v3 = vld [vmem:[%s12211_s18 + $0x1540] ss:$16 sps:$4 sm:$0xff]  }
 0x420   : > { %7163 = vmatpush1.bf16.msra.mxu0 %v10224_v6  ;;  %7696 = vmatpush1.bf16.msra.mxu1 %v10227_v7  ;;  %v10311_v6 = vld [vmem:[%s12211_s18 + $0x1548] ss:$16 sps:$4 sm:$0xff]   ;;  %v10316_v7 = vld [vmem:[%s12211_s18 + $0x1564] ss:$16 sps:$4 sm:$0xff]  }
 0x421   : > { %7164 = vmatprep.subr.bf16.mxu0 %v10232_v8  ;;  %7697 = vmatprep.subr.bf16.mxu1 %v10235_v55  ;;  %v10319_v8 = vld [vmem:[%s12211_s18 + $0x156c] ss:$16 sps:$4 sm:$0xff]   ;;  %v10314_v55 = vld [vmem:[%s12211_s18 + $0x1560] ss:$16 sps:$4 sm:$0xff]  }
 0x424   : > { %7165 = vmatpush1.bf16.msra.mxu0 %v10230_v9  ;;  %7698 = vmatpush1.bf16.msra.mxu1 %v10233_v10  ;;  %v10317_v9 = vld [vmem:[%s12211_s18 + $0x1568] ss:$16 sps:$4 sm:$0xff]   ;;  %v10322_v10 = vld [vmem:[%s12211_s18 + $0x1584] ss:$16 sps:$4 sm:$0xff]  }
 0x425   : > { %7166 = vmatprep.subr.bf16.mxu0 %v10238_v11  ;;  %7699 = vmatprep.subr.bf16.mxu1 %v10241_v1  ;;  %v10325_v11 = vld [vmem:[%s12211_s18 + $0x158c] ss:$16 sps:$4 sm:$0xff]   ;;  %v10320_v1 = vld [vmem:[%s12211_s18 + $0x1580] ss:$16 sps:$4 sm:$0xff]  }
 0x428   : > { %7167 = vmatpush1.bf16.msra.mxu0 %v10236_v13  ;;  %7700 = vmatpush1.bf16.msra.mxu1 %v10239_v30  ;;  %v10328_v13 = vld [vmem:[%s12211_s18 + $0x15a4] ss:$16 sps:$4 sm:$0xff]   ;;  %v10331_v30 = vld [vmem:[%s12211_s18 + $0x15ac] ss:$16 sps:$4 sm:$0xff]  }
 0x429   : > { %7168 = vmatprep.subr.bf16.mxu0 %v10244_v16  ;;  %7701 = vmatprep.subr.bf16.mxu1 %v10247_v17  ;;  %v10326_v16 = vld [vmem:[%s12211_s18 + $0x15a0] ss:$16 sps:$4 sm:$0xff]   ;;  %v10329_v17 = vld [vmem:[%s12211_s18 + $0x15a8] ss:$16 sps:$4 sm:$0xff]  }
 0x42c   : > { %7169 = vmatpush1.bf16.msra.mxu0 %v10242_v52  ;;  %7702 = vmatpush1.bf16.msra.mxu1 %v10245_v19  ;;  %v10334_v52 = vld [vmem:[%s12211_s18 + $0x15c4] ss:$16 sps:$4 sm:$0xff]   ;;  %v10337_v19 = vld [vmem:[%s12211_s18 + $0x15cc] ss:$16 sps:$4 sm:$0xff]  }
 0x42d   : > { %7179 = vmatprep.subr.bf16.mxu0 %v10250_v20  ;;  %7712 = vmatprep.subr.bf16.mxu1 %v10253_v4  ;;  %v10332_v20 = vld [vmem:[%s12211_s18 + $0x15c0] ss:$16 sps:$4 sm:$0xff]   ;;  %v10335_v4 = vld [vmem:[%s12211_s18 + $0x15c8] ss:$16 sps:$4 sm:$0xff]  }
 0x42f   : > { %7171 = vmatmul.mubr.bf16.vlgmr.msra.gmra.mrb[0].mxu0 %v2803_v22  ;;  %7704 = vmatmul.mubr.bf16.vlgmr.msra.gmra.mrb[0].mxu1 %v2803_v22  ;;  %v10343_v22 = vld [vmem:[%s12211_s18 + $0x15ec] ss:$16 sps:$4 sm:$0xff]  }
 0x430   : > { %7180 = vmatpush1.bf16.msra.mxu0 %v10248_v23  ;;  %7713 = vmatpush1.bf16.msra.mxu1 %v10251_v14  ;;  %v10338_v23 = vld [vmem:[%s12211_s18 + $0x15e0] ss:$16 sps:$4 sm:$0xff]   ;;  %v10341_v14 = vld [vmem:[%s12211_s18 + $0x15e8] ss:$16 sps:$4 sm:$0xff]  }
 0x431   : > { %7181 = vmatprep.subr.bf16.mxu0 %v10256_v24  ;;  %7714 = vmatprep.subr.bf16.mxu1 %v10259_v25  ;;  %v10347_v24 = vld [vmem:[%s12211_s18 + $0x1604] ss:$16 sps:$4 sm:$0xff]   ;;  %v10350_v25 = vld [vmem:[%s12211_s18 + $0x160c] ss:$16 sps:$4 sm:$0xff]  }
 0x432   : > { %7211 = vmatprep.mubr.bf16.mxu0 %v12981_v26  ;;  %7744 = vmatprep.mubr.bf16.mxu1 %v12981_v26 }
 0x434   : > { %7182 = vmatpush1.bf16.msra.mxu0 %v10254_v15  ;;  %7715 = vmatpush1.bf16.msra.mxu1 %v10257_v27  ;;  %v13047_v15 = vrot.slane %v12966_v18, %v12261_v2  ;;  %v10345_v27 = vld [vmem:[%s12211_s18 + $0x1600] ss:$16 sps:$4 sm:$0xff]  }
 0x435   : > { %7183 = vmatprep.subr.bf16.mxu0 %v10262_v28  ;;  %7716 = vmatprep.subr.bf16.mxu1 %v10265_v29  ;;  %v10348_v28 = vld [vmem:[%s12211_s18 + $0x1608] ss:$16 sps:$4 sm:$0xff]   ;;  %v10353_v29 = vld [vmem:[%s12211_s18 + $0x1624] ss:$16 sps:$4 sm:$0xff]   ;;  %v10351_v18 = vld [vmem:[%s12211_s18 + $0x1620] ss:$16 sps:$4 sm:$0xff]  }
 0x438   : > { %7184 = vmatpush1.bf16.msra.mxu0 %v10260_v31  ;;  %7717 = vmatpush1.bf16.msra.mxu1 %v10263_v33  ;;  %v10356_v31 = vld [vmem:[%s12211_s18 + $0x162c] ss:$16 sps:$4 sm:$0xff]   ;;  %v2806_v33 = vcombine.high %v12981_v26, %v12981_v26  ;;  %v10357_v26 = vld [vmem:[%s12211_s18 + $0x1640] ss:$16 sps:$4 sm:$0xff]  }
 0x439   : > { %7185 = vmatprep.subr.bf16.mxu0 %v10268_v5  ;;  %7718 = vmatprep.subr.bf16.mxu1 %v10271_v34  ;;  %v10354_v5 = vld [vmem:[%s12211_s18 + $0x1628] ss:$16 sps:$4 sm:$0xff]   ;;  %v10359_v34 = vld [vmem:[%s12211_s18 + $0x1644] ss:$16 sps:$4 sm:$0xff]  }
 0x43c   : > { %7186 = vmatpush1.bf16.msra.mxu0 %v10266_v35  ;;  %7719 = vmatpush1.bf16.msra.mxu1 %v10269_v36  ;;  %v10362_v35 = vld [vmem:[%s12211_s18 + $0x164c] ss:$16 sps:$4 sm:$0xff]   ;;  %v10360_v36 = vld [vmem:[%s12211_s18 + $0x1648] ss:$16 sps:$4 sm:$0xff]  }
 0x43d   : > { %7187 = vmatprep.subr.bf16.mxu0 %v10274_v37  ;;  %7720 = vmatprep.subr.bf16.mxu1 %v10277_v39  ;;  %v10365_v37 = vld [vmem:[%s12211_s18 + $0x1664] ss:$16 sps:$4 sm:$0xff]   ;;  %v10368_v39 = vld [vmem:[%s12211_s18 + $0x166c] ss:$16 sps:$4 sm:$0xff]  }
 0x440   : > { %7188 = vmatpush1.bf16.msra.mxu0 %v10272_v40  ;;  %7721 = vmatpush1.bf16.msra.mxu1 %v10275_v41  ;;  %v10363_v40 = vld [vmem:[%s12211_s18 + $0x1660] ss:$16 sps:$4 sm:$0xff]   ;;  %v10366_v41 = vld [vmem:[%s12211_s18 + $0x1668] ss:$16 sps:$4 sm:$0xff]  }
 0x441   : > { %7189 = vmatprep.subr.bf16.mxu0 %v10280_v43  ;;  %7722 = vmatprep.subr.bf16.mxu1 %v10283_v44  ;;  %v10371_v43 = vld [vmem:[%s12211_s18 + $0x1684] ss:$16 sps:$4 sm:$0xff]   ;;  %v10374_v44 = vld [vmem:[%s12211_s18 + $0x168c] ss:$16 sps:$4 sm:$0xff]  }
 0x444   : > { %7190 = vmatpush1.bf16.msra.mxu0 %v10278_v45  ;;  %7723 = vmatpush1.bf16.msra.mxu1 %v10281_v46  ;;  %v10369_v45 = vld [vmem:[%s12211_s18 + $0x1680] ss:$16 sps:$4 sm:$0xff]   ;;  %v10372_v46 = vld [vmem:[%s12211_s18 + $0x1688] ss:$16 sps:$4 sm:$0xff]  }
 0x445   : > { %7191 = vmatprep.subr.bf16.mxu0 %v10286_v47  ;;  %7724 = vmatprep.subr.bf16.mxu1 %v10289_v32  ;;  %v10377_v47 = vld [vmem:[%s12211_s18 + $0x16a4] ss:$16 sps:$4 sm:$0xff]   ;;  %v10380_v32 = vld [vmem:[%s12211_s18 + $0x16ac] ss:$16 sps:$4 sm:$0xff]  }
 0x448   : > { %7192 = vmatpush1.bf16.msra.mxu0 %v10284_v48  ;;  %7725 = vmatpush1.bf16.msra.mxu1 %v10287_v49  ;;  %v10375_v48 = vld [vmem:[%s12211_s18 + $0x16a0] ss:$16 sps:$4 sm:$0xff]   ;;  %v10378_v49 = vld [vmem:[%s12211_s18 + $0x16a8] ss:$16 sps:$4 sm:$0xff]  }
 0x449   : > { %7193 = vmatprep.subr.bf16.mxu0 %v10292_v50  ;;  %7726 = vmatprep.subr.bf16.mxu1 %v10295_v42  ;;  %v10383_v50 = vld [vmem:[%s12211_s18 + $0x16c4] ss:$16 sps:$4 sm:$0xff]   ;;  %v10386_v42 = vld [vmem:[%s12211_s18 + $0x16cc] ss:$16 sps:$4 sm:$0xff]  }
 0x44c   : > { %7194 = vmatpush1.bf16.msra.mxu0 %v10290_v51  ;;  %7727 = vmatpush1.bf16.msra.mxu1 %v10293_v53  ;;  %v10381_v51 = vld [vmem:[%s12211_s18 + $0x16c0] ss:$16 sps:$4 sm:$0xff]   ;;  %v10384_v53 = vld [vmem:[%s12211_s18 + $0x16c8] ss:$16 sps:$4 sm:$0xff]  }
 0x44d   : > { %7195 = vmatprep.subr.bf16.mxu0 %v10298_v54  ;;  %7728 = vmatprep.subr.bf16.mxu1 %v10301_v56  ;;  %v10389_v54 = vld [vmem:[%s12211_s18 + $0x16e4] ss:$16 sps:$4 sm:$0xff]   ;;  %v10392_v56 = vld [vmem:[%s12211_s18 + $0x16ec] ss:$16 sps:$4 sm:$0xff]  }
 0x450   : > { %7196 = vmatpush1.bf16.msra.mxu0 %v10296_v57  ;;  %7729 = vmatpush1.bf16.msra.mxu1 %v10299_v38  ;;  %v10387_v57 = vld [vmem:[%s12211_s18 + $0x16e0] ss:$16 sps:$4 sm:$0xff]   ;;  %v10390_v38 = vld [vmem:[%s12211_s18 + $0x16e8] ss:$16 sps:$4 sm:$0xff]  }
 0x451   : > { %7197 = vmatprep.subr.bf16.mxu0 %v10304_v58  ;;  %7730 = vmatprep.subr.bf16.mxu1 %v10307_v60  ;;  %v10395_v58 = vld [vmem:[%s12211_s18 + $0x1704] ss:$16 sps:$4 sm:$0xff]   ;;  %v10398_v60 = vld [vmem:[%s12211_s18 + $0x170c] ss:$16 sps:$4 sm:$0xff]  }
 0x454   : > { %7198 = vmatpush1.bf16.msra.mxu0 %v10302_v61  ;;  %7731 = vmatpush1.bf16.msra.mxu1 %v10305_v62  ;;  %v10393_v61 = vld [vmem:[%s12211_s18 + $0x1700] ss:$16 sps:$4 sm:$0xff]   ;;  %v10396_v62 = vld [vmem:[%s12211_s18 + $0x1708] ss:$16 sps:$4 sm:$0xff]  }
 0x455   : > { %7199 = vmatprep.subr.bf16.mxu0 %v10310_v63  ;;  %7732 = vmatprep.subr.bf16.mxu1 %v10313_v0  ;;  %v10401_v63 = vld [vmem:[%s12211_s18 + $0x1724] ss:$16 sps:$4 sm:$0xff]   ;;  %v10404_v0 = vld [vmem:[%s12211_s18 + $0x172c] ss:$16 sps:$4 sm:$0xff]  }
 0x458   : > { %7200 = vmatpush1.bf16.msra.mxu0 %v10308_v3  ;;  %7733 = vmatpush1.bf16.msra.mxu1 %v10311_v6  ;;  %v10399_v3 = vld [vmem:[%s12211_s18 + $0x1720] ss:$16 sps:$4 sm:$0xff]   ;;  %v10402_v6 = vld [vmem:[%s12211_s18 + $0x1728] ss:$16 sps:$4 sm:$0xff]  }
 0x459   : > { %7201 = vmatprep.subr.bf16.mxu0 %v10316_v7  ;;  %7734 = vmatprep.subr.bf16.mxu1 %v10319_v8  ;;  %v10407_v7 = vld [vmem:[%s12211_s18 + $0x1744] ss:$16 sps:$4 sm:$0xff]   ;;  %v10410_v8 = vld [vmem:[%s12211_s18 + $0x174c] ss:$16 sps:$4 sm:$0xff]  }
 0x45c   : > { %7202 = vmatpush1.bf16.msra.mxu0 %v10314_v55  ;;  %7735 = vmatpush1.bf16.msra.mxu1 %v10317_v9  ;;  %v10405_v55 = vld [vmem:[%s12211_s18 + $0x1740] ss:$16 sps:$4 sm:$0xff]   ;;  %v10408_v9 = vld [vmem:[%s12211_s18 + $0x1748] ss:$16 sps:$4 sm:$0xff]  }
 0x45d   : > { %7203 = vmatprep.subr.bf16.mxu0 %v10322_v10  ;;  %7736 = vmatprep.subr.bf16.mxu1 %v10325_v11  ;;  %v10413_v10 = vld [vmem:[%s12211_s18 + $0x1764] ss:$16 sps:$4 sm:$0xff]   ;;  %v10416_v11 = vld [vmem:[%s12211_s18 + $0x176c] ss:$16 sps:$4 sm:$0xff]  }
 0x460   : > { %7204 = vmatpush1.bf16.msra.mxu0 %v10320_v1  ;;  %7737 = vmatpush1.bf16.msra.mxu1 %v10323_v12  ;;  %v10411_v1 = vld [vmem:[%s12211_s18 + $0x1760] ss:$16 sps:$4 sm:$0xff]   ;;  %v10414_v12 = vld [vmem:[%s12211_s18 + $0x1768] ss:$16 sps:$4 sm:$0xff]  }
 0x461   : > { %7205 = vmatprep.subr.bf16.mxu0 %v10328_v13  ;;  %7738 = vmatprep.subr.bf16.mxu1 %v10331_v30  ;;  %v10419_v13 = vld [vmem:[%s12211_s18 + $0x1784] ss:$16 sps:$4 sm:$0xff]   ;;  %v10422_v30 = vld [vmem:[%s12211_s18 + $0x178c] ss:$16 sps:$4 sm:$0xff]  }
 0x464   : > { %7206 = vmatpush1.bf16.msra.mxu0 %v10326_v16  ;;  %7739 = vmatpush1.bf16.msra.mxu1 %v10329_v17  ;;  %v10417_v16 = vld [vmem:[%s12211_s18 + $0x1780] ss:$16 sps:$4 sm:$0xff]   ;;  %v10420_v17 = vld [vmem:[%s12211_s18 + $0x1788] ss:$16 sps:$4 sm:$0xff]  }
 0x465   : > { %7207 = vmatprep.subr.bf16.mxu0 %v10334_v52  ;;  %7740 = vmatprep.subr.bf16.mxu1 %v10337_v19  ;;  %v10425_v52 = vld [vmem:[%s12211_s18 + $0x17a4] ss:$16 sps:$4 sm:$0xff]   ;;  %v10428_v19 = vld [vmem:[%s12211_s18 + $0x17ac] ss:$16 sps:$4 sm:$0xff]  }
 0x468   : > { %7208 = vmatpush1.bf16.msra.mxu0 %v10332_v20  ;;  %7741 = vmatpush1.bf16.msra.mxu1 %v10335_v4  ;;  %v10423_v20 = vld [vmem:[%s12211_s18 + $0x17a0] ss:$16 sps:$4 sm:$0xff]   ;;  %v10426_v4 = vld [vmem:[%s12211_s18 + $0x17a8] ss:$16 sps:$4 sm:$0xff]  }
 0x469   : > { %7209 = vmatprep.subr.bf16.mxu0 %v10340_v21  ;;  %7742 = vmatprep.subr.bf16.mxu1 %v10343_v22  ;;  %v10431_v21 = vld [vmem:[%s12211_s18 + $0x17c4] ss:$16 sps:$4 sm:$0xff]   ;;  %v10434_v22 = vld [vmem:[%s12211_s18 + $0x17cc] ss:$16 sps:$4 sm:$0xff]  }
 0x46c   : > { %7210 = vmatpush1.bf16.msra.mxu0 %v10338_v23  ;;  %7743 = vmatpush1.bf16.msra.mxu1 %v10341_v14  ;;  %v10429_v23 = vld [vmem:[%s12211_s18 + $0x17c0] ss:$16 sps:$4 sm:$0xff]   ;;  %v10432_v14 = vld [vmem:[%s12211_s18 + $0x17c8] ss:$16 sps:$4 sm:$0xff]  }
 0x46d   : > { %7220 = vmatprep.subr.bf16.mxu0 %v10347_v24  ;;  %7753 = vmatprep.subr.bf16.mxu1 %v10350_v25  ;;  %v10437_v24 = vld [vmem:[%s12211_s18 + $0x17e4] ss:$16 sps:$4 sm:$0xff]   ;;  %v10440_v25 = vld [vmem:[%s12211_s18 + $0x17ec] ss:$16 sps:$4 sm:$0xff]  }
 0x46f   : > { %7212 = vmatmul.mubr.bf16.vlgmr.msra.gmra.mrb[0].mxu0 %v13047_v15  ;;  %7745 = vmatmul.mubr.bf16.vlgmr.msra.gmra.mrb[0].mxu1 %v13047_v15 }
 0x470   : > { %7221 = vmatpush1.bf16.msra.mxu0 %v10345_v27  ;;  %7754 = vmatpush1.bf16.msra.mxu1 %v10348_v28  ;;  %v10435_v27 = vld [vmem:[%s12211_s18 + $0x17e0] ss:$16 sps:$4 sm:$0xff]   ;;  %v10438_v28 = vld [vmem:[%s12211_s18 + $0x17e8] ss:$16 sps:$4 sm:$0xff]  }
 0x471   : > { %7222 = vmatprep.subr.bf16.mxu0 %v10353_v29  ;;  %7755 = vmatprep.subr.bf16.mxu1 %v10356_v31  ;;  %v10443_v29 = vld [vmem:[%s12211_s18 + $0x1804] ss:$16 sps:$4 sm:$0xff]   ;;  %v10446_v31 = vld [vmem:[%s12211_s18 + $0x180c] ss:$16 sps:$4 sm:$0xff]  }
 0x472   : > { %7252 = vmatprep.mubr.bf16.mxu0 %v2806_v33  ;;  %7785 = vmatprep.mubr.bf16.mxu1 %v2806_v33  ;;  %v2804_v33 = vcombine.high %v13047_v15, %v13047_v15  ;;  %v10450_v15 = vld [vmem:[%s12211_s18 + $0x1828] ss:$16 sps:$4 sm:$0xff]  }
 0x474   : > { %7223 = vmatpush1.bf16.msra.mxu0 %v10351_v18  ;;  %7756 = vmatpush1.bf16.msra.mxu1 %v10354_v5  ;;  %v10441_v18 = vld [vmem:[%s12211_s18 + $0x1800] ss:$16 sps:$4 sm:$0xff]   ;;  %v10444_v5 = vld [vmem:[%s12211_s18 + $0x1808] ss:$16 sps:$4 sm:$0xff]  }
 0x475   : > { %7224 = vmatprep.subr.bf16.mxu0 %v10359_v34  ;;  %7757 = vmatprep.subr.bf16.mxu1 %v10362_v35  ;;  %v10449_v34 = vld [vmem:[%s12211_s18 + $0x1824] ss:$16 sps:$4 sm:$0xff]   ;;  %v10452_v35 = vld [vmem:[%s12211_s18 + $0x182c] ss:$16 sps:$4 sm:$0xff]  }
 0x478   : > { %7225 = vmatpush1.bf16.msra.mxu0 %v10357_v26  ;;  %7758 = vmatpush1.bf16.msra.mxu1 %v10360_v36  ;;  %v10447_v26 = vld [vmem:[%s12211_s18 + $0x1820] ss:$16 sps:$4 sm:$0xff]   ;;  %v10455_v36 = vld [vmem:[%s12211_s18 + $0x1844] ss:$16 sps:$4 sm:$0xff]  }
 0x479   : > { %7226 = vmatprep.subr.bf16.mxu0 %v10365_v37  ;;  %7759 = vmatprep.subr.bf16.mxu1 %v10368_v39  ;;  %v10458_v37 = vld [vmem:[%s12211_s18 + $0x184c] ss:$16 sps:$4 sm:$0xff]   ;;  %v10555_v39 = vmov 0  }
 0x47c   : > { %7227 = vmatpush1.bf16.msra.mxu0 %v10363_v40  ;;  %7760 = vmatpush1.bf16.msra.mxu1 %v10366_v41  ;;  %v10453_v40 = vld [vmem:[%s12211_s18 + $0x1840] ss:$16 sps:$4 sm:$0xff]   ;;  %v10456_v41 = vld [vmem:[%s12211_s18 + $0x1848] ss:$16 sps:$4 sm:$0xff]  }
 0x47d   : > { %7228 = vmatprep.subr.bf16.mxu0 %v10371_v43  ;;  %7761 = vmatprep.subr.bf16.mxu1 %v10374_v44  ;;  %v10461_v43 = vld [vmem:[%s12211_s18 + $0x1864] ss:$16 sps:$4 sm:$0xff]   ;;  %v10464_v44 = vld [vmem:[%s12211_s18 + $0x186c] ss:$16 sps:$4 sm:$0xff]  }
 0x480   : > { %7229 = vmatpush1.bf16.msra.mxu0 %v10369_v45  ;;  %7762 = vmatpush1.bf16.msra.mxu1 %v10372_v46  ;;  %v10459_v45 = vld [vmem:[%s12211_s18 + $0x1860] ss:$16 sps:$4 sm:$0xff]   ;;  %v10462_v46 = vld [vmem:[%s12211_s18 + $0x1868] ss:$16 sps:$4 sm:$0xff]  }
 0x481   : > { %7230 = vmatprep.subr.bf16.mxu0 %v10377_v47  ;;  %7763 = vmatprep.subr.bf16.mxu1 %v10380_v32  ;;  %v8280_v47 = vld.sshfl [vmem:[%s13215_s0 + $0x18] sm:$0x1 pattern:$0x75316420]  ;;  %v10465_v32 = vld [vmem:[%s12209_s20 + $0x40] sm:$0xff]  }
 0x484   : > { %7231 = vmatpush1.bf16.msra.mxu0 %v10375_v48  ;;  %7764 = vmatpush1.bf16.msra.mxu1 %v10378_v49  ;;  %v10466_v48 = vld [vmem:[%s12209_s20 + $0xc0] sm:$0xff]   ;;  %v2820_v49 = vrot.slane %v8280_v47, %v12261_v2  ;;  %v10471_v2 = vld [vmem:[%s12209_s20 + $0x8] sm:$0xff]  }
 0x485   : > { %7232 = vmatprep.subr.bf16.mxu0 %v10383_v50  ;;  %7765 = vmatprep.subr.bf16.mxu1 %v10386_v42  ;;  %v10467_v50 = vld [vmem:[%s12209_s20] sm:$0xff]  }
 0x486   : > { %v10468_v42 = vld [vmem:[%s12209_s20 + $0x80] sm:$0xff]  }
 0x488   : > { %7233 = vmatpush1.bf16.msra.mxu0 %v10381_v51  ;;  %7766 = vmatpush1.bf16.msra.mxu1 %v10384_v53  ;;  %v10469_v51 = vld [vmem:[%s12209_s20 + $0x48] sm:$0xff]  }
 0x489   : > { %7234 = vmatprep.subr.bf16.mxu0 %v10389_v54  ;;  %7767 = vmatprep.subr.bf16.mxu1 %v10392_v56  ;;  %v10470_v53 = vld [vmem:[%s12209_s20 + $0xc8] sm:$0xff]   ;;  %v10473_v56 = vld [vmem:[%s12209_s20 + $0x50] sm:$0xff]  }
 0x48a   : > { %v10472_v54 = vld [vmem:[%s12209_s20 + $0x88] sm:$0xff]  }
 0x48c   : > { %7235 = vmatpush1.bf16.msra.mxu0 %v10387_v57  ;;  %7768 = vmatpush1.bf16.msra.mxu1 %v10390_v38  ;;  %v10474_v57 = vld [vmem:[%s12209_s20 + $0xd0] sm:$0xff]  }
 0x48d   : > { %7236 = vmatprep.subr.bf16.mxu0 %v10395_v58  ;;  %7769 = vmatprep.subr.bf16.mxu1 %v10398_v60  ;;  %v10475_v38 = vld [vmem:[%s12209_s20 + $0x10] sm:$0xff]   ;;  %v10477_v60 = vld [vmem:[%s12209_s20 + $0x58] sm:$0xff]  }
 0x48e   : > { %v10476_v58 = vld [vmem:[%s12209_s20 + $0x90] sm:$0xff]  }
 0x490   : > { %7237 = vmatpush1.bf16.msra.mxu0 %v10393_v61  ;;  %7770 = vmatpush1.bf16.msra.mxu1 %v10396_v62  ;;  %v10478_v61 = vld [vmem:[%s12209_s20 + $0xd8] sm:$0xff]  }
 0x491   : > { %7238 = vmatprep.subr.bf16.mxu0 %v10401_v63  ;;  %7771 = vmatprep.subr.bf16.mxu1 %v10404_v0  ;;  %v10479_v62 = vld [vmem:[%s12209_s20 + $0x18] sm:$0xff]   ;;  %v10481_v0 = vld [vmem:[%s12209_s20 + $0x60] sm:$0xff]  }
 0x492   : > { %v10480_v63 = vld [vmem:[%s12209_s20 + $0x98] sm:$0xff]  }
 0x494   : > { %7239 = vmatpush1.bf16.msra.mxu0 %v10399_v3  ;;  %7772 = vmatpush1.bf16.msra.mxu1 %v10402_v6  ;;  %v10482_v3 = vld [vmem:[%s12209_s20 + $0xe0] sm:$0xff]  }
 0x495   : > { %7240 = vmatprep.subr.bf16.mxu0 %v10407_v7  ;;  %7773 = vmatprep.subr.bf16.mxu1 %v10410_v8  ;;  %v10483_v6 = vld [vmem:[%s12209_s20 + $0x20] sm:$0xff]   ;;  %v10485_v8 = vld [vmem:[%s12209_s20 + $0x68] sm:$0xff]  }
 0x496   : > { %v10484_v7 = vld [vmem:[%s12209_s20 + $0xa0] sm:$0xff]  }
 0x498   : > { %7241 = vmatpush1.bf16.msra.mxu0 %v10405_v55  ;;  %7774 = vmatpush1.bf16.msra.mxu1 %v10408_v9  ;;  %v10486_v55 = vld [vmem:[%s12209_s20 + $0xe8] sm:$0xff]  }
 0x499   : > { %7242 = vmatprep.subr.bf16.mxu0 %v10413_v10  ;;  %7775 = vmatprep.subr.bf16.mxu1 %v10416_v11  ;;  %v10487_v9 = vld [vmem:[%s12209_s20 + $0x28] sm:$0xff]   ;;  %v10489_v11 = vld [vmem:[%s12209_s20 + $0x70] sm:$0xff]  }
 0x49a   : > { %v10488_v10 = vld [vmem:[%s12209_s20 + $0xa8] sm:$0xff]  }
 0x49c   : > { %7243 = vmatpush1.bf16.msra.mxu0 %v10411_v1  ;;  %7776 = vmatpush1.bf16.msra.mxu1 %v10414_v12  ;;  %v10490_v1 = vld [vmem:[%s12209_s20 + $0xf0] sm:$0xff]  }
 0x49d   : > { %7244 = vmatprep.subr.bf16.mxu0 %v10419_v13  ;;  %7777 = vmatprep.subr.bf16.mxu1 %v10422_v30  ;;  %v10491_v12 = vld [vmem:[%s12209_s20 + $0x30] sm:$0xff]   ;;  %v10493_v30 = vld [vmem:[%s12209_s20 + $0x78] sm:$0xff]  }
 0x49e   : > { %v10492_v13 = vld [vmem:[%s12209_s20 + $0xb0] sm:$0xff]  }
 0x4a0   : > { %7245 = vmatpush1.bf16.msra.mxu0 %v10417_v16  ;;  %7778 = vmatpush1.bf16.msra.mxu1 %v10420_v17  ;;  %v10494_v16 = vld [vmem:[%s12209_s20 + $0xf8] sm:$0xff]  }
 0x4a1   : > { %7246 = vmatprep.subr.bf16.mxu0 %v10425_v52  ;;  %7779 = vmatprep.subr.bf16.mxu1 %v10428_v19  ;;  %v10495_v17 = vld [vmem:[%s12209_s20 + $0x38] sm:$0xff]   ;;  %v2638_v19 = vsub.s32 0, %v12253_v59 }
 0x4a2   : > { %v10496_v52 = vld [vmem:[%s12209_s20 + $0xb8] sm:$0xff]  }
 0x4a4   : > { %7247 = vmatpush1.bf16.msra.mxu0 %v10423_v20  ;;  %7780 = vmatpush1.bf16.msra.mxu1 %v10426_v4  ;;  %v2646_v20 = vsub.s32 2, %v12253_v59  ;;  %v2634_v4 = vld [vmem:[%s1831_s14] sm:$0xf] }
 0x4a5   : > { %7248 = vmatprep.subr.bf16.mxu0 %v10431_v21  ;;  %7781 = vmatprep.subr.bf16.mxu1 %v10434_v22  ;;  %v2642_v21 = vsub.s32 1, %v12253_v59  ;;  %v2650_v22 = vsub.s32 3, %v12253_v59 }
 0x4a8   : > { %7249 = vmatpush1.bf16.msra.mxu0 %v10429_v23  ;;  %7782 = vmatpush1.bf16.msra.mxu1 %v10432_v14  ;;  %v2639_v23 = vrot.slane %v2634_v4, %v2638_v19  ;;  %v2647_v14 = vrot.slane %v2634_v4, %v2646_v20 }
 0x4a9   : > { %7250 = vmatprep.subr.bf16.mxu0 %v10437_v24  ;;  %7783 = vmatprep.subr.bf16.mxu1 %v10440_v25  ;;  %v2643_v24 = vrot.slane %v2634_v4, %v2642_v21  ;;  %v2651_v25 = vrot.slane %v2634_v4, %v2650_v22 }
 0x4ac   : > { %7251 = vmatpush1.bf16.msra.mxu0 %v10435_v27  ;;  %7784 = vmatpush1.bf16.msra.mxu1 %v10438_v28 }
 0x4ad   : > { %7261 = vmatprep.subr.bf16.mxu0 %v10443_v29  ;;  %7794 = vmatprep.subr.bf16.mxu1 %v10446_v31 }
 0x4af   : > { %7253 = vmatmul.mubr.bf16.vlgmr.msra.gmra.mrb[0].mxu0 %v2804_v33  ;;  %7786 = vmatmul.mubr.bf16.vlgmr.msra.gmra.mrb[0].mxu1 %v2804_v33 }
 0x4b0   : > { %7262 = vmatpush1.bf16.msra.mxu0 %v10441_v18  ;;  %7795 = vmatpush1.bf16.msra.mxu1 %v10444_v5 }
 0x4b1   : > { %7263 = vmatprep.subr.bf16.mxu0 %v10449_v34  ;;  %7796 = vmatprep.subr.bf16.mxu1 %v10452_v35 }
 0x4b2   : > { %7293 = vmatprep.mubr.bf16.mxu0 %v10555_v39  ;;  %7826 = vmatprep.mubr.bf16.mxu1 %v10555_v39 }
 0x4b4   : > { %7264 = vmatpush1.bf16.msra.mxu0 %v10447_v26  ;;  %7797 = vmatpush1.bf16.msra.mxu1 %v10450_v15 }
 0x4b5   : > { %7265 = vmatprep.subr.bf16.mxu0 %v10455_v36  ;;  %7798 = vmatprep.subr.bf16.mxu1 %v10458_v37 }
 0x4b8   : > { %7266 = vmatpush1.bf16.msra.mxu0 %v10453_v40  ;;  %7799 = vmatpush1.bf16.msra.mxu1 %v10456_v41 }
 0x4b9   : > { %7267 = vmatprep.subr.bf16.mxu0 %v10461_v43  ;;  %7800 = vmatprep.subr.bf16.mxu1 %v10464_v44 }
 0x4bc   : > { %7268 = vmatpush1.bf16.msra.mxu0 %v10459_v45  ;;  %7801 = vmatpush1.bf16.msra.mxu1 %v10462_v46 }
 0x4bd   : > { %9106 = vmatprep.subr.bf16.mxu0 %v10465_v32  ;;  %9128 = vmatprep.subr.bf16.mxu1 %v10466_v48 }
 0x4bf   : > { %9065 = vmatmul.mubr.msk.bf16.vlgmr.msra.gmra.mrb[0].mxu0 %vm6765_vm1, %v2820_v49  ;;  %9066 = vmatmul.mubr.msk.bf16.vlgmr.msra.gmra.mrb[0].mxu1 %vm6765_vm1, %v2820_v49 }
 0x4c0   : > { %9107 = vmatpush3.bf16.msra.mxu0 %v10467_v50  ;;  %9129 = vmatpush3.bf16.msra.mxu1 %v10468_v42 }
 0x4c1   : > { %9108 = vmatprep.subr.bf16.mxu0 %v10469_v51  ;;  %9130 = vmatprep.subr.bf16.mxu1 %v10470_v53  ;;  %v7839_v53 = vld [vmem:[#allocation2] sm:$0x3] }
 0x4c4   : > { %9109 = vmatpush3.bf16.msra.mxu0 %v10471_v2  ;;  %9131 = vmatpush3.bf16.msra.mxu1 %v10472_v54 }
 0x4c5   : > { %9110 = vmatprep.subr.bf16.mxu0 %v10473_v56  ;;  %9132 = vmatprep.subr.bf16.mxu1 %v10474_v57 }
 0x4c8   : > { %9111 = vmatpush3.bf16.msra.mxu0 %v10475_v38  ;;  %9133 = vmatpush3.bf16.msra.mxu1 %v10476_v58  ;;  %v9100_v58 = vld [vmem:[%s13219_s4] ss:$0 sm:$0xff] (!%p9099_p11) }
 0x4c9   : > { %9112 = vmatprep.subr.bf16.mxu0 %v10477_v60  ;;  %9134 = vmatprep.subr.bf16.mxu1 %v10478_v61 }
 0x4cc   : > { %9113 = vmatpush3.bf16.msra.mxu0 %v10479_v62  ;;  %9135 = vmatpush3.bf16.msra.mxu1 %v10480_v63 }
 0x4cd   : > { %9114 = vmatprep.subr.bf16.mxu0 %v10481_v0  ;;  %9136 = vmatprep.subr.bf16.mxu1 %v10482_v3 }
 0x4d0   : > { %9115 = vmatpush3.bf16.msra.mxu0 %v10483_v6  ;;  %9137 = vmatpush3.bf16.msra.mxu1 %v10484_v7 }
 0x4d1   : > { %9116 = vmatprep.subr.bf16.mxu0 %v10485_v8  ;;  %9138 = vmatprep.subr.bf16.mxu1 %v10486_v55 }
 0x4d4   : > { %9117 = vmatpush3.bf16.msra.mxu0 %v10487_v9  ;;  %9139 = vmatpush3.bf16.msra.mxu1 %v10488_v10 }
 0x4d5   : > { %9118 = vmatprep.subr.bf16.mxu0 %v10489_v11  ;;  %9140 = vmatprep.subr.bf16.mxu1 %v10490_v1 }
 0x4d8   : > { %9119 = vmatpush3.bf16.msra.mxu0 %v10491_v12  ;;  %9141 = vmatpush3.bf16.msra.mxu1 %v10492_v13 }
 0x4d9   : > { %9120 = vmatprep.subr.bf16.mxu0 %v10493_v30  ;;  %9142 = vmatprep.subr.bf16.mxu1 %v10494_v16 }
 0x4dc   : > { %9121 = vmatpush3.bf16.msra.mxu0 %v10495_v17  ;;  %9143 = vmatpush3.bf16.msra.mxu1 %v10496_v52 }
 0x592   : > { %v7295_v27 = vpop.f32.mrb[0].mxu0  ;;  %v7828_v28 = vpop.f32.mrb[0].mxu1 }
 0x593   : > { %v9150_v29 = vadd.f32 %v7295_v27, %v2639_v23  ;;  %v9152_v31 = vadd.f32 %v7828_v28, %v2647_v14  ;;  %v7297_v33 = vpop.f32.mrb[1].mxu0  ;;  %v7830_v18 = vpop.f32.mrb[1].mxu1 }
 0x594   : > { %v9151_v5 = vadd.f32 %v7297_v33, %v2643_v24  ;;  %v9153_v34 = vadd.f32 %v7830_v18, %v2651_v25  ;;  %v7299_v35 = vpop.f32.mrb[2].mxu0  ;;  %v7832_v26 = vpop.f32.mrb[2].mxu1 }
 0x595   : > { %v7835_v15 = vmax.f32 %v9150_v29, 0.0  ;;  %v7837_v36 = vmax.f32 %v9152_v31, 0.0  ;;  %v7300_v37 = vpop.f32.mrb[3].mxu0  ;;  %v7833_v39 = vpop.f32.mrb[3].mxu1 }
 0x596   : > { %v7836_v40 = vmax.f32 %v9151_v5, 0.0  ;;  %v7838_v59 = vmax.f32 %v9153_v34, 0.0 }
 0x597   : > { %v7840_v44 = vpack.c.bf16 %v7835_v15, %v7835_v15  ;;  %v7842_v45 = vpack.c.bf16 %v7837_v36, %v7837_v36 }
 0x598   : > { %v7841_v41 = vpack.c.bf16 %v7836_v40, %v7836_v40  ;;  %v7843_v43 = vpack.c.bf16 %v7838_v59, %v7838_v59 }
 0x59a   : > { %8132 = vmatprep.mubr.bf16.mxu0 %v7841_v41  ;;  %8172 = vmatprep.mubr.bf16.mxu1 %v7843_v43 }
 0x59b   : > { %8133 = vmatmul.mubr.bf16.vlgmr.msra.gmra.mrb[4].mxu0 %v7840_v44  ;;  %8173 = vmatmul.mubr.bf16.vlgmr.msra.gmra.mrb[4].mxu1 %v7842_v45 }
 0x66e   : > { %v9122_v46 = vpop.f32.mrb[4].mxu0  ;;  %v9144_v47 = vpop.f32.mrb[4].mxu1 }
 0x66f   : > { %v9123_v32 = vpop.f32.mrb[5].mxu0  ;;  %v9145_v48 = vpop.f32.mrb[5].mxu1 }
 0x670   : > { %v9124_v49 = vadd.f32 %v9123_v32, %v9122_v46  ;;  %v9146_v50 = vadd.f32 %v9145_v48, %v9144_v47  ;;  %v9125_v42 = vpop.f32.mrb[6].mxu0  ;;  %v9147_v51 = vpop.f32.mrb[6].mxu1  ;;  %8186 = sbr.rel (%p9099_p11) target bundleno = 1665 (0x681), region = 71 }
 0x671   : > { %v9126_v2 = vpop.f32.mrb[7].mxu0  ;;  %v9148_v54 = vpop.f32.mrb[7].mxu1 }
 0x672   : > { %v8175_v56 = vadd.f32 %v9146_v50, %v9124_v49 }
 0x674   : > { %v8180_v57 = vadd.f32 %v8175_v56, %v7839_v53 }
 0x676   : > { %8182 = vst.msk [vmem:[#allocation2] sm:$0x3] %vm8181_vm2, %v8180_v57 }
 0x67d   : > { %v8187_v38 = vld [vmem:[#allocation2] sm:$0x3] }
 0x67e   : > { %v8195_v60 = vadd.f32 %v9100_v58, %v8187_v38 }
 0x680   : > { %8196 = vst.msk [vmem:[#allocation4] sm:$0x3] %vm8181_vm2, %v8195_v60 }
 0x681 PF: > { %p9256_p12 = scmp.eq.s32.totalorder %s10603_s21, 1  ;;  %s10556_s13 = smov [#allocation4]  }
 0x682   : > { %s8204_s14 = sshll.u32 %s10556_s13, 4  ;;  %s8205_s14 = int_to_ptr.vmem [resolvable:$true] %s8204_s14 }
 0x683   : > { %s10499_s15 = scalar_lea.vmem %s8205_s14, 32  ;;  %p10506_p2 = scmp.lt.s32.totalorder %s8205_s14, %s8205_s14 }
 0x684   : > { %p10500_p13 = scmp.ne.s32.totalorder %s8205_s14, %s10499_s15  ;;  %p10507_p3 = scmp.lt.s32.totalorder %s10499_s15, %s10499_s15 }
 0x686   : > { %p10501_p0 = pnand %p10500_p13, %p9256_p12  ;;  %p10508_p4 = por %p10507_p3, %p10506_p2 }
 0x688   : > { %p10502_p1 = pneg %p10501_p0 }
 0x68a   : > { %p10509_p5 = pnand %p10508_p4, %p10502_p1 }
 0x68c   : > { %10512 = shalt.err (!%p10509_p5)
}
 0x68d   : > { %s10513_s20 = scalar_lea.hbm %s13220_s5, 32 }
 0x68e   : > { %p10514_p6 = scmp.ne.s32.totalorder %s13220_s5, %s10513_s20  ;;  %p10519_p9 = scmp.lt.u32.totalorder %s10513_s20, %s13220_s5 }
 0x690   : > { %p10515_p7 = pnand %p10514_p6, %p9256_p12 }
 0x692   : > { %p10516_p8 = pneg %p10515_p7 }
 0x694   : > { %p10521_p10 = pnand %p10519_p9, %p10516_p8 }
 0x696   : > { %10524 = shalt.err (!%p10521_p10)
}
 0x697   : > { %9253 = dma.vmem_to_hbm [thread:$0]  (%p9256_p12), %s8205_s14, 32, %s13220_s5, [#allocation5]  }
 0x698   : > { %10538 = dma.done.wait (%p9256_p12), [#allocation5], 32  }
 0x699   : > { %10540 = vsyncadd (%p9256_p12), [#allocation5], 4294967264 }
 0x69a PF: > { %p13_p11 = scmp.ge.s32.totalorder %s10606_s22, 4   ;;  %s13221_s18 = smov %s10547_s19 }
 0x69b   : > { %s13222_s19 = smov %s10615_s25  ;;  %s13223_s20 = smov %s10606_s22 }
 0x69c   :  { %15 = sbr.rel (!%p13_p11) target bundleno = 2 (0x2), region = 109 }
 0x6a3   :  { %8217 = vsyncpa [#allocation5], 1 }
 0x6a4   :  { %8219 = vsyncpa [#allocation5 + $0x1], 1 }

</bundles_post_ra>
